<compile_context>
chip_gen: v5e
topology: v5e:2x2
jax: 0.10.0
libtpu: 0.0.40
codegen_flags: <defaults>
</compile_context>

<pallas_src>
from functools import partial

import numpy as np
import jax
import jax.numpy as jnp
from jax.experimental import pallas as pl
from jax.experimental.pallas import tpu as pltpu


# ----------------------------------------------------------------------------
# In-kernel helpers (traced inline; everything is (channels, flat-spatial))
# ----------------------------------------------------------------------------
def _flow_step(xbuf, hbuf, mask, w1f, b1, w2, b2, w3, b3, winv,
               *, C, Ch, hidden, Lp, G, Wp):
    """One FlowAssembly step (invconv 1x1 folded + affine coupling) in VMEM.

    xbuf : (C, Lp + 2G) flat-padded activation, zero border/guard.
    hbuf : (hidden, Lp + 2G) scratch for the coupling-net hidden features.
    mask : (1, Lp) 1.0 on interior pixels, 0.0 on the 1-px zero border.
    Updates xbuf's center slab in place; returns the coupling logdet (1, 1).
    """
    f32 = jnp.float32
    # --- im2col for the first 3x3 conv (invconv folded into w1f) ------------
    taps = [xbuf[:, ky * Wp + kx: ky * Wp + kx + Lp]
            for ky in range(3) for kx in range(3)]
    p1 = jnp.concatenate(taps, axis=0)                                 # (9C, Lp)
    h1 = jnp.maximum(jnp.dot(w1f, p1, preferred_element_type=f32) + b1, 0.0)
    # --- 1x1 conv -------------------------------------------------------------
    h2 = jnp.maximum(jnp.dot(w2, h1, preferred_element_type=f32) + b2, 0.0)
    hbuf[:, G:G + Lp] = h2 * mask          # zeroed border == conv zero padding
    # --- second 3x3 conv, merged shift / log-scale heads ----------------------
    taps2 = [hbuf[:, ky * Wp + kx: ky * Wp + kx + Lp]
             for ky in range(3) for kx in range(3)]
    p2 = jnp.concatenate(taps2, axis=0)                                # (9h, Lp)
    st = jnp.dot(w3, p2, preferred_element_type=f32) + b3              # (2Ch, Lp)
    shift = st[:Ch]
    scale = jax.nn.sigmoid(st[Ch:] + 2.0)
    log_scale = jnp.log(scale)
    # --- invertible 1x1 conv + affine coupling on the z2 half -----------------
    x = xbuf[:, G:G + Lp]                                              # (C, Lp)
    y = jnp.dot(winv, x, preferred_element_type=f32)
    z = jnp.concatenate([y[:Ch], (y[Ch:] + shift) * scale], axis=0) * mask
    xbuf[:, G:G + Lp] = z
    ld = jnp.sum(log_scale * mask, axis=1, keepdims=True)              # (Ch, 1)
    return jnp.sum(ld, axis=0, keepdims=True)                          # (1, 1)


# ----------------------------------------------------------------------------
# Fused Pallas kernels
# ----------------------------------------------------------------------------
def _pre_chain_kernel(x_ref, mask_ref, w1f_ref, b1_ref, w2_ref, b2_ref,
                      w3_ref, b3_ref, winv_ref, z_ref, ld_ref, xbuf, hbuf,
                      *, steps, C, Ch, hidden, Lp, G, Wp):
    f32 = jnp.float32
    xbuf[...] = jnp.zeros_like(xbuf)
    hbuf[...] = jnp.zeros_like(hbuf)
    xbuf[:, G:G + Lp] = x_ref[0].astype(f32)       # input already flat-padded
    mask = mask_ref[...]

    ld = jnp.zeros((1, 1), f32)
    for s in range(steps):                          # unrolled: steps is static
        ld = ld + _flow_step(xbuf, hbuf, mask,
                             w1f_ref[s], b1_ref[s], w2_ref[s], b2_ref[s],
                             w3_ref[s], b3_ref[s], winv_ref[s],
                             C=C, Ch=Ch, hidden=hidden, Lp=Lp, G=G, Wp=Wp)

    z_ref[0] = xbuf[:, G:G + Lp].astype(z_ref.dtype)
    ld_ref[0] = ld


def _post_chain_kernel(x_ref, mask_ref, w1f_ref, b1_ref, w2_ref, b2_ref,
                       w3_ref, b3_ref, winv_ref,
                       cw1_ref, cb1_ref, cw2_ref, cb2_ref,
                       z_ref, z1_ref, ld_ref, xbuf, hbuf, cbuf,
                       *, steps, C, Ch, hidden, chidden, Lp, G, Wp):
    f32 = jnp.float32
    xbuf[...] = jnp.zeros_like(xbuf)
    hbuf[...] = jnp.zeros_like(hbuf)
    cbuf[...] = jnp.zeros_like(cbuf)
    xbuf[:, G:G + Lp] = x_ref[0].astype(f32)
    mask = mask_ref[...]

    ld = jnp.zeros((1, 1), f32)
    for s in range(steps):
        ld = ld + _flow_step(xbuf, hbuf, mask,
                             w1f_ref[s], b1_ref[s], w2_ref[s], b2_ref[s],
                             w3_ref[s], b3_ref[s], winv_ref[s],
                             C=C, Ch=Ch, hidden=hidden, Lp=Lp, G=G, Wp=Wp)

    # --- Split: z = first Ch channels, a1 = last Ch channels ------------------
    # --- level0_condFlow (simplified; see TODO): conv3x3 -> relu -> conv3x3 ---
    taps = [xbuf[:Ch, ky * Wp + kx: ky * Wp + kx + Lp]
            for ky in range(3) for kx in range(3)]
    pc = jnp.concatenate(taps, axis=0)                                  # (9Ch, Lp)
    feat = jnp.maximum(jnp.dot(cw1_ref[...], pc, preferred_element_type=f32)
                       + cb1_ref[...], 0.0)
    cbuf[:, G:G + Lp] = feat * mask
    taps2 = [cbuf[:, ky * Wp + kx: ky * Wp + kx + Lp]
             for ky in range(3) for kx in range(3)]
    pc2 = jnp.concatenate(taps2, axis=0)                                # (9ch, Lp)
    ms = jnp.dot(cw2_ref[...], pc2, preferred_element_type=f32) + cb2_ref[...]
    mean = ms[:Ch]
    logs = jnp.tanh(ms[Ch:])                                            # bounded
    a1 = xbuf[Ch:, G:G + Lp]
    z1 = (a1 - mean) * jnp.exp(-logs) * mask
    nl = -logs * mask
    ld = ld + jnp.sum(jnp.sum(nl, axis=1, keepdims=True), axis=0, keepdims=True)

    z_ref[0] = xbuf[:Ch, G:G + Lp].astype(z_ref.dtype)
    z1_ref[0] = z1.astype(z1_ref.dtype)
    ld_ref[0] = ld


# ----------------------------------------------------------------------------
# Wrappers
# ----------------------------------------------------------------------------
def _flat_pad_nchw(x):
    """(B, C, H, W) -> (B, C, (H+2)*(W+2)) with a one-pixel zero border."""
    B, C, H, W = x.shape
    xp = jnp.pad(x, ((0, 0), (0, 0), (1, 1), (1, 1)))
    return xp.reshape(B, C, (H + 2) * (W + 2))


def _interior_mask_flat(H, W):
    m = np.zeros((H + 2, W + 2), np.float32)
    m[1:H + 1, 1:W + 1] = 1.0
    return jnp.asarray(m.reshape(1, (H + 2) * (W + 2)))


def _unflatten(zflat, H, W):
    B, Cc, _ = zflat.shape
    return zflat.reshape(B, Cc, H + 2, W + 2)[:, :, 1:1 + H, 1:1 + W]


def pre_chain_forward(x_nchw, p):
    """All preK FlowAssembly steps in one pallas_call."""
    B, C, H, W = x_nchw.shape
    Ch = C // 2
    steps, hidden = p["w1f"].shape[0], p["w1f"].shape[1]
    Hp, Wp = H + 2, W + 2
    Lp = Hp * Wp
    G = Wp + 1
    xflat = _flat_pad_nchw(x_nchw)
    mask = _interior_mask_flat(H, W)

    zflat, ld = pl.pallas_call(
        partial(_pre_chain_kernel, steps=steps, C=C, Ch=Ch, hidden=hidden,
                Lp=Lp, G=G, Wp=Wp),
        grid=(B,),
        in_specs=[
            pl.BlockSpec((1, C, Lp), lambda b: (b, 0, 0)),
            pl.BlockSpec((1, Lp), lambda b: (0, 0)),
            pl.BlockSpec(p["w1f"].shape, lambda b: (0, 0, 0)),
            pl.BlockSpec(p["b1"].shape, lambda b: (0, 0, 0)),
            pl.BlockSpec(p["w2"].shape, lambda b: (0, 0, 0)),
            pl.BlockSpec(p["b2"].shape, lambda b: (0, 0, 0)),
            pl.BlockSpec(p["w3"].shape, lambda b: (0, 0, 0)),
            pl.BlockSpec(p["b3"].shape, lambda b: (0, 0, 0)),
            pl.BlockSpec(p["winv"].shape, lambda b: (0, 0, 0)),
        ],
        out_specs=(
            pl.BlockSpec((1, C, Lp), lambda b: (b, 0, 0)),
            pl.BlockSpec((1, 1, 1), lambda b: (b, 0, 0)),
        ),
        out_shape=(
            jax.ShapeDtypeStruct((B, C, Lp), x_nchw.dtype),
            jax.ShapeDtypeStruct((B, 1, 1), jnp.float32),
        ),
        scratch_shapes=[
            pltpu.VMEM((C, Lp + 2 * G), jnp.float32),
            pltpu.VMEM((hidden, Lp + 2 * G), jnp.float32),
        ],
        compiler_params=pltpu.CompilerParams(dimension_semantics=("parallel",)),
    )(xflat, mask, p["w1f"], p["b1"], p["w2"], p["b2"], p["w3"], p["b3"],
      p["winv"])

    z = _unflatten(zflat, H, W)
    logdet = H * W * p["logabsdet_sum"] + ld[:, 0, 0]
    return z, logdet


def post_chain_forward(x_nchw, p):
    """(K - splitOff) FlowAssembly steps + Split + cond tail, one pallas_call."""
    B, C, H, W = x_nchw.shape
    Ch = C // 2
    steps, hidden = p["w1f"].shape[0], p["w1f"].shape[1]
    chidden = p["cw1"].shape[0]
    Hp, Wp = H + 2, W + 2
    Lp = Hp * Wp
    G = Wp + 1
    xflat = _flat_pad_nchw(x_nchw)
    mask = _interior_mask_flat(H, W)

    zflat, z1flat, ld = pl.pallas_call(
        partial(_post_chain_kernel, steps=steps, C=C, Ch=Ch, hidden=hidden,
                chidden=chidden, Lp=Lp, G=G, Wp=Wp),
        grid=(B,),
        in_specs=[
            pl.BlockSpec((1, C, Lp), lambda b: (b, 0, 0)),
            pl.BlockSpec((1, Lp), lambda b: (0, 0)),
            pl.BlockSpec(p["w1f"].shape, lambda b: (0, 0, 0)),
            pl.BlockSpec(p["b1"].shape, lambda b: (0, 0, 0)),
            pl.BlockSpec(p["w2"].shape, lambda b: (0, 0, 0)),
            pl.BlockSpec(p["b2"].shape, lambda b: (0, 0, 0)),
            pl.BlockSpec(p["w3"].shape, lambda b: (0, 0, 0)),
            pl.BlockSpec(p["b3"].shape, lambda b: (0, 0, 0)),
            pl.BlockSpec(p["winv"].shape, lambda b: (0, 0, 0)),
            pl.BlockSpec(p["cw1"].shape, lambda b: (0, 0)),
            pl.BlockSpec(p["cb1"].shape, lambda b: (0, 0)),
            pl.BlockSpec(p["cw2"].shape, lambda b: (0, 0)),
            pl.BlockSpec(p["cb2"].shape, lambda b: (0, 0)),
        ],
        out_specs=(
            pl.BlockSpec((1, Ch, Lp), lambda b: (b, 0, 0)),
            pl.BlockSpec((1, Ch, Lp), lambda b: (b, 0, 0)),
            pl.BlockSpec((1, 1, 1), lambda b: (b, 0, 0)),
        ),
        out_shape=(
            jax.ShapeDtypeStruct((B, Ch, Lp), x_nchw.dtype),
            jax.ShapeDtypeStruct((B, Ch, Lp), x_nchw.dtype),
            jax.ShapeDtypeStruct((B, 1, 1), jnp.float32),
        ),
        scratch_shapes=[
            pltpu.VMEM((C, Lp + 2 * G), jnp.float32),
            pltpu.VMEM((hidden, Lp + 2 * G), jnp.float32),
            pltpu.VMEM((chidden, Lp + 2 * G), jnp.float32),
        ],
        compiler_params=pltpu.CompilerParams(dimension_semantics=("parallel",)),
    )(xflat, mask, p["w1f"], p["b1"], p["w2"], p["b2"], p["w3"], p["b3"],
      p["winv"], p["cw1"], p["cb1"], p["cw2"], p["cb2"])

    z = _unflatten(zflat, H, W)
    z1 = _unflatten(z1flat, H, W)
    logdet = H * W * p["logabsdet_sum"] + ld[:, 0, 0]
    return z, z1, logdet


def squeeze2d_nchw(x, f):
    """Space-to-depth in NCHW matching PyTorch ordering (c*f*f + fy*f + fx)."""
    B, C, H, W = x.shape
    x = x.reshape(B, C, H // f, f, W // f, f)
    x = jnp.transpose(x, (0, 1, 3, 5, 2, 4))
    return x.reshape(B, C * f * f, H // f, W // f)


def flownet_normal_flow(hr_nchw, params, *, factor=4):
    x, logdet = pre_chain_forward(hr_nchw, params["pre"])
    x = squeeze2d_nchw(x, factor)
    z, z1, ld_post = post_chain_forward(x, params["post"])
    logdet = logdet + ld_post
    z2 = None
    return z, logdet, z1, z2


# ----------------------------------------------------------------------------
# Parameter init (natural / PyTorch-like layouts) + one-time packing
# ----------------------------------------------------------------------------
def init_flow_assembly_raw(key, C, hidden=16):
    k1, k2, k3, k4 = jax.random.split(key, 4)
    Ch = C // 2
    q, _ = jnp.linalg.qr(jax.random.normal(k1, (C, C), jnp.float32))
    return {
        "winv": q.astype(jnp.float32),                           # (Cout, Cin)
        "w1": 0.05 * jax.random.normal(k2, (hidden, Ch, 3, 3), jnp.float32),
        "b1": jnp.zeros((hidden,), jnp.float32),
        "w2": 0.05 * jax.random.normal(k3, (hidden, hidden), jnp.float32),
        "b2": jnp.zeros((hidden,), jnp.float32),
        "w3": 0.05 * jax.random.normal(k4, (2 * Ch, hidden, 3, 3), jnp.float32),
        "b3": jnp.zeros((2 * Ch,), jnp.float32),
    }


def pack_flow_chain(raw_list):
    """Fold invconv into conv#1, flatten im2col weights (tap-major), merge the
    shift/scale heads, stack per-step weights, precompute sum of log|det|."""
    w1f, b1, w2, b2, w3, b3, winv = [], [], [], [], [], [], []
    logabs = jnp.zeros((), jnp.float32)
    for r in raw_list:
        Winv = r["winv"]
        C = Winv.shape[0]
        Ch = C // 2
        hidden = r["w1"].shape[0]
        _, lad = jnp.linalg.slogdet(Winv)
        logabs = logabs + lad
        # coupling conditions on y1 = (Winv @ x)[:Ch]; fold into the 3x3 weights
        w1t = jnp.transpose(r["w1"], (2, 3, 0, 1)).reshape(9, hidden, Ch)
        w1f_s = jnp.einsum("tkc,cd->tkd", w1t, Winv[:Ch, :])     # (9, hidden, C)
        w1f.append(jnp.transpose(w1f_s, (1, 0, 2)).reshape(hidden, 9 * C))
        b1.append(r["b1"].reshape(hidden, 1))
        w2.append(r["w2"])
        b2.append(r["b2"].reshape(hidden, 1))
        w3.append(jnp.transpose(r["w3"], (0, 2, 3, 1)).reshape(2 * Ch, 9 * hidden))
        b3.append(r["b3"].reshape(2 * Ch, 1))
        winv.append(Winv)
    return {
        "w1f": jnp.stack(w1f), "b1": jnp.stack(b1),
        "w2": jnp.stack(w2), "b2": jnp.stack(b2),
        "w3": jnp.stack(w3), "b3": jnp.stack(b3),
        "winv": jnp.stack(winv),
        "logabsdet_sum": logabs,
    }


def init_cond_raw(key, Cs, hidden=32):
    k1, k2 = jax.random.split(key)
    return {
        "cw1": 0.05 * jax.random.normal(k1, (hidden, Cs, 3, 3), jnp.float32),
        "cb1": jnp.zeros((hidden,), jnp.float32),
        "cw2": 0.05 * jax.random.normal(k2, (2 * Cs, hidden, 3, 3), jnp.float32),
        "cb2": jnp.zeros((2 * Cs,), jnp.float32),
    }


def pack_cond(raw):
    hidden = raw["cw1"].shape[0]
    Cs = raw["cw1"].shape[1]
    return {
        "cw1": jnp.transpose(raw["cw1"], (0, 2, 3, 1)).reshape(hidden, 9 * Cs),
        "cb1": raw["cb1"].reshape(hidden, 1),
        "cw2": jnp.transpose(raw["cw2"], (0, 2, 3, 1)).reshape(2 * Cs, 9 * hidden),
        "cb2": raw["cb2"].reshape(2 * Cs, 1),
    }


def init_params(key, C_in, *, preK=3, K=8, splitOff=4, factor=4,
                hidden=16, cond_hidden=32):
    n_pre, n_post = preK, K - splitOff
    keys = jax.random.split(key, n_pre + n_post + 1)
    pre_raw = [init_flow_assembly_raw(keys[i], C_in, hidden) for i in range(n_pre)]
    C2 = C_in * factor * factor   # 2D space-to-depth (see TODO at top)
    post_raw = [init_flow_assembly_raw(keys[n_pre + i], C2, hidden)
                for i in range(n_post)]
    pre = pack_flow_chain(pre_raw)
    post = pack_flow_chain(post_raw)
    post.update(pack_cond(init_cond_raw(keys[-1], C2 // 2, cond_hidden)))
    return {"pre": pre, "post": post}


# ----------------------------------------------------------------------------
if __name__ == "__main__":
    B, C, H, W = 2, 4, 16, 16     # small shapes; C=4 so couplings split evenly
    key = jax.random.PRNGKey(0)
    k_x, k_p = jax.random.split(key)
    hr = jax.random.normal(k_x, (B, C, H, W), jnp.float32)
    params = init_params(k_p, C, preK=3, K=8, splitOff=4, factor=4)

    fwd = jax.jit(partial(flownet_normal_flow, factor=4))
    z, logdet, z1, z2 = fwd(hr, params)
    jax.block_until_ready((z, logdet, z1))

    assert z.shape == (B, 32, H // 4, W // 4)
    assert z1.shape == (B, 32, H // 4, W // 4)
    assert logdet.shape == (B,)
    assert z2 is None
    assert bool(jnp.all(jnp.isfinite(z)))
    assert bool(jnp.all(jnp.isfinite(z1)))
    assert bool(jnp.all(jnp.isfinite(logdet)))
    print("KERNEL_OK")
</pallas_src>

<mosaic_0001>
module attributes {stable_mosaic.version = 11 : i64} {
  func.func @_pre_chain_kernel(%arg0: i32, %arg1: memref<1x4x324xf32, #tpu.memory_space<vmem>>, %arg2: memref<1x324xf32, #tpu.memory_space<vmem>>, %arg3: memref<3x16x36xf32, #tpu.memory_space<vmem>>, %arg4: memref<3x16x1xf32, #tpu.memory_space<vmem>>, %arg5: memref<3x16x16xf32, #tpu.memory_space<vmem>>, %arg6: memref<3x16x1xf32, #tpu.memory_space<vmem>>, %arg7: memref<3x4x144xf32, #tpu.memory_space<vmem>>, %arg8: memref<3x4x1xf32, #tpu.memory_space<vmem>>, %arg9: memref<3x4x4xf32, #tpu.memory_space<vmem>>, %arg10: memref<1x4x324xf32, #tpu.memory_space<vmem>>, %arg11: memref<1x1x1xf32, #tpu.memory_space<vmem>>, %arg12: memref<4x362xf32, #tpu.memory_space<vmem>>, %arg13: memref<16x362xf32, #tpu.memory_space<vmem>>) attributes {dimension_semantics = [#tpu.dimension_semantics<parallel>], iteration_bounds = array<i64: 2>, scalar_prefetch = 0 : i64, scratch_operands = 2 : i64, tpu.core_type = #tpu.core_type<tc>, window_params = [{transform_indices = @transform_0, window_bounds = array<i64: 1, 4, 324>}, {pipeline_mode = #tpu.pipeline_mode<synchronous>, transform_indices = @transform_1, window_bounds = array<i64: 1, 324>}, {pipeline_mode = #tpu.pipeline_mode<synchronous>, transform_indices = @transform_2, window_bounds = array<i64: 3, 16, 36>}, {pipeline_mode = #tpu.pipeline_mode<synchronous>, transform_indices = @transform_3, window_bounds = array<i64: 3, 16, 1>}, {pipeline_mode = #tpu.pipeline_mode<synchronous>, transform_indices = @transform_4, window_bounds = array<i64: 3, 16, 16>}, {pipeline_mode = #tpu.pipeline_mode<synchronous>, transform_indices = @transform_5, window_bounds = array<i64: 3, 16, 1>}, {pipeline_mode = #tpu.pipeline_mode<synchronous>, transform_indices = @transform_6, window_bounds = array<i64: 3, 4, 144>}, {pipeline_mode = #tpu.pipeline_mode<synchronous>, transform_indices = @transform_7, window_bounds = array<i64: 3, 4, 1>}, {pipeline_mode = #tpu.pipeline_mode<synchronous>, transform_indices = @transform_8, window_bounds = array<i64: 3, 4, 4>}, {transform_indices = @transform_9, window_bounds = array<i64: 1, 4, 324>}, {transform_indices = @transform_10, window_bounds = array<i64: 1, 1, 1>}]} {
    %cst = arith.constant 0.000000e+00 : f32
    %0 = vector.broadcast %cst : f32 to vector<4x362xf32>
    %c0 = arith.constant 0 : index
    %c0_0 = arith.constant 0 : index
    %1 = vector.load %arg12[%c0, %c0_0] : memref<4x362xf32, #tpu.memory_space<vmem>>, vector<4x362xf32>
    tpu.vector_store %arg12[%c0, %c0_0], %0 {strides = array<i32>} : memref<4x362xf32, #tpu.memory_space<vmem>>, vector<4x362xf32>,
    %cst_1 = arith.constant 0.000000e+00 : f32
    %2 = vector.broadcast %cst_1 : f32 to vector<16x362xf32>
    %c0_2 = arith.constant 0 : index
    %c0_3 = arith.constant 0 : index
    %3 = vector.load %arg13[%c0_2, %c0_3] : memref<16x362xf32, #tpu.memory_space<vmem>>, vector<16x362xf32>
    tpu.vector_store %arg13[%c0_2, %c0_3], %2 {strides = array<i32>} : memref<16x362xf32, #tpu.memory_space<vmem>>, vector<16x362xf32>,
    %c0_4 = arith.constant 0 : index
    %c0_5 = arith.constant 0 : index
    %c0_6 = arith.constant 0 : index
    %4 = vector.load %arg1[%c0_4, %c0_5, %c0_6] : memref<1x4x324xf32, #tpu.memory_space<vmem>>, vector<1x4x324xf32>
    %5 = vector.shape_cast %4 : vector<1x4x324xf32> to vector<4x324xf32>
    %c0_7 = arith.constant 0 : index
    %c19 = arith.constant 19 : index
    %6 = vector.load %arg12[%c0_7, %c19] : memref<4x362xf32, #tpu.memory_space<vmem>>, vector<4x324xf32>
    tpu.vector_store %arg12[%c0_7, %c19], %5 {strides = array<i32>} : memref<4x362xf32, #tpu.memory_space<vmem>>, vector<4x324xf32>,
    %c0_8 = arith.constant 0 : index
    %c0_9 = arith.constant 0 : index
    %7 = vector.load %arg2[%c0_8, %c0_9] : memref<1x324xf32, #tpu.memory_space<vmem>>, vector<1x324xf32>
    %cst_10 = arith.constant 0.000000e+00 : f32
    %8 = vector.broadcast %cst_10 : f32 to vector<1x1xf32>
    %c0_11 = arith.constant 0 : index
    %c0_12 = arith.constant 0 : index
    %c0_13 = arith.constant 0 : index
    %9 = vector.load %arg3[%c0_11, %c0_12, %c0_13] : memref<3x16x36xf32, #tpu.memory_space<vmem>>, vector<1x16x36xf32>
    %10 = vector.shape_cast %9 : vector<1x16x36xf32> to vector<16x36xf32>
    %c0_14 = arith.constant 0 : index
    %c0_15 = arith.constant 0 : index
    %c0_16 = arith.constant 0 : index
    %11 = vector.load %arg4[%c0_14, %c0_15, %c0_16] : memref<3x16x1xf32, #tpu.memory_space<vmem>>, vector<1x16x1xf32>
    %12 = vector.shape_cast %11 : vector<1x16x1xf32> to vector<16x1xf32>
    %c0_17 = arith.constant 0 : index
    %c0_18 = arith.constant 0 : index
    %c0_19 = arith.constant 0 : index
    %13 = vector.load %arg5[%c0_17, %c0_18, %c0_19] : memref<3x16x16xf32, #tpu.memory_space<vmem>>, vector<1x16x16xf32>
    %14 = vector.shape_cast %13 : vector<1x16x16xf32> to vector<16x16xf32>
    %c0_20 = arith.constant 0 : index
    %c0_21 = arith.constant 0 : index
    %c0_22 = arith.constant 0 : index
    %15 = vector.load %arg6[%c0_20, %c0_21, %c0_22] : memref<3x16x1xf32, #tpu.memory_space<vmem>>, vector<1x16x1xf32>
    %16 = vector.shape_cast %15 : vector<1x16x1xf32> to vector<16x1xf32>
    %c0_23 = arith.constant 0 : index
    %c0_24 = arith.constant 0 : index
    %c0_25 = arith.constant 0 : index
    %17 = vector.load %arg7[%c0_23, %c0_24, %c0_25] : memref<3x4x144xf32, #tpu.memory_space<vmem>>, vector<1x4x144xf32>
    %18 = vector.shape_cast %17 : vector<1x4x144xf32> to vector<4x144xf32>
    %c0_26 = arith.constant 0 : index
    %c0_27 = arith.constant 0 : index
    %c0_28 = arith.constant 0 : index
    %19 = vector.load %arg8[%c0_26, %c0_27, %c0_28] : memref<3x4x1xf32, #tpu.memory_space<vmem>>, vector<1x4x1xf32>
    %20 = vector.shape_cast %19 : vector<1x4x1xf32> to vector<4x1xf32>
    %c0_29 = arith.constant 0 : index
    %c0_30 = arith.constant 0 : index
    %c0_31 = arith.constant 0 : index
    %21 = vector.load %arg9[%c0_29, %c0_30, %c0_31] : memref<3x4x4xf32, #tpu.memory_space<vmem>>, vector<1x4x4xf32>
    %22 = vector.shape_cast %21 : vector<1x4x4xf32> to vector<4x4xf32>
    %c0_32 = arith.constant 0 : index
    %c0_33 = arith.constant 0 : index
    %23 = vector.load %arg12[%c0_32, %c0_33] : memref<4x362xf32, #tpu.memory_space<vmem>>, vector<4x324xf32>
    %c0_34 = arith.constant 0 : index
    %c1 = arith.constant 1 : index
    %24 = vector.load %arg12[%c0_34, %c1] : memref<4x362xf32, #tpu.memory_space<vmem>>, vector<4x324xf32>
    %c0_35 = arith.constant 0 : index
    %c2 = arith.constant 2 : index
    %25 = vector.load %arg12[%c0_35, %c2] : memref<4x362xf32, #tpu.memory_space<vmem>>, vector<4x324xf32>
    %c0_36 = arith.constant 0 : index
    %c18 = arith.constant 18 : index
    %26 = vector.load %arg12[%c0_36, %c18] : memref<4x362xf32, #tpu.memory_space<vmem>>, vector<4x324xf32>
    %c0_37 = arith.constant 0 : index
    %c19_38 = arith.constant 19 : index
    %27 = vector.load %arg12[%c0_37, %c19_38] : memref<4x362xf32, #tpu.memory_space<vmem>>, vector<4x324xf32>
    %c0_39 = arith.constant 0 : index
    %c20 = arith.constant 20 : index
    %28 = vector.load %arg12[%c0_39, %c20] : memref<4x362xf32, #tpu.memory_space<vmem>>, vector<4x324xf32>
    %c0_40 = arith.constant 0 : index
    %c36 = arith.constant 36 : index
    %29 = vector.load %arg12[%c0_40, %c36] : memref<4x362xf32, #tpu.memory_space<vmem>>, vector<4x324xf32>
    %c0_41 = arith.constant 0 : index
    %c37 = arith.constant 37 : index
    %30 = vector.load %arg12[%c0_41, %c37] : memref<4x362xf32, #tpu.memory_space<vmem>>, vector<4x324xf32>
    %c0_42 = arith.constant 0 : index
    %c38 = arith.constant 38 : index
    %31 = vector.load %arg12[%c0_42, %c38] : memref<4x362xf32, #tpu.memory_space<vmem>>, vector<4x324xf32>
    %32 = tpu.concatenate %23, %24, %25, %26, %27, %28, %29, %30, %31 in 0 : vector<4x324xf32>, vector<4x324xf32>, vector<4x324xf32>, vector<4x324xf32>, vector<4x324xf32>, vector<4x324xf32>, vector<4x324xf32>, vector<4x324xf32>, vector<4x324xf32> -> vector<36x324xf32>
    %cst_43 = arith.constant dense<0.000000e+00> : vector<16x324xf32>
    %33 = tpu.matmul %10, %32, %cst_43 {dimension_numbers = #tpu.dot_dimension_numbers<[1], [0], [0], [1], [0, 0, 1, 1], [], []>} : vector<16x36xf32>, vector<36x324xf32>, vector<16x324xf32> -> vector<16x324xf32>
    %34 = vector.broadcast %12 : vector<16x1xf32> to vector<16x324xf32>
    %35 = arith.addf %33, %34 : vector<16x324xf32>
    %cst_44 = arith.constant 0.000000e+00 : f32
    %36 = vector.broadcast %cst_44 : f32 to vector<16x324xf32>
    %37 = arith.maximumf %35, %36 : vector<16x324xf32>
    %cst_45 = arith.constant dense<0.000000e+00> : vector<16x324xf32>
    %38 = tpu.matmul %14, %37, %cst_45 {dimension_numbers = #tpu.dot_dimension_numbers<[1], [0], [0], [1], [0, 0, 1, 1], [], []>} : vector<16x16xf32>, vector<16x324xf32>, vector<16x324xf32> -> vector<16x324xf32>
    %39 = vector.broadcast %16 : vector<16x1xf32> to vector<16x324xf32>
    %40 = arith.addf %38, %39 : vector<16x324xf32>
    %cst_46 = arith.constant 0.000000e+00 : f32
    %41 = vector.broadcast %cst_46 : f32 to vector<16x324xf32>
    %42 = arith.maximumf %40, %41 : vector<16x324xf32>
    %43 = vector.broadcast %7 : vector<1x324xf32> to vector<16x324xf32>
    %44 = arith.mulf %42, %43 : vector<16x324xf32>
    %c0_47 = arith.constant 0 : index
    %c19_48 = arith.constant 19 : index
    %45 = vector.load %arg13[%c0_47, %c19_48] : memref<16x362xf32, #tpu.memory_space<vmem>>, vector<16x324xf32>
    tpu.vector_store %arg13[%c0_47, %c19_48], %44 {strides = array<i32>} : memref<16x362xf32, #tpu.memory_space<vmem>>, vector<16x324xf32>,
    %c0_49 = arith.constant 0 : index
    %c0_50 = arith.constant 0 : index
    %46 = vector.load %arg13[%c0_49, %c0_50] : memref<16x362xf32, #tpu.memory_space<vmem>>, vector<16x324xf32>
    %c0_51 = arith.constant 0 : index
    %c1_52 = arith.constant 1 : index
    %47 = vector.load %arg13[%c0_51, %c1_52] : memref<16x362xf32, #tpu.memory_space<vmem>>, vector<16x324xf32>
    %c0_53 = arith.constant 0 : index
    %c2_54 = arith.constant 2 : index
    %48 = vector.load %arg13[%c0_53, %c2_54] : memref<16x362xf32, #tpu.memory_space<vmem>>, vector<16x324xf32>
    %c0_55 = arith.constant 0 : index
    %c18_56 = arith.constant 18 : index
    %49 = vector.load %arg13[%c0_55, %c18_56] : memref<16x362xf32, #tpu.memory_space<vmem>>, vector<16x324xf32>
    %c0_57 = arith.constant 0 : index
    %c19_58 = arith.constant 19 : index
    %50 = vector.load %arg13[%c0_57, %c19_58] : memref<16x362xf32, #tpu.memory_space<vmem>>, vector<16x324xf32>
    %c0_59 = arith.constant 0 : index
    %c20_60 = arith.constant 20 : index
    %51 = vector.load %arg13[%c0_59, %c20_60] : memref<16x362xf32, #tpu.memory_space<vmem>>, vector<16x324xf32>
    %c0_61 = arith.constant 0 : index
    %c36_62 = arith.constant 36 : index
    %52 = vector.load %arg13[%c0_61, %c36_62] : memref<16x362xf32, #tpu.memory_space<vmem>>, vector<16x324xf32>
    %c0_63 = arith.constant 0 : index
    %c37_64 = arith.constant 37 : index
    %53 = vector.load %arg13[%c0_63, %c37_64] : memref<16x362xf32, #tpu.memory_space<vmem>>, vector<16x324xf32>
    %c0_65 = arith.constant 0 : index
    %c38_66 = arith.constant 38 : index
    %54 = vector.load %arg13[%c0_65, %c38_66] : memref<16x362xf32, #tpu.memory_space<vmem>>, vector<16x324xf32>
    %55 = tpu.concatenate %46, %47, %48, %49, %50, %51, %52, %53, %54 in 0 : vector<16x324xf32>, vector<16x324xf32>, vector<16x324xf32>, vector<16x324xf32>, vector<16x324xf32>, vector<16x324xf32>, vector<16x324xf32>, vector<16x324xf32>, vector<16x324xf32> -> vector<144x324xf32>
    %cst_67 = arith.constant dense<0.000000e+00> : vector<4x324xf32>
    %56 = tpu.matmul %18, %55, %cst_67 {dimension_numbers = #tpu.dot_dimension_numbers<[1], [0], [0], [1], [0, 0, 1, 1], [], []>} : vector<4x144xf32>, vector<144x324xf32>, vector<4x324xf32> -> vector<4x324xf32>
    %57 = vector.broadcast %20 : vector<4x1xf32> to vector<4x324xf32>
    %58 = arith.addf %56, %57 : vector<4x324xf32>
    %59 = vector.extract_strided_slice %58 {offsets = [0, 0], sizes = [2, 324], strides = [1, 1]} : vector<4x324xf32> to vector<2x324xf32>
    %60 = vector.extract_strided_slice %58 {offsets = [2, 0], sizes = [2, 324], strides = [1, 1]} : vector<4x324xf32> to vector<2x324xf32>
    %cst_68 = arith.constant 2.000000e+00 : f32
    %61 = vector.broadcast %cst_68 : f32 to vector<2x324xf32>
    %62 = arith.addf %60, %61 : vector<2x324xf32>
    %63 = arith.negf %62 : vector<2x324xf32>
    %64 = math.exp %63 : vector<2x324xf32>
    %cst_69 = arith.constant 1.000000e+00 : f32
    %65 = vector.broadcast %cst_69 : f32 to vector<2x324xf32>
    %66 = arith.addf %65, %64 : vector<2x324xf32>
    %67 = arith.divf %65, %66 : vector<2x324xf32>
    %68 = math.log %67 : vector<2x324xf32>
    %c0_70 = arith.constant 0 : index
    %c19_71 = arith.constant 19 : index
    %69 = vector.load %arg12[%c0_70, %c19_71] : memref<4x362xf32, #tpu.memory_space<vmem>>, vector<4x324xf32>
    %cst_72 = arith.constant dense<0.000000e+00> : vector<4x324xf32>
    %70 = tpu.matmul %22, %69, %cst_72 {dimension_numbers = #tpu.dot_dimension_numbers<[1], [0], [0], [1], [0, 0, 1, 1], [], []>} : vector<4x4xf32>, vector<4x324xf32>, vector<4x324xf32> -> vector<4x324xf32>
    %71 = vector.extract_strided_slice %70 {offsets = [0, 0], sizes = [2, 324], strides = [1, 1]} : vector<4x324xf32> to vector<2x324xf32>
    %72 = vector.extract_strided_slice %70 {offsets = [2, 0], sizes = [2, 324], strides = [1, 1]} : vector<4x324xf32> to vector<2x324xf32>
    %73 = arith.addf %72, %59 : vector<2x324xf32>
    %74 = arith.mulf %73, %67 : vector<2x324xf32>
    %75 = tpu.concatenate %71, %74 in 0 : vector<2x324xf32>, vector<2x324xf32> -> vector<4x324xf32>
    %76 = vector.broadcast %7 : vector<1x324xf32> to vector<4x324xf32>
    %77 = arith.mulf %75, %76 : vector<4x324xf32>
    %c0_73 = arith.constant 0 : index
    %c19_74 = arith.constant 19 : index
    %78 = vector.load %arg12[%c0_73, %c19_74] : memref<4x362xf32, #tpu.memory_space<vmem>>, vector<4x324xf32>
    tpu.vector_store %arg12[%c0_73, %c19_74], %77 {strides = array<i32>} : memref<4x362xf32, #tpu.memory_space<vmem>>, vector<4x324xf32>,
    %79 = vector.broadcast %7 : vector<1x324xf32> to vector<2x324xf32>
    %80 = arith.mulf %68, %79 : vector<2x324xf32>
    %cst_75 = arith.constant dense<0.000000e+00> : vector<2xf32>
    %81 = vector.multi_reduction <add>, %80, %cst_75 [1] : vector<2x324xf32> to vector<2xf32>
    %82 = vector.shape_cast %81 : vector<2xf32> to vector<2x1xf32>
    %cst_76 = arith.constant dense<0.000000e+00> : vector<1xf32>
    %83 = vector.multi_reduction <add>, %82, %cst_76 [0] : vector<2x1xf32> to vector<1xf32>
    %84 = vector.shape_cast %83 : vector<1xf32> to vector<1x1xf32>
    %85 = arith.addf %8, %84 : vector<1x1xf32>
    %c1_77 = arith.constant 1 : index
    %c0_78 = arith.constant 0 : index
    %c0_79 = arith.constant 0 : index
    %86 = vector.load %arg3[%c1_77, %c0_78, %c0_79] : memref<3x16x36xf32, #tpu.memory_space<vmem>>, vector<1x16x36xf32>
    %87 = vector.shape_cast %86 : vector<1x16x36xf32> to vector<16x36xf32>
    %c1_80 = arith.constant 1 : index
    %c0_81 = arith.constant 0 : index
    %c0_82 = arith.constant 0 : index
    %88 = vector.load %arg4[%c1_80, %c0_81, %c0_82] : memref<3x16x1xf32, #tpu.memory_space<vmem>>, vector<1x16x1xf32>
    %89 = vector.shape_cast %88 : vector<1x16x1xf32> to vector<16x1xf32>
    %c1_83 = arith.constant 1 : index
    %c0_84 = arith.constant 0 : index
    %c0_85 = arith.constant 0 : index
    %90 = vector.load %arg5[%c1_83, %c0_84, %c0_85] : memref<3x16x16xf32, #tpu.memory_space<vmem>>, vector<1x16x16xf32>
    %91 = vector.shape_cast %90 : vector<1x16x16xf32> to vector<16x16xf32>
    %c1_86 = arith.constant 1 : index
    %c0_87 = arith.constant 0 : index
    %c0_88 = arith.constant 0 : index
    %92 = vector.load %arg6[%c1_86, %c0_87, %c0_88] : memref<3x16x1xf32, #tpu.memory_space<vmem>>, vector<1x16x1xf32>
    %93 = vector.shape_cast %92 : vector<1x16x1xf32> to vector<16x1xf32>
    %c1_89 = arith.constant 1 : index
    %c0_90 = arith.constant 0 : index
    %c0_91 = arith.constant 0 : index
    %94 = vector.load %arg7[%c1_89, %c0_90, %c0_91] : memref<3x4x144xf32, #tpu.memory_space<vmem>>, vector<1x4x144xf32>
    %95 = vector.shape_cast %94 : vector<1x4x144xf32> to vector<4x144xf32>
    %c1_92 = arith.constant 1 : index
    %c0_93 = arith.constant 0 : index
    %c0_94 = arith.constant 0 : index
    %96 = vector.load %arg8[%c1_92, %c0_93, %c0_94] : memref<3x4x1xf32, #tpu.memory_space<vmem>>, vector<1x4x1xf32>
    %97 = vector.shape_cast %96 : vector<1x4x1xf32> to vector<4x1xf32>
    %c1_95 = arith.constant 1 : index
    %c0_96 = arith.constant 0 : index
    %c0_97 = arith.constant 0 : index
    %98 = vector.load %arg9[%c1_95, %c0_96, %c0_97] : memref<3x4x4xf32, #tpu.memory_space<vmem>>, vector<1x4x4xf32>
    %99 = vector.shape_cast %98 : vector<1x4x4xf32> to vector<4x4xf32>
    %c0_98 = arith.constant 0 : index
    %c0_99 = arith.constant 0 : index
    %100 = vector.load %arg12[%c0_98, %c0_99] : memref<4x362xf32, #tpu.memory_space<vmem>>, vector<4x324xf32>
    %c0_100 = arith.constant 0 : index
    %c1_101 = arith.constant 1 : index
    %101 = vector.load %arg12[%c0_100, %c1_101] : memref<4x362xf32, #tpu.memory_space<vmem>>, vector<4x324xf32>
    %c0_102 = arith.constant 0 : index
    %c2_103 = arith.constant 2 : index
    %102 = vector.load %arg12[%c0_102, %c2_103] : memref<4x362xf32, #tpu.memory_space<vmem>>, vector<4x324xf32>
    %c0_104 = arith.constant 0 : index
    %c18_105 = arith.constant 18 : index
    %103 = vector.load %arg12[%c0_104, %c18_105] : memref<4x362xf32, #tpu.memory_space<vmem>>, vector<4x324xf32>
    %c0_106 = arith.constant 0 : index
    %c19_107 = arith.constant 19 : index
    %104 = vector.load %arg12[%c0_106, %c19_107] : memref<4x362xf32, #tpu.memory_space<vmem>>, vector<4x324xf32>
    %c0_108 = arith.constant 0 : index
    %c20_109 = arith.constant 20 : index
    %105 = vector.load %arg12[%c0_108, %c20_109] : memref<4x362xf32, #tpu.memory_space<vmem>>, vector<4x324xf32>
    %c0_110 = arith.constant 0 : index
    %c36_111 = arith.constant 36 : index
    %106 = vector.load %arg12[%c0_110, %c36_111] : memref<4x362xf32, #tpu.memory_space<vmem>>, vector<4x324xf32>
    %c0_112 = arith.constant 0 : index
    %c37_113 = arith.constant 37 : index
    %107 = vector.load %arg12[%c0_112, %c37_113] : memref<4x362xf32, #tpu.memory_space<vmem>>, vector<4x324xf32>
    %c0_114 = arith.constant 0 : index
    %c38_115 = arith.constant 38 : index
    %108 = vector.load %arg12[%c0_114, %c38_115] : memref<4x362xf32, #tpu.memory_space<vmem>>, vector<4x324xf32>
    %109 = tpu.concatenate %100, %101, %102, %103, %104, %105, %106, %107, %108 in 0 : vector<4x324xf32>, vector<4x324xf32>, vector<4x324xf32>, vector<4x324xf32>, vector<4x324xf32>, vector<4x324xf32>, vector<4x324xf32>, vector<4x324xf32>, vector<4x324xf32> -> vector<36x324xf32>
    %cst_116 = arith.constant dense<0.000000e+00> : vector<16x324xf32>
    %110 = tpu.matmul %87, %109, %cst_116 {dimension_numbers = #tpu.dot_dimension_numbers<[1], [0], [0], [1], [0, 0, 1, 1], [], []>} : vector<16x36xf32>, vector<36x324xf32>, vector<16x324xf32> -> vector<16x324xf32>
    %111 = vector.broadcast %89 : vector<16x1xf32> to vector<16x324xf32>
    %112 = arith.addf %110, %111 : vector<16x324xf32>
    %cst_117 = arith.constant 0.000000e+00 : f32
    %113 = vector.broadcast %cst_117 : f32 to vector<16x324xf32>
    %114 = arith.maximumf %112, %113 : vector<16x324xf32>
    %cst_118 = arith.constant dense<0.000000e+00> : vector<16x324xf32>
    %115 = tpu.matmul %91, %114, %cst_118 {dimension_numbers = #tpu.dot_dimension_numbers<[1], [0], [0], [1], [0, 0, 1, 1], [], []>} : vector<16x16xf32>, vector<16x324xf32>, vector<16x324xf32> -> vector<16x324xf32>
    %116 = vector.broadcast %93 : vector<16x1xf32> to vector<16x324xf32>
    %117 = arith.addf %115, %116 : vector<16x324xf32>
    %cst_119 = arith.constant 0.000000e+00 : f32
    %118 = vector.broadcast %cst_119 : f32 to vector<16x324xf32>
    %119 = arith.maximumf %117, %118 : vector<16x324xf32>
    %120 = vector.broadcast %7 : vector<1x324xf32> to vector<16x324xf32>
    %121 = arith.mulf %119, %120 : vector<16x324xf32>
    %c0_120 = arith.constant 0 : index
    %c19_121 = arith.constant 19 : index
    %122 = vector.load %arg13[%c0_120, %c19_121] : memref<16x362xf32, #tpu.memory_space<vmem>>, vector<16x324xf32>
    tpu.vector_store %arg13[%c0_120, %c19_121], %121 {strides = array<i32>} : memref<16x362xf32, #tpu.memory_space<vmem>>, vector<16x324xf32>,
    %c0_122 = arith.constant 0 : index
    %c0_123 = arith.constant 0 : index
    %123 = vector.load %arg13[%c0_122, %c0_123] : memref<16x362xf32, #tpu.memory_space<vmem>>, vector<16x324xf32>
    %c0_124 = arith.constant 0 : index
    %c1_125 = arith.constant 1 : index
    %124 = vector.load %arg13[%c0_124, %c1_125] : memref<16x362xf32, #tpu.memory_space<vmem>>, vector<16x324xf32>
    %c0_126 = arith.constant 0 : index
    %c2_127 = arith.constant 2 : index
    %125 = vector.load %arg13[%c0_126, %c2_127] : memref<16x362xf32, #tpu.memory_space<vmem>>, vector<16x324xf32>
    %c0_128 = arith.constant 0 : index
    %c18_129 = arith.constant 18 : index
    %126 = vector.load %arg13[%c0_128, %c18_129] : memref<16x362xf32, #tpu.memory_space<vmem>>, vector<16x324xf32>
    %c0_130 = arith.constant 0 : index
    %c19_131 = arith.constant 19 : index
    %127 = vector.load %arg13[%c0_130, %c19_131] : memref<16x362xf32, #tpu.memory_space<vmem>>, vector<16x324xf32>
    %c0_132 = arith.constant 0 : index
    %c20_133 = arith.constant 20 : index
    %128 = vector.load %arg13[%c0_132, %c20_133] : memref<16x362xf32, #tpu.memory_space<vmem>>, vector<16x324xf32>
    %c0_134 = arith.constant 0 : index
    %c36_135 = arith.constant 36 : index
    %129 = vector.load %arg13[%c0_134, %c36_135] : memref<16x362xf32, #tpu.memory_space<vmem>>, vector<16x324xf32>
    %c0_136 = arith.constant 0 : index
    %c37_137 = arith.constant 37 : index
    %130 = vector.load %arg13[%c0_136, %c37_137] : memref<16x362xf32, #tpu.memory_space<vmem>>, vector<16x324xf32>
    %c0_138 = arith.constant 0 : index
    %c38_139 = arith.constant 38 : index
    %131 = vector.load %arg13[%c0_138, %c38_139] : memref<16x362xf32, #tpu.memory_space<vmem>>, vector<16x324xf32>
    %132 = tpu.concatenate %123, %124, %125, %126, %127, %128, %129, %130, %131 in 0 : vector<16x324xf32>, vector<16x324xf32>, vector<16x324xf32>, vector<16x324xf32>, vector<16x324xf32>, vector<16x324xf32>, vector<16x324xf32>, vector<16x324xf32>, vector<16x324xf32> -> vector<144x324xf32>
    %cst_140 = arith.constant dense<0.000000e+00> : vector<4x324xf32>
    %133 = tpu.matmul %95, %132, %cst_140 {dimension_numbers = #tpu.dot_dimension_numbers<[1], [0], [0], [1], [0, 0, 1, 1], [], []>} : vector<4x144xf32>, vector<144x324xf32>, vector<4x324xf32> -> vector<4x324xf32>
    %134 = vector.broadcast %97 : vector<4x1xf32> to vector<4x324xf32>
    %135 = arith.addf %133, %134 : vector<4x324xf32>
    %136 = vector.extract_strided_slice %135 {offsets = [0, 0], sizes = [2, 324], strides = [1, 1]} : vector<4x324xf32> to vector<2x324xf32>
    %137 = vector.extract_strided_slice %135 {offsets = [2, 0], sizes = [2, 324], strides = [1, 1]} : vector<4x324xf32> to vector<2x324xf32>
    %cst_141 = arith.constant 2.000000e+00 : f32
    %138 = vector.broadcast %cst_141 : f32 to vector<2x324xf32>
    %139 = arith.addf %137, %138 : vector<2x324xf32>
    %140 = arith.negf %139 : vector<2x324xf32>
    %141 = math.exp %140 : vector<2x324xf32>
    %cst_142 = arith.constant 1.000000e+00 : f32
    %142 = vector.broadcast %cst_142 : f32 to vector<2x324xf32>
    %143 = arith.addf %142, %141 : vector<2x324xf32>
    %144 = arith.divf %142, %143 : vector<2x324xf32>
    %145 = math.log %144 : vector<2x324xf32>
    %c0_143 = arith.constant 0 : index
    %c19_144 = arith.constant 19 : index
    %146 = vector.load %arg12[%c0_143, %c19_144] : memref<4x362xf32, #tpu.memory_space<vmem>>, vector<4x324xf32>
    %cst_145 = arith.constant dense<0.000000e+00> : vector<4x324xf32>
    %147 = tpu.matmul %99, %146, %cst_145 {dimension_numbers = #tpu.dot_dimension_numbers<[1], [0], [0], [1], [0, 0, 1, 1], [], []>} : vector<4x4xf32>, vector<4x324xf32>, vector<4x324xf32> -> vector<4x324xf32>
    %148 = vector.extract_strided_slice %147 {offsets = [0, 0], sizes = [2, 324], strides = [1, 1]} : vector<4x324xf32> to vector<2x324xf32>
    %149 = vector.extract_strided_slice %147 {offsets = [2, 0], sizes = [2, 324], strides = [1, 1]} : vector<4x324xf32> to vector<2x324xf32>
    %150 = arith.addf %149, %136 : vector<2x324xf32>
    %151 = arith.mulf %150, %144 : vector<2x324xf32>
    %152 = tpu.concatenate %148, %151 in 0 : vector<2x324xf32>, vector<2x324xf32> -> vector<4x324xf32>
    %153 = vector.broadcast %7 : vector<1x324xf32> to vector<4x324xf32>
    %154 = arith.mulf %152, %153 : vector<4x324xf32>
    %c0_146 = arith.constant 0 : index
    %c19_147 = arith.constant 19 : index
    %155 = vector.load %arg12[%c0_146, %c19_147] : memref<4x362xf32, #tpu.memory_space<vmem>>, vector<4x324xf32>
    tpu.vector_store %arg12[%c0_146, %c19_147], %154 {strides = array<i32>} : memref<4x362xf32, #tpu.memory_space<vmem>>, vector<4x324xf32>,
    %156 = vector.broadcast %7 : vector<1x324xf32> to vector<2x324xf32>
    %157 = arith.mulf %145, %156 : vector<2x324xf32>
    %cst_148 = arith.constant dense<0.000000e+00> : vector<2xf32>
    %158 = vector.multi_reduction <add>, %157, %cst_148 [1] : vector<2x324xf32> to vector<2xf32>
    %159 = vector.shape_cast %158 : vector<2xf32> to vector<2x1xf32>
    %cst_149 = arith.constant dense<0.000000e+00> : vector<1xf32>
    %160 = vector.multi_reduction <add>, %159, %cst_149 [0] : vector<2x1xf32> to vector<1xf32>
    %161 = vector.shape_cast %160 : vector<1xf32> to vector<1x1xf32>
    %162 = arith.addf %85, %161 : vector<1x1xf32>
    %c2_150 = arith.constant 2 : index
    %c0_151 = arith.constant 0 : index
    %c0_152 = arith.constant 0 : index
    %163 = vector.load %arg3[%c2_150, %c0_151, %c0_152] : memref<3x16x36xf32, #tpu.memory_space<vmem>>, vector<1x16x36xf32>
    %164 = vector.shape_cast %163 : vector<1x16x36xf32> to vector<16x36xf32>
    %c2_153 = arith.constant 2 : index
    %c0_154 = arith.constant 0 : index
    %c0_155 = arith.constant 0 : index
    %165 = vector.load %arg4[%c2_153, %c0_154, %c0_155] : memref<3x16x1xf32, #tpu.memory_space<vmem>>, vector<1x16x1xf32>
    %166 = vector.shape_cast %165 : vector<1x16x1xf32> to vector<16x1xf32>
    %c2_156 = arith.constant 2 : index
    %c0_157 = arith.constant 0 : index
    %c0_158 = arith.constant 0 : index
    %167 = vector.load %arg5[%c2_156, %c0_157, %c0_158] : memref<3x16x16xf32, #tpu.memory_space<vmem>>, vector<1x16x16xf32>
    %168 = vector.shape_cast %167 : vector<1x16x16xf32> to vector<16x16xf32>
    %c2_159 = arith.constant 2 : index
    %c0_160 = arith.constant 0 : index
    %c0_161 = arith.constant 0 : index
    %169 = vector.load %arg6[%c2_159, %c0_160, %c0_161] : memref<3x16x1xf32, #tpu.memory_space<vmem>>, vector<1x16x1xf32>
    %170 = vector.shape_cast %169 : vector<1x16x1xf32> to vector<16x1xf32>
    %c2_162 = arith.constant 2 : index
    %c0_163 = arith.constant 0 : index
    %c0_164 = arith.constant 0 : index
    %171 = vector.load %arg7[%c2_162, %c0_163, %c0_164] : memref<3x4x144xf32, #tpu.memory_space<vmem>>, vector<1x4x144xf32>
    %172 = vector.shape_cast %171 : vector<1x4x144xf32> to vector<4x144xf32>
    %c2_165 = arith.constant 2 : index
    %c0_166 = arith.constant 0 : index
    %c0_167 = arith.constant 0 : index
    %173 = vector.load %arg8[%c2_165, %c0_166, %c0_167] : memref<3x4x1xf32, #tpu.memory_space<vmem>>, vector<1x4x1xf32>
    %174 = vector.shape_cast %173 : vector<1x4x1xf32> to vector<4x1xf32>
    %c2_168 = arith.constant 2 : index
    %c0_169 = arith.constant 0 : index
    %c0_170 = arith.constant 0 : index
    %175 = vector.load %arg9[%c2_168, %c0_169, %c0_170] : memref<3x4x4xf32, #tpu.memory_space<vmem>>, vector<1x4x4xf32>
    %176 = vector.shape_cast %175 : vector<1x4x4xf32> to vector<4x4xf32>
    %c0_171 = arith.constant 0 : index
    %c0_172 = arith.constant 0 : index
    %177 = vector.load %arg12[%c0_171, %c0_172] : memref<4x362xf32, #tpu.memory_space<vmem>>, vector<4x324xf32>
    %c0_173 = arith.constant 0 : index
    %c1_174 = arith.constant 1 : index
    %178 = vector.load %arg12[%c0_173, %c1_174] : memref<4x362xf32, #tpu.memory_space<vmem>>, vector<4x324xf32>
    %c0_175 = arith.constant 0 : index
    %c2_176 = arith.constant 2 : index
    %179 = vector.load %arg12[%c0_175, %c2_176] : memref<4x362xf32, #tpu.memory_space<vmem>>, vector<4x324xf32>
    %c0_177 = arith.constant 0 : index
    %c18_178 = arith.constant 18 : index
    %180 = vector.load %arg12[%c0_177, %c18_178] : memref<4x362xf32, #tpu.memory_space<vmem>>, vector<4x324xf32>
    %c0_179 = arith.constant 0 : index
    %c19_180 = arith.constant 19 : index
    %181 = vector.load %arg12[%c0_179, %c19_180] : memref<4x362xf32, #tpu.memory_space<vmem>>, vector<4x324xf32>
    %c0_181 = arith.constant 0 : index
    %c20_182 = arith.constant 20 : index
    %182 = vector.load %arg12[%c0_181, %c20_182] : memref<4x362xf32, #tpu.memory_space<vmem>>, vector<4x324xf32>
    %c0_183 = arith.constant 0 : index
    %c36_184 = arith.constant 36 : index
    %183 = vector.load %arg12[%c0_183, %c36_184] : memref<4x362xf32, #tpu.memory_space<vmem>>, vector<4x324xf32>
    %c0_185 = arith.constant 0 : index
    %c37_186 = arith.constant 37 : index
    %184 = vector.load %arg12[%c0_185, %c37_186] : memref<4x362xf32, #tpu.memory_space<vmem>>, vector<4x324xf32>
    %c0_187 = arith.constant 0 : index
    %c38_188 = arith.constant 38 : index
    %185 = vector.load %arg12[%c0_187, %c38_188] : memref<4x362xf32, #tpu.memory_space<vmem>>, vector<4x324xf32>
    %186 = tpu.concatenate %177, %178, %179, %180, %181, %182, %183, %184, %185 in 0 : vector<4x324xf32>, vector<4x324xf32>, vector<4x324xf32>, vector<4x324xf32>, vector<4x324xf32>, vector<4x324xf32>, vector<4x324xf32>, vector<4x324xf32>, vector<4x324xf32> -> vector<36x324xf32>
    %cst_189 = arith.constant dense<0.000000e+00> : vector<16x324xf32>
    %187 = tpu.matmul %164, %186, %cst_189 {dimension_numbers = #tpu.dot_dimension_numbers<[1], [0], [0], [1], [0, 0, 1, 1], [], []>} : vector<16x36xf32>, vector<36x324xf32>, vector<16x324xf32> -> vector<16x324xf32>
    %188 = vector.broadcast %166 : vector<16x1xf32> to vector<16x324xf32>
    %189 = arith.addf %187, %188 : vector<16x324xf32>
    %cst_190 = arith.constant 0.000000e+00 : f32
    %190 = vector.broadcast %cst_190 : f32 to vector<16x324xf32>
    %191 = arith.maximumf %189, %190 : vector<16x324xf32>
    %cst_191 = arith.constant dense<0.000000e+00> : vector<16x324xf32>
    %192 = tpu.matmul %168, %191, %cst_191 {dimension_numbers = #tpu.dot_dimension_numbers<[1], [0], [0], [1], [0, 0, 1, 1], [], []>} : vector<16x16xf32>, vector<16x324xf32>, vector<16x324xf32> -> vector<16x324xf32>
    %193 = vector.broadcast %170 : vector<16x1xf32> to vector<16x324xf32>
    %194 = arith.addf %192, %193 : vector<16x324xf32>
    %cst_192 = arith.constant 0.000000e+00 : f32
    %195 = vector.broadcast %cst_192 : f32 to vector<16x324xf32>
    %196 = arith.maximumf %194, %195 : vector<16x324xf32>
    %197 = vector.broadcast %7 : vector<1x324xf32> to vector<16x324xf32>
    %198 = arith.mulf %196, %197 : vector<16x324xf32>
    %c0_193 = arith.constant 0 : index
    %c19_194 = arith.constant 19 : index
    %199 = vector.load %arg13[%c0_193, %c19_194] : memref<16x362xf32, #tpu.memory_space<vmem>>, vector<16x324xf32>
    tpu.vector_store %arg13[%c0_193, %c19_194], %198 {strides = array<i32>} : memref<16x362xf32, #tpu.memory_space<vmem>>, vector<16x324xf32>,
    %c0_195 = arith.constant 0 : index
    %c0_196 = arith.constant 0 : index
    %200 = vector.load %arg13[%c0_195, %c0_196] : memref<16x362xf32, #tpu.memory_space<vmem>>, vector<16x324xf32>
    %c0_197 = arith.constant 0 : index
    %c1_198 = arith.constant 1 : index
    %201 = vector.load %arg13[%c0_197, %c1_198] : memref<16x362xf32, #tpu.memory_space<vmem>>, vector<16x324xf32>
    %c0_199 = arith.constant 0 : index
    %c2_200 = arith.constant 2 : index
    %202 = vector.load %arg13[%c0_199, %c2_200] : memref<16x362xf32, #tpu.memory_space<vmem>>, vector<16x324xf32>
    %c0_201 = arith.constant 0 : index
    %c18_202 = arith.constant 18 : index
    %203 = vector.load %arg13[%c0_201, %c18_202] : memref<16x362xf32, #tpu.memory_space<vmem>>, vector<16x324xf32>
    %c0_203 = arith.constant 0 : index
    %c19_204 = arith.constant 19 : index
    %204 = vector.load %arg13[%c0_203, %c19_204] : memref<16x362xf32, #tpu.memory_space<vmem>>, vector<16x324xf32>
    %c0_205 = arith.constant 0 : index
    %c20_206 = arith.constant 20 : index
    %205 = vector.load %arg13[%c0_205, %c20_206] : memref<16x362xf32, #tpu.memory_space<vmem>>, vector<16x324xf32>
    %c0_207 = arith.constant 0 : index
    %c36_208 = arith.constant 36 : index
    %206 = vector.load %arg13[%c0_207, %c36_208] : memref<16x362xf32, #tpu.memory_space<vmem>>, vector<16x324xf32>
    %c0_209 = arith.constant 0 : index
    %c37_210 = arith.constant 37 : index
    %207 = vector.load %arg13[%c0_209, %c37_210] : memref<16x362xf32, #tpu.memory_space<vmem>>, vector<16x324xf32>
    %c0_211 = arith.constant 0 : index
    %c38_212 = arith.constant 38 : index
    %208 = vector.load %arg13[%c0_211, %c38_212] : memref<16x362xf32, #tpu.memory_space<vmem>>, vector<16x324xf32>
    %209 = tpu.concatenate %200, %201, %202, %203, %204, %205, %206, %207, %208 in 0 : vector<16x324xf32>, vector<16x324xf32>, vector<16x324xf32>, vector<16x324xf32>, vector<16x324xf32>, vector<16x324xf32>, vector<16x324xf32>, vector<16x324xf32>, vector<16x324xf32> -> vector<144x324xf32>
    %cst_213 = arith.constant dense<0.000000e+00> : vector<4x324xf32>
    %210 = tpu.matmul %172, %209, %cst_213 {dimension_numbers = #tpu.dot_dimension_numbers<[1], [0], [0], [1], [0, 0, 1, 1], [], []>} : vector<4x144xf32>, vector<144x324xf32>, vector<4x324xf32> -> vector<4x324xf32>
    %211 = vector.broadcast %174 : vector<4x1xf32> to vector<4x324xf32>
    %212 = arith.addf %210, %211 : vector<4x324xf32>
    %213 = vector.extract_strided_slice %212 {offsets = [0, 0], sizes = [2, 324], strides = [1, 1]} : vector<4x324xf32> to vector<2x324xf32>
    %214 = vector.extract_strided_slice %212 {offsets = [2, 0], sizes = [2, 324], strides = [1, 1]} : vector<4x324xf32> to vector<2x324xf32>
    %cst_214 = arith.constant 2.000000e+00 : f32
    %215 = vector.broadcast %cst_214 : f32 to vector<2x324xf32>
    %216 = arith.addf %214, %215 : vector<2x324xf32>
    %217 = arith.negf %216 : vector<2x324xf32>
    %218 = math.exp %217 : vector<2x324xf32>
    %cst_215 = arith.constant 1.000000e+00 : f32
    %219 = vector.broadcast %cst_215 : f32 to vector<2x324xf32>
    %220 = arith.addf %219, %218 : vector<2x324xf32>
    %221 = arith.divf %219, %220 : vector<2x324xf32>
    %222 = math.log %221 : vector<2x324xf32>
    %c0_216 = arith.constant 0 : index
    %c19_217 = arith.constant 19 : index
    %223 = vector.load %arg12[%c0_216, %c19_217] : memref<4x362xf32, #tpu.memory_space<vmem>>, vector<4x324xf32>
    %cst_218 = arith.constant dense<0.000000e+00> : vector<4x324xf32>
    %224 = tpu.matmul %176, %223, %cst_218 {dimension_numbers = #tpu.dot_dimension_numbers<[1], [0], [0], [1], [0, 0, 1, 1], [], []>} : vector<4x4xf32>, vector<4x324xf32>, vector<4x324xf32> -> vector<4x324xf32>
    %225 = vector.extract_strided_slice %224 {offsets = [0, 0], sizes = [2, 324], strides = [1, 1]} : vector<4x324xf32> to vector<2x324xf32>
    %226 = vector.extract_strided_slice %224 {offsets = [2, 0], sizes = [2, 324], strides = [1, 1]} : vector<4x324xf32> to vector<2x324xf32>
    %227 = arith.addf %226, %213 : vector<2x324xf32>
    %228 = arith.mulf %227, %221 : vector<2x324xf32>
    %229 = tpu.concatenate %225, %228 in 0 : vector<2x324xf32>, vector<2x324xf32> -> vector<4x324xf32>
    %230 = vector.broadcast %7 : vector<1x324xf32> to vector<4x324xf32>
    %231 = arith.mulf %229, %230 : vector<4x324xf32>
    %c0_219 = arith.constant 0 : index
    %c19_220 = arith.constant 19 : index
    %232 = vector.load %arg12[%c0_219, %c19_220] : memref<4x362xf32, #tpu.memory_space<vmem>>, vector<4x324xf32>
    tpu.vector_store %arg12[%c0_219, %c19_220], %231 {strides = array<i32>} : memref<4x362xf32, #tpu.memory_space<vmem>>, vector<4x324xf32>,
    %233 = vector.broadcast %7 : vector<1x324xf32> to vector<2x324xf32>
    %234 = arith.mulf %222, %233 : vector<2x324xf32>
    %cst_221 = arith.constant dense<0.000000e+00> : vector<2xf32>
    %235 = vector.multi_reduction <add>, %234, %cst_221 [1] : vector<2x324xf32> to vector<2xf32>
    %236 = vector.shape_cast %235 : vector<2xf32> to vector<2x1xf32>
    %cst_222 = arith.constant dense<0.000000e+00> : vector<1xf32>
    %237 = vector.multi_reduction <add>, %236, %cst_222 [0] : vector<2x1xf32> to vector<1xf32>
    %238 = vector.shape_cast %237 : vector<1xf32> to vector<1x1xf32>
    %239 = arith.addf %162, %238 : vector<1x1xf32>
    %c0_223 = arith.constant 0 : index
    %c19_224 = arith.constant 19 : index
    %240 = vector.load %arg12[%c0_223, %c19_224] : memref<4x362xf32, #tpu.memory_space<vmem>>, vector<4x324xf32>
    %c0_225 = arith.constant 0 : index
    %c0_226 = arith.constant 0 : index
    %c0_227 = arith.constant 0 : index
    %241 = vector.load %arg10[%c0_225, %c0_226, %c0_227] : memref<1x4x324xf32, #tpu.memory_space<vmem>>, vector<1x4x324xf32>
    %242 = vector.shape_cast %241 : vector<1x4x324xf32> to vector<4x324xf32>
    %243 = vector.shape_cast %240 : vector<4x324xf32> to vector<1x4x324xf32>
    tpu.vector_store %arg10[%c0_225, %c0_226, %c0_227], %243 {strides = array<i32>} : memref<1x4x324xf32, #tpu.memory_space<vmem>>, vector<1x4x324xf32>,
    %c0_228 = arith.constant 0 : index
    %c0_229 = arith.constant 0 : index
    %c0_230 = arith.constant 0 : index
    %244 = vector.load %arg11[%c0_228, %c0_229, %c0_230] : memref<1x1x1xf32, #tpu.memory_space<vmem>>, vector<1x1x1xf32>
    %245 = vector.shape_cast %244 : vector<1x1x1xf32> to vector<1x1xf32>
    %246 = vector.shape_cast %239 : vector<1x1xf32> to vector<1x1x1xf32>
    tpu.vector_store %arg11[%c0_228, %c0_229, %c0_230], %246 {strides = array<i32>} : memref<1x1x1xf32, #tpu.memory_space<vmem>>, vector<1x1x1xf32>,
    return
  }
  func.func @transform_0(%arg0: i32) -> (i32, i32, i32) {
    %c0_i32 = arith.constant 0 : i32
    %c0_i32_0 = arith.constant 0 : i32
    %c0_i32_1 = arith.constant 0 : i32
    return %arg0, %c0_i32, %c0_i32_0 : i32, i32, i32
  }
  func.func @transform_1(%arg0: i32) -> (i32, i32) {
    %c0_i32 = arith.constant 0 : i32
    %c0_i32_0 = arith.constant 0 : i32
    %c0_i32_1 = arith.constant 0 : i32
    return %c0_i32, %c0_i32_0 : i32, i32
  }
  func.func @transform_2(%arg0: i32) -> (i32, i32, i32) {
    %c0_i32 = arith.constant 0 : i32
    %c0_i32_0 = arith.constant 0 : i32
    %c0_i32_1 = arith.constant 0 : i32
    %c0_i32_2 = arith.constant 0 : i32
    return %c0_i32, %c0_i32_0, %c0_i32_1 : i32, i32, i32
  }
  func.func @transform_3(%arg0: i32) -> (i32, i32, i32) {
    %c0_i32 = arith.constant 0 : i32
    %c0_i32_0 = arith.constant 0 : i32
    %c0_i32_1 = arith.constant 0 : i32
    %c0_i32_2 = arith.constant 0 : i32
    return %c0_i32, %c0_i32_0, %c0_i32_1 : i32, i32, i32
  }
  func.func @transform_4(%arg0: i32) -> (i32, i32, i32) {
    %c0_i32 = arith.constant 0 : i32
    %c0_i32_0 = arith.constant 0 : i32
    %c0_i32_1 = arith.constant 0 : i32
    %c0_i32_2 = arith.constant 0 : i32
    return %c0_i32, %c0_i32_0, %c0_i32_1 : i32, i32, i32
  }
  func.func @transform_5(%arg0: i32) -> (i32, i32, i32) {
    %c0_i32 = arith.constant 0 : i32
    %c0_i32_0 = arith.constant 0 : i32
    %c0_i32_1 = arith.constant 0 : i32
    %c0_i32_2 = arith.constant 0 : i32
    return %c0_i32, %c0_i32_0, %c0_i32_1 : i32, i32, i32
  }
  func.func @transform_6(%arg0: i32) -> (i32, i32, i32) {
    %c0_i32 = arith.constant 0 : i32
    %c0_i32_0 = arith.constant 0 : i32
    %c0_i32_1 = arith.constant 0 : i32
    %c0_i32_2 = arith.constant 0 : i32
    return %c0_i32, %c0_i32_0, %c0_i32_1 : i32, i32, i32
  }
  func.func @transform_7(%arg0: i32) -> (i32, i32, i32) {
    %c0_i32 = arith.constant 0 : i32
    %c0_i32_0 = arith.constant 0 : i32
    %c0_i32_1 = arith.constant 0 : i32
    %c0_i32_2 = arith.constant 0 : i32
    return %c0_i32, %c0_i32_0, %c0_i32_1 : i32, i32, i32
  }
  func.func @transform_8(%arg0: i32) -> (i32, i32, i32) {
    %c0_i32 = arith.constant 0 : i32
    %c0_i32_0 = arith.constant 0 : i32
    %c0_i32_1 = arith.constant 0 : i32
    %c0_i32_2 = arith.constant 0 : i32
    return %c0_i32, %c0_i32_0, %c0_i32_1 : i32, i32, i32
  }
  func.func @transform_9(%arg0: i32) -> (i32, i32, i32) {
    %c0_i32 = arith.constant 0 : i32
    %c0_i32_0 = arith.constant 0 : i32
    %c0_i32_1 = arith.constant 0 : i32
    return %arg0, %c0_i32, %c0_i32_0 : i32, i32, i32
  }
  func.func @transform_10(%arg0: i32) -> (i32, i32, i32) {
    %c0_i32 = arith.constant 0 : i32
    %c0_i32_0 = arith.constant 0 : i32
    %c0_i32_1 = arith.constant 0 : i32
    return %arg0, %c0_i32, %c0_i32_0 : i32, i32, i32
  }
}

module attributes {stable_mosaic.version = 11 : i64} {
  func.func @_post_chain_kernel(%arg0: i32, %arg1: memref<1x64x36xf32, #tpu.memory_space<vmem>>, %arg2: memref<1x36xf32, #tpu.memory_space<vmem>>, %arg3: memref<4x16x576xf32, #tpu.memory_space<vmem>>, %arg4: memref<4x16x1xf32, #tpu.memory_space<vmem>>, %arg5: memref<4x16x16xf32, #tpu.memory_space<vmem>>, %arg6: memref<4x16x1xf32, #tpu.memory_space<vmem>>, %arg7: memref<4x64x144xf32, #tpu.memory_space<vmem>>, %arg8: memref<4x64x1xf32, #tpu.memory_space<vmem>>, %arg9: memref<4x64x64xf32, #tpu.memory_space<vmem>>, %arg10: memref<32x288xf32, #tpu.memory_space<vmem>>, %arg11: memref<32x1xf32, #tpu.memory_space<vmem>>, %arg12: memref<64x288xf32, #tpu.memory_space<vmem>>, %arg13: memref<64x1xf32, #tpu.memory_space<vmem>>, %arg14: memref<1x32x36xf32, #tpu.memory_space<vmem>>, %arg15: memref<1x32x36xf32, #tpu.memory_space<vmem>>, %arg16: memref<1x1x1xf32, #tpu.memory_space<vmem>>, %arg17: memref<64x50xf32, #tpu.memory_space<vmem>>, %arg18: memref<16x50xf32, #tpu.memory_space<vmem>>, %arg19: memref<32x50xf32, #tpu.memory_space<vmem>>) attributes {dimension_semantics = [#tpu.dimension_semantics<parallel>], iteration_bounds = array<i64: 2>, scalar_prefetch = 0 : i64, scratch_operands = 3 : i64, tpu.core_type = #tpu.core_type<tc>, window_params = [{transform_indices = @transform_0, window_bounds = array<i64: 1, 64, 36>}, {pipeline_mode = #tpu.pipeline_mode<synchronous>, transform_indices = @transform_1, window_bounds = array<i64: 1, 36>}, {pipeline_mode = #tpu.pipeline_mode<synchronous>, transform_indices = @transform_2, window_bounds = array<i64: 4, 16, 576>}, {pipeline_mode = #tpu.pipeline_mode<synchronous>, transform_indices = @transform_3, window_bounds = array<i64: 4, 16, 1>}, {pipeline_mode = #tpu.pipeline_mode<synchronous>, transform_indices = @transform_4, window_bounds = array<i64: 4, 16, 16>}, {pipeline_mode = #tpu.pipeline_mode<synchronous>, transform_indices = @transform_5, window_bounds = array<i64: 4, 16, 1>}, {pipeline_mode = #tpu.pipeline_mode<synchronous>, transform_indices = @transform_6, window_bounds = array<i64: 4, 64, 144>}, {pipeline_mode = #tpu.pipeline_mode<synchronous>, transform_indices = @transform_7, window_bounds = array<i64: 4, 64, 1>}, {pipeline_mode = #tpu.pipeline_mode<synchronous>, transform_indices = @transform_8, window_bounds = array<i64: 4, 64, 64>}, {pipeline_mode = #tpu.pipeline_mode<synchronous>, transform_indices = @transform_9, window_bounds = array<i64: 32, 288>}, {pipeline_mode = #tpu.pipeline_mode<synchronous>, transform_indices = @transform_10, window_bounds = array<i64: 32, 1>}, {pipeline_mode = #tpu.pipeline_mode<synchronous>, transform_indices = @transform_11, window_bounds = array<i64: 64, 288>}, {pipeline_mode = #tpu.pipeline_mode<synchronous>, transform_indices = @transform_12, window_bounds = array<i64: 64, 1>}, {transform_indices = @transform_13, window_bounds = array<i64: 1, 32, 36>}, {transform_indices = @transform_14, window_bounds = array<i64: 1, 32, 36>}, {transform_indices = @transform_15, window_bounds = array<i64: 1, 1, 1>}]} {
    %cst = arith.constant 0.000000e+00 : f32
    %0 = vector.broadcast %cst : f32 to vector<64x50xf32>
    %c0 = arith.constant 0 : index
    %c0_0 = arith.constant 0 : index
    %1 = vector.load %arg17[%c0, %c0_0] : memref<64x50xf32, #tpu.memory_space<vmem>>, vector<64x50xf32>
    tpu.vector_store %arg17[%c0, %c0_0], %0 {strides = array<i32>} : memref<64x50xf32, #tpu.memory_space<vmem>>, vector<64x50xf32>,
    %cst_1 = arith.constant 0.000000e+00 : f32
    %2 = vector.broadcast %cst_1 : f32 to vector<16x50xf32>
    %c0_2 = arith.constant 0 : index
    %c0_3 = arith.constant 0 : index
    %3 = vector.load %arg18[%c0_2, %c0_3] : memref<16x50xf32, #tpu.memory_space<vmem>>, vector<16x50xf32>
    tpu.vector_store %arg18[%c0_2, %c0_3], %2 {strides = array<i32>} : memref<16x50xf32, #tpu.memory_space<vmem>>, vector<16x50xf32>,
    %cst_4 = arith.constant 0.000000e+00 : f32
    %4 = vector.broadcast %cst_4 : f32 to vector<32x50xf32>
    %c0_5 = arith.constant 0 : index
    %c0_6 = arith.constant 0 : index
    %5 = vector.load %arg19[%c0_5, %c0_6] : memref<32x50xf32, #tpu.memory_space<vmem>>, vector<32x50xf32>
    tpu.vector_store %arg19[%c0_5, %c0_6], %4 {strides = array<i32>} : memref<32x50xf32, #tpu.memory_space<vmem>>, vector<32x50xf32>,
    %c0_7 = arith.constant 0 : index
    %c0_8 = arith.constant 0 : index
    %c0_9 = arith.constant 0 : index
    %6 = vector.load %arg1[%c0_7, %c0_8, %c0_9] : memref<1x64x36xf32, #tpu.memory_space<vmem>>, vector<1x64x36xf32>
    %7 = vector.shape_cast %6 : vector<1x64x36xf32> to vector<64x36xf32>
    %c0_10 = arith.constant 0 : index
    %c7 = arith.constant 7 : index
    %8 = vector.load %arg17[%c0_10, %c7] : memref<64x50xf32, #tpu.memory_space<vmem>>, vector<64x36xf32>
    tpu.vector_store %arg17[%c0_10, %c7], %7 {strides = array<i32>} : memref<64x50xf32, #tpu.memory_space<vmem>>, vector<64x36xf32>,
    %c0_11 = arith.constant 0 : index
    %c0_12 = arith.constant 0 : index
    %9 = vector.load %arg2[%c0_11, %c0_12] : memref<1x36xf32, #tpu.memory_space<vmem>>, vector<1x36xf32>
    %cst_13 = arith.constant 0.000000e+00 : f32
    %10 = vector.broadcast %cst_13 : f32 to vector<1x1xf32>
    %c0_14 = arith.constant 0 : index
    %c0_15 = arith.constant 0 : index
    %c0_16 = arith.constant 0 : index
    %11 = vector.load %arg3[%c0_14, %c0_15, %c0_16] : memref<4x16x576xf32, #tpu.memory_space<vmem>>, vector<1x16x576xf32>
    %12 = vector.shape_cast %11 : vector<1x16x576xf32> to vector<16x576xf32>
    %c0_17 = arith.constant 0 : index
    %c0_18 = arith.constant 0 : index
    %c0_19 = arith.constant 0 : index
    %13 = vector.load %arg4[%c0_17, %c0_18, %c0_19] : memref<4x16x1xf32, #tpu.memory_space<vmem>>, vector<1x16x1xf32>
    %14 = vector.shape_cast %13 : vector<1x16x1xf32> to vector<16x1xf32>
    %c0_20 = arith.constant 0 : index
    %c0_21 = arith.constant 0 : index
    %c0_22 = arith.constant 0 : index
    %15 = vector.load %arg5[%c0_20, %c0_21, %c0_22] : memref<4x16x16xf32, #tpu.memory_space<vmem>>, vector<1x16x16xf32>
    %16 = vector.shape_cast %15 : vector<1x16x16xf32> to vector<16x16xf32>
    %c0_23 = arith.constant 0 : index
    %c0_24 = arith.constant 0 : index
    %c0_25 = arith.constant 0 : index
    %17 = vector.load %arg6[%c0_23, %c0_24, %c0_25] : memref<4x16x1xf32, #tpu.memory_space<vmem>>, vector<1x16x1xf32>
    %18 = vector.shape_cast %17 : vector<1x16x1xf32> to vector<16x1xf32>
    %c0_26 = arith.constant 0 : index
    %c0_27 = arith.constant 0 : index
    %c0_28 = arith.constant 0 : index
    %19 = vector.load %arg7[%c0_26, %c0_27, %c0_28] : memref<4x64x144xf32, #tpu.memory_space<vmem>>, vector<1x64x144xf32>
    %20 = vector.shape_cast %19 : vector<1x64x144xf32> to vector<64x144xf32>
    %c0_29 = arith.constant 0 : index
    %c0_30 = arith.constant 0 : index
    %c0_31 = arith.constant 0 : index
    %21 = vector.load %arg8[%c0_29, %c0_30, %c0_31] : memref<4x64x1xf32, #tpu.memory_space<vmem>>, vector<1x64x1xf32>
    %22 = vector.shape_cast %21 : vector<1x64x1xf32> to vector<64x1xf32>
    %c0_32 = arith.constant 0 : index
    %c0_33 = arith.constant 0 : index
    %c0_34 = arith.constant 0 : index
    %23 = vector.load %arg9[%c0_32, %c0_33, %c0_34] : memref<4x64x64xf32, #tpu.memory_space<vmem>>, vector<1x64x64xf32>
    %24 = vector.shape_cast %23 : vector<1x64x64xf32> to vector<64x64xf32>
    %c0_35 = arith.constant 0 : index
    %c0_36 = arith.constant 0 : index
    %25 = vector.load %arg17[%c0_35, %c0_36] : memref<64x50xf32, #tpu.memory_space<vmem>>, vector<64x36xf32>
    %c0_37 = arith.constant 0 : index
    %c1 = arith.constant 1 : index
    %26 = vector.load %arg17[%c0_37, %c1] : memref<64x50xf32, #tpu.memory_space<vmem>>, vector<64x36xf32>
    %c0_38 = arith.constant 0 : index
    %c2 = arith.constant 2 : index
    %27 = vector.load %arg17[%c0_38, %c2] : memref<64x50xf32, #tpu.memory_space<vmem>>, vector<64x36xf32>
    %c0_39 = arith.constant 0 : index
    %c6 = arith.constant 6 : index
    %28 = vector.load %arg17[%c0_39, %c6] : memref<64x50xf32, #tpu.memory_space<vmem>>, vector<64x36xf32>
    %c0_40 = arith.constant 0 : index
    %c7_41 = arith.constant 7 : index
    %29 = vector.load %arg17[%c0_40, %c7_41] : memref<64x50xf32, #tpu.memory_space<vmem>>, vector<64x36xf32>
    %c0_42 = arith.constant 0 : index
    %c8 = arith.constant 8 : index
    %30 = vector.load %arg17[%c0_42, %c8] : memref<64x50xf32, #tpu.memory_space<vmem>>, vector<64x36xf32>
    %c0_43 = arith.constant 0 : index
    %c12 = arith.constant 12 : index
    %31 = vector.load %arg17[%c0_43, %c12] : memref<64x50xf32, #tpu.memory_space<vmem>>, vector<64x36xf32>
    %c0_44 = arith.constant 0 : index
    %c13 = arith.constant 13 : index
    %32 = vector.load %arg17[%c0_44, %c13] : memref<64x50xf32, #tpu.memory_space<vmem>>, vector<64x36xf32>
    %c0_45 = arith.constant 0 : index
    %c14 = arith.constant 14 : index
    %33 = vector.load %arg17[%c0_45, %c14] : memref<64x50xf32, #tpu.memory_space<vmem>>, vector<64x36xf32>
    %34 = tpu.concatenate %25, %26, %27, %28, %29, %30, %31, %32, %33 in 0 : vector<64x36xf32>, vector<64x36xf32>, vector<64x36xf32>, vector<64x36xf32>, vector<64x36xf32>, vector<64x36xf32>, vector<64x36xf32>, vector<64x36xf32>, vector<64x36xf32> -> vector<576x36xf32>
    %cst_46 = arith.constant dense<0.000000e+00> : vector<16x36xf32>
    %35 = tpu.matmul %12, %34, %cst_46 {dimension_numbers = #tpu.dot_dimension_numbers<[1], [0], [0], [1], [0, 0, 1, 1], [], []>} : vector<16x576xf32>, vector<576x36xf32>, vector<16x36xf32> -> vector<16x36xf32>
    %36 = vector.broadcast %14 : vector<16x1xf32> to vector<16x36xf32>
    %37 = arith.addf %35, %36 : vector<16x36xf32>
    %cst_47 = arith.constant 0.000000e+00 : f32
    %38 = vector.broadcast %cst_47 : f32 to vector<16x36xf32>
    %39 = arith.maximumf %37, %38 : vector<16x36xf32>
    %cst_48 = arith.constant dense<0.000000e+00> : vector<16x36xf32>
    %40 = tpu.matmul %16, %39, %cst_48 {dimension_numbers = #tpu.dot_dimension_numbers<[1], [0], [0], [1], [0, 0, 1, 1], [], []>} : vector<16x16xf32>, vector<16x36xf32>, vector<16x36xf32> -> vector<16x36xf32>
    %41 = vector.broadcast %18 : vector<16x1xf32> to vector<16x36xf32>
    %42 = arith.addf %40, %41 : vector<16x36xf32>
    %cst_49 = arith.constant 0.000000e+00 : f32
    %43 = vector.broadcast %cst_49 : f32 to vector<16x36xf32>
    %44 = arith.maximumf %42, %43 : vector<16x36xf32>
    %45 = vector.broadcast %9 : vector<1x36xf32> to vector<16x36xf32>
    %46 = arith.mulf %44, %45 : vector<16x36xf32>
    %c0_50 = arith.constant 0 : index
    %c7_51 = arith.constant 7 : index
    %47 = vector.load %arg18[%c0_50, %c7_51] : memref<16x50xf32, #tpu.memory_space<vmem>>, vector<16x36xf32>
    tpu.vector_store %arg18[%c0_50, %c7_51], %46 {strides = array<i32>} : memref<16x50xf32, #tpu.memory_space<vmem>>, vector<16x36xf32>,
    %c0_52 = arith.constant 0 : index
    %c0_53 = arith.constant 0 : index
    %48 = vector.load %arg18[%c0_52, %c0_53] : memref<16x50xf32, #tpu.memory_space<vmem>>, vector<16x36xf32>
    %c0_54 = arith.constant 0 : index
    %c1_55 = arith.constant 1 : index
    %49 = vector.load %arg18[%c0_54, %c1_55] : memref<16x50xf32, #tpu.memory_space<vmem>>, vector<16x36xf32>
    %c0_56 = arith.constant 0 : index
    %c2_57 = arith.constant 2 : index
    %50 = vector.load %arg18[%c0_56, %c2_57] : memref<16x50xf32, #tpu.memory_space<vmem>>, vector<16x36xf32>
    %c0_58 = arith.constant 0 : index
    %c6_59 = arith.constant 6 : index
    %51 = vector.load %arg18[%c0_58, %c6_59] : memref<16x50xf32, #tpu.memory_space<vmem>>, vector<16x36xf32>
    %c0_60 = arith.constant 0 : index
    %c7_61 = arith.constant 7 : index
    %52 = vector.load %arg18[%c0_60, %c7_61] : memref<16x50xf32, #tpu.memory_space<vmem>>, vector<16x36xf32>
    %c0_62 = arith.constant 0 : index
    %c8_63 = arith.constant 8 : index
    %53 = vector.load %arg18[%c0_62, %c8_63] : memref<16x50xf32, #tpu.memory_space<vmem>>, vector<16x36xf32>
    %c0_64 = arith.constant 0 : index
    %c12_65 = arith.constant 12 : index
    %54 = vector.load %arg18[%c0_64, %c12_65] : memref<16x50xf32, #tpu.memory_space<vmem>>, vector<16x36xf32>
    %c0_66 = arith.constant 0 : index
    %c13_67 = arith.constant 13 : index
    %55 = vector.load %arg18[%c0_66, %c13_67] : memref<16x50xf32, #tpu.memory_space<vmem>>, vector<16x36xf32>
    %c0_68 = arith.constant 0 : index
    %c14_69 = arith.constant 14 : index
    %56 = vector.load %arg18[%c0_68, %c14_69] : memref<16x50xf32, #tpu.memory_space<vmem>>, vector<16x36xf32>
    %57 = tpu.concatenate %48, %49, %50, %51, %52, %53, %54, %55, %56 in 0 : vector<16x36xf32>, vector<16x36xf32>, vector<16x36xf32>, vector<16x36xf32>, vector<16x36xf32>, vector<16x36xf32>, vector<16x36xf32>, vector<16x36xf32>, vector<16x36xf32> -> vector<144x36xf32>
    %cst_70 = arith.constant dense<0.000000e+00> : vector<64x36xf32>
    %58 = tpu.matmul %20, %57, %cst_70 {dimension_numbers = #tpu.dot_dimension_numbers<[1], [0], [0], [1], [0, 0, 1, 1], [], []>} : vector<64x144xf32>, vector<144x36xf32>, vector<64x36xf32> -> vector<64x36xf32>
    %59 = vector.broadcast %22 : vector<64x1xf32> to vector<64x36xf32>
    %60 = arith.addf %58, %59 : vector<64x36xf32>
    %61 = vector.extract_strided_slice %60 {offsets = [0, 0], sizes = [32, 36], strides = [1, 1]} : vector<64x36xf32> to vector<32x36xf32>
    %62 = vector.extract_strided_slice %60 {offsets = [32, 0], sizes = [32, 36], strides = [1, 1]} : vector<64x36xf32> to vector<32x36xf32>
    %cst_71 = arith.constant 2.000000e+00 : f32
    %63 = vector.broadcast %cst_71 : f32 to vector<32x36xf32>
    %64 = arith.addf %62, %63 : vector<32x36xf32>
    %65 = arith.negf %64 : vector<32x36xf32>
    %66 = math.exp %65 : vector<32x36xf32>
    %cst_72 = arith.constant 1.000000e+00 : f32
    %67 = vector.broadcast %cst_72 : f32 to vector<32x36xf32>
    %68 = arith.addf %67, %66 : vector<32x36xf32>
    %69 = arith.divf %67, %68 : vector<32x36xf32>
    %70 = math.log %69 : vector<32x36xf32>
    %c0_73 = arith.constant 0 : index
    %c7_74 = arith.constant 7 : index
    %71 = vector.load %arg17[%c0_73, %c7_74] : memref<64x50xf32, #tpu.memory_space<vmem>>, vector<64x36xf32>
    %cst_75 = arith.constant dense<0.000000e+00> : vector<64x36xf32>
    %72 = tpu.matmul %24, %71, %cst_75 {dimension_numbers = #tpu.dot_dimension_numbers<[1], [0], [0], [1], [0, 0, 1, 1], [], []>} : vector<64x64xf32>, vector<64x36xf32>, vector<64x36xf32> -> vector<64x36xf32>
    %73 = vector.extract_strided_slice %72 {offsets = [0, 0], sizes = [32, 36], strides = [1, 1]} : vector<64x36xf32> to vector<32x36xf32>
    %74 = vector.extract_strided_slice %72 {offsets = [32, 0], sizes = [32, 36], strides = [1, 1]} : vector<64x36xf32> to vector<32x36xf32>
    %75 = arith.addf %74, %61 : vector<32x36xf32>
    %76 = arith.mulf %75, %69 : vector<32x36xf32>
    %77 = tpu.concatenate %73, %76 in 0 : vector<32x36xf32>, vector<32x36xf32> -> vector<64x36xf32>
    %78 = vector.broadcast %9 : vector<1x36xf32> to vector<64x36xf32>
    %79 = arith.mulf %77, %78 : vector<64x36xf32>
    %c0_76 = arith.constant 0 : index
    %c7_77 = arith.constant 7 : index
    %80 = vector.load %arg17[%c0_76, %c7_77] : memref<64x50xf32, #tpu.memory_space<vmem>>, vector<64x36xf32>
    tpu.vector_store %arg17[%c0_76, %c7_77], %79 {strides = array<i32>} : memref<64x50xf32, #tpu.memory_space<vmem>>, vector<64x36xf32>,
    %81 = vector.broadcast %9 : vector<1x36xf32> to vector<32x36xf32>
    %82 = arith.mulf %70, %81 : vector<32x36xf32>
    %cst_78 = arith.constant dense<0.000000e+00> : vector<32xf32>
    %83 = vector.multi_reduction <add>, %82, %cst_78 [1] : vector<32x36xf32> to vector<32xf32>
    %84 = vector.shape_cast %83 : vector<32xf32> to vector<32x1xf32>
    %cst_79 = arith.constant dense<0.000000e+00> : vector<1xf32>
    %85 = vector.multi_reduction <add>, %84, %cst_79 [0] : vector<32x1xf32> to vector<1xf32>
    %86 = vector.shape_cast %85 : vector<1xf32> to vector<1x1xf32>
    %87 = arith.addf %10, %86 : vector<1x1xf32>
    %c1_80 = arith.constant 1 : index
    %c0_81 = arith.constant 0 : index
    %c0_82 = arith.constant 0 : index
    %88 = vector.load %arg3[%c1_80, %c0_81, %c0_82] : memref<4x16x576xf32, #tpu.memory_space<vmem>>, vector<1x16x576xf32>
    %89 = vector.shape_cast %88 : vector<1x16x576xf32> to vector<16x576xf32>
    %c1_83 = arith.constant 1 : index
    %c0_84 = arith.constant 0 : index
    %c0_85 = arith.constant 0 : index
    %90 = vector.load %arg4[%c1_83, %c0_84, %c0_85] : memref<4x16x1xf32, #tpu.memory_space<vmem>>, vector<1x16x1xf32>
    %91 = vector.shape_cast %90 : vector<1x16x1xf32> to vector<16x1xf32>
    %c1_86 = arith.constant 1 : index
    %c0_87 = arith.constant 0 : index
    %c0_88 = arith.constant 0 : index
    %92 = vector.load %arg5[%c1_86, %c0_87, %c0_88] : memref<4x16x16xf32, #tpu.memory_space<vmem>>, vector<1x16x16xf32>
    %93 = vector.shape_cast %92 : vector<1x16x16xf32> to vector<16x16xf32>
    %c1_89 = arith.constant 1 : index
    %c0_90 = arith.constant 0 : index
    %c0_91 = arith.constant 0 : index
    %94 = vector.load %arg6[%c1_89, %c0_90, %c0_91] : memref<4x16x1xf32, #tpu.memory_space<vmem>>, vector<1x16x1xf32>
    %95 = vector.shape_cast %94 : vector<1x16x1xf32> to vector<16x1xf32>
    %c1_92 = arith.constant 1 : index
    %c0_93 = arith.constant 0 : index
    %c0_94 = arith.constant 0 : index
    %96 = vector.load %arg7[%c1_92, %c0_93, %c0_94] : memref<4x64x144xf32, #tpu.memory_space<vmem>>, vector<1x64x144xf32>
    %97 = vector.shape_cast %96 : vector<1x64x144xf32> to vector<64x144xf32>
    %c1_95 = arith.constant 1 : index
    %c0_96 = arith.constant 0 : index
    %c0_97 = arith.constant 0 : index
    %98 = vector.load %arg8[%c1_95, %c0_96, %c0_97] : memref<4x64x1xf32, #tpu.memory_space<vmem>>, vector<1x64x1xf32>
    %99 = vector.shape_cast %98 : vector<1x64x1xf32> to vector<64x1xf32>
    %c1_98 = arith.constant 1 : index
    %c0_99 = arith.constant 0 : index
    %c0_100 = arith.constant 0 : index
    %100 = vector.load %arg9[%c1_98, %c0_99, %c0_100] : memref<4x64x64xf32, #tpu.memory_space<vmem>>, vector<1x64x64xf32>
    %101 = vector.shape_cast %100 : vector<1x64x64xf32> to vector<64x64xf32>
    %c0_101 = arith.constant 0 : index
    %c0_102 = arith.constant 0 : index
    %102 = vector.load %arg17[%c0_101, %c0_102] : memref<64x50xf32, #tpu.memory_space<vmem>>, vector<64x36xf32>
    %c0_103 = arith.constant 0 : index
    %c1_104 = arith.constant 1 : index
    %103 = vector.load %arg17[%c0_103, %c1_104] : memref<64x50xf32, #tpu.memory_space<vmem>>, vector<64x36xf32>
    %c0_105 = arith.constant 0 : index
    %c2_106 = arith.constant 2 : index
    %104 = vector.load %arg17[%c0_105, %c2_106] : memref<64x50xf32, #tpu.memory_space<vmem>>, vector<64x36xf32>
    %c0_107 = arith.constant 0 : index
    %c6_108 = arith.constant 6 : index
    %105 = vector.load %arg17[%c0_107, %c6_108] : memref<64x50xf32, #tpu.memory_space<vmem>>, vector<64x36xf32>
    %c0_109 = arith.constant 0 : index
    %c7_110 = arith.constant 7 : index
    %106 = vector.load %arg17[%c0_109, %c7_110] : memref<64x50xf32, #tpu.memory_space<vmem>>, vector<64x36xf32>
    %c0_111 = arith.constant 0 : index
    %c8_112 = arith.constant 8 : index
    %107 = vector.load %arg17[%c0_111, %c8_112] : memref<64x50xf32, #tpu.memory_space<vmem>>, vector<64x36xf32>
    %c0_113 = arith.constant 0 : index
    %c12_114 = arith.constant 12 : index
    %108 = vector.load %arg17[%c0_113, %c12_114] : memref<64x50xf32, #tpu.memory_space<vmem>>, vector<64x36xf32>
    %c0_115 = arith.constant 0 : index
    %c13_116 = arith.constant 13 : index
    %109 = vector.load %arg17[%c0_115, %c13_116] : memref<64x50xf32, #tpu.memory_space<vmem>>, vector<64x36xf32>
    %c0_117 = arith.constant 0 : index
    %c14_118 = arith.constant 14 : index
    %110 = vector.load %arg17[%c0_117, %c14_118] : memref<64x50xf32, #tpu.memory_space<vmem>>, vector<64x36xf32>
    %111 = tpu.concatenate %102, %103, %104, %105, %106, %107, %108, %109, %110 in 0 : vector<64x36xf32>, vector<64x36xf32>, vector<64x36xf32>, vector<64x36xf32>, vector<64x36xf32>, vector<64x36xf32>, vector<64x36xf32>, vector<64x36xf32>, vector<64x36xf32> -> vector<576x36xf32>
    %cst_119 = arith.constant dense<0.000000e+00> : vector<16x36xf32>
    %112 = tpu.matmul %89, %111, %cst_119 {dimension_numbers = #tpu.dot_dimension_numbers<[1], [0], [0], [1], [0, 0, 1, 1], [], []>} : vector<16x576xf32>, vector<576x36xf32>, vector<16x36xf32> -> vector<16x36xf32>
    %113 = vector.broadcast %91 : vector<16x1xf32> to vector<16x36xf32>
    %114 = arith.addf %112, %113 : vector<16x36xf32>
    %cst_120 = arith.constant 0.000000e+00 : f32
    %115 = vector.broadcast %cst_120 : f32 to vector<16x36xf32>
    %116 = arith.maximumf %114, %115 : vector<16x36xf32>
    %cst_121 = arith.constant dense<0.000000e+00> : vector<16x36xf32>
    %117 = tpu.matmul %93, %116, %cst_121 {dimension_numbers = #tpu.dot_dimension_numbers<[1], [0], [0], [1], [0, 0, 1, 1], [], []>} : vector<16x16xf32>, vector<16x36xf32>, vector<16x36xf32> -> vector<16x36xf32>
    %118 = vector.broadcast %95 : vector<16x1xf32> to vector<16x36xf32>
    %119 = arith.addf %117, %118 : vector<16x36xf32>
    %cst_122 = arith.constant 0.000000e+00 : f32
    %120 = vector.broadcast %cst_122 : f32 to vector<16x36xf32>
    %121 = arith.maximumf %119, %120 : vector<16x36xf32>
    %122 = vector.broadcast %9 : vector<1x36xf32> to vector<16x36xf32>
    %123 = arith.mulf %121, %122 : vector<16x36xf32>
    %c0_123 = arith.constant 0 : index
    %c7_124 = arith.constant 7 : index
    %124 = vector.load %arg18[%c0_123, %c7_124] : memref<16x50xf32, #tpu.memory_space<vmem>>, vector<16x36xf32>
    tpu.vector_store %arg18[%c0_123, %c7_124], %123 {strides = array<i32>} : memref<16x50xf32, #tpu.memory_space<vmem>>, vector<16x36xf32>,
    %c0_125 = arith.constant 0 : index
    %c0_126 = arith.constant 0 : index
    %125 = vector.load %arg18[%c0_125, %c0_126] : memref<16x50xf32, #tpu.memory_space<vmem>>, vector<16x36xf32>
    %c0_127 = arith.constant 0 : index
    %c1_128 = arith.constant 1 : index
    %126 = vector.load %arg18[%c0_127, %c1_128] : memref<16x50xf32, #tpu.memory_space<vmem>>, vector<16x36xf32>
    %c0_129 = arith.constant 0 : index
    %c2_130 = arith.constant 2 : index
    %127 = vector.load %arg18[%c0_129, %c2_130] : memref<16x50xf32, #tpu.memory_space<vmem>>, vector<16x36xf32>
    %c0_131 = arith.constant 0 : index
    %c6_132 = arith.constant 6 : index
    %128 = vector.load %arg18[%c0_131, %c6_132] : memref<16x50xf32, #tpu.memory_space<vmem>>, vector<16x36xf32>
    %c0_133 = arith.constant 0 : index
    %c7_134 = arith.constant 7 : index
    %129 = vector.load %arg18[%c0_133, %c7_134] : memref<16x50xf32, #tpu.memory_space<vmem>>, vector<16x36xf32>
    %c0_135 = arith.constant 0 : index
    %c8_136 = arith.constant 8 : index
    %130 = vector.load %arg18[%c0_135, %c8_136] : memref<16x50xf32, #tpu.memory_space<vmem>>, vector<16x36xf32>
    %c0_137 = arith.constant 0 : index
    %c12_138 = arith.constant 12 : index
    %131 = vector.load %arg18[%c0_137, %c12_138] : memref<16x50xf32, #tpu.memory_space<vmem>>, vector<16x36xf32>
    %c0_139 = arith.constant 0 : index
    %c13_140 = arith.constant 13 : index
    %132 = vector.load %arg18[%c0_139, %c13_140] : memref<16x50xf32, #tpu.memory_space<vmem>>, vector<16x36xf32>
    %c0_141 = arith.constant 0 : index
    %c14_142 = arith.constant 14 : index
    %133 = vector.load %arg18[%c0_141, %c14_142] : memref<16x50xf32, #tpu.memory_space<vmem>>, vector<16x36xf32>
    %134 = tpu.concatenate %125, %126, %127, %128, %129, %130, %131, %132, %133 in 0 : vector<16x36xf32>, vector<16x36xf32>, vector<16x36xf32>, vector<16x36xf32>, vector<16x36xf32>, vector<16x36xf32>, vector<16x36xf32>, vector<16x36xf32>, vector<16x36xf32> -> vector<144x36xf32>
    %cst_143 = arith.constant dense<0.000000e+00> : vector<64x36xf32>
    %135 = tpu.matmul %97, %134, %cst_143 {dimension_numbers = #tpu.dot_dimension_numbers<[1], [0], [0], [1], [0, 0, 1, 1], [], []>} : vector<64x144xf32>, vector<144x36xf32>, vector<64x36xf32> -> vector<64x36xf32>
    %136 = vector.broadcast %99 : vector<64x1xf32> to vector<64x36xf32>
    %137 = arith.addf %135, %136 : vector<64x36xf32>
    %138 = vector.extract_strided_slice %137 {offsets = [0, 0], sizes = [32, 36], strides = [1, 1]} : vector<64x36xf32> to vector<32x36xf32>
    %139 = vector.extract_strided_slice %137 {offsets = [32, 0], sizes = [32, 36], strides = [1, 1]} : vector<64x36xf32> to vector<32x36xf32>
    %cst_144 = arith.constant 2.000000e+00 : f32
    %140 = vector.broadcast %cst_144 : f32 to vector<32x36xf32>
    %141 = arith.addf %139, %140 : vector<32x36xf32>
    %142 = arith.negf %141 : vector<32x36xf32>
    %143 = math.exp %142 : vector<32x36xf32>
    %cst_145 = arith.constant 1.000000e+00 : f32
    %144 = vector.broadcast %cst_145 : f32 to vector<32x36xf32>
    %145 = arith.addf %144, %143 : vector<32x36xf32>
    %146 = arith.divf %144, %145 : vector<32x36xf32>
    %147 = math.log %146 : vector<32x36xf32>
    %c0_146 = arith.constant 0 : index
    %c7_147 = arith.constant 7 : index
    %148 = vector.load %arg17[%c0_146, %c7_147] : memref<64x50xf32, #tpu.memory_space<vmem>>, vector<64x36xf32>
    %cst_148 = arith.constant dense<0.000000e+00> : vector<64x36xf32>
    %149 = tpu.matmul %101, %148, %cst_148 {dimension_numbers = #tpu.dot_dimension_numbers<[1], [0], [0], [1], [0, 0, 1, 1], [], []>} : vector<64x64xf32>, vector<64x36xf32>, vector<64x36xf32> -> vector<64x36xf32>
    %150 = vector.extract_strided_slice %149 {offsets = [0, 0], sizes = [32, 36], strides = [1, 1]} : vector<64x36xf32> to vector<32x36xf32>
    %151 = vector.extract_strided_slice %149 {offsets = [32, 0], sizes = [32, 36], strides = [1, 1]} : vector<64x36xf32> to vector<32x36xf32>
    %152 = arith.addf %151, %138 : vector<32x36xf32>
    %153 = arith.mulf %152, %146 : vector<32x36xf32>
    %154 = tpu.concatenate %150, %153 in 0 : vector<32x36xf32>, vector<32x36xf32> -> vector<64x36xf32>
    %155 = vector.broadcast %9 : vector<1x36xf32> to vector<64x36xf32>
    %156 = arith.mulf %154, %155 : vector<64x36xf32>
    %c0_149 = arith.constant 0 : index
    %c7_150 = arith.constant 7 : index
    %157 = vector.load %arg17[%c0_149, %c7_150] : memref<64x50xf32, #tpu.memory_space<vmem>>, vector<64x36xf32>
    tpu.vector_store %arg17[%c0_149, %c7_150], %156 {strides = array<i32>} : memref<64x50xf32, #tpu.memory_space<vmem>>, vector<64x36xf32>,
    %158 = vector.broadcast %9 : vector<1x36xf32> to vector<32x36xf32>
    %159 = arith.mulf %147, %158 : vector<32x36xf32>
    %cst_151 = arith.constant dense<0.000000e+00> : vector<32xf32>
    %160 = vector.multi_reduction <add>, %159, %cst_151 [1] : vector<32x36xf32> to vector<32xf32>
    %161 = vector.shape_cast %160 : vector<32xf32> to vector<32x1xf32>
    %cst_152 = arith.constant dense<0.000000e+00> : vector<1xf32>
    %162 = vector.multi_reduction <add>, %161, %cst_152 [0] : vector<32x1xf32> to vector<1xf32>
    %163 = vector.shape_cast %162 : vector<1xf32> to vector<1x1xf32>
    %164 = arith.addf %87, %163 : vector<1x1xf32>
    %c2_153 = arith.constant 2 : index
    %c0_154 = arith.constant 0 : index
    %c0_155 = arith.constant 0 : index
    %165 = vector.load %arg3[%c2_153, %c0_154, %c0_155] : memref<4x16x576xf32, #tpu.memory_space<vmem>>, vector<1x16x576xf32>
    %166 = vector.shape_cast %165 : vector<1x16x576xf32> to vector<16x576xf32>
    %c2_156 = arith.constant 2 : index
    %c0_157 = arith.constant 0 : index
    %c0_158 = arith.constant 0 : index
    %167 = vector.load %arg4[%c2_156, %c0_157, %c0_158] : memref<4x16x1xf32, #tpu.memory_space<vmem>>, vector<1x16x1xf32>
    %168 = vector.shape_cast %167 : vector<1x16x1xf32> to vector<16x1xf32>
    %c2_159 = arith.constant 2 : index
    %c0_160 = arith.constant 0 : index
    %c0_161 = arith.constant 0 : index
    %169 = vector.load %arg5[%c2_159, %c0_160, %c0_161] : memref<4x16x16xf32, #tpu.memory_space<vmem>>, vector<1x16x16xf32>
    %170 = vector.shape_cast %169 : vector<1x16x16xf32> to vector<16x16xf32>
    %c2_162 = arith.constant 2 : index
    %c0_163 = arith.constant 0 : index
    %c0_164 = arith.constant 0 : index
    %171 = vector.load %arg6[%c2_162, %c0_163, %c0_164] : memref<4x16x1xf32, #tpu.memory_space<vmem>>, vector<1x16x1xf32>
    %172 = vector.shape_cast %171 : vector<1x16x1xf32> to vector<16x1xf32>
    %c2_165 = arith.constant 2 : index
    %c0_166 = arith.constant 0 : index
    %c0_167 = arith.constant 0 : index
    %173 = vector.load %arg7[%c2_165, %c0_166, %c0_167] : memref<4x64x144xf32, #tpu.memory_space<vmem>>, vector<1x64x144xf32>
    %174 = vector.shape_cast %173 : vector<1x64x144xf32> to vector<64x144xf32>
    %c2_168 = arith.constant 2 : index
    %c0_169 = arith.constant 0 : index
    %c0_170 = arith.constant 0 : index
    %175 = vector.load %arg8[%c2_168, %c0_169, %c0_170] : memref<4x64x1xf32, #tpu.memory_space<vmem>>, vector<1x64x1xf32>
    %176 = vector.shape_cast %175 : vector<1x64x1xf32> to vector<64x1xf32>
    %c2_171 = arith.constant 2 : index
    %c0_172 = arith.constant 0 : index
    %c0_173 = arith.constant 0 : index
    %177 = vector.load %arg9[%c2_171, %c0_172, %c0_173] : memref<4x64x64xf32, #tpu.memory_space<vmem>>, vector<1x64x64xf32>
    %178 = vector.shape_cast %177 : vector<1x64x64xf32> to vector<64x64xf32>
    %c0_174 = arith.constant 0 : index
    %c0_175 = arith.constant 0 : index
    %179 = vector.load %arg17[%c0_174, %c0_175] : memref<64x50xf32, #tpu.memory_space<vmem>>, vector<64x36xf32>
    %c0_176 = arith.constant 0 : index
    %c1_177 = arith.constant 1 : index
    %180 = vector.load %arg17[%c0_176, %c1_177] : memref<64x50xf32, #tpu.memory_space<vmem>>, vector<64x36xf32>
    %c0_178 = arith.constant 0 : index
    %c2_179 = arith.constant 2 : index
    %181 = vector.load %arg17[%c0_178, %c2_179] : memref<64x50xf32, #tpu.memory_space<vmem>>, vector<64x36xf32>
    %c0_180 = arith.constant 0 : index
    %c6_181 = arith.constant 6 : index
    %182 = vector.load %arg17[%c0_180, %c6_181] : memref<64x50xf32, #tpu.memory_space<vmem>>, vector<64x36xf32>
    %c0_182 = arith.constant 0 : index
    %c7_183 = arith.constant 7 : index
    %183 = vector.load %arg17[%c0_182, %c7_183] : memref<64x50xf32, #tpu.memory_space<vmem>>, vector<64x36xf32>
    %c0_184 = arith.constant 0 : index
    %c8_185 = arith.constant 8 : index
    %184 = vector.load %arg17[%c0_184, %c8_185] : memref<64x50xf32, #tpu.memory_space<vmem>>, vector<64x36xf32>
    %c0_186 = arith.constant 0 : index
    %c12_187 = arith.constant 12 : index
    %185 = vector.load %arg17[%c0_186, %c12_187] : memref<64x50xf32, #tpu.memory_space<vmem>>, vector<64x36xf32>
    %c0_188 = arith.constant 0 : index
    %c13_189 = arith.constant 13 : index
    %186 = vector.load %arg17[%c0_188, %c13_189] : memref<64x50xf32, #tpu.memory_space<vmem>>, vector<64x36xf32>
    %c0_190 = arith.constant 0 : index
    %c14_191 = arith.constant 14 : index
    %187 = vector.load %arg17[%c0_190, %c14_191] : memref<64x50xf32, #tpu.memory_space<vmem>>, vector<64x36xf32>
    %188 = tpu.concatenate %179, %180, %181, %182, %183, %184, %185, %186, %187 in 0 : vector<64x36xf32>, vector<64x36xf32>, vector<64x36xf32>, vector<64x36xf32>, vector<64x36xf32>, vector<64x36xf32>, vector<64x36xf32>, vector<64x36xf32>, vector<64x36xf32> -> vector<576x36xf32>
    %cst_192 = arith.constant dense<0.000000e+00> : vector<16x36xf32>
    %189 = tpu.matmul %166, %188, %cst_192 {dimension_numbers = #tpu.dot_dimension_numbers<[1], [0], [0], [1], [0, 0, 1, 1], [], []>} : vector<16x576xf32>, vector<576x36xf32>, vector<16x36xf32> -> vector<16x36xf32>
    %190 = vector.broadcast %168 : vector<16x1xf32> to vector<16x36xf32>
    %191 = arith.addf %189, %190 : vector<16x36xf32>
    %cst_193 = arith.constant 0.000000e+00 : f32
    %192 = vector.broadcast %cst_193 : f32 to vector<16x36xf32>
    %193 = arith.maximumf %191, %192 : vector<16x36xf32>
    %cst_194 = arith.constant dense<0.000000e+00> : vector<16x36xf32>
    %194 = tpu.matmul %170, %193, %cst_194 {dimension_numbers = #tpu.dot_dimension_numbers<[1], [0], [0], [1], [0, 0, 1, 1], [], []>} : vector<16x16xf32>, vector<16x36xf32>, vector<16x36xf32> -> vector<16x36xf32>
    %195 = vector.broadcast %172 : vector<16x1xf32> to vector<16x36xf32>
    %196 = arith.addf %194, %195 : vector<16x36xf32>
    %cst_195 = arith.constant 0.000000e+00 : f32
    %197 = vector.broadcast %cst_195 : f32 to vector<16x36xf32>
    %198 = arith.maximumf %196, %197 : vector<16x36xf32>
    %199 = vector.broadcast %9 : vector<1x36xf32> to vector<16x36xf32>
    %200 = arith.mulf %198, %199 : vector<16x36xf32>
    %c0_196 = arith.constant 0 : index
    %c7_197 = arith.constant 7 : index
    %201 = vector.load %arg18[%c0_196, %c7_197] : memref<16x50xf32, #tpu.memory_space<vmem>>, vector<16x36xf32>
    tpu.vector_store %arg18[%c0_196, %c7_197], %200 {strides = array<i32>} : memref<16x50xf32, #tpu.memory_space<vmem>>, vector<16x36xf32>,
    %c0_198 = arith.constant 0 : index
    %c0_199 = arith.constant 0 : index
    %202 = vector.load %arg18[%c0_198, %c0_199] : memref<16x50xf32, #tpu.memory_space<vmem>>, vector<16x36xf32>
    %c0_200 = arith.constant 0 : index
    %c1_201 = arith.constant 1 : index
    %203 = vector.load %arg18[%c0_200, %c1_201] : memref<16x50xf32, #tpu.memory_space<vmem>>, vector<16x36xf32>
    %c0_202 = arith.constant 0 : index
    %c2_203 = arith.constant 2 : index
    %204 = vector.load %arg18[%c0_202, %c2_203] : memref<16x50xf32, #tpu.memory_space<vmem>>, vector<16x36xf32>
    %c0_204 = arith.constant 0 : index
    %c6_205 = arith.constant 6 : index
    %205 = vector.load %arg18[%c0_204, %c6_205] : memref<16x50xf32, #tpu.memory_space<vmem>>, vector<16x36xf32>
    %c0_206 = arith.constant 0 : index
    %c7_207 = arith.constant 7 : index
    %206 = vector.load %arg18[%c0_206, %c7_207] : memref<16x50xf32, #tpu.memory_space<vmem>>, vector<16x36xf32>
    %c0_208 = arith.constant 0 : index
    %c8_209 = arith.constant 8 : index
    %207 = vector.load %arg18[%c0_208, %c8_209] : memref<16x50xf32, #tpu.memory_space<vmem>>, vector<16x36xf32>
    %c0_210 = arith.constant 0 : index
    %c12_211 = arith.constant 12 : index
    %208 = vector.load %arg18[%c0_210, %c12_211] : memref<16x50xf32, #tpu.memory_space<vmem>>, vector<16x36xf32>
    %c0_212 = arith.constant 0 : index
    %c13_213 = arith.constant 13 : index
    %209 = vector.load %arg18[%c0_212, %c13_213] : memref<16x50xf32, #tpu.memory_space<vmem>>, vector<16x36xf32>
    %c0_214 = arith.constant 0 : index
    %c14_215 = arith.constant 14 : index
    %210 = vector.load %arg18[%c0_214, %c14_215] : memref<16x50xf32, #tpu.memory_space<vmem>>, vector<16x36xf32>
    %211 = tpu.concatenate %202, %203, %204, %205, %206, %207, %208, %209, %210 in 0 : vector<16x36xf32>, vector<16x36xf32>, vector<16x36xf32>, vector<16x36xf32>, vector<16x36xf32>, vector<16x36xf32>, vector<16x36xf32>, vector<16x36xf32>, vector<16x36xf32> -> vector<144x36xf32>
    %cst_216 = arith.constant dense<0.000000e+00> : vector<64x36xf32>
    %212 = tpu.matmul %174, %211, %cst_216 {dimension_numbers = #tpu.dot_dimension_numbers<[1], [0], [0], [1], [0, 0, 1, 1], [], []>} : vector<64x144xf32>, vector<144x36xf32>, vector<64x36xf32> -> vector<64x36xf32>
    %213 = vector.broadcast %176 : vector<64x1xf32> to vector<64x36xf32>
    %214 = arith.addf %212, %213 : vector<64x36xf32>
    %215 = vector.extract_strided_slice %214 {offsets = [0, 0], sizes = [32, 36], strides = [1, 1]} : vector<64x36xf32> to vector<32x36xf32>
    %216 = vector.extract_strided_slice %214 {offsets = [32, 0], sizes = [32, 36], strides = [1, 1]} : vector<64x36xf32> to vector<32x36xf32>
    %cst_217 = arith.constant 2.000000e+00 : f32
    %217 = vector.broadcast %cst_217 : f32 to vector<32x36xf32>
    %218 = arith.addf %216, %217 : vector<32x36xf32>
    %219 = arith.negf %218 : vector<32x36xf32>
    %220 = math.exp %219 : vector<32x36xf32>
    %cst_218 = arith.constant 1.000000e+00 : f32
    %221 = vector.broadcast %cst_218 : f32 to vector<32x36xf32>
    %222 = arith.addf %221, %220 : vector<32x36xf32>
    %223 = arith.divf %221, %222 : vector<32x36xf32>
    %224 = math.log %223 : vector<32x36xf32>
    %c0_219 = arith.constant 0 : index
    %c7_220 = arith.constant 7 : index
    %225 = vector.load %arg17[%c0_219, %c7_220] : memref<64x50xf32, #tpu.memory_space<vmem>>, vector<64x36xf32>
    %cst_221 = arith.constant dense<0.000000e+00> : vector<64x36xf32>
    %226 = tpu.matmul %178, %225, %cst_221 {dimension_numbers = #tpu.dot_dimension_numbers<[1], [0], [0], [1], [0, 0, 1, 1], [], []>} : vector<64x64xf32>, vector<64x36xf32>, vector<64x36xf32> -> vector<64x36xf32>
    %227 = vector.extract_strided_slice %226 {offsets = [0, 0], sizes = [32, 36], strides = [1, 1]} : vector<64x36xf32> to vector<32x36xf32>
    %228 = vector.extract_strided_slice %226 {offsets = [32, 0], sizes = [32, 36], strides = [1, 1]} : vector<64x36xf32> to vector<32x36xf32>
    %229 = arith.addf %228, %215 : vector<32x36xf32>
    %230 = arith.mulf %229, %223 : vector<32x36xf32>
    %231 = tpu.concatenate %227, %230 in 0 : vector<32x36xf32>, vector<32x36xf32> -> vector<64x36xf32>
    %232 = vector.broadcast %9 : vector<1x36xf32> to vector<64x36xf32>
    %233 = arith.mulf %231, %232 : vector<64x36xf32>
    %c0_222 = arith.constant 0 : index
    %c7_223 = arith.constant 7 : index
    %234 = vector.load %arg17[%c0_222, %c7_223] : memref<64x50xf32, #tpu.memory_space<vmem>>, vector<64x36xf32>
    tpu.vector_store %arg17[%c0_222, %c7_223], %233 {strides = array<i32>} : memref<64x50xf32, #tpu.memory_space<vmem>>, vector<64x36xf32>,
    %235 = vector.broadcast %9 : vector<1x36xf32> to vector<32x36xf32>
    %236 = arith.mulf %224, %235 : vector<32x36xf32>
    %cst_224 = arith.constant dense<0.000000e+00> : vector<32xf32>
    %237 = vector.multi_reduction <add>, %236, %cst_224 [1] : vector<32x36xf32> to vector<32xf32>
    %238 = vector.shape_cast %237 : vector<32xf32> to vector<32x1xf32>
    %cst_225 = arith.constant dense<0.000000e+00> : vector<1xf32>
    %239 = vector.multi_reduction <add>, %238, %cst_225 [0] : vector<32x1xf32> to vector<1xf32>
    %240 = vector.shape_cast %239 : vector<1xf32> to vector<1x1xf32>
    %241 = arith.addf %164, %240 : vector<1x1xf32>
    %c3 = arith.constant 3 : index
    %c0_226 = arith.constant 0 : index
    %c0_227 = arith.constant 0 : index
    %242 = vector.load %arg3[%c3, %c0_226, %c0_227] : memref<4x16x576xf32, #tpu.memory_space<vmem>>, vector<1x16x576xf32>
    %243 = vector.shape_cast %242 : vector<1x16x576xf32> to vector<16x576xf32>
    %c3_228 = arith.constant 3 : index
    %c0_229 = arith.constant 0 : index
    %c0_230 = arith.constant 0 : index
    %244 = vector.load %arg4[%c3_228, %c0_229, %c0_230] : memref<4x16x1xf32, #tpu.memory_space<vmem>>, vector<1x16x1xf32>
    %245 = vector.shape_cast %244 : vector<1x16x1xf32> to vector<16x1xf32>
    %c3_231 = arith.constant 3 : index
    %c0_232 = arith.constant 0 : index
    %c0_233 = arith.constant 0 : index
    %246 = vector.load %arg5[%c3_231, %c0_232, %c0_233] : memref<4x16x16xf32, #tpu.memory_space<vmem>>, vector<1x16x16xf32>
    %247 = vector.shape_cast %246 : vector<1x16x16xf32> to vector<16x16xf32>
    %c3_234 = arith.constant 3 : index
    %c0_235 = arith.constant 0 : index
    %c0_236 = arith.constant 0 : index
    %248 = vector.load %arg6[%c3_234, %c0_235, %c0_236] : memref<4x16x1xf32, #tpu.memory_space<vmem>>, vector<1x16x1xf32>
    %249 = vector.shape_cast %248 : vector<1x16x1xf32> to vector<16x1xf32>
    %c3_237 = arith.constant 3 : index
    %c0_238 = arith.constant 0 : index
    %c0_239 = arith.constant 0 : index
    %250 = vector.load %arg7[%c3_237, %c0_238, %c0_239] : memref<4x64x144xf32, #tpu.memory_space<vmem>>, vector<1x64x144xf32>
    %251 = vector.shape_cast %250 : vector<1x64x144xf32> to vector<64x144xf32>
    %c3_240 = arith.constant 3 : index
    %c0_241 = arith.constant 0 : index
    %c0_242 = arith.constant 0 : index
    %252 = vector.load %arg8[%c3_240, %c0_241, %c0_242] : memref<4x64x1xf32, #tpu.memory_space<vmem>>, vector<1x64x1xf32>
    %253 = vector.shape_cast %252 : vector<1x64x1xf32> to vector<64x1xf32>
    %c3_243 = arith.constant 3 : index
    %c0_244 = arith.constant 0 : index
    %c0_245 = arith.constant 0 : index
    %254 = vector.load %arg9[%c3_243, %c0_244, %c0_245] : memref<4x64x64xf32, #tpu.memory_space<vmem>>, vector<1x64x64xf32>
    %255 = vector.shape_cast %254 : vector<1x64x64xf32> to vector<64x64xf32>
    %c0_246 = arith.constant 0 : index
    %c0_247 = arith.constant 0 : index
    %256 = vector.load %arg17[%c0_246, %c0_247] : memref<64x50xf32, #tpu.memory_space<vmem>>, vector<64x36xf32>
    %c0_248 = arith.constant 0 : index
    %c1_249 = arith.constant 1 : index
    %257 = vector.load %arg17[%c0_248, %c1_249] : memref<64x50xf32, #tpu.memory_space<vmem>>, vector<64x36xf32>
    %c0_250 = arith.constant 0 : index
    %c2_251 = arith.constant 2 : index
    %258 = vector.load %arg17[%c0_250, %c2_251] : memref<64x50xf32, #tpu.memory_space<vmem>>, vector<64x36xf32>
    %c0_252 = arith.constant 0 : index
    %c6_253 = arith.constant 6 : index
    %259 = vector.load %arg17[%c0_252, %c6_253] : memref<64x50xf32, #tpu.memory_space<vmem>>, vector<64x36xf32>
    %c0_254 = arith.constant 0 : index
    %c7_255 = arith.constant 7 : index
    %260 = vector.load %arg17[%c0_254, %c7_255] : memref<64x50xf32, #tpu.memory_space<vmem>>, vector<64x36xf32>
    %c0_256 = arith.constant 0 : index
    %c8_257 = arith.constant 8 : index
    %261 = vector.load %arg17[%c0_256, %c8_257] : memref<64x50xf32, #tpu.memory_space<vmem>>, vector<64x36xf32>
    %c0_258 = arith.constant 0 : index
    %c12_259 = arith.constant 12 : index
    %262 = vector.load %arg17[%c0_258, %c12_259] : memref<64x50xf32, #tpu.memory_space<vmem>>, vector<64x36xf32>
    %c0_260 = arith.constant 0 : index
    %c13_261 = arith.constant 13 : index
    %263 = vector.load %arg17[%c0_260, %c13_261] : memref<64x50xf32, #tpu.memory_space<vmem>>, vector<64x36xf32>
    %c0_262 = arith.constant 0 : index
    %c14_263 = arith.constant 14 : index
    %264 = vector.load %arg17[%c0_262, %c14_263] : memref<64x50xf32, #tpu.memory_space<vmem>>, vector<64x36xf32>
    %265 = tpu.concatenate %256, %257, %258, %259, %260, %261, %262, %263, %264 in 0 : vector<64x36xf32>, vector<64x36xf32>, vector<64x36xf32>, vector<64x36xf32>, vector<64x36xf32>, vector<64x36xf32>, vector<64x36xf32>, vector<64x36xf32>, vector<64x36xf32> -> vector<576x36xf32>
    %cst_264 = arith.constant dense<0.000000e+00> : vector<16x36xf32>
    %266 = tpu.matmul %243, %265, %cst_264 {dimension_numbers = #tpu.dot_dimension_numbers<[1], [0], [0], [1], [0, 0, 1, 1], [], []>} : vector<16x576xf32>, vector<576x36xf32>, vector<16x36xf32> -> vector<16x36xf32>
    %267 = vector.broadcast %245 : vector<16x1xf32> to vector<16x36xf32>
    %268 = arith.addf %266, %267 : vector<16x36xf32>
    %cst_265 = arith.constant 0.000000e+00 : f32
    %269 = vector.broadcast %cst_265 : f32 to vector<16x36xf32>
    %270 = arith.maximumf %268, %269 : vector<16x36xf32>
    %cst_266 = arith.constant dense<0.000000e+00> : vector<16x36xf32>
    %271 = tpu.matmul %247, %270, %cst_266 {dimension_numbers = #tpu.dot_dimension_numbers<[1], [0], [0], [1], [0, 0, 1, 1], [], []>} : vector<16x16xf32>, vector<16x36xf32>, vector<16x36xf32> -> vector<16x36xf32>
    %272 = vector.broadcast %249 : vector<16x1xf32> to vector<16x36xf32>
    %273 = arith.addf %271, %272 : vector<16x36xf32>
    %cst_267 = arith.constant 0.000000e+00 : f32
    %274 = vector.broadcast %cst_267 : f32 to vector<16x36xf32>
    %275 = arith.maximumf %273, %274 : vector<16x36xf32>
    %276 = vector.broadcast %9 : vector<1x36xf32> to vector<16x36xf32>
    %277 = arith.mulf %275, %276 : vector<16x36xf32>
    %c0_268 = arith.constant 0 : index
    %c7_269 = arith.constant 7 : index
    %278 = vector.load %arg18[%c0_268, %c7_269] : memref<16x50xf32, #tpu.memory_space<vmem>>, vector<16x36xf32>
    tpu.vector_store %arg18[%c0_268, %c7_269], %277 {strides = array<i32>} : memref<16x50xf32, #tpu.memory_space<vmem>>, vector<16x36xf32>,
    %c0_270 = arith.constant 0 : index
    %c0_271 = arith.constant 0 : index
    %279 = vector.load %arg18[%c0_270, %c0_271] : memref<16x50xf32, #tpu.memory_space<vmem>>, vector<16x36xf32>
    %c0_272 = arith.constant 0 : index
    %c1_273 = arith.constant 1 : index
    %280 = vector.load %arg18[%c0_272, %c1_273] : memref<16x50xf32, #tpu.memory_space<vmem>>, vector<16x36xf32>
    %c0_274 = arith.constant 0 : index
    %c2_275 = arith.constant 2 : index
    %281 = vector.load %arg18[%c0_274, %c2_275] : memref<16x50xf32, #tpu.memory_space<vmem>>, vector<16x36xf32>
    %c0_276 = arith.constant 0 : index
    %c6_277 = arith.constant 6 : index
    %282 = vector.load %arg18[%c0_276, %c6_277] : memref<16x50xf32, #tpu.memory_space<vmem>>, vector<16x36xf32>
    %c0_278 = arith.constant 0 : index
    %c7_279 = arith.constant 7 : index
    %283 = vector.load %arg18[%c0_278, %c7_279] : memref<16x50xf32, #tpu.memory_space<vmem>>, vector<16x36xf32>
    %c0_280 = arith.constant 0 : index
    %c8_281 = arith.constant 8 : index
    %284 = vector.load %arg18[%c0_280, %c8_281] : memref<16x50xf32, #tpu.memory_space<vmem>>, vector<16x36xf32>
    %c0_282 = arith.constant 0 : index
    %c12_283 = arith.constant 12 : index
    %285 = vector.load %arg18[%c0_282, %c12_283] : memref<16x50xf32, #tpu.memory_space<vmem>>, vector<16x36xf32>
    %c0_284 = arith.constant 0 : index
    %c13_285 = arith.constant 13 : index
    %286 = vector.load %arg18[%c0_284, %c13_285] : memref<16x50xf32, #tpu.memory_space<vmem>>, vector<16x36xf32>
    %c0_286 = arith.constant 0 : index
    %c14_287 = arith.constant 14 : index
    %287 = vector.load %arg18[%c0_286, %c14_287] : memref<16x50xf32, #tpu.memory_space<vmem>>, vector<16x36xf32>
    %288 = tpu.concatenate %279, %280, %281, %282, %283, %284, %285, %286, %287 in 0 : vector<16x36xf32>, vector<16x36xf32>, vector<16x36xf32>, vector<16x36xf32>, vector<16x36xf32>, vector<16x36xf32>, vector<16x36xf32>, vector<16x36xf32>, vector<16x36xf32> -> vector<144x36xf32>
    %cst_288 = arith.constant dense<0.000000e+00> : vector<64x36xf32>
    %289 = tpu.matmul %251, %288, %cst_288 {dimension_numbers = #tpu.dot_dimension_numbers<[1], [0], [0], [1], [0, 0, 1, 1], [], []>} : vector<64x144xf32>, vector<144x36xf32>, vector<64x36xf32> -> vector<64x36xf32>
    %290 = vector.broadcast %253 : vector<64x1xf32> to vector<64x36xf32>
    %291 = arith.addf %289, %290 : vector<64x36xf32>
    %292 = vector.extract_strided_slice %291 {offsets = [0, 0], sizes = [32, 36], strides = [1, 1]} : vector<64x36xf32> to vector<32x36xf32>
    %293 = vector.extract_strided_slice %291 {offsets = [32, 0], sizes = [32, 36], strides = [1, 1]} : vector<64x36xf32> to vector<32x36xf32>
    %cst_289 = arith.constant 2.000000e+00 : f32
    %294 = vector.broadcast %cst_289 : f32 to vector<32x36xf32>
    %295 = arith.addf %293, %294 : vector<32x36xf32>
    %296 = arith.negf %295 : vector<32x36xf32>
    %297 = math.exp %296 : vector<32x36xf32>
    %cst_290 = arith.constant 1.000000e+00 : f32
    %298 = vector.broadcast %cst_290 : f32 to vector<32x36xf32>
    %299 = arith.addf %298, %297 : vector<32x36xf32>
    %300 = arith.divf %298, %299 : vector<32x36xf32>
    %301 = math.log %300 : vector<32x36xf32>
    %c0_291 = arith.constant 0 : index
    %c7_292 = arith.constant 7 : index
    %302 = vector.load %arg17[%c0_291, %c7_292] : memref<64x50xf32, #tpu.memory_space<vmem>>, vector<64x36xf32>
    %cst_293 = arith.constant dense<0.000000e+00> : vector<64x36xf32>
    %303 = tpu.matmul %255, %302, %cst_293 {dimension_numbers = #tpu.dot_dimension_numbers<[1], [0], [0], [1], [0, 0, 1, 1], [], []>} : vector<64x64xf32>, vector<64x36xf32>, vector<64x36xf32> -> vector<64x36xf32>
    %304 = vector.extract_strided_slice %303 {offsets = [0, 0], sizes = [32, 36], strides = [1, 1]} : vector<64x36xf32> to vector<32x36xf32>
    %305 = vector.extract_strided_slice %303 {offsets = [32, 0], sizes = [32, 36], strides = [1, 1]} : vector<64x36xf32> to vector<32x36xf32>
    %306 = arith.addf %305, %292 : vector<32x36xf32>
    %307 = arith.mulf %306, %300 : vector<32x36xf32>
    %308 = tpu.concatenate %304, %307 in 0 : vector<32x36xf32>, vector<32x36xf32> -> vector<64x36xf32>
    %309 = vector.broadcast %9 : vector<1x36xf32> to vector<64x36xf32>
    %310 = arith.mulf %308, %309 : vector<64x36xf32>
    %c0_294 = arith.constant 0 : index
    %c7_295 = arith.constant 7 : index
    %311 = vector.load %arg17[%c0_294, %c7_295] : memref<64x50xf32, #tpu.memory_space<vmem>>, vector<64x36xf32>
    tpu.vector_store %arg17[%c0_294, %c7_295], %310 {strides = array<i32>} : memref<64x50xf32, #tpu.memory_space<vmem>>, vector<64x36xf32>,
    %312 = vector.broadcast %9 : vector<1x36xf32> to vector<32x36xf32>
    %313 = arith.mulf %301, %312 : vector<32x36xf32>
    %cst_296 = arith.constant dense<0.000000e+00> : vector<32xf32>
    %314 = vector.multi_reduction <add>, %313, %cst_296 [1] : vector<32x36xf32> to vector<32xf32>
    %315 = vector.shape_cast %314 : vector<32xf32> to vector<32x1xf32>
    %cst_297 = arith.constant dense<0.000000e+00> : vector<1xf32>
    %316 = vector.multi_reduction <add>, %315, %cst_297 [0] : vector<32x1xf32> to vector<1xf32>
    %317 = vector.shape_cast %316 : vector<1xf32> to vector<1x1xf32>
    %318 = arith.addf %241, %317 : vector<1x1xf32>
    %c0_298 = arith.constant 0 : index
    %c0_299 = arith.constant 0 : index
    %319 = vector.load %arg17[%c0_298, %c0_299] : memref<64x50xf32, #tpu.memory_space<vmem>>, vector<32x36xf32>
    %c0_300 = arith.constant 0 : index
    %c1_301 = arith.constant 1 : index
    %320 = vector.load %arg17[%c0_300, %c1_301] : memref<64x50xf32, #tpu.memory_space<vmem>>, vector<32x36xf32>
    %c0_302 = arith.constant 0 : index
    %c2_303 = arith.constant 2 : index
    %321 = vector.load %arg17[%c0_302, %c2_303] : memref<64x50xf32, #tpu.memory_space<vmem>>, vector<32x36xf32>
    %c0_304 = arith.constant 0 : index
    %c6_305 = arith.constant 6 : index
    %322 = vector.load %arg17[%c0_304, %c6_305] : memref<64x50xf32, #tpu.memory_space<vmem>>, vector<32x36xf32>
    %c0_306 = arith.constant 0 : index
    %c7_307 = arith.constant 7 : index
    %323 = vector.load %arg17[%c0_306, %c7_307] : memref<64x50xf32, #tpu.memory_space<vmem>>, vector<32x36xf32>
    %c0_308 = arith.constant 0 : index
    %c8_309 = arith.constant 8 : index
    %324 = vector.load %arg17[%c0_308, %c8_309] : memref<64x50xf32, #tpu.memory_space<vmem>>, vector<32x36xf32>
    %c0_310 = arith.constant 0 : index
    %c12_311 = arith.constant 12 : index
    %325 = vector.load %arg17[%c0_310, %c12_311] : memref<64x50xf32, #tpu.memory_space<vmem>>, vector<32x36xf32>
    %c0_312 = arith.constant 0 : index
    %c13_313 = arith.constant 13 : index
    %326 = vector.load %arg17[%c0_312, %c13_313] : memref<64x50xf32, #tpu.memory_space<vmem>>, vector<32x36xf32>
    %c0_314 = arith.constant 0 : index
    %c14_315 = arith.constant 14 : index
    %327 = vector.load %arg17[%c0_314, %c14_315] : memref<64x50xf32, #tpu.memory_space<vmem>>, vector<32x36xf32>
    %328 = tpu.concatenate %319, %320, %321, %322, %323, %324, %325, %326, %327 in 0 : vector<32x36xf32>, vector<32x36xf32>, vector<32x36xf32>, vector<32x36xf32>, vector<32x36xf32>, vector<32x36xf32>, vector<32x36xf32>, vector<32x36xf32>, vector<32x36xf32> -> vector<288x36xf32>
    %c0_316 = arith.constant 0 : index
    %c0_317 = arith.constant 0 : index
    %329 = vector.load %arg10[%c0_316, %c0_317] : memref<32x288xf32, #tpu.memory_space<vmem>>, vector<32x288xf32>
    %cst_318 = arith.constant dense<0.000000e+00> : vector<32x36xf32>
    %330 = tpu.matmul %329, %328, %cst_318 {dimension_numbers = #tpu.dot_dimension_numbers<[1], [0], [0], [1], [0, 0, 1, 1], [], []>} : vector<32x288xf32>, vector<288x36xf32>, vector<32x36xf32> -> vector<32x36xf32>
    %c0_319 = arith.constant 0 : index
    %c0_320 = arith.constant 0 : index
    %331 = vector.load %arg11[%c0_319, %c0_320] : memref<32x1xf32, #tpu.memory_space<vmem>>, vector<32x1xf32>
    %332 = vector.broadcast %331 : vector<32x1xf32> to vector<32x36xf32>
    %333 = arith.addf %330, %332 : vector<32x36xf32>
    %cst_321 = arith.constant 0.000000e+00 : f32
    %334 = vector.broadcast %cst_321 : f32 to vector<32x36xf32>
    %335 = arith.maximumf %333, %334 : vector<32x36xf32>
    %336 = vector.broadcast %9 : vector<1x36xf32> to vector<32x36xf32>
    %337 = arith.mulf %335, %336 : vector<32x36xf32>
    %c0_322 = arith.constant 0 : index
    %c7_323 = arith.constant 7 : index
    %338 = vector.load %arg19[%c0_322, %c7_323] : memref<32x50xf32, #tpu.memory_space<vmem>>, vector<32x36xf32>
    tpu.vector_store %arg19[%c0_322, %c7_323], %337 {strides = array<i32>} : memref<32x50xf32, #tpu.memory_space<vmem>>, vector<32x36xf32>,
    %c0_324 = arith.constant 0 : index
    %c0_325 = arith.constant 0 : index
    %339 = vector.load %arg19[%c0_324, %c0_325] : memref<32x50xf32, #tpu.memory_space<vmem>>, vector<32x36xf32>
    %c0_326 = arith.constant 0 : index
    %c1_327 = arith.constant 1 : index
    %340 = vector.load %arg19[%c0_326, %c1_327] : memref<32x50xf32, #tpu.memory_space<vmem>>, vector<32x36xf32>
    %c0_328 = arith.constant 0 : index
    %c2_329 = arith.constant 2 : index
    %341 = vector.load %arg19[%c0_328, %c2_329] : memref<32x50xf32, #tpu.memory_space<vmem>>, vector<32x36xf32>
    %c0_330 = arith.constant 0 : index
    %c6_331 = arith.constant 6 : index
    %342 = vector.load %arg19[%c0_330, %c6_331] : memref<32x50xf32, #tpu.memory_space<vmem>>, vector<32x36xf32>
    %c0_332 = arith.constant 0 : index
    %c7_333 = arith.constant 7 : index
    %343 = vector.load %arg19[%c0_332, %c7_333] : memref<32x50xf32, #tpu.memory_space<vmem>>, vector<32x36xf32>
    %c0_334 = arith.constant 0 : index
    %c8_335 = arith.constant 8 : index
    %344 = vector.load %arg19[%c0_334, %c8_335] : memref<32x50xf32, #tpu.memory_space<vmem>>, vector<32x36xf32>
    %c0_336 = arith.constant 0 : index
    %c12_337 = arith.constant 12 : index
    %345 = vector.load %arg19[%c0_336, %c12_337] : memref<32x50xf32, #tpu.memory_space<vmem>>, vector<32x36xf32>
    %c0_338 = arith.constant 0 : index
    %c13_339 = arith.constant 13 : index
    %346 = vector.load %arg19[%c0_338, %c13_339] : memref<32x50xf32, #tpu.memory_space<vmem>>, vector<32x36xf32>
    %c0_340 = arith.constant 0 : index
    %c14_341 = arith.constant 14 : index
    %347 = vector.load %arg19[%c0_340, %c14_341] : memref<32x50xf32, #tpu.memory_space<vmem>>, vector<32x36xf32>
    %348 = tpu.concatenate %339, %340, %341, %342, %343, %344, %345, %346, %347 in 0 : vector<32x36xf32>, vector<32x36xf32>, vector<32x36xf32>, vector<32x36xf32>, vector<32x36xf32>, vector<32x36xf32>, vector<32x36xf32>, vector<32x36xf32>, vector<32x36xf32> -> vector<288x36xf32>
    %c0_342 = arith.constant 0 : index
    %c0_343 = arith.constant 0 : index
    %349 = vector.load %arg12[%c0_342, %c0_343] : memref<64x288xf32, #tpu.memory_space<vmem>>, vector<64x288xf32>
    %cst_344 = arith.constant dense<0.000000e+00> : vector<64x36xf32>
    %350 = tpu.matmul %349, %348, %cst_344 {dimension_numbers = #tpu.dot_dimension_numbers<[1], [0], [0], [1], [0, 0, 1, 1], [], []>} : vector<64x288xf32>, vector<288x36xf32>, vector<64x36xf32> -> vector<64x36xf32>
    %c0_345 = arith.constant 0 : index
    %c0_346 = arith.constant 0 : index
    %351 = vector.load %arg13[%c0_345, %c0_346] : memref<64x1xf32, #tpu.memory_space<vmem>>, vector<64x1xf32>
    %352 = vector.broadcast %351 : vector<64x1xf32> to vector<64x36xf32>
    %353 = arith.addf %350, %352 : vector<64x36xf32>
    %354 = vector.extract_strided_slice %353 {offsets = [0, 0], sizes = [32, 36], strides = [1, 1]} : vector<64x36xf32> to vector<32x36xf32>
    %355 = vector.extract_strided_slice %353 {offsets = [32, 0], sizes = [32, 36], strides = [1, 1]} : vector<64x36xf32> to vector<32x36xf32>
    %356 = math.tanh %355 : vector<32x36xf32>
    %c32 = arith.constant 32 : index
    %c7_347 = arith.constant 7 : index
    %357 = vector.load %arg17[%c32, %c7_347] : memref<64x50xf32, #tpu.memory_space<vmem>>, vector<32x36xf32>
    %358 = arith.subf %357, %354 : vector<32x36xf32>
    %cst_348 = arith.constant 0.000000e+00 : f32
    %359 = vector.broadcast %cst_348 : f32 to vector<32x36xf32>
    %360 = arith.subf %359, %356 : vector<32x36xf32>
    %361 = math.exp %360 : vector<32x36xf32>
    %362 = arith.mulf %358, %361 : vector<32x36xf32>
    %363 = vector.broadcast %9 : vector<1x36xf32> to vector<32x36xf32>
    %364 = arith.mulf %362, %363 : vector<32x36xf32>
    %cst_349 = arith.constant 0.000000e+00 : f32
    %365 = vector.broadcast %cst_349 : f32 to vector<32x36xf32>
    %366 = arith.subf %365, %356 : vector<32x36xf32>
    %367 = vector.broadcast %9 : vector<1x36xf32> to vector<32x36xf32>
    %368 = arith.mulf %366, %367 : vector<32x36xf32>
    %cst_350 = arith.constant dense<0.000000e+00> : vector<32xf32>
    %369 = vector.multi_reduction <add>, %368, %cst_350 [1] : vector<32x36xf32> to vector<32xf32>
    %370 = vector.shape_cast %369 : vector<32xf32> to vector<32x1xf32>
    %cst_351 = arith.constant dense<0.000000e+00> : vector<1xf32>
    %371 = vector.multi_reduction <add>, %370, %cst_351 [0] : vector<32x1xf32> to vector<1xf32>
    %372 = vector.shape_cast %371 : vector<1xf32> to vector<1x1xf32>
    %373 = arith.addf %318, %372 : vector<1x1xf32>
    %c0_352 = arith.constant 0 : index
    %c7_353 = arith.constant 7 : index
    %374 = vector.load %arg17[%c0_352, %c7_353] : memref<64x50xf32, #tpu.memory_space<vmem>>, vector<32x36xf32>
    %c0_354 = arith.constant 0 : index
    %c0_355 = arith.constant 0 : index
    %c0_356 = arith.constant 0 : index
    %375 = vector.load %arg14[%c0_354, %c0_355, %c0_356] : memref<1x32x36xf32, #tpu.memory_space<vmem>>, vector<1x32x36xf32>
    %376 = vector.shape_cast %375 : vector<1x32x36xf32> to vector<32x36xf32>
    %377 = vector.shape_cast %374 : vector<32x36xf32> to vector<1x32x36xf32>
    tpu.vector_store %arg14[%c0_354, %c0_355, %c0_356], %377 {strides = array<i32>} : memref<1x32x36xf32, #tpu.memory_space<vmem>>, vector<1x32x36xf32>,
    %c0_357 = arith.constant 0 : index
    %c0_358 = arith.constant 0 : index
    %c0_359 = arith.constant 0 : index
    %378 = vector.load %arg15[%c0_357, %c0_358, %c0_359] : memref<1x32x36xf32, #tpu.memory_space<vmem>>, vector<1x32x36xf32>
    %379 = vector.shape_cast %378 : vector<1x32x36xf32> to vector<32x36xf32>
    %380 = vector.shape_cast %364 : vector<32x36xf32> to vector<1x32x36xf32>
    tpu.vector_store %arg15[%c0_357, %c0_358, %c0_359], %380 {strides = array<i32>} : memref<1x32x36xf32, #tpu.memory_space<vmem>>, vector<1x32x36xf32>,
    %c0_360 = arith.constant 0 : index
    %c0_361 = arith.constant 0 : index
    %c0_362 = arith.constant 0 : index
    %381 = vector.load %arg16[%c0_360, %c0_361, %c0_362] : memref<1x1x1xf32, #tpu.memory_space<vmem>>, vector<1x1x1xf32>
    %382 = vector.shape_cast %381 : vector<1x1x1xf32> to vector<1x1xf32>
    %383 = vector.shape_cast %373 : vector<1x1xf32> to vector<1x1x1xf32>
    tpu.vector_store %arg16[%c0_360, %c0_361, %c0_362], %383 {strides = array<i32>} : memref<1x1x1xf32, #tpu.memory_space<vmem>>, vector<1x1x1xf32>,
    return
  }
  func.func @transform_0(%arg0: i32) -> (i32, i32, i32) {
    %c0_i32 = arith.constant 0 : i32
    %c0_i32_0 = arith.constant 0 : i32
    %c0_i32_1 = arith.constant 0 : i32
    return %arg0, %c0_i32, %c0_i32_0 : i32, i32, i32
  }
  func.func @transform_1(%arg0: i32) -> (i32, i32) {
    %c0_i32 = arith.constant 0 : i32
    %c0_i32_0 = arith.constant 0 : i32
    %c0_i32_1 = arith.constant 0 : i32
    return %c0_i32, %c0_i32_0 : i32, i32
  }
  func.func @transform_2(%arg0: i32) -> (i32, i32, i32) {
    %c0_i32 = arith.constant 0 : i32
    %c0_i32_0 = arith.constant 0 : i32
    %c0_i32_1 = arith.constant 0 : i32
    %c0_i32_2 = arith.constant 0 : i32
    return %c0_i32, %c0_i32_0, %c0_i32_1 : i32, i32, i32
  }
  func.func @transform_3(%arg0: i32) -> (i32, i32, i32) {
    %c0_i32 = arith.constant 0 : i32
    %c0_i32_0 = arith.constant 0 : i32
    %c0_i32_1 = arith.constant 0 : i32
    %c0_i32_2 = arith.constant 0 : i32
    return %c0_i32, %c0_i32_0, %c0_i32_1 : i32, i32, i32
  }
  func.func @transform_4(%arg0: i32) -> (i32, i32, i32) {
    %c0_i32 = arith.constant 0 : i32
    %c0_i32_0 = arith.constant 0 : i32
    %c0_i32_1 = arith.constant 0 : i32
    %c0_i32_2 = arith.constant 0 : i32
    return %c0_i32, %c0_i32_0, %c0_i32_1 : i32, i32, i32
  }
  func.func @transform_5(%arg0: i32) -> (i32, i32, i32) {
    %c0_i32 = arith.constant 0 : i32
    %c0_i32_0 = arith.constant 0 : i32
    %c0_i32_1 = arith.constant 0 : i32
    %c0_i32_2 = arith.constant 0 : i32
    return %c0_i32, %c0_i32_0, %c0_i32_1 : i32, i32, i32
  }
  func.func @transform_6(%arg0: i32) -> (i32, i32, i32) {
    %c0_i32 = arith.constant 0 : i32
    %c0_i32_0 = arith.constant 0 : i32
    %c0_i32_1 = arith.constant 0 : i32
    %c0_i32_2 = arith.constant 0 : i32
    return %c0_i32, %c0_i32_0, %c0_i32_1 : i32, i32, i32
  }
  func.func @transform_7(%arg0: i32) -> (i32, i32, i32) {
    %c0_i32 = arith.constant 0 : i32
    %c0_i32_0 = arith.constant 0 : i32
    %c0_i32_1 = arith.constant 0 : i32
    %c0_i32_2 = arith.constant 0 : i32
    return %c0_i32, %c0_i32_0, %c0_i32_1 : i32, i32, i32
  }
  func.func @transform_8(%arg0: i32) -> (i32, i32, i32) {
    %c0_i32 = arith.constant 0 : i32
    %c0_i32_0 = arith.constant 0 : i32
    %c0_i32_1 = arith.constant 0 : i32
    %c0_i32_2 = arith.constant 0 : i32
    return %c0_i32, %c0_i32_0, %c0_i32_1 : i32, i32, i32
  }
  func.func @transform_9(%arg0: i32) -> (i32, i32) {
    %c0_i32 = arith.constant 0 : i32
    %c0_i32_0 = arith.constant 0 : i32
    %c0_i32_1 = arith.constant 0 : i32
    return %c0_i32, %c0_i32_0 : i32, i32
  }
  func.func @transform_10(%arg0: i32) -> (i32, i32) {
    %c0_i32 = arith.constant 0 : i32
    %c0_i32_0 = arith.constant 0 : i32
    %c0_i32_1 = arith.constant 0 : i32
    return %c0_i32, %c0_i32_0 : i32, i32
  }
  func.func @transform_11(%arg0: i32) -> (i32, i32) {
    %c0_i32 = arith.constant 0 : i32
    %c0_i32_0 = arith.constant 0 : i32
    %c0_i32_1 = arith.constant 0 : i32
    return %c0_i32, %c0_i32_0 : i32, i32
  }
  func.func @transform_12(%arg0: i32) -> (i32, i32) {
    %c0_i32 = arith.constant 0 : i32
    %c0_i32_0 = arith.constant 0 : i32
    %c0_i32_1 = arith.constant 0 : i32
    return %c0_i32, %c0_i32_0 : i32, i32
  }
  func.func @transform_13(%arg0: i32) -> (i32, i32, i32) {
    %c0_i32 = arith.constant 0 : i32
    %c0_i32_0 = arith.constant 0 : i32
    %c0_i32_1 = arith.constant 0 : i32
    return %arg0, %c0_i32, %c0_i32_0 : i32, i32, i32
  }
  func.func @transform_14(%arg0: i32) -> (i32, i32, i32) {
    %c0_i32 = arith.constant 0 : i32
    %c0_i32_0 = arith.constant 0 : i32
    %c0_i32_1 = arith.constant 0 : i32
    return %arg0, %c0_i32, %c0_i32_0 : i32, i32, i32
  }
  func.func @transform_15(%arg0: i32) -> (i32, i32, i32) {
    %c0_i32 = arith.constant 0 : i32
    %c0_i32_0 = arith.constant 0 : i32
    %c0_i32_1 = arith.constant 0 : i32
    return %arg0, %c0_i32, %c0_i32_0 : i32, i32, i32
  }
}

</mosaic_0001>

<bundles_post_ra>
// kernel: flownet_normal_flow.2
= control target key start
LH: loop header
LB: loop body
LE: loop exit
PB: predicated region body
PF: predicated region fallthrough
CT: control target
= control target key end

     0   :  { %s4061_s13 = smov 0   ;;  %s5131_s0 = inlined_call_operand.vmem [shape: f32[2,4,324], index: 0, kind: input, shape index: {}]   ;;  %s5132_s1 = inlined_call_operand.vmem [shape: f32[1,324], index: 1, kind: input, shape index: {}]   ;;  %s5133_s2 = inlined_call_operand.vmem [shape: f32[3,16,36], index: 2, kind: input, shape index: {}]   ;;  %s5134_s3 = inlined_call_operand.vmem [shape: f32[3,16,1], index: 3, kind: input, shape index: {}]   ;;  %s5135_s4 = inlined_call_operand.vmem [shape: f32[3,16,16], index: 4, kind: input, shape index: {}]   ;;  %s5136_s5 = inlined_call_operand.vmem [shape: f32[3,16,1], index: 5, kind: input, shape index: {}]   ;;  %s5137_s6 = inlined_call_operand.vmem [shape: f32[3,4,144], index: 6, kind: input, shape index: {}]   ;;  %s5138_s7 = inlined_call_operand.vmem [shape: f32[3,4,1], index: 7, kind: input, shape index: {}]   ;;  %s5139_s8 = inlined_call_operand.vmem [shape: f32[3,4,4], index: 8, kind: input, shape index: {}]   ;;  %s5140_s9 = inlined_call_operand.vmem [shape: f32[2,4,324], index: 9, kind: output, shape index: {0}]   ;;  %s5141_s10 = inlined_call_operand.vmem [shape: f32[2,1,1], index: 10, kind: output, shape index: {1}]  }
   0x1 LB: > { %s3333_s14 = sadd.s32 4294967295, %s3993_s13   ;;  %p3337_p0 = scmp.ge.s32.totalorder %s3993_s13, 1  ;;  %s3993_s13 = sphi %s4061_s13, %s21_s13  }
   0x2   : > { %p315_p1 = scmp.lt.s32.totalorder %s3993_s13, 3 }
   0x4   : > { %p316_p2 = pnand %p3337_p0, %p315_p1 }
   0x5   : > { %p356_p3 = scmp.lt.s32.totalorder (!%p316_p2), %s3333_s14, 1  ;;  %s3996_s19 = smov (!%p316_p2), 19  }
   0x6   : > { %319 = sbr.rel (%p316_p2) target bundleno = 3589 (0xe05), region = 56  ;;  %s3997_s20 = smov (!%p316_p2), 126  }
   0x7   : > { %s3998_s21 = smov (!%p316_p2), 110   ;;  %s3999_s22 = smov (!%p316_p2), 109  }
   0x8   : > { %s4000_s23 = smov (!%p316_p2), 108   ;;  %s4001_s24 = smov (!%p316_p2), 92  }
   0x9   : > { %s4002_s25 = smov (!%p316_p2), 91   ;;  %s4003_s28 = smov (!%p316_p2), 90  }
   0xa   : > { %s4004_s29 = smov (!%p316_p2), 127  }
   0xb   : > { %v3995_v0 = vmov 0.0   ;;  %s5278_s14 = smov (!%p356_p3, %s3333_s14), 1  ;;  %vm370_vm0 = vcmask 863232   ;;  %vm393_vm1 = vcmask 1043608   ;;  %vm394_vm2 = vcmask 1047556   ;;  %v408_v40 = vld [vmem:[%s5137_s6] sm:$0xff] }
   0xc   : > { %369 = vst [vmem:[#allocation2] sm:$0xff] %v3995_v0  ;;  %s3445_s15 = smul.u32 12, %s5278_s14  ;;  %vm388_vm3 = vcmask 154624   ;;  %vm4083_vm4 = vmor %vm394_vm2, %vm393_vm1  ;;  %vm5152_vm5 = vcmask 707584   ;;  %vm569_vm6 = vcmask 1043456   ;;  %v4005_v57 = vmov 0  }
   0xd   : > { %372 = vst [vmem:[#allocation3] sm:$0xff] %v3995_v0  ;;  %3500 = vset.pattern.permute.xlu1 %v4005_v57  ;;  %v403_v58 = vld [vmem:[%s5134_s3 + $0x8] sm:$0xff]  ;;  %3501 = vset.pattern.permute.xlu2 %v4005_v57  ;;  %vm5153_vm7 = vcmask 744448   ;;  %vm5154_vm8 = vcmask 736256   ;;  %vm529_vm9 = vcmask 752640   ;;  %vm5150_vm10 = vcmask 883712  }
   0xe   : > { %376 = vst [vmem:[#allocation3 + $0x18] sm:$0xff] %v3995_v0  ;;  %s360_s18 = scalar_lea.vmem %s5131_s0, %s3445_s15  ;;  %3502 = vset.pattern.permute.xlu0 %v4005_v57  ;;  %vm5151_vm11 = vcmask 891904   ;;  %vm5149_vm12 = vcmask 900096   ;;  %vm5148_vm13 = vcmask 1031168   ;;  %vm5147_vm14 = vcmask 1039360   ;;  %s365_s26 = scalar_lea.vmem %s5140_s9, %s3445_s15 }
   0xf   : > { %v379_v1 = vld [vmem:[%s360_s18] sm:$0xff]  ;;  %v380_v2 = vld [vmem:[%s360_s18 + $0x8] sm:$0xf]  ;;  %371 = vst.msk [vmem:[#allocation2 + $0x8] sm:$0xf] %vm370_vm0, %v3995_v0  ;;  %vm5142_vm15 = vcmask 293888  }
  0x10   : > { %383 = vrot.lane.b32.xlu0 %v379_v1, %s3996_s19  ;;  %vm5146_vm0 = vcmask 130048   ;;  %vm374_vm1 = vcmask 867328   ;;  %vm5144_vm2 = vcmask 1047704  }
  0x11   : > { %378 = vst.msk [vmem:[#allocation3 + $0x28] sm:$0xff] %vm374_vm1, %v3995_v0 }
  0x12   : > { %375 = vst.msk [vmem:[#allocation3 + $0x10] sm:$0xff] %vm374_vm1, %v3995_v0  ;;  %vm5143_vm1 = vcmask 31744  }
  0x18   : > { %385 = vrot.lane.b32.xlu0 %v380_v2, %s3996_s19 }
  0x82   : > { %v384_v3 = vpop.permute.xlu0 %383 }
  0x83   : > { %v387_v5 = vrot.slane %v384_v3, 4 }
  0x85   : > { %v389_v6 = vsel %vm388_vm3, %v387_v5, %v384_v3 }
  0x86   : > { %396 = vst.msk [vmem:[#allocation2] sm:$0xff] %vm4083_vm4, %v389_v6 }
  0x8a   : > { %v386_v7 = vpop.permute.xlu0 %385 }
  0x8b   : > { %v390_v8 = vsel %vm388_vm3, %v387_v5, %v386_v7 }
  0x8c   : > { %398 = vst.msk [vmem:[#allocation2 + $0x8] sm:$0xf] %vm5152_vm5, %v390_v8 }
  0x8d   : > { %v4092_v9 = vld [vmem:[#allocation2] sm:$0xff] }
  0x8e   : > { %415 = vst [vmem:[#allocation1] ss:$2 sm:$0xff] %v4092_v9 }
  0x93   : > { %v412_v10 = vld [vmem:[#allocation2 + $0x8] sm:$0xf] }
  0x94   : > { %417 = vst [vmem:[#allocation1 + $0x10] ss:$2 sm:$0xff] %v412_v10  ;;  %v1208_v45 = vld [vmem:[#allocation2 + $0x8] sm:$0xf] }
  0x95   : > { %v4095_v11 = vld.sshfl [vmem:[#allocation1] sm:$0xff pattern:$0x75316420]  ;;  %v4097_v12 = vld.sshfl [vmem:[#allocation1 + $0x8] sm:$0xff pattern:$0x75316420] }
  0x96   : > { %425 = vst [vmem:[#allocation1 + $0x1] ss:$2 sm:$0xff] %v4092_v9 }
  0x9b   : > { %v4100_v13 = vld.sshfl [vmem:[#allocation1 + $0x10] sm:$0xff pattern:$0x75316420] }
  0x9c   : > { %427 = vst [vmem:[#allocation1 + $0x11] ss:$2 sm:$0xff] %v412_v10 }
  0x9d   : > { %v4102_v14 = vld.sshfl [vmem:[#allocation1] sm:$0xff pattern:$0x75316420]  ;;  %v4104_v15 = vld.sshfl [vmem:[#allocation1 + $0x8] sm:$0xff pattern:$0x75316420] }
  0x9e   : > { %443 = vst [vmem:[#allocation1] ss:$2 sm:$0xff] %v4092_v9  ;;  %v3495_v48 = vpack.i.bf16 %v4104_v15, %v4102_v14 }
  0xa3   : > { %v430_v16 = vld.sshfl [vmem:[#allocation1 + $0x10] sm:$0xff pattern:$0x75316420] }
  0xa4   : > { %445 = vst [vmem:[#allocation1 + $0x10] ss:$2 sm:$0xff] %v412_v10 }
  0xa5   : > { %v446_v17 = vld.sshfl [vmem:[#allocation1] sm:$0xff pattern:$0x75316420]  ;;  %v447_v18 = vld.sshfl [vmem:[#allocation1 + $0x8] sm:$0xff pattern:$0x75316420] }
  0xa6   : > { %462 = vst [vmem:[#allocation1 + $0x1] ss:$2 sm:$0xff] %v4092_v9  ;;  %v3465_v19 = vpack.i.bf16 %v447_v18, %v446_v17 }
  0xa8   : > { %3466 = vrot.lane.b32.xlu2 %v3465_v19, %s3997_s20 }
  0xab   : > { %v4109_v20 = vld.sshfl [vmem:[#allocation1 + $0x10] sm:$0xff pattern:$0x75316420] }
  0xac   : > { %464 = vst [vmem:[#allocation1 + $0x11] ss:$2 sm:$0xff] %v412_v10 }
  0xad   : > { %v465_v21 = vld.sshfl [vmem:[#allocation1] sm:$0xff pattern:$0x75316420]  ;;  %v466_v22 = vld.sshfl [vmem:[#allocation1 + $0x8] sm:$0xff pattern:$0x75316420] }
  0xae   : > { %480 = vst [vmem:[#allocation1] ss:$2 sm:$0xff] %v4092_v9  ;;  %v3470_v23 = vpack.i.bf16 %v466_v22, %v465_v21 }
  0xb0   : > { %3471 = vrot.lane.b32.xlu0 %v3470_v23, %s3998_s21 }
  0xb3   : > { %v467_v24 = vld.sshfl [vmem:[#allocation1 + $0x10] sm:$0xff pattern:$0x75316420] }
  0xb4   : > { %482 = vst [vmem:[#allocation1 + $0x10] ss:$2 sm:$0xff] %v412_v10 }
  0xb5   : > { %v483_v25 = vld.sshfl [vmem:[#allocation1] sm:$0xff pattern:$0x75316420]  ;;  %v484_v26 = vld.sshfl [vmem:[#allocation1 + $0x8] sm:$0xff pattern:$0x75316420] }
  0xb6   : > { %499 = vst [vmem:[#allocation1 + $0x1] ss:$2 sm:$0xff] %v4092_v9  ;;  %v3475_v27 = vpack.i.bf16 %v484_v26, %v483_v25  ;;  %v402_v26 = vld [vmem:[%s5134_s3] sm:$0xff] }
  0xb8   : > { %3476 = vrot.lane.b32.xlu0 %v3475_v27, %s3999_s22 }
  0xbb   : > { %v485_v28 = vld.sshfl [vmem:[#allocation1 + $0x10] sm:$0xff pattern:$0x75316420] }
  0xbc   : > { %501 = vst [vmem:[#allocation1 + $0x11] ss:$2 sm:$0xff] %v412_v10 }
  0xbd   : > { %v502_v29 = vld.sshfl [vmem:[#allocation1] sm:$0xff pattern:$0x75316420]  ;;  %v503_v30 = vld.sshfl [vmem:[#allocation1 + $0x8] sm:$0xff pattern:$0x75316420] }
  0xbe   : > { %517 = vst [vmem:[#allocation1] ss:$2 sm:$0xff] %v4092_v9  ;;  %v3480_v31 = vpack.i.bf16 %v503_v30, %v502_v29 }
  0xc0   : > { %3481 = vrot.lane.b32.xlu1 %v3480_v31, %s4000_s23 }
  0xc3   : > { %v504_v32 = vld.sshfl [vmem:[#allocation1 + $0x10] sm:$0xff pattern:$0x75316420] }
  0xc4   : > { %519 = vst [vmem:[#allocation1 + $0x10] ss:$2 sm:$0xff] %v412_v10 }
  0xc5   : > { %v520_v33 = vld.sshfl [vmem:[#allocation1] sm:$0xff pattern:$0x75316420]  ;;  %v521_v34 = vld.sshfl [vmem:[#allocation1 + $0x8] sm:$0xff pattern:$0x75316420] }
  0xc6   : > { %536 = vst [vmem:[#allocation1 + $0x1] ss:$2 sm:$0xff] %v4092_v9  ;;  %v3485_v35 = vpack.i.bf16 %v521_v34, %v520_v33 }
  0xc8   : > { %3486 = vrot.lane.b32.xlu2 %v3485_v35, %s4001_s24 }
  0xcb   : > { %v522_v36 = vld.sshfl [vmem:[#allocation1 + $0x10] sm:$0xff pattern:$0x75316420] }
  0xcc   : > { %538 = vst [vmem:[#allocation1 + $0x11] ss:$2 sm:$0xff] %v412_v10  ;;  %527 = vrot.lane.b32.xlu0 %v522_v36, %s4001_s24 }
  0xcd   : > { %v539_v37 = vld.sshfl [vmem:[#allocation1] sm:$0xff pattern:$0x75316420]  ;;  %v540_v38 = vld.sshfl [vmem:[#allocation1 + $0x8] sm:$0xff pattern:$0x75316420] }
  0xce   : > { %554 = vst [vmem:[#allocation1] ss:$2 sm:$0xff] %v4092_v9  ;;  %v3490_v39 = vpack.i.bf16 %v540_v38, %v539_v37 }
  0xd0   : > { %3491 = vrot.lane.b32.xlu2 %v3490_v39, %s4002_s25 }
  0xd3   : > { %v541_v41 = vld.sshfl [vmem:[#allocation1 + $0x10] sm:$0xff pattern:$0x75316420] }
  0xd4   : > { %556 = vst [vmem:[#allocation1 + $0x10] ss:$2 sm:$0xff] %v412_v10  ;;  %509 = vrot.lane.b32.xlu0 %v504_v32, %s4000_s23  ;;  %v406_v10 = vld [vmem:[%s5136_s5] sm:$0xff] }
  0xd5   : > { %v557_v42 = vld.sshfl [vmem:[#allocation1] sm:$0xff pattern:$0x75316420]  ;;  %v558_v43 = vld.sshfl [vmem:[#allocation1 + $0x8] sm:$0xff pattern:$0x75316420] }
  0xd6   : > { %1015 = vst [vmem:[#allocation1] ss:$2 sm:$0xff] %v408_v40  ;;  %560 = vrot.lane.b32.xlu1 %v557_v42, %s4003_s28  ;;  %v400_v32 = vld [vmem:[%s5133_s2] sm:$0xff]  ;;  %v401_v42 = vld [vmem:[%s5133_s2 + $0x8] sm:$0xff] }
  0xd8   : > { %490 = vrot.lane.b32.xlu2 %v485_v28, %s3999_s22 }
  0xdb   : > { %v559_v44 = vld.sshfl [vmem:[#allocation1 + $0x10] sm:$0xff pattern:$0x75316420] }
  0xdc   : > { %1213 = vst [vmem:[#allocation1 + $0x10] ss:$2 sm:$0xff] %v1208_v45  ;;  %435 = vrot.lane.b32.xlu0 %v430_v16, %s4004_s29 }
  0xdd   : > { %v4129_v46 = vld.sshfl [vmem:[#allocation1] sm:$0xff pattern:$0x75316420]  ;;  %v4131_v47 = vld.sshfl [vmem:[#allocation1 + $0x8] sm:$0xff pattern:$0x75316420] }
  0xde   : > { %1211 = vst [vmem:[#allocation1] ss:$2 sm:$0xff] %v4092_v9  ;;  %562 = vrot.lane.b32.xlu1 %v558_v43, %s4003_s28 }
  0xe0   : > { %564 = vrot.lane.b32.xlu2 %v559_v44, %s4003_s28 }
  0xe6   : > { %3496 = vrot.lane.b32.xlu1 %v3495_v48, %s4004_s29 }
  0xe8   : > { %472 = vrot.lane.b32.xlu2 %v467_v24, %s3998_s21 }
  0xee   : > { %546 = vrot.lane.b32.xlu1 %v541_v41, %s4002_s25 }
  0xf0   : > { %584 = vperm.xlu2 %3501, %v402_v26  }
  0xf6   : > { %453 = vrot.lane.b32.xlu1 %v4109_v20, %s3997_s20 }
  0xfe   : > { %589 = vperm.xlu1 %3500, %v403_v58  }
 0x102   : > { %v4143_v49 = vpop.permute.xlu2 %3466 }
 0x103   : > { %v3469_v16 = vunpack.i.h.bf16 %v4143_v49  ;;  %v3468_v17 = vunpack.i.l.bf16 %v4143_v49 }
 0x105   : > { %v456_v25 = vsel %vm5148_vm13, %v3468_v17, %v3469_v16 }
 0x106   : > { %682 = vperm.xlu1 %3500, %v406_v10  }
 0x122   : > { %v4145_v50 = vpop.permute.xlu2 %3486  ;;  %v4154_v55 = vpop.permute.xlu0 %3471 }
 0x123   : > { %v3489_v62 = vunpack.i.h.bf16 %v4145_v50  ;;  %v3488_v63 = vunpack.i.l.bf16 %v4145_v50  ;;  %v3474_v3 = vunpack.i.h.bf16 %v4154_v55  ;;  %v3473_v5 = vunpack.i.l.bf16 %v4154_v55 }
 0x125   : > { %v530_v18 = vsel %vm529_vm9, %v3488_v63, %v3489_v62  ;;  %v475_v23 = vsel %vm5149_vm12, %v3473_v5, %v3474_v3  ;;  %v404_v63 = vld [vmem:[%s5135_s4] sm:$0xff] }
 0x126   : > { %v573_v27 = vsel %vm569_vm6, %v456_v25, %v475_v23 }
 0x12a   : > { %v4147_v51 = vpop.permute.xlu2 %3491  ;;  %v3477_v61 = vpop.permute.xlu0 %3476 }
 0x12b   : > { %v3494_v59 = vunpack.i.h.bf16 %v4147_v51  ;;  %v3493_v60 = vunpack.i.l.bf16 %v4147_v51  ;;  %v3479_v6 = vunpack.i.h.bf16 %v3477_v61  ;;  %v3478_v7 = vunpack.i.l.bf16 %v3477_v61 }
 0x12d   : > { %v549_v9 = vsel %vm5153_vm7, %v3493_v60, %v3494_v59  ;;  %v493_v22 = vsel %vm5151_vm11, %v3478_v7, %v3479_v6 }
 0x12e   : > { %v579_v20 = vsel %vm569_vm6, %v530_v18, %v549_v9  ;;  %v399_v18 = vld [vmem:[%s5132_s1] sm:$0x7] }
 0x132   : > { %v4149_v52 = vpop.permute.xlu2 %490  ;;  %v4152_v54 = vpop.permute.xlu1 %3481 }
 0x133   : > { %v3484_v1 = vunpack.i.h.bf16 %v4152_v54  ;;  %v3483_v2 = vunpack.i.l.bf16 %v4152_v54  ;;  %v494_v41 = vsel %vm5151_vm11, %v3479_v6, %v4149_v52 }
 0x135   : > { %v512_v19 = vsel %vm5150_vm10, %v3483_v2, %v3484_v1 }
 0x136   : > { %v576_v24 = vsel %vm569_vm6, %v493_v22, %v512_v19  ;;  %v4244_v22 = vperm.slane %v399_v18, 0 }
 0x13a   : > { %v565_v53 = vpop.permute.xlu2 %564 }
 0x13b   : > { %3346 = vmatpush.msk.msra.mxu2 %vm569_vm6, %v565_v53 }
 0x13e   : > { %v528_v21 = vpop.permute.xlu0 %527 }
 0x13f   : > { %v531_v37 = vsel %vm529_vm9, %v3489_v62, %v528_v21 }
 0x142   : > { %v473_v44 = vpop.permute.xlu2 %472 }
 0x143   : > { %v476_v51 = vsel %vm5149_vm12, %v3474_v3, %v473_v44  ;;  %v405_v3 = vld [vmem:[%s5135_s4 + $0x8] sm:$0xff] }
 0x146   : > { %v510_v34 = vpop.permute.xlu0 %509 }
 0x147   : > { %v513_v39 = vsel %vm5150_vm10, %v3484_v1, %v510_v34 }
 0x148   : > { %v561_v56 = vpop.permute.xlu1 %560  ;;  %v577_v43 = vsel %vm569_vm6, %v494_v41, %v513_v39 }
 0x14a   : > { %v585_v57 = vpop.permute.xlu2 %584 }
 0x14e   : > { %v436_v45 = vpop.permute.xlu0 %435 }
 0x14f   : > { %v572_v54 = vsel %vm569_vm6, %v4100_v13, %v436_v45  ;;  %v407_v13 = vld [vmem:[%s5136_s5 + $0x8] sm:$0xff] }
 0x150   : > { %v563_v8 = vpop.permute.xlu1 %562  ;;  %687 = vperm.xlu0 %3502, %v407_v13  }
 0x151   : > { %v567_v14 = vsel %vm5154_vm8, %v561_v56, %v563_v8  ;;  %v568_v15 = vsel %vm5154_vm8, %v563_v8, %v565_v53 }
 0x152   : > { %3340 = vmatpush.msk.msra.mxu0 %vm569_vm6, %v567_v14  ;;  %3343 = vmatpush.msk.msra.mxu1 %vm569_vm6, %v568_v15 }
 0x154   : > { %617 = vmatpush.msra.mxu0 %v579_v20 }
 0x156   : > { %618 = vmatpush.msra.mxu0 %v576_v24 }
 0x158   : > { %v3497_v28 = vpop.permute.xlu1 %3496  ;;  %619 = vmatpush.msra.mxu0 %v573_v27 }
 0x159   : > { %v3499_v29 = vunpack.i.h.bf16 %v3497_v28  ;;  %v3498_v30 = vunpack.i.l.bf16 %v3497_v28 }
 0x15b   : > { %v438_v31 = vsel %vm5147_vm14, %v3498_v30, %v3499_v29 }
 0x15c   : > { %v570_v33 = vsel %vm569_vm6, %v4095_v11, %v438_v31  ;;  %v578_v11 = vsel %vm569_vm6, %v4149_v52, %v510_v34  ;;  %v439_v52 = vsel %vm5147_vm14, %v3499_v29, %v436_v45 }
 0x15d   : > { %620 = vmatpush.msra.mxu0 %v570_v33  ;;  %v571_v56 = vsel %vm569_vm6, %v4097_v12, %v439_v52  ;;  %v4248_v33 = vperm.slane %v399_v18, 2 }
 0x15e   : > { %3341 = vmatmul.msk.f32.vlgmr.msra.gmra.mxu0 %vm5142_vm15, %v400_v32 }
 0x160   : > { %v547_v35 = vpop.permute.xlu1 %546 }
 0x161   : > { %v581_v36 = vsel %vm569_vm6, %v528_v21, %v547_v35  ;;  %v550_v38 = vsel %vm5153_vm7, %v3494_v59, %v547_v35  ;;  %v4250_v35 = vperm.slane %v399_v18, 1 }
 0x162   : > { %663 = vmatpush.msra.mxu2 %v581_v36  ;;  %v580_v40 = vsel %vm569_vm6, %v531_v37, %v550_v38 }
 0x163   : > { %640 = vmatpush.msra.mxu1 %v580_v40 }
 0x164   : > { %664 = vmatpush.msra.mxu2 %v578_v11 }
 0x165   : > { %641 = vmatpush.msra.mxu1 %v577_v43 }
 0x166   : > { %3342 = vmatmul.msk.f32.gmra.mxu0 %vm5142_vm15, %v401_v42 }
 0x168   : > { %v454_v48 = vpop.permute.xlu1 %453 }
 0x169   : > { %v575_v49 = vsel %vm569_vm6, %v454_v48, %v473_v44  ;;  %v457_v50 = vsel %vm5148_vm13, %v3469_v16, %v454_v48 }
 0x16a   : > { %665 = vmatpush.msra.mxu2 %v575_v49  ;;  %v574_v53 = vsel %vm569_vm6, %v457_v50, %v476_v51 }
 0x16b   : > { %642 = vmatpush.msra.mxu1 %v574_v53 }
 0x16c   : > { %666 = vmatpush.msra.mxu2 %v572_v54 }
 0x16d   : > { %643 = vmatpush.msra.mxu1 %v571_v56  ;;  %3347 = vmatmul.msk.f32.vlgmr.msra.gmra.mxu2 %vm5142_vm15, %v400_v32 }
 0x16e   : > { %3344 = vmatmul.msk.f32.vlgmr.msra.gmra.mxu1 %vm5142_vm15, %v400_v32 }
 0x170   : > { %v590_v58 = vpop.permute.xlu1 %589 }
 0x175   : > { %3348 = vmatmul.msk.f32.gmra.mxu2 %vm5142_vm15, %v401_v42 }
 0x176   : > { %3345 = vmatmul.msk.f32.gmra.mxu1 %vm5142_vm15, %v401_v42  ;;  %vm5145_vm15 = vcmask 711680  }
 0x178   : > { %v683_v19 = vpop.permute.xlu1 %682 }
 0x1c2   : > { %v688_v28 = vpop.permute.xlu0 %687 }
 0x1db   : > { %v622_v55 = vpop.f32.mrf.mxu0 }
 0x1dc   : > { %v623_v61 = vadd.f32 %v622_v55, %v585_v57 }
 0x1de   : > { %v674_v62 = vmax.f32 %v623_v61, 0.0 }
 0x1e3   : > { %v625_v59 = vpop.f32.mrf.mxu0 }
 0x1e4   : > { %v626_v60 = vadd.f32 %v625_v59, %v590_v58 }
 0x1e6   : > { %v677_v12 = vmax.f32 %v626_v60, 0.0 }
 0x1e8   : > { %711 = vmatpush.msra.mxu3 %v677_v12 }
 0x1ea   : > { %712 = vmatpush.msra.mxu3 %v674_v62 }
 0x1eb   : > { %v645_v1 = vpop.f32.mrf.mxu1  ;;  %3349 = vmatmul.msk.f32.vlgmr.msra.gmra.mxu3 %vm5146_vm0, %v404_v63 }
 0x1ec   : > { %v646_v6 = vadd.f32 %v645_v1, %v585_v57  ;;  %v1214_v1 = vld.sshfl [vmem:[#allocation1] sm:$0xff pattern:$0x75316420] }
 0x1ee   : > { %v675_v9 = vmax.f32 %v646_v6, 0.0  ;;  %v1215_v6 = vld.sshfl [vmem:[#allocation1 + $0x8] sm:$0xff pattern:$0x75316420] }
 0x1f0   : > { %v668_v2 = vpop.f32.mrf.mxu2 }
 0x1f1   : > { %v669_v14 = vadd.f32 %v668_v2, %v585_v57 }
 0x1f3   : > { %v648_v5 = vpop.f32.mrf.mxu1  ;;  %3350 = vmatmul.msk.f32.gmra.mxu3 %vm5146_vm0, %v405_v3  ;;  %v676_v17 = vmax.f32 %v669_v14, 0.0 }
 0x1f4   : > { %v649_v7 = vadd.f32 %v648_v5, %v590_v58  ;;  %v1216_v5 = vld.sshfl [vmem:[#allocation1 + $0x10] sm:$0xff pattern:$0x75316420] }
 0x1f6   : > { %v678_v8 = vmax.f32 %v649_v7, 0.0  ;;  %v409_v7 = vld [vmem:[%s5138_s7] sm:$0xf] }
 0x1f8   : > { %v671_v10 = vpop.f32.mrf.mxu2  ;;  %734 = vmatpush.msrb.mxu3 %v678_v8 }
 0x1f9   : > { %v672_v15 = vadd.f32 %v671_v10, %v590_v58 }
 0x1fa   : > { %735 = vmatpush.msrb.mxu3 %v675_v9 }
 0x1fb   : > { %v679_v16 = vmax.f32 %v672_v15, 0.0  ;;  %3351 = vmatmul.msk.f32.vlgmr.msrb.gmra.mxu3 %vm5146_vm0, %v404_v63 }
 0x1fd   : > { %757 = vmatpush.msrb.mxu0 %v679_v16 }
 0x1ff   : > { %758 = vmatpush.msrb.mxu0 %v676_v17 }
 0x200   : > { %3353 = vmatmul.msk.f32.vlgmr.msrb.gmra.mxu0 %vm5146_vm0, %v404_v63 }
 0x203   : > { %3352 = vmatmul.msk.f32.gmra.mxu3 %vm5146_vm0, %v405_v3 }
 0x208   : > { %3354 = vmatmul.msk.f32.gmra.mxu0 %vm5146_vm0, %v405_v3 }
 0x26e   : > { %v714_v20 = vpop.f32.mrf.mxu3 }
 0x26f   : > { %v715_v21 = vadd.f32 %v714_v20, %v683_v19 }
 0x271   : > { %v766_v23 = vmax.f32 %v715_v21, 0.0 }
 0x273   : > { %v779_v24 = vmul.f32 %v4244_v22, %v766_v23 }
 0x275   : > { %791 = vrot.lane.b32.xlu0 %v779_v24, %s3996_s19 }
 0x276   : > { %v717_v25 = vpop.f32.mrf.mxu3 }
 0x277   : > { %v718_v37 = vadd.f32 %v717_v25, %v688_v28 }
 0x279   : > { %v769_v11 = vmax.f32 %v718_v37, 0.0 }
 0x27b   : > { %v782_v43 = vmul.f32 %v4244_v22, %v769_v11 }
 0x27d   : > { %v760_v26 = vpop.f32.mrf.mxu0 }
 0x27e   : > { %v737_v27 = vpop.f32.mrf.mxu3  ;;  %v761_v42 = vadd.f32 %v760_v26, %v683_v19 }
 0x27f   : > { %v738_v39 = vadd.f32 %v737_v27, %v683_v19 }
 0x280   : > { %v768_v45 = vmax.f32 %v761_v42, 0.0 }
 0x281   : > { %v767_v41 = vmax.f32 %v738_v39, 0.0 }
 0x282   : > { %v781_v48 = vmul.f32 %v4248_v33, %v768_v45 }
 0x283   : > { %v780_v44 = vmul.f32 %v4250_v35, %v767_v41 }
 0x285   : > { %v763_v29 = vpop.f32.mrf.mxu0 }
 0x286   : > { %v764_v30 = vadd.f32 %v763_v29, %v688_v28  ;;  %v740_v31 = vpop.f32.mrf.mxu3 }
 0x287   : > { %v741_v32 = vadd.f32 %v740_v31, %v688_v28 }
 0x288   : > { %v771_v34 = vmax.f32 %v764_v30, 0.0 }
 0x289   : > { %v770_v36 = vmax.f32 %v741_v32, 0.0 }
 0x28a   : > { %v784_v38 = vmul.f32 %v4248_v33, %v771_v34 }
 0x28b   : > { %v783_v40 = vmul.f32 %v4250_v35, %v770_v36 }
 0x28c   : > { %801 = vrot.lane.b32.xlu2 %v784_v38, %s3996_s19 }
 0x28d   : > { %799 = vrot.lane.b32.xlu1 %v783_v40, %s3996_s19 }
 0x294   : > { %797 = vrot.lane.b32.xlu2 %v782_v43, %s3996_s19 }
 0x295   : > { %793 = vrot.lane.b32.xlu1 %v780_v44, %s3996_s19 }
 0x29c   : > { %795 = vrot.lane.b32.xlu2 %v781_v48, %s3996_s19 }
 0x2e6   : > { %v802_v49 = vpop.permute.xlu2 %801 }
 0x2e7   : > { %v792_v50 = vpop.permute.xlu0 %791 }
 0x2e8   : > { %814 = vst.msk [vmem:[#allocation3] sm:$0xff] %vm5144_vm2, %v792_v50 }
 0x2ee   : > { %v798_v51 = vpop.permute.xlu2 %797 }
 0x2ef   : > { %818 = vst.msk [vmem:[#allocation3 + $0x18] sm:$0xff] %vm5144_vm2, %v798_v51  ;;  %v4266_v52 = vld [vmem:[#allocation3] sm:$0xff]  ;;  %vm1310_vm2 = vcmask 1041408  }
 0x2f6   : > { %v4268_v53 = vld [vmem:[#allocation3 + $0x18] sm:$0xff]  ;;  %v796_v55 = vpop.permute.xlu2 %795 }
 0x2f7   : > { %v3503_v54 = vpack.i.bf16 %v4266_v52, %v4268_v53 }
 0x2f9   : > { %3504 = vrot.lane.b32.xlu2 %v3503_v54, %s4002_s25 }
 0x2ff   : > { %v800_v56 = vpop.permute.xlu1 %799 }
 0x300   : > { %v806_v0 = vsel %vm388_vm3, %v800_v56, %v802_v49  ;;  %v4282_v13 = vsel %vm388_vm3, %v798_v51, %v800_v56 }
 0x301   : > { %820 = vst.msk [vmem:[#allocation3 + $0x28] sm:$0xff] %vm5145_vm15, %v806_v0  ;;  %3509 = vrot.lane.b32.xlu2 %v3503_v54, %s4001_s24  ;;  %v3583_v2 = vpack.i.bf16 %v4282_v13, %v4268_v53 }
 0x307   : > { %v794_v57 = vpop.permute.xlu1 %793 }
 0x308   : > { %v804_v58 = vsel %vm388_vm3, %v794_v57, %v796_v55  ;;  %v4279_v59 = vld [vmem:[#allocation3 + $0x28] sm:$0xff]  ;;  %v4287_v61 = vsel %vm388_vm3, %v792_v50, %v794_v57 }
 0x309   : > { %817 = vst.msk [vmem:[#allocation3 + $0x10] sm:$0xff] %vm5145_vm15, %v804_v58  ;;  %3514 = vrot.lane.b32.xlu2 %v3503_v54, %s4000_s23  ;;  %v3558_v60 = vpack.i.bf16 %v4279_v59, %v4282_v13  ;;  %v3553_v63 = vpack.i.bf16 %v4287_v61, %v4266_v52 }
 0x310   : > { %v4289_v12 = vld [vmem:[#allocation3 + $0x10] sm:$0xff] }
 0x311   : > { %3559 = vrot.lane.b32.xlu2 %v3558_v60, %s4001_s24  ;;  %v3523_v62 = vpack.i.bf16 %v4289_v12, %v4287_v61  ;;  %v3608_v3 = vpack.i.bf16 %v4289_v12, %v4279_v59 }
 0x313   : > { %3524 = vrot.lane.b32.xlu0 %v3523_v62, %s4001_s24  ;;  %3519 = vrot.lane.b32.xlu1 %v3523_v62, %s4002_s25 }
 0x319   : > { %3564 = vrot.lane.b32.xlu2 %v3523_v62, %s3997_s20 }
 0x31b   : > { %3529 = vrot.lane.b32.xlu0 %v3523_v62, %s4000_s23  ;;  %3554 = vrot.lane.b32.xlu1 %v3553_v63, %s4003_s28 }
 0x321   : > { %3594 = vrot.lane.b32.xlu2 %v3558_v60, %s3997_s20 }
 0x323   : > { %3534 = vrot.lane.b32.xlu0 %v3523_v62, %s3999_s22  ;;  %3569 = vrot.lane.b32.xlu1 %v3558_v60, %s4000_s23 }
 0x329   : > { %3599 = vrot.lane.b32.xlu2 %v3523_v62, %s4004_s29 }
 0x32b   : > { %3539 = vrot.lane.b32.xlu0 %v3558_v60, %s4002_s25  ;;  %3574 = vrot.lane.b32.xlu1 %v3558_v60, %s3999_s22 }
 0x331   : > { %3619 = vrot.lane.b32.xlu2 %v3503_v54, %s4004_s29 }
 0x333   : > { %3544 = vrot.lane.b32.xlu0 %v3523_v62, %s3998_s21  ;;  %3579 = vrot.lane.b32.xlu1 %v3558_v60, %s3998_s21 }
 0x339   : > { %1217 = vrot.lane.b32.xlu2 %v1214_v1, %s3999_s22 }
 0x33b   : > { %3549 = vrot.lane.b32.xlu0 %v3503_v54, %s3999_s22  ;;  %3584 = vrot.lane.b32.xlu1 %v3583_v2, %s4003_s28 }
 0x343   : > { %3604 = vrot.lane.b32.xlu0 %v3558_v60, %s4004_s29  ;;  %3589 = vrot.lane.b32.xlu1 %v3503_v54, %s3998_s21 }
 0x34b   : > { %3609 = vrot.lane.b32.xlu0 %v3608_v3, %s4003_s28  ;;  %3614 = vrot.lane.b32.xlu1 %v3503_v54, %s3997_s20 }
 0x353   : > { %1219 = vrot.lane.b32.xlu0 %v1215_v6, %s3999_s22  ;;  %1221 = vrot.lane.b32.xlu1 %v1216_v5, %s3999_s22  ;;  %v3505_v8 = vpop.permute.xlu2 %3504 }
 0x354   : > { %v3506_v21 = vunpack.i.l.bf16 %v3505_v8  ;;  %v3507_v29 = vunpack.i.h.bf16 %v3505_v8 }
 0x35b   : > { %1011 = vperm.xlu0 %3502, %v409_v7   ;;  %v3510_v9 = vpop.permute.xlu2 %3509 }
 0x35c   : > { %v3511_v37 = vunpack.i.l.bf16 %v3510_v9  ;;  %v3512_v41 = vunpack.i.h.bf16 %v3510_v9 }
 0x363   : > { %v3515_v15 = vpop.permute.xlu2 %3514 }
 0x364   : > { %v3516_v48 = vunpack.i.l.bf16 %v3515_v15  ;;  %v3517_v55 = vunpack.i.h.bf16 %v3515_v15 }
 0x36b   : > { %v3560_v20 = vpop.permute.xlu2 %3559 }
 0x36c   : > { %v3562_v30 = vunpack.i.h.bf16 %v3560_v20  ;;  %v3561_v31 = vunpack.i.l.bf16 %v3560_v20 }
 0x36e   : > { %v957_v44 = vsel %vm529_vm9, %v3511_v37, %v3561_v31  ;;  %v958_v45 = vsel %vm529_vm9, %v3561_v31, %v3562_v30 }
 0x373   : > { %v4332_v32 = vpop.permute.xlu2 %3564 }
 0x37b   : > { %v4352_v2 = vpop.permute.xlu2 %3594 }
 0x385   : > { %v3525_v10 = vpop.permute.xlu0 %3524  ;;  %v3520_v14 = vpop.permute.xlu1 %3519 }
 0x386   : > { %v3522_v25 = vunpack.i.h.bf16 %v3520_v14  ;;  %v3521_v26 = vunpack.i.l.bf16 %v3520_v14  ;;  %v3527_v38 = vunpack.i.h.bf16 %v3525_v10  ;;  %v3526_v39 = vunpack.i.l.bf16 %v3525_v10 }
 0x388   : > { %v977_v40 = vsel %vm5153_vm7, %v3507_v29, %v3521_v26  ;;  %v978_v11 = vsel %vm5153_vm7, %v3521_v26, %v3522_v25  ;;  %v955_v56 = vsel %vm529_vm9, %v3512_v41, %v3526_v39  ;;  %v956_v0 = vsel %vm529_vm9, %v3526_v39, %v3527_v38 }
 0x38d   : > { %v3530_v16 = vpop.permute.xlu0 %3529  ;;  %v4326_v17 = vpop.permute.xlu1 %3554 }
 0x38e   : > { %v3532_v51 = vunpack.i.h.bf16 %v3530_v16  ;;  %v3531_v54 = vunpack.i.l.bf16 %v3530_v16  ;;  %v3557_v6 = vunpack.i.h.bf16 %v4326_v17  ;;  %v3556_v8 = vunpack.i.l.bf16 %v4326_v17 }
 0x390   : > { %v933_v3 = vsel %vm5150_vm10, %v3517_v55, %v3531_v54  ;;  %v934_v5 = vsel %vm5150_vm10, %v3531_v54, %v3532_v51  ;;  %v999_v31 = vsel %vm5154_vm8, %v3556_v8, %v3557_v6 }
 0x395   : > { %v4328_v18 = vpop.permute.xlu0 %3534  ;;  %v3570_v19 = vpop.permute.xlu1 %3569 }
 0x396   : > { %v3572_v42 = vunpack.i.h.bf16 %v3570_v19  ;;  %v3571_v43 = vunpack.i.l.bf16 %v3570_v19  ;;  %v3537_v63 = vunpack.i.h.bf16 %v4328_v18  ;;  %v3536_v1 = vunpack.i.l.bf16 %v4328_v18 }
 0x398   : > { %v935_v60 = vsel %vm5150_vm10, %v3516_v48, %v3571_v43  ;;  %v936_v62 = vsel %vm5150_vm10, %v3571_v43, %v3572_v42  ;;  %v912_v16 = vsel %vm5151_vm11, %v3536_v1, %v3537_v63 }
 0x39d   : > { %v3540_v23 = vpop.permute.xlu0 %3539  ;;  %v4330_v24 = vpop.permute.xlu1 %3574 }
 0x39e   : > { %v3542_v27 = vunpack.i.h.bf16 %v3540_v23  ;;  %v3541_v28 = vunpack.i.l.bf16 %v3540_v23  ;;  %v3577_v57 = vunpack.i.h.bf16 %v4330_v24  ;;  %v3576_v58 = vunpack.i.l.bf16 %v4330_v24 }
 0x3a0   : > { %1101 = vmatpush.msra.mxu0 %v3542_v27  ;;  %v979_v34 = vsel %vm5153_vm7, %v3506_v21, %v3541_v28  ;;  %v980_v36 = vsel %vm5153_vm7, %v3541_v28, %v3542_v27  ;;  %v914_v7 = vsel %vm5151_vm11, %v3576_v58, %v3577_v57  ;;  %v3597_v27 = vunpack.i.h.bf16 %v4352_v2 }
 0x3a1   : > { %1021 = vmatpush.msrb.mxu1 %v979_v34  ;;  %1061 = vmatpush.msra.mxu3 %v980_v36  ;;  %v3596_v28 = vunpack.i.l.bf16 %v4352_v2  ;;  %v3567_v34 = vunpack.i.h.bf16 %v4332_v32  ;;  %v3566_v36 = vunpack.i.l.bf16 %v4332_v32 }
 0x3a2   : > { %1102 = vmatpush.msra.mxu0 %v3522_v25 }
 0x3a3   : > { %1022 = vmatpush.msrb.mxu1 %v977_v40  ;;  %1062 = vmatpush.msra.mxu3 %v978_v11  ;;  %v870_v11 = vsel %vm5148_vm13, %v3596_v28, %v3597_v27  ;;  %v868_v48 = vsel %vm5148_vm13, %v3566_v36, %v3567_v34 }
 0x3a4   : > { %1103 = vmatpush.msra.mxu0 %v3562_v30 }
 0x3a5   : > { %v4340_v49 = vpop.permute.xlu0 %3544  ;;  %v4342_v50 = vpop.permute.xlu1 %3579  ;;  %1023 = vmatpush.msrb.mxu1 %v957_v44  ;;  %1063 = vmatpush.msra.mxu3 %v958_v45 }
 0x3a6   : > { %1104 = vmatpush.msra.mxu0 %v3527_v38  ;;  %v3582_v9 = vunpack.i.h.bf16 %v4342_v50  ;;  %v3581_v10 = vunpack.i.l.bf16 %v4342_v50  ;;  %v3547_v23 = vunpack.i.h.bf16 %v4340_v49  ;;  %v3546_v24 = vunpack.i.l.bf16 %v4340_v49  ;;  %v3600_v38 = vpop.permute.xlu2 %3599 }
 0x3a7   : > { %1024 = vmatpush.msrb.mxu1 %v955_v56  ;;  %1064 = vmatpush.msra.mxu3 %v956_v0  ;;  %v3602_v32 = vunpack.i.h.bf16 %v3600_v38  ;;  %v3601_v45 = vunpack.i.l.bf16 %v3600_v38 }
 0x3a8   : > { %1105 = vmatpush.msra.mxu0 %v3572_v42  ;;  %v892_v29 = vsel %vm5149_vm12, %v3581_v10, %v3582_v9  ;;  %v890_v37 = vsel %vm5149_vm12, %v3546_v24, %v3547_v23 }
 0x3a9   : > { %1025 = vmatpush.msrb.mxu1 %v935_v60  ;;  %1065 = vmatpush.msra.mxu3 %v936_v62  ;;  %v846_v54 = vsel %vm5147_vm14, %v3601_v45, %v3602_v32 }
 0x3aa   : > { %1106 = vmatpush.msra.mxu0 %v3532_v51 }
 0x3ab   : > { %1026 = vmatpush.msrb.mxu1 %v933_v3  ;;  %1066 = vmatpush.msra.mxu3 %v934_v5 }
 0x3ac   : > { %1107 = vmatpush.msra.mxu0 %v3577_v57 }
 0x3ad   : > { %v3550_v14 = vpop.permute.xlu0 %3549  ;;  %v4361_v15 = vpop.permute.xlu1 %3584  ;;  %1067 = vmatpush.msra.mxu3 %v914_v7 }
 0x3ae   : > { %v3552_v18 = vunpack.i.h.bf16 %v3550_v14  ;;  %v3551_v19 = vunpack.i.l.bf16 %v3550_v14  ;;  %v3587_v20 = vunpack.i.h.bf16 %v4361_v15  ;;  %v3586_v21 = vunpack.i.l.bf16 %v4361_v15  ;;  %1108 = vmatpush.msra.mxu0 %v3537_v63  ;;  %v3620_v60 = vpop.permute.xlu2 %3619 }
 0x3af   : > { %1068 = vmatpush.msra.mxu3 %v912_v16  ;;  %v3621_v2 = vunpack.i.l.bf16 %v3620_v60 }
 0x3b0   : > { %1109 = vmatpush.msra.mxu0 %v3582_v9  ;;  %v913_v25 = vsel %vm5151_vm11, %v3551_v19, %v3576_v58  ;;  %v1001_v26 = vsel %vm5154_vm8, %v3586_v21, %v3587_v20  ;;  %v911_v30 = vsel %vm5151_vm11, %v3552_v18, %v3536_v1  ;;  %v3622_v1 = vunpack.i.h.bf16 %v3620_v60  ;;  %v410_v9 = vld [vmem:[%s5139_s8] sm:$0xf] }
 0x3b1   : > { %1027 = vmatpush.msrb.mxu1 %v913_v25  ;;  %1055 = vmatpush.msrb.mxu2 %v1001_v26 }
 0x3b2   : > { %1069 = vmatpush.msra.mxu3 %v892_v29  ;;  %1110 = vmatpush.msra.mxu0 %v3547_v23  ;;  %v845_v8 = vsel %vm5147_vm14, %v3622_v1, %v3601_v45 }
 0x3b3   : > { %1028 = vmatpush.msrb.mxu1 %v911_v30  ;;  %1056 = vmatpush.msrb.mxu2 %v999_v31 }
 0x3b4   : > { %1070 = vmatpush.msra.mxu3 %v890_v37  ;;  %3355 = vmatmul.msk.f32.vlgmr.msrb.gmra.mxu2 %vm5146_vm0, %v4131_v47 }
 0x3b5   : > { %1111 = vmatpush.msra.mxu0 %v3597_v27  ;;  %v3605_v39 = vpop.permute.xlu0 %3604  ;;  %v3590_v40 = vpop.permute.xlu1 %3589 }
 0x3b6   : > { %v3607_v41 = vunpack.i.h.bf16 %v3605_v39  ;;  %v3606_v42 = vunpack.i.l.bf16 %v3605_v39  ;;  %v3592_v43 = vunpack.i.h.bf16 %v3590_v40  ;;  %v3591_v44 = vunpack.i.l.bf16 %v3590_v40  ;;  %1071 = vmatpush.msra.mxu3 %v870_v11  ;;  %v1218_v17 = vpop.permute.xlu2 %1217 }
 0x3b7   : > { %1112 = vmatpush.msra.mxu0 %v3567_v34 }
 0x3b8   : > { %1072 = vmatpush.msra.mxu3 %v868_v48  ;;  %v891_v49 = vsel %vm5149_vm12, %v3591_v44, %v3581_v10  ;;  %v848_v50 = vsel %vm5147_vm14, %v3606_v42, %v3607_v41  ;;  %v889_v51 = vsel %vm5149_vm12, %v3592_v43, %v3546_v24 }
 0x3b9   : > { %1113 = vmatpush.msra.mxu0 %v3607_v41  ;;  %1029 = vmatpush.msrb.mxu1 %v891_v49 }
 0x3ba   : > { %1073 = vmatpush.msra.mxu3 %v848_v50 }
 0x3bb   : > { %1114 = vmatpush.msra.mxu0 %v3602_v32  ;;  %1030 = vmatpush.msrb.mxu1 %v889_v51 }
 0x3bc   : > { %1074 = vmatpush.msra.mxu3 %v846_v54 }
 0x3bd   : > { %1115 = vmatpush.msra.mxu0 %v4279_v59  ;;  %v3610_v56 = vpop.permute.xlu0 %3609  ;;  %v3615_v0 = vpop.permute.xlu1 %3614 }
 0x3be   : > { %v3611_v55 = vunpack.i.l.bf16 %v3610_v56  ;;  %v3617_v57 = vunpack.i.h.bf16 %v3615_v0  ;;  %v3616_v58 = vunpack.i.l.bf16 %v3615_v0  ;;  %1075 = vmatpush.msra.mxu3 %v4282_v13  ;;  %v3612_v62 = vunpack.i.h.bf16 %v3610_v56 }
 0x3bf   : > { %1116 = vmatpush.msra.mxu0 %v4289_v12  ;;  %v847_v12 = vsel %vm5147_vm14, %v3621_v2, %v3606_v42 }
 0x3c0   : > { %1076 = vmatpush.msra.mxu3 %v4287_v61  ;;  %1117 = vmatmul.f32.vlgmr.msra.gmra.mxu0 %v4129_v46  ;;  %v869_v63 = vsel %vm5148_vm13, %v3616_v58, %v3596_v28  ;;  %v1002_v59 = vsel %vm5154_vm8, %v3587_v20, %v3611_v55  ;;  %v867_v13 = vsel %vm5148_vm13, %v3617_v57, %v3566_v36 }
 0x3c1   : > { %1077 = vmatmul.f32.vlgmr.msra.gmra.mxu3 %v4129_v46  ;;  %1031 = vmatpush.msrb.mxu1 %v869_v63  ;;  %v1000_v61 = vsel %vm5154_vm8, %v3557_v6, %v3612_v62 }
 0x3c2   : > { %1095 = vmatpush.msra.mxu2 %v1002_v59 }
 0x3c3   : > { %1032 = vmatpush.msrb.mxu1 %v867_v13 }
 0x3c4   : > { %1096 = vmatpush.msra.mxu2 %v1000_v61 }
 0x3c5   : > { %3356 = vmatmul.msk.f32.vlgmr.msra.gmra.mxu2 %vm5146_vm0, %v4131_v47  ;;  %v1220_v3 = vpop.permute.xlu0 %1219  ;;  %v1222_v5 = vpop.permute.xlu1 %1221  ;;  %1033 = vmatpush.msrb.mxu1 %v847_v12 }
 0x3c6   : > { %1135 = vmatpush.msrb.mxu2 %v3611_v55  ;;  %v1224_v7 = vsel %vm5151_vm11, %v1220_v3, %v1222_v5  ;;  %v1223_v6 = vsel %vm5151_vm11, %v1218_v17, %v1220_v3 }
 0x3c7   : > { %1034 = vmatpush.msrb.mxu1 %v845_v8 }
 0x3c8   : > { %1136 = vmatpush.msrb.mxu2 %v3612_v62 }
 0x3c9   : > { %1035 = vmatpush.msrb.mxu1 %v4268_v53 }
 0x3ca   : > { %3363 = vmatpush.msk.msra.mxu2 %vm569_vm6, %v1224_v7 }
 0x3cb   : > { %1036 = vmatpush.msrb.mxu1 %v4266_v52 }
 0x3cc   : > { %1037 = vmatmul.f32.vlgmr.msrb.gmra.mxu1 %v4129_v46 }
 0x3cd   : > { %3357 = vmatmul.msk.f32.vlgmr.msrb.gmra.mxu2 %vm5146_vm0, %v4131_v47  ;;  %3361 = vmatpush.msk.msra.mxu1 %vm569_vm6, %v1223_v6  ;;  %v1012_v53 = vpop.permute.xlu0 %1011 }
 0x3cf   : > { %3365 = vmatpush.msk.msrb.mxu1 %vm569_vm6, %v1222_v5 }
 0x3d4   : > { %3362 = vmatmul.msk.f32.vlgmr.msra.gmra.mxu1 %vm5143_vm1, %v410_v9 }
 0x3d5   : > { %3364 = vmatmul.msk.f32.vlgmr.msra.gmra.mxu2 %vm5143_vm1, %v410_v9 }
 0x3dc   : > { %3366 = vmatmul.msk.f32.vlgmr.msrb.gmra.mxu1 %vm5143_vm1, %v410_v9 }
 0x437   : > { %v1058_v52 = vpop.f32.mrf.mxu2 }
 0x43d   : > { %v1118_v19 = vpop.f32.mrf.mxu0 }
 0x43e   : > { %v1119_v24 = vadd.f32 %v1118_v19, %v1012_v53 }
 0x444   : > { %v1078_v46 = vpop.f32.mrf.mxu3 }
 0x445   : > { %v1079_v10 = vadd.f32 %v1078_v46, %v1012_v53 }
 0x448   : > { %v1098_v47 = vpop.f32.mrf.mxu2 }
 0x449   : > { %v1099_v14 = vadd.f32 %v1098_v47, %v1079_v10  ;;  %v1038_v15 = vpop.f32.mrf.mxu1 }
 0x44a   : > { %v1039_v16 = vadd.f32 %v1038_v15, %v1012_v53 }
 0x44b   : > { %v1142_v18 = vadd.f32 2.0, %v1099_v14  ;;  %v1299_v48 = vrot.slane %v1099_v14, 6 }
 0x44c   : > { %v1059_v20 = vadd.f32 %v1058_v52, %v1039_v16 }
 0x44d   : > { %v3359_v21 = vmul.f32 -1.442695, %v1142_v18 }
 0x44e   : > { %v1141_v23 = vadd.f32 2.0, %v1059_v20  ;;  %v1298_v54 = vrot.slane %v1059_v20, 6 }
 0x44f   : > { %3933 = vpow2.f32 %v3359_v21 }
 0x450   : > { %v3358_v25 = vmul.f32 -1.442695, %v1141_v23  ;;  %v1138_v26 = vpop.f32.mrf.mxu2 }
 0x451   : > { %v4424_v27 = vadd.f32 %v1138_v26, %v1119_v24  ;;  %v1252_v41 = vpop.f32.mrf.mxu1 }
 0x452   : > { %3935 = vpow2.f32 %v3358_v25  ;;  %v1304_v1 = vadd.f32 %v1298_v54, %v1252_v41 }
 0x453   : > { %v1143_v28 = vadd.f32 2.0, %v4424_v27  ;;  %v1300_v52 = vrot.slane %v4424_v27, 6 }
 0x455   : > { %v3934_v29 = vpop.eup %3933  ;;  %v3360_v30 = vmul.f32 -1.442695, %v1143_v28 }
 0x456   : > { %v1154_v31 = vadd.f32 1.0, %v3934_v29 }
 0x457   : > { %3937 = vpow2.f32 %v3360_v30 }
 0x458   : > { %v3936_v34 = vpop.eup %3935  ;;  %3939 = vrcp.f32 %v1154_v31  ;;  %v1182_v44 = vand.u32 2147483648, %v1154_v31  ;;  %v1180_v45 = vand.u32 2147483647, %v1154_v31  ;;  %v1272_v50 = vpop.f32.mrf.mxu2  ;;  %vm1176_vm15 = vweird.f32 %v1154_v31 }
 0x459   : > { %v1153_v36 = vadd.f32 1.0, %v3936_v34  ;;  %v1305_v62 = vadd.f32 %v1299_v48, %v1272_v50  ;;  %v1292_v9 = vpop.f32.mrf.mxu1 }
 0x45a   : > { %v1183_v58 = vor.u32 1.1754944e-38, %v1182_v44  ;;  %vm1181_vm13 = vcmp.eq.f32.partialorder %v1180_v45, 8.507059e+37  ;;  %v1306_v15 = vadd.f32 %v1300_v52, %v1292_v9 }
 0x45b   : > { %3941 = vrcp.f32 %v1153_v36  ;;  %v1167_v51 = vand.u32 2147483648, %v1153_v36  ;;  %v1165_v57 = vand.u32 2147483647, %v1153_v36  ;;  %vm1161_vm12 = vweird.f32 %v1153_v36 }
 0x45d   : > { %v3938_v37 = vpop.eup %3937  ;;  %v1168_v13 = vor.u32 1.1754944e-38, %v1167_v51  ;;  %vm1166_vm11 = vcmp.eq.f32.partialorder %v1165_v57, 8.507059e+37 }
 0x45e   : > { %v3940_v38 = vpop.eup %3939  ;;  %v1155_v39 = vadd.f32 1.0, %v3938_v37 }
 0x45f   : > { %v1172_v40 = vmul.f32 %v3940_v38, %v1154_v31  ;;  %vm1177_vm1 = vweird.f32 %v3940_v38 }
 0x460   : > { %3943 = vrcp.f32 %v1155_v39  ;;  %vm1178_vm14 = vmor %vm1176_vm15, %vm1177_vm1  ;;  %v1195_v5 = vand.u32 2147483647, %v1155_v39  ;;  %v1197_v7 = vand.u32 2147483648, %v1155_v39  ;;  %vm1340_vm15 = vcmask 551938  }
 0x461   : > { %v3942_v11 = vpop.eup %3941  ;;  %v1173_v42 = vsub.f32 1.0, %v1172_v40  ;;  %vm5158_vm1 = vcmask 883712  }
 0x462   : > { %v1157_v43 = vmul.f32 %v3942_v11, %v1153_v36  ;;  %vm1162_vm0 = vweird.f32 %v3942_v11  ;;  %v1198_v14 = vor.u32 1.1754944e-38, %v1197_v7 }
 0x463   : > { %v1174_v32 = vmul.f32 %v3940_v38, %v1173_v42  ;;  %vm1163_vm10 = vmor %vm1161_vm12, %vm1162_vm0  ;;  %vm1191_vm12 = vweird.f32 %v1155_v39  ;;  %vm5157_vm0 = vcmask 891904  }
 0x464   : > { %v1158_v49 = vsub.f32 1.0, %v1157_v43 }
 0x465   : > { %v1175_v56 = vadd.f32 %v3940_v38, %v1174_v32 }
 0x466   : > { %v3944_v0 = vpop.eup %3943  ;;  %v1159_v55 = vmul.f32 %v3942_v11, %v1158_v49 }
 0x467   : > { %v1179_v60 = vsel %vm1178_vm14, %v3940_v38, %v1175_v56  ;;  %v1187_v63 = vmul.f32 %v3944_v0, %v1155_v39  ;;  %vm1192_vm14 = vweird.f32 %v3944_v0 }
 0x468   : > { %v1160_v59 = vadd.f32 %v3942_v11, %v1159_v55  ;;  %v1184_v2 = vsel %vm1181_vm13, %v1183_v58, %v1179_v60  ;;  %vm1336_vm13 = vcmask 1043458  }
 0x469   : > { %3945 = vlog2.f32 %v1184_v2  ;;  %v1308_v61 = vmul.f32 %v1305_v62, %v1184_v2  ;;  %v1188_v12 = vsub.f32 1.0, %v1187_v63 }
 0x46a   : > { %v1164_v3 = vsel %vm1163_vm10, %v3942_v11, %v1160_v59  ;;  %vm1193_vm10 = vmor %vm1191_vm12, %vm1192_vm14  ;;  %vm5159_vm14 = vcmask 900096   ;;  %vm5160_vm12 = vcmask 1031168  }
 0x46b   : > { %v1169_v8 = vsel %vm1166_vm11, %v1168_v13, %v1164_v3  ;;  %v1312_v17 = vsel %vm1310_vm2, %v1272_v50, %v1308_v61  ;;  %v1189_v6 = vmul.f32 %v3944_v0, %v1188_v12  ;;  %vm1196_vm11 = vcmp.eq.f32.partialorder %v1195_v5, 8.507059e+37 }
 0x46c   : > { %3947 = vlog2.f32 %v1169_v8  ;;  %v1307_v46 = vmul.f32 %v1304_v1, %v1169_v8  ;;  %v1315_v53 = vmul.f32 %v1312_v17, %v4250_v35 }
 0x46d   : > { %v1190_v10 = vadd.f32 %v3944_v0, %v1189_v6 }
 0x46e   : > { %v1311_v47 = vsel %vm1310_vm2, %v1252_v41, %v1307_v46  ;;  %v1320_v19 = vrot.slane %v1315_v53, 4 }
 0x46f   : > { %v3946_v16 = vpop.eup %3945  ;;  %v1314_v18 = vmul.f32 %v1311_v47, %v4244_v22  ;;  %v1194_v20 = vsel %vm1193_vm10, %v3944_v0, %v1190_v10  ;;  %vm5161_vm10 = vcmask 1039360  }
 0x470   : > { %v1204_v21 = vmul.f32 0.6931472, %v3946_v16  ;;  %v1199_v23 = vsel %vm1196_vm11, %v1198_v14, %v1194_v20  ;;  %v3375_v16 = vld [vmem:[%s5137_s6 + $0x8] sm:$0xff]  ;;  %vm5162_vm11 = vcmask 293888  }
 0x471   : > { %3949 = vlog2.f32 %v1199_v23  ;;  %v1309_v24 = vmul.f32 %v1306_v15, %v1199_v23  ;;  %v1321_v25 = vsel %vm569_vm6, %v1314_v18, %v1320_v19 }
 0x472   : > { %v3948_v26 = vpop.eup %3947  ;;  %1322 = vrot.lane.b32.xlu1 %v1321_v25, %s3996_s19  ;;  %v1334_v29 = vmul.f32 %v1204_v21, %v4250_v35  ;;  %v3370_v25 = vld [vmem:[%s5134_s3 + $0x18] sm:$0xff] }
 0x473   : > { %v1202_v27 = vmul.f32 0.6931472, %v3948_v26  ;;  %v1313_v28 = vsel %vm1310_vm2, %v1292_v9, %v1309_v24  ;;  %v3374_v26 = vld [vmem:[%s5136_s5 + $0x18] sm:$0xff] }
 0x474   : > { %v1316_v30 = vmul.f32 %v1313_v28, %v4248_v33  ;;  %v1338_v37 = vsel %vm1336_vm13, %v1334_v29, 0.0  ;;  %v3373_v28 = vld [vmem:[%s5136_s5 + $0x10] sm:$0xff] }
 0x475   : > { %v1333_v31 = vmul.f32 %v1202_v27, %v4244_v22  ;;  %v3369_v27 = vld [vmem:[%s5134_s3 + $0x10] sm:$0xff] }
 0x476   : > { %1324 = vrot.lane.b32.xlu2 %v1316_v30, %s3996_s19 }
 0x477   : > { %v3950_v34 = vpop.eup %3949  ;;  %v1337_v36 = vsel %vm1336_vm13, %v1333_v31, 0.0 }
 0x478   : > { %v1206_v38 = vmul.f32 0.6931472, %v3950_v34  ;;  %v1339_v39 = vadd.f32 %v1338_v37, %v1337_v36 }
 0x47a   : > { %v1335_v40 = vmul.f32 %v1206_v38, %v4248_v33 }
 0x47c   : > { %v1341_v11 = vsel %vm1340_vm15, %v1335_v40, 0.0 }
 0x47d   : > { %v4443_v41 = vadd.f32 %v1341_v11, %v1339_v39 }
 0x4d0   : > { %v1325_v44 = vpop.permute.xlu2 %1324 }
 0x4e4   : > { %v1323_v42 = vpop.permute.xlu1 %1322 }
 0x4e5   : > { %v1326_v43 = vrot.slane %v1323_v42, 4 }
 0x4e7   : > { %v1327_v32 = vsel %vm388_vm3, %v1326_v43, %v1323_v42  ;;  %v1328_v45 = vsel %vm388_vm3, %v1326_v43, %v1325_v44 }
 0x4e8   : > { %1331 = vst.msk [vmem:[#allocation2] sm:$0xff] %vm4083_vm4, %v1327_v32 }
 0x4e9   : > { %1332 = vst.msk [vmem:[#allocation2 + $0x8] sm:$0xf] %vm5152_vm5, %v1328_v45 }
 0x4ef   : > { %v4450_v48 = vld [vmem:[#allocation2] sm:$0xff] }
 0x4f0   : > { %v1375_v49 = vld [vmem:[#allocation2 + $0x8] sm:$0xf]  ;;  %1378 = vst [vmem:[#allocation1] ss:$2 sm:$0xff] %v4450_v48 }
 0x4f1   : > { %1380 = vst [vmem:[#allocation1 + $0x10] ss:$2 sm:$0xff] %v1375_v49  ;;  %v2151_v18 = vld [vmem:[#allocation2 + $0x8] sm:$0xf] }
 0x4f7   : > { %v4453_v50 = vld.sshfl [vmem:[#allocation1] sm:$0xff pattern:$0x75316420]  ;;  %v4455_v51 = vld.sshfl [vmem:[#allocation1 + $0x8] sm:$0xff pattern:$0x75316420] }
 0x4f8   : > { %v4457_v54 = vld.sshfl [vmem:[#allocation1 + $0x10] sm:$0xff pattern:$0x75316420]  ;;  %1388 = vst [vmem:[#allocation1 + $0x1] ss:$2 sm:$0xff] %v4450_v48 }
 0x4f9   : > { %1390 = vst [vmem:[#allocation1 + $0x11] ss:$2 sm:$0xff] %v1375_v49 }
 0x4ff   : > { %v4460_v56 = vld.sshfl [vmem:[#allocation1] sm:$0xff pattern:$0x75316420]  ;;  %v1392_v0 = vld.sshfl [vmem:[#allocation1 + $0x8] sm:$0xff pattern:$0x75316420] }
 0x500   : > { %v1393_v55 = vld.sshfl [vmem:[#allocation1 + $0x10] sm:$0xff pattern:$0x75316420]  ;;  %1405 = vst [vmem:[#allocation1] ss:$2 sm:$0xff] %v4450_v48 }
 0x501   : > { %1407 = vst [vmem:[#allocation1 + $0x10] ss:$2 sm:$0xff] %v1375_v49  ;;  %v3623_v57 = vpack.i.bf16 %v1393_v55, %v1392_v0 }
 0x503   : > { %3624 = vrot.lane.b32.xlu0 %v3623_v57, %s4004_s29 }
 0x507   : > { %v1408_v58 = vld.sshfl [vmem:[#allocation1] sm:$0xff pattern:$0x75316420]  ;;  %v1409_v60 = vld.sshfl [vmem:[#allocation1 + $0x8] sm:$0xff pattern:$0x75316420] }
 0x508   : > { %1423 = vst [vmem:[#allocation1 + $0x1] ss:$2 sm:$0xff] %v4450_v48  ;;  %v1410_v62 = vld.sshfl [vmem:[#allocation1 + $0x10] sm:$0xff pattern:$0x75316420] }
 0x509   : > { %v3628_v63 = vpack.i.bf16 %v1410_v62, %v1409_v60  ;;  %1425 = vst [vmem:[#allocation1 + $0x11] ss:$2 sm:$0xff] %v1375_v49 }
 0x50b   : > { %3629 = vrot.lane.b32.xlu0 %v3628_v63, %s3997_s20 }
 0x50f   : > { %v1426_v59 = vld.sshfl [vmem:[#allocation1] sm:$0xff pattern:$0x75316420]  ;;  %v1427_v1 = vld.sshfl [vmem:[#allocation1 + $0x8] sm:$0xff pattern:$0x75316420] }
 0x510   : > { %1440 = vst [vmem:[#allocation1] ss:$2 sm:$0xff] %v4450_v48  ;;  %v1428_v2 = vld.sshfl [vmem:[#allocation1 + $0x10] sm:$0xff pattern:$0x75316420] }
 0x511   : > { %v3633_v13 = vpack.i.bf16 %v1428_v2, %v1427_v1  ;;  %1442 = vst [vmem:[#allocation1 + $0x10] ss:$2 sm:$0xff] %v1375_v49 }
 0x513   : > { %3634 = vrot.lane.b32.xlu1 %v3633_v13, %s3998_s21 }
 0x517   : > { %v1443_v61 = vld.sshfl [vmem:[#allocation1] sm:$0xff pattern:$0x75316420]  ;;  %v1444_v12 = vld.sshfl [vmem:[#allocation1 + $0x8] sm:$0xff pattern:$0x75316420] }
 0x518   : > { %1458 = vst [vmem:[#allocation1 + $0x1] ss:$2 sm:$0xff] %v4450_v48  ;;  %v1445_v3 = vld.sshfl [vmem:[#allocation1 + $0x10] sm:$0xff pattern:$0x75316420] }
 0x519   : > { %v3638_v5 = vpack.i.bf16 %v1445_v3, %v1444_v12  ;;  %1460 = vst [vmem:[#allocation1 + $0x11] ss:$2 sm:$0xff] %v1375_v49 }
 0x51b   : > { %3639 = vrot.lane.b32.xlu1 %v3638_v5, %s3999_s22 }
 0x51f   : > { %v1461_v7 = vld.sshfl [vmem:[#allocation1] sm:$0xff pattern:$0x75316420]  ;;  %v1462_v8 = vld.sshfl [vmem:[#allocation1 + $0x8] sm:$0xff pattern:$0x75316420] }
 0x520   : > { %1475 = vst [vmem:[#allocation1] ss:$2 sm:$0xff] %v4450_v48  ;;  %v1463_v17 = vld.sshfl [vmem:[#allocation1 + $0x10] sm:$0xff pattern:$0x75316420] }
 0x521   : > { %v3643_v6 = vpack.i.bf16 %v1463_v17, %v1462_v8  ;;  %1477 = vst [vmem:[#allocation1 + $0x10] ss:$2 sm:$0xff] %v1375_v49 }
 0x523   : > { %3644 = vrot.lane.b32.xlu2 %v3643_v6, %s4000_s23 }
 0x527   : > { %v1478_v9 = vld.sshfl [vmem:[#allocation1] sm:$0xff pattern:$0x75316420]  ;;  %v1479_v52 = vld.sshfl [vmem:[#allocation1 + $0x8] sm:$0xff pattern:$0x75316420] }
 0x528   : > { %1493 = vst [vmem:[#allocation1 + $0x1] ss:$2 sm:$0xff] %v4450_v48  ;;  %1481 = vrot.lane.b32.xlu1 %v1478_v9, %s4001_s24  ;;  %v1480_v46 = vld.sshfl [vmem:[#allocation1 + $0x10] sm:$0xff pattern:$0x75316420] }
 0x529   : > { %v3648_v53 = vpack.i.bf16 %v1480_v46, %v1479_v52  ;;  %1495 = vst [vmem:[#allocation1 + $0x11] ss:$2 sm:$0xff] %v1375_v49 }
 0x52b   : > { %3649 = vrot.lane.b32.xlu2 %v3648_v53, %s4001_s24 }
 0x52f   : > { %v1496_v10 = vld.sshfl [vmem:[#allocation1] sm:$0xff pattern:$0x75316420]  ;;  %v1497_v47 = vld.sshfl [vmem:[#allocation1 + $0x8] sm:$0xff pattern:$0x75316420] }
 0x530   : > { %1510 = vst [vmem:[#allocation1] ss:$2 sm:$0xff] %v4450_v48  ;;  %v1498_v14 = vld.sshfl [vmem:[#allocation1 + $0x10] sm:$0xff pattern:$0x75316420] }
 0x531   : > { %v3653_v15 = vpack.i.bf16 %v1498_v14, %v1497_v47  ;;  %1512 = vst [vmem:[#allocation1 + $0x10] ss:$2 sm:$0xff] %v1375_v49 }
 0x533   : > { %3654 = vrot.lane.b32.xlu0 %v3653_v15, %s4002_s25  ;;  %1499 = vrot.lane.b32.xlu2 %v1496_v10, %s4002_s25  ;;  %v3367_v10 = vld [vmem:[%s5133_s2 + $0x10] sm:$0xff] }
 0x537   : > { %v1513_v19 = vld.sshfl [vmem:[#allocation1] sm:$0xff pattern:$0x75316420]  ;;  %v1514_v20 = vld.sshfl [vmem:[#allocation1 + $0x8] sm:$0xff pattern:$0x75316420] }
 0x538   : > { %1958 = vst [vmem:[#allocation1] ss:$2 sm:$0xff] %v3375_v16  ;;  %v1515_v21 = vld.sshfl [vmem:[#allocation1 + $0x10] sm:$0xff pattern:$0x75316420] }
 0x539   : > { %1520 = vrot.lane.b32.xlu1 %v1515_v21, %s4003_s28  ;;  %2156 = vst [vmem:[#allocation1 + $0x10] ss:$2 sm:$0xff] %v2151_v18 }
 0x53b   : > { %1518 = vrot.lane.b32.xlu0 %v1514_v20, %s4003_s28  ;;  %1516 = vrot.lane.b32.xlu2 %v1513_v19, %s4003_s28 }
 0x53f   : > { %v4484_v23 = vld.sshfl [vmem:[#allocation1] sm:$0xff pattern:$0x75316420]  ;;  %v4486_v24 = vld.sshfl [vmem:[#allocation1 + $0x8] sm:$0xff pattern:$0x75316420] }
 0x540   : > { %2154 = vst [vmem:[#allocation1] ss:$2 sm:$0xff] %v4450_v48 }
 0x541   : > { %1464 = vrot.lane.b32.xlu1 %v1461_v7, %s4000_s23 }
 0x543   : > { %1446 = vrot.lane.b32.xlu0 %v1443_v61, %s3999_s22  ;;  %1411 = vrot.lane.b32.xlu2 %v1408_v58, %s3997_s20 }
 0x549   : > { %1394 = vrot.lane.b32.xlu1 %v4460_v56, %s4004_s29 }
 0x54b   : > { %1429 = vrot.lane.b32.xlu0 %v1426_v59, %s3998_s21  ;;  %1543 = vperm.xlu2 %3501, %v3370_v25  }
 0x551   : > { %1640 = vperm.xlu1 %3500, %v3374_v26   ;;  %v3368_v26 = vld [vmem:[%s5133_s2 + $0x18] sm:$0xff] }
 0x553   : > { %1538 = vperm.xlu0 %3502, %v3369_v27   ;;  %1635 = vperm.xlu2 %3501, %v3373_v28  }
 0x575   : > { %v4509_v31 = vpop.permute.xlu0 %3624 }
 0x576   : > { %v3627_v32 = vunpack.i.h.bf16 %v4509_v31  ;;  %v3626_v56 = vunpack.i.l.bf16 %v4509_v31 }
 0x578   : > { %v1526_v14 = vsel %vm569_vm6, %v4457_v54, %v3627_v32  ;;  %v1401_v16 = vsel %vm5161_vm10, %v3626_v56, %v3627_v32  ;;  %vm5167_vm10 = vcmask 1031168  }
 0x579   : > { %v1525_v25 = vsel %vm569_vm6, %v4455_v51, %v1401_v16 }
 0x57d   : > { %v3645_v29 = vpop.permute.xlu2 %3644  ;;  %v4511_v37 = vpop.permute.xlu0 %3629 }
 0x57e   : > { %v3647_v0 = vunpack.i.h.bf16 %v3645_v29  ;;  %v3646_v55 = vunpack.i.l.bf16 %v3645_v29  ;;  %v3632_v2 = vunpack.i.h.bf16 %v4511_v37  ;;  %v3631_v3 = vunpack.i.l.bf16 %v4511_v37 }
 0x580   : > { %v1471_v52 = vsel %vm5158_vm1, %v3646_v55, %v3647_v0  ;;  %v1418_v15 = vsel %vm5160_vm12, %v3631_v3, %v3632_v2  ;;  %vm5166_vm12 = vmmov %vm5162_vm11 }
 0x585   : > { %v4507_v30 = vpop.permute.xlu1 %3634  ;;  %v3650_v34 = vpop.permute.xlu2 %3649 }
 0x586   : > { %v3652_v43 = vunpack.i.h.bf16 %v3650_v34  ;;  %v3651_v44 = vunpack.i.l.bf16 %v3650_v34  ;;  %v3637_v57 = vunpack.i.h.bf16 %v4507_v30  ;;  %v3636_v58 = vunpack.i.l.bf16 %v4507_v30 }
 0x588   : > { %v1488_v12 = vsel %vm529_vm9, %v3651_v44, %v3652_v43  ;;  %v1529_v9 = vsel %vm569_vm6, %v3632_v2, %v3637_v57  ;;  %v1436_v46 = vsel %vm5159_vm14, %v3636_v58, %v3637_v57  ;;  %vm5165_vm14 = vmmov %vm5162_vm11 }
 0x589   : > { %v1528_v18 = vsel %vm569_vm6, %v1418_v15, %v1436_v46 }
 0x58d   : > { %v3640_v36 = vpop.permute.xlu1 %3639  ;;  %v1500_v38 = vpop.permute.xlu2 %1499 }
 0x58e   : > { %v3642_v45 = vunpack.i.h.bf16 %v3640_v36  ;;  %v3641_v48 = vunpack.i.l.bf16 %v3640_v36 }
 0x590   : > { %v1532_v7 = vsel %vm569_vm6, %v3642_v45, %v3647_v0  ;;  %v1453_v8 = vsel %vm5157_vm0, %v3641_v48, %v3642_v45  ;;  %vm5163_vm0 = vmmov %vm5158_vm1  ;;  %vm5164_vm1 = vcmask 891904   ;;  %v3371_v45 = vld [vmem:[%s5135_s4 + $0x10] sm:$0xff] }
 0x591   : > { %v1531_v53 = vsel %vm569_vm6, %v1453_v8, %v1471_v52 }
 0x595   : > { %v1517_v60 = vpop.permute.xlu2 %1516 }
 0x59a   : > { %v1482_v39 = vpop.permute.xlu1 %1481 }
 0x59b   : > { %v1487_v5 = vsel %vm529_vm9, %v1482_v39, %v3651_v44 }
 0x59d   : > { %v1412_v27 = vpop.permute.xlu2 %1411 }
 0x59e   : > { %v1417_v30 = vsel %vm5167_vm10, %v1412_v27, %v3631_v3 }
 0x5a5   : > { %v3655_v40 = vpop.permute.xlu0 %3654 }
 0x5a6   : > { %v3657_v11 = vunpack.i.h.bf16 %v3655_v40  ;;  %v3656_v42 = vunpack.i.l.bf16 %v3655_v40 }
 0x5a8   : > { %v1535_v63 = vsel %vm569_vm6, %v3652_v43, %v3657_v11  ;;  %v1505_v59 = vsel %vm5153_vm7, %v1500_v38, %v3656_v42  ;;  %v1506_v1 = vsel %vm5153_vm7, %v3656_v42, %v3657_v11  ;;  %v1544_v38 = vpop.permute.xlu2 %1543 }
 0x5a9   : > { %v1533_v17 = vsel %vm569_vm6, %v1487_v5, %v1505_v59  ;;  %v1534_v6 = vsel %vm569_vm6, %v1488_v12, %v1506_v1 }
 0x5ab   : > { %v1521_v49 = vpop.permute.xlu1 %1520 }
 0x5ac   : > { %3384 = vmatpush.msk.msrb.mxu0 %vm569_vm6, %v1521_v49 }
 0x5ad   : > { %v1519_v62 = vpop.permute.xlu0 %1518 }
 0x5ae   : > { %v1522_v13 = vsel %vm5154_vm8, %v1517_v60, %v1519_v62  ;;  %v1523_v61 = vsel %vm5154_vm8, %v1519_v62, %v1521_v49  ;;  %1616 = vmatpush.msrb.mxu0 %v1535_v63 }
 0x5af   : > { %3378 = vmatpush.msk.msrb.mxu2 %vm569_vm6, %v1522_v13  ;;  %3381 = vmatpush.msk.msrb.mxu3 %vm569_vm6, %v1523_v61 }
 0x5b0   : > { %1617 = vmatpush.msrb.mxu0 %v1532_v7  ;;  %v1636_v5 = vpop.permute.xlu2 %1635 }
 0x5b1   : > { %1570 = vmatpush.msrb.mxu2 %v1533_v17  ;;  %1593 = vmatpush.msrb.mxu3 %v1534_v6 }
 0x5b2   : > { %1618 = vmatpush.msrb.mxu0 %v1529_v9 }
 0x5b3   : > { %v1465_v47 = vpop.permute.xlu1 %1464  ;;  %1594 = vmatpush.msrb.mxu3 %v1531_v53 }
 0x5b4   : > { %1619 = vmatpush.msrb.mxu0 %v1526_v14  ;;  %v1470_v20 = vsel %vm5163_vm0, %v1465_v47, %v3646_v55  ;;  %vm5169_vm0 = vcmask 900096   ;;  %v3372_v55 = vld [vmem:[%s5135_s4 + $0x18] sm:$0xff] }
 0x5b5   : > { %1595 = vmatpush.msrb.mxu3 %v1528_v18  ;;  %3385 = vmatmul.msk.f32.vlgmr.msrb.gmra.mxu0 %vm5162_vm11, %v3367_v10  ;;  %v1447_v19 = vpop.permute.xlu0 %1446  ;;  %vm5168_vm11 = vcmask 1039360  }
 0x5b6   : > { %v1452_v21 = vsel %vm5164_vm1, %v1447_v19, %v3641_v48  ;;  %vm5170_vm1 = vmmov %vm5166_vm12 }
 0x5b7   : > { %1596 = vmatpush.msrb.mxu3 %v1525_v25  ;;  %v1530_v54 = vsel %vm569_vm6, %v1452_v21, %v1470_v20  ;;  %vm5172_vm5 = vmmov %vm5170_vm1 }
 0x5b8   : > { %1571 = vmatpush.msrb.mxu2 %v1530_v54  ;;  %3382 = vmatmul.msk.f32.vlgmr.msrb.gmra.mxu3 %vm5165_vm14, %v3367_v10  ;;  %vm5171_vm14 = vmmov %vm5170_vm1 }
 0x5bb   : > { %v1395_v28 = vpop.permute.xlu1 %1394 }
 0x5bc   : > { %v1400_v31 = vsel %vm5168_vm11, %v1395_v28, %v3626_v56 }
 0x5bd   : > { %3386 = vmatmul.msk.f32.gmra.mxu0 %vm5166_vm12, %v3368_v26  ;;  %v1430_v29 = vpop.permute.xlu0 %1429  ;;  %v1524_v36 = vsel %vm569_vm6, %v4453_v50, %v1400_v31  ;;  %vm5173_vm12 = vcmask 130048  }
 0x5be   : > { %v1435_v51 = vsel %vm5169_vm0, %v1430_v29, %v3636_v58 }
 0x5bf   : > { %v1527_v34 = vsel %vm569_vm6, %v1417_v30, %v1435_v51 }
 0x5c0   : > { %1572 = vmatpush.msrb.mxu2 %v1527_v34  ;;  %3383 = vmatmul.msk.f32.gmra.mxu3 %vm5170_vm1, %v3368_v26 }
 0x5c2   : > { %1573 = vmatpush.msrb.mxu2 %v1524_v36 }
 0x5c3   : > { %3379 = vmatmul.msk.f32.vlgmr.msrb.gmra.mxu2 %vm5171_vm14, %v3367_v10  ;;  %v1641_v2 = vpop.permute.xlu1 %1640  ;;  %vm5179_vm14 = vcmask 711680  }
 0x5c5   : > { %v1539_v39 = vpop.permute.xlu0 %1538 }
 0x5cb   : > { %3380 = vmatmul.msk.f32.gmra.mxu2 %vm5172_vm5, %v3368_v26  ;;  %vm5174_vm5 = vmmov %vm5173_vm12 }
 0x5cc   : > { %vm5175_vm10 = vmmov %vm5174_vm5 }
 0x5cd   : > { %vm5176_vm11 = vmmov %vm5174_vm5 }
 0x5ce   : > { %vm5177_vm0 = vmmov %vm5174_vm5 }
 0x5cf   : > { %vm5178_vm1 = vmmov %vm5177_vm0 }
 0x632   : > { %v1621_v37 = vpop.f32.mrf.mxu0 }
 0x633   : > { %v1622_v11 = vadd.f32 %v1621_v37, %v1539_v39 }
 0x635   : > { %v1629_v32 = vmax.f32 %v1622_v11, 0.0 }
 0x63a   : > { %v1624_v40 = vpop.f32.mrf.mxu0 }
 0x63b   : > { %v1625_v42 = vadd.f32 %v1624_v40, %v1544_v38  ;;  %v1598_v43 = vpop.f32.mrf.mxu3 }
 0x63c   : > { %v1599_v48 = vadd.f32 %v1598_v43, %v1539_v39 }
 0x63d   : > { %v1632_v44 = vmax.f32 %v1625_v42, 0.0 }
 0x63e   : > { %v1628_v57 = vmax.f32 %v1599_v48, 0.0  ;;  %v2158_v48 = vld.sshfl [vmem:[#allocation1 + $0x8] sm:$0xff pattern:$0x75316420] }
 0x63f   : > { %1709 = vmatpush.msra.mxu3 %v1632_v44 }
 0x641   : > { %1710 = vmatpush.msra.mxu3 %v1629_v32 }
 0x642   : > { %3391 = vmatmul.msk.f32.vlgmr.msra.gmra.mxu3 %vm5173_vm12, %v3371_v45  ;;  %vm5180_vm12 = vcmask 1047704  }
 0x643   : > { %v1601_v50 = vpop.f32.mrf.mxu3 }
 0x644   : > { %v1602_v49 = vadd.f32 %v1601_v50, %v1544_v38 }
 0x646   : > { %v1631_v56 = vmax.f32 %v1602_v49, 0.0  ;;  %v1575_v0 = vpop.f32.mrf.mxu2  ;;  %v2157_v49 = vld.sshfl [vmem:[#allocation1] sm:$0xff pattern:$0x75316420] }
 0x647   : > { %v1576_v60 = vadd.f32 %v1575_v0, %v1539_v39  ;;  %v3376_v0 = vld [vmem:[%s5138_s7 + $0x4] sm:$0xf] }
 0x648   : > { %1686 = vmatpush.msra.mxu2 %v1631_v56  ;;  %v2159_v56 = vld.sshfl [vmem:[#allocation1 + $0x10] sm:$0xff pattern:$0x75316420] }
 0x649   : > { %v1627_v59 = vmax.f32 %v1576_v60, 0.0 }
 0x64a   : > { %1687 = vmatpush.msra.mxu2 %v1628_v57  ;;  %3392 = vmatmul.msk.f32.gmra.mxu3 %vm5174_vm5, %v3372_v55  ;;  %vm5181_vm5 = vmmov %vm5179_vm14 }
 0x64b   : > { %3389 = vmatmul.msk.f32.vlgmr.msra.gmra.mxu2 %vm5175_vm10, %v3371_v45  ;;  %vm5182_vm10 = vmmov %vm5180_vm12 }
 0x64e   : > { %v1578_v58 = vpop.f32.mrf.mxu2 }
 0x64f   : > { %v1579_v62 = vadd.f32 %v1578_v58, %v1544_v38 }
 0x651   : > { %v1630_v63 = vmax.f32 %v1579_v62, 0.0 }
 0x653   : > { %1663 = vmatpush.msra.mxu1 %v1630_v63  ;;  %3390 = vmatmul.msk.f32.gmra.mxu2 %vm5176_vm11, %v3372_v55  ;;  %vm5183_vm11 = vcmask 883712  }
 0x655   : > { %1664 = vmatpush.msra.mxu1 %v1627_v59 }
 0x656   : > { %3387 = vmatmul.msk.f32.vlgmr.msra.gmra.mxu1 %vm5177_vm0, %v3371_v45  ;;  %vm5184_vm0 = vmmov %vm5183_vm11 }
 0x65e   : > { %3388 = vmatmul.msk.f32.gmra.mxu1 %vm5178_vm1, %v3372_v55  ;;  %vm5185_vm1 = vmmov %vm5184_vm0 }
 0x6c5   : > { %v1712_v1 = vpop.f32.mrf.mxu3 }
 0x6c6   : > { %v1713_v7 = vadd.f32 %v1712_v1, %v1636_v5 }
 0x6c8   : > { %v1720_v6 = vmax.f32 %v1713_v7, 0.0 }
 0x6ca   : > { %v1726_v53 = vmul.f32 %v1720_v6, %v4248_v33 }
 0x6cd   : > { %v1715_v13 = vpop.f32.mrf.mxu3 }
 0x6ce   : > { %v1716_v61 = vadd.f32 %v1715_v13, %v1641_v2  ;;  %v1689_v12 = vpop.f32.mrf.mxu2 }
 0x6cf   : > { %v1690_v10 = vadd.f32 %v1689_v12, %v1636_v5 }
 0x6d0   : > { %v1723_v3 = vmax.f32 %v1716_v61, 0.0 }
 0x6d1   : > { %v1719_v18 = vmax.f32 %v1690_v10, 0.0 }
 0x6d2   : > { %v1729_v8 = vmul.f32 %v1723_v3, %v4248_v33 }
 0x6d3   : > { %v1666_v17 = vpop.f32.mrf.mxu1  ;;  %v1725_v21 = vmul.f32 %v1719_v18, %v4250_v35 }
 0x6d4   : > { %1746 = vrot.lane.b32.xlu2 %v1729_v8, %s3996_s19  ;;  %v1667_v19 = vadd.f32 %v1666_v17, %v1636_v5 }
 0x6d6   : > { %v1692_v9 = vpop.f32.mrf.mxu2  ;;  %v1718_v25 = vmax.f32 %v1667_v19, 0.0 }
 0x6d7   : > { %v1693_v52 = vadd.f32 %v1692_v9, %v1641_v2 }
 0x6d8   : > { %v1724_v54 = vmul.f32 %v1718_v25, %v4244_v22 }
 0x6d9   : > { %v1722_v46 = vmax.f32 %v1693_v52, 0.0 }
 0x6db   : > { %v1728_v47 = vmul.f32 %v1722_v46, %v4250_v35  ;;  %v1669_v14 = vpop.f32.mrf.mxu1 }
 0x6dc   : > { %v1670_v15 = vadd.f32 %v1669_v14, %v1641_v2  ;;  %1740 = vrot.lane.b32.xlu2 %v1726_v53, %s3996_s19 }
 0x6dd   : > { %1744 = vrot.lane.b32.xlu1 %v1728_v47, %s3996_s19 }
 0x6de   : > { %v1721_v16 = vmax.f32 %v1670_v15, 0.0 }
 0x6e0   : > { %v1727_v20 = vmul.f32 %v1721_v16, %v4244_v22 }
 0x6e2   : > { %1742 = vrot.lane.b32.xlu0 %v1727_v20, %s3996_s19 }
 0x6e5   : > { %1738 = vrot.lane.b32.xlu1 %v1725_v21, %s3996_s19 }
 0x6ea   : > { %1736 = vrot.lane.b32.xlu0 %v1724_v54, %s3996_s19 }
 0x72e   : > { %v1747_v26 = vpop.permute.xlu2 %1746 }
 0x736   : > { %v1741_v30 = vpop.permute.xlu2 %1740 }
 0x74f   : > { %v1745_v27 = vpop.permute.xlu1 %1744 }
 0x750   : > { %v1751_v28 = vsel %vm388_vm3, %v1745_v27, %v1747_v26 }
 0x751   : > { %1763 = vst.msk [vmem:[#allocation3 + $0x28] sm:$0xff] %vm5179_vm14, %v1751_v28  ;;  %vm5186_vm14 = vmmov %vm5184_vm0 }
 0x754   : > { %v1743_v29 = vpop.permute.xlu0 %1742 }
 0x755   : > { %1761 = vst.msk [vmem:[#allocation3 + $0x18] sm:$0xff] %vm5180_vm12, %v1743_v29  ;;  %v4617_v43 = vsel %vm388_vm3, %v1743_v29, %v1745_v27  ;;  %vm5187_vm12 = vcmask 891904  }
 0x757   : > { %v1739_v31 = vpop.permute.xlu1 %1738 }
 0x758   : > { %v1749_v51 = vsel %vm388_vm3, %v1739_v31, %v1741_v30  ;;  %v4613_v42 = vld [vmem:[#allocation3 + $0x28] sm:$0xff] }
 0x759   : > { %1760 = vst.msk [vmem:[#allocation3 + $0x10] sm:$0xff] %vm5181_vm5, %v1749_v51  ;;  %v3733_v44 = vpack.i.bf16 %v4613_v42, %v4617_v43  ;;  %vm5188_vm5 = vmmov %vm5187_vm12 }
 0x75c   : > { %v1737_v34 = vpop.permute.xlu0 %1736  ;;  %v4606_v40 = vld [vmem:[#allocation3 + $0x18] sm:$0xff] }
 0x75d   : > { %1758 = vst.msk [vmem:[#allocation3] sm:$0xff] %vm5182_vm10, %v1737_v34  ;;  %v4596_v36 = vsel %vm388_vm3, %v1737_v34, %v1739_v31  ;;  %v3758_v32 = vpack.i.bf16 %v4617_v43, %v4606_v40  ;;  %vm5189_vm10 = vmmov %vm5188_vm5 }
 0x760   : > { %v4598_v37 = vld [vmem:[#allocation3 + $0x10] sm:$0xff] }
 0x761   : > { %v3663_v38 = vpack.i.bf16 %v4598_v37, %v4596_v36  ;;  %v3773_v50 = vpack.i.bf16 %v4598_v37, %v4613_v42 }
 0x763   : > { %3664 = vrot.lane.b32.xlu0 %v3663_v38, %s4001_s24  ;;  %3659 = vrot.lane.b32.xlu1 %v3663_v38, %s4002_s25 }
 0x764   : > { %v4604_v39 = vld [vmem:[#allocation3] sm:$0xff] }
 0x765   : > { %v3678_v11 = vpack.i.bf16 %v4604_v39, %v4606_v40  ;;  %v3728_v45 = vpack.i.bf16 %v4596_v36, %v4604_v39 }
 0x767   : > { %3679 = vrot.lane.b32.xlu2 %v3678_v11, %s4002_s25 }
 0x76b   : > { %3669 = vrot.lane.b32.xlu0 %v3663_v38, %s4000_s23  ;;  %3724 = vrot.lane.b32.xlu1 %v3663_v38, %s4004_s29 }
 0x76f   : > { %3684 = vrot.lane.b32.xlu2 %v3678_v11, %s4001_s24 }
 0x773   : > { %3674 = vrot.lane.b32.xlu0 %v3663_v38, %s3999_s22  ;;  %3734 = vrot.lane.b32.xlu1 %v3733_v44, %s4000_s23 }
 0x777   : > { %3689 = vrot.lane.b32.xlu2 %v3678_v11, %s4000_s23 }
 0x77b   : > { %3694 = vrot.lane.b32.xlu0 %v3733_v44, %s4002_s25  ;;  %3739 = vrot.lane.b32.xlu1 %v3733_v44, %s3999_s22 }
 0x77f   : > { %3704 = vrot.lane.b32.xlu2 %v3733_v44, %s4001_s24 }
 0x783   : > { %3699 = vrot.lane.b32.xlu0 %v3663_v38, %s3998_s21  ;;  %3744 = vrot.lane.b32.xlu1 %v3733_v44, %s3998_s21 }
 0x787   : > { %3709 = vrot.lane.b32.xlu2 %v3678_v11, %s3999_s22 }
 0x78b   : > { %3714 = vrot.lane.b32.xlu0 %v3663_v38, %s3997_s20  ;;  %3749 = vrot.lane.b32.xlu1 %v3733_v44, %s3997_s20 }
 0x78f   : > { %3719 = vrot.lane.b32.xlu2 %v3678_v11, %s3998_s21 }
 0x793   : > { %3759 = vrot.lane.b32.xlu0 %v3758_v32, %s4003_s28  ;;  %3754 = vrot.lane.b32.xlu1 %v3733_v44, %s4004_s29 }
 0x797   : > { %3729 = vrot.lane.b32.xlu2 %v3728_v45, %s4003_s28 }
 0x79b   : > { %3764 = vrot.lane.b32.xlu0 %v3678_v11, %s3997_s20  ;;  %3769 = vrot.lane.b32.xlu1 %v3678_v11, %s4004_s29 }
 0x79f   : > { %3774 = vrot.lane.b32.xlu2 %v3773_v50, %s4003_s28 }
 0x7a3   : > { %2162 = vrot.lane.b32.xlu1 %v2158_v48, %s3999_s22  ;;  %2160 = vrot.lane.b32.xlu0 %v2157_v49, %s3999_s22 }
 0x7a7   : > { %2164 = vrot.lane.b32.xlu2 %v2159_v56, %s3999_s22 }
 0x7ab   : > { %1954 = vperm.xlu0 %3502, %v3376_v0  }
 0x7c1   : > { %v3680_v55 = vpop.permute.xlu2 %3679 }
 0x7c2   : > { %v3681_v12 = vunpack.i.l.bf16 %v3680_v55  ;;  %v3682_v9 = vunpack.i.h.bf16 %v3680_v55 }
 0x7c9   : > { %v3685_v57 = vpop.permute.xlu2 %3684 }
 0x7ca   : > { %v3686_v47 = vunpack.i.l.bf16 %v3685_v57  ;;  %v3687_v20 = vunpack.i.h.bf16 %v3685_v57 }
 0x7d1   : > { %v4651_v58 = vpop.permute.xlu2 %3689 }
 0x7d2   : > { %v3691_v27 = vunpack.i.l.bf16 %v4651_v58  ;;  %v3692_v38 = vunpack.i.h.bf16 %v4651_v58 }
 0x7d5   : > { %v3665_v60 = vpop.permute.xlu0 %3664  ;;  %v3660_v62 = vpop.permute.xlu1 %3659 }
 0x7d6   : > { %v3662_v7 = vunpack.i.h.bf16 %v3660_v62  ;;  %v3661_v8 = vunpack.i.l.bf16 %v3660_v62  ;;  %v3667_v14 = vunpack.i.h.bf16 %v3665_v60  ;;  %v3666_v15 = vunpack.i.l.bf16 %v3665_v60 }
 0x7d8   : > { %v1920_v18 = vsel %vm5153_vm7, %v3682_v9, %v3661_v8  ;;  %v1921_v19 = vsel %vm5153_vm7, %v3661_v8, %v3662_v7  ;;  %v1898_v51 = vsel %vm529_vm9, %v3687_v20, %v3666_v15  ;;  %v1899_v34 = vsel %vm529_vm9, %v3666_v15, %v3667_v14 }
 0x7d9   : > { %v3705_v1 = vpop.permute.xlu2 %3704 }
 0x7da   : > { %v3707_v52 = vunpack.i.h.bf16 %v3705_v1  ;;  %v3706_v46 = vunpack.i.l.bf16 %v3705_v1 }
 0x7dc   : > { %v1900_v54 = vsel %vm529_vm9, %v3686_v47, %v3706_v46  ;;  %v1901_v26 = vsel %vm529_vm9, %v3706_v46, %v3707_v52 }
 0x7dd   : > { %v4653_v63 = vpop.permute.xlu0 %3669  ;;  %v4655_v59 = vpop.permute.xlu1 %3724 }
 0x7de   : > { %v3672_v30 = vunpack.i.h.bf16 %v4653_v63  ;;  %v3671_v31 = vunpack.i.l.bf16 %v4653_v63  ;;  %v3727_v47 = vunpack.i.h.bf16 %v4655_v59  ;;  %v3726_v15 = vunpack.i.l.bf16 %v4655_v59 }
 0x7e0   : > { %v1876_v56 = vsel %vm5185_vm1, %v3692_v38, %v3671_v31  ;;  %v1877_v0 = vsel %vm5186_vm14, %v3671_v31, %v3672_v30 }
 0x7e1   : > { %v4659_v61 = vpop.permute.xlu2 %3709 }
 0x7e2   : > { %v3711_v48 = vunpack.i.l.bf16 %v4659_v61  ;;  %v3712_v55 = vunpack.i.h.bf16 %v4659_v61 }
 0x7e5   : > { %v4657_v2 = vpop.permute.xlu0 %3674  ;;  %v3735_v13 = vpop.permute.xlu1 %3734 }
 0x7e6   : > { %v3737_v21 = vunpack.i.h.bf16 %v3735_v13  ;;  %v3736_v25 = vunpack.i.l.bf16 %v3735_v13  ;;  %v3676_v50 = vunpack.i.l.bf16 %v4657_v2  ;;  %v3677_v49 = vunpack.i.h.bf16 %v4657_v2 }
 0x7e8   : > { %v1878_v32 = vsel %vm5183_vm11, %v3691_v27, %v3736_v25  ;;  %v1879_v45 = vsel %vm5184_vm0, %v3736_v25, %v3737_v21  ;;  %v1854_v13 = vsel %vm5189_vm10, %v3712_v55, %v3676_v50  ;;  %vm5190_vm11 = vmmov %vm5188_vm5  ;;  %vm5191_vm0 = vcmask 900096  }
 0x7e9   : > { %v4665_v16 = vpop.permute.xlu2 %3719  ;;  %vm5192_vm1 = vmmov %vm5191_vm0 }
 0x7ea   : > { %v3721_v61 = vunpack.i.l.bf16 %v4665_v16  ;;  %vm5193_vm14 = vmmov %vm5191_vm0 }
 0x7ed   : > { %v3695_v3 = vpop.permute.xlu0 %3694  ;;  %v4661_v5 = vpop.permute.xlu1 %3739 }
 0x7ee   : > { %v3697_v17 = vunpack.i.h.bf16 %v3695_v3  ;;  %v3696_v6 = vunpack.i.l.bf16 %v3695_v3  ;;  %v3742_v11 = vunpack.i.h.bf16 %v4661_v5  ;;  %v3741_v44 = vunpack.i.l.bf16 %v4661_v5 }
 0x7ef   : > { %v1855_v5 = vsel %vm5190_vm11, %v3676_v50, %v3677_v49  ;;  %vm5197_vm11 = vcmask 1039360  }
 0x7f0   : > { %2044 = vmatpush.msrb.mxu3 %v3697_v17  ;;  %v1922_v53 = vsel %vm5153_vm7, %v3681_v12, %v3696_v6  ;;  %v1923_v10 = vsel %vm5153_vm7, %v3696_v6, %v3697_v17  ;;  %v1856_v62 = vsel %vm5187_vm12, %v3711_v48, %v3741_v44  ;;  %v1857_v63 = vsel %vm5188_vm5, %v3741_v44, %v3742_v11  ;;  %vm5194_vm12 = vmmov %vm5191_vm0 }
 0x7f1   : > { %1964 = vmatpush.msrb.mxu1 %v1922_v53  ;;  %2004 = vmatpush.msrb.mxu2 %v1923_v10  ;;  %v4687_v57 = vpop.permute.xlu2 %3729  ;;  %vm5195_vm5 = vcmask 1031168  }
 0x7f2   : > { %2045 = vmatpush.msrb.mxu3 %v3662_v7  ;;  %v3722_v7 = vunpack.i.h.bf16 %v4665_v16  ;;  %v3732_v16 = vunpack.i.h.bf16 %v4687_v57  ;;  %vm5196_vm10 = vmmov %vm5195_vm5 }
 0x7f3   : > { %1965 = vmatpush.msrb.mxu1 %v1920_v18  ;;  %2005 = vmatpush.msrb.mxu2 %v1921_v19  ;;  %v3731_v18 = vunpack.i.l.bf16 %v4687_v57 }
 0x7f4   : > { %2046 = vmatpush.msrb.mxu3 %v3707_v52 }
 0x7f5   : > { %v3700_v28 = vpop.permute.xlu0 %3699  ;;  %v3745_v29 = vpop.permute.xlu1 %3744  ;;  %1966 = vmatpush.msrb.mxu1 %v1900_v54  ;;  %2006 = vmatpush.msrb.mxu2 %v1901_v26 }
 0x7f6   : > { %2047 = vmatpush.msrb.mxu3 %v3667_v14  ;;  %v3747_v58 = vunpack.i.h.bf16 %v3745_v29  ;;  %v3746_v60 = vunpack.i.l.bf16 %v3745_v29  ;;  %v3702_v12 = vunpack.i.h.bf16 %v3700_v28  ;;  %v3701_v3 = vunpack.i.l.bf16 %v3700_v28 }
 0x7f7   : > { %1967 = vmatpush.msrb.mxu1 %v1898_v51  ;;  %2007 = vmatpush.msrb.mxu2 %v1899_v34  ;;  %v1942_v51 = vsel %vm5154_vm8, %v3731_v18, %v3732_v16 }
 0x7f8   : > { %2048 = vmatpush.msrb.mxu3 %v3737_v21  ;;  %v1834_v6 = vsel %vm5191_vm0, %v3721_v61, %v3746_v60  ;;  %v1835_v9 = vsel %vm5192_vm1, %v3746_v60, %v3747_v58  ;;  %v1832_v53 = vsel %vm5193_vm14, %v3722_v7, %v3701_v3  ;;  %v1833_v10 = vsel %vm5194_vm12, %v3701_v3, %v3702_v12  ;;  %vm5198_vm0 = vmmov %vm5197_vm11  ;;  %v3377_v60 = vld [vmem:[%s5139_s8 + $0x4] sm:$0xf] }
 0x7f9   : > { %1968 = vmatpush.msrb.mxu1 %v1878_v32  ;;  %2008 = vmatpush.msrb.mxu2 %v1879_v45  ;;  %v3775_v28 = vpop.permute.xlu2 %3774  ;;  %v1789_v34 = vsel %vm5198_vm0, %v3726_v15, %v3727_v47  ;;  %vm5199_vm1 = vcmask 130048   ;;  %vm5200_vm14 = vmmov %vm5195_vm5 }
 0x7fa   : > { %2049 = vmatpush.msrb.mxu3 %v3672_v30  ;;  %v3777_v30 = vunpack.i.h.bf16 %v3775_v28  ;;  %v3776_v31 = vunpack.i.l.bf16 %v3775_v28  ;;  %vm5201_vm12 = vmmov %vm5195_vm5 }
 0x7fb   : > { %1969 = vmatpush.msrb.mxu1 %v1876_v56  ;;  %2009 = vmatpush.msrb.mxu2 %v1877_v0 }
 0x7fc   : > { %2050 = vmatpush.msrb.mxu3 %v3742_v11  ;;  %v1943_v50 = vsel %vm5154_vm8, %v3732_v16, %v3777_v30 }
 0x7fd   : > { %v4691_v1 = vpop.permute.xlu0 %3714  ;;  %v4693_v2 = vpop.permute.xlu1 %3749  ;;  %1970 = vmatpush.msrb.mxu1 %v1856_v62  ;;  %2010 = vmatpush.msrb.mxu2 %v1857_v63 }
 0x7fe   : > { %2051 = vmatpush.msrb.mxu3 %v3677_v49  ;;  %v3752_v8 = vunpack.i.h.bf16 %v4693_v2  ;;  %v3751_v17 = vunpack.i.l.bf16 %v4693_v2  ;;  %v3717_v52 = vunpack.i.h.bf16 %v4691_v1  ;;  %v3716_v46 = vunpack.i.l.bf16 %v4691_v1 }
 0x7ff   : > { %1971 = vmatpush.msrb.mxu1 %v1854_v13  ;;  %2011 = vmatpush.msrb.mxu2 %v1855_v5 }
 0x800   : > { %2052 = vmatpush.msrb.mxu3 %v3747_v58  ;;  %v1813_v14 = vsel %vm5195_vm5, %v3751_v17, %v3752_v8  ;;  %v1811_v21 = vsel %vm5196_vm10, %v3716_v46, %v3717_v52  ;;  %vm5202_vm5 = vmmov %vm5199_vm1 }
 0x801   : > { %1972 = vmatpush.msrb.mxu1 %v1834_v6  ;;  %2012 = vmatpush.msrb.mxu2 %v1835_v9  ;;  %vm5203_vm10 = vmmov %vm5198_vm0 }
 0x802   : > { %2053 = vmatpush.msrb.mxu3 %v3702_v12 }
 0x803   : > { %1973 = vmatpush.msrb.mxu1 %v1832_v53  ;;  %2013 = vmatpush.msrb.mxu2 %v1833_v10 }
 0x804   : > { %2054 = vmatpush.msrb.mxu3 %v3752_v8 }
 0x805   : > { %v3760_v19 = vpop.permute.xlu0 %3759  ;;  %v3755_v20 = vpop.permute.xlu1 %3754  ;;  %2014 = vmatpush.msrb.mxu2 %v1813_v14 }
 0x806   : > { %v3762_v25 = vunpack.i.h.bf16 %v3760_v19  ;;  %v3761_v54 = vunpack.i.l.bf16 %v3760_v19  ;;  %v3757_v26 = vunpack.i.h.bf16 %v3755_v20  ;;  %v3756_v27 = vunpack.i.l.bf16 %v3755_v20  ;;  %2055 = vmatpush.msrb.mxu3 %v3717_v52 }
 0x807   : > { %2015 = vmatpush.msrb.mxu2 %v1811_v21 }
 0x808   : > { %2056 = vmatpush.msrb.mxu3 %v3757_v26  ;;  %v1944_v29 = vsel %vm5154_vm8, %v3761_v54, %v3762_v25  ;;  %v1791_v59 = vsel %vm5197_vm11, %v3756_v27, %v3757_v26  ;;  %v1945_v38 = vsel %vm5154_vm8, %v3762_v25, %v3776_v31  ;;  %vm5204_vm11 = vcmask 891904  }
 0x809   : > { %1998 = vmatpush.msra.mxu0 %v1944_v29  ;;  %2016 = vmatpush.msrb.mxu2 %v1791_v59 }
 0x80a   : > { %2057 = vmatpush.msrb.mxu3 %v3727_v47 }
 0x80b   : > { %1999 = vmatpush.msra.mxu0 %v1942_v51  ;;  %2017 = vmatpush.msrb.mxu2 %v1789_v34 }
 0x80c   : > { %3393 = vmatmul.msk.f32.vlgmr.msra.gmra.mxu0 %vm5199_vm1, %v4486_v24  ;;  %2058 = vmatpush.msrb.mxu3 %v4613_v42  ;;  %vm5205_vm1 = vmmov %vm5204_vm11 }
 0x80d   : > { %2038 = vmatpush.msrb.mxu0 %v1945_v38  ;;  %v3765_v11 = vpop.permute.xlu0 %3764  ;;  %v3770_v44 = vpop.permute.xlu1 %3769  ;;  %2018 = vmatpush.msrb.mxu2 %v4617_v43 }
 0x80e   : > { %v3767_v32 = vunpack.i.h.bf16 %v3765_v11  ;;  %v3766_v45 = vunpack.i.l.bf16 %v3765_v11  ;;  %2059 = vmatpush.msrb.mxu3 %v4598_v37  ;;  %v3771_v48 = vunpack.i.l.bf16 %v3770_v44  ;;  %v3772_v49 = vunpack.i.h.bf16 %v3770_v44 }
 0x80f   : > { %2039 = vmatpush.msrb.mxu0 %v1943_v50  ;;  %2019 = vmatpush.msrb.mxu2 %v4596_v36  ;;  %v2165_v36 = vpop.permute.xlu2 %2164 }
 0x810   : > { %2060 = vmatmul.f32.vlgmr.msrb.gmra.mxu3 %v4484_v23  ;;  %v1812_v42 = vsel %vm5200_vm14, %v3766_v45, %v3751_v17  ;;  %2020 = vmatmul.f32.vlgmr.msrb.gmra.mxu2 %v4484_v23  ;;  %v1810_v43 = vsel %vm5201_vm12, %v3767_v32, %v3716_v46  ;;  %v1790_v37 = vsel %vm5203_vm10, %v3771_v48, %v3756_v27  ;;  %vm5206_vm14 = vmmov %vm5202_vm5  ;;  %vm5207_vm12 = vcmask 31744  }
 0x811   : > { %2078 = vmatpush.msra.mxu0 %v3776_v31  ;;  %1974 = vmatpush.msrb.mxu1 %v1812_v42  ;;  %v1788_v55 = vsel %vm5198_vm0, %v3772_v49, %v3726_v15 }
 0x813   : > { %2079 = vmatpush.msra.mxu0 %v3777_v30  ;;  %1975 = vmatpush.msrb.mxu1 %v1810_v43 }
 0x814   : > { %3394 = vmatmul.msk.f32.vlgmr.msrb.gmra.mxu0 %vm5202_vm5, %v4486_v24  ;;  %vm5208_vm5 = vmmov %vm5207_vm12 }
 0x815   : > { %1976 = vmatpush.msrb.mxu1 %v1790_v37  ;;  %v2163_v56 = vpop.permute.xlu1 %2162  ;;  %v2161_v57 = vpop.permute.xlu0 %2160  ;;  %vm5209_vm10 = vmmov %vm5208_vm5 }
 0x816   : > { %v2167_v0 = vsel %vm5204_vm11, %v2163_v56, %v2165_v36  ;;  %v2166_v58 = vsel %vm5205_vm1, %v2161_v57, %v2163_v56 }
 0x817   : > { %1977 = vmatpush.msrb.mxu1 %v1788_v55  ;;  %3401 = vmatpush.msk.msrb.mxu0 %vm569_vm6, %v2167_v0 }
 0x819   : > { %1978 = vmatpush.msrb.mxu1 %v4606_v40 }
 0x81b   : > { %1979 = vmatpush.msrb.mxu1 %v4604_v39 }
 0x81c   : > { %1980 = vmatmul.f32.vlgmr.msrb.gmra.mxu1 %v4484_v23  ;;  %3395 = vmatmul.msk.f32.vlgmr.msra.gmra.mxu0 %vm5206_vm14, %v4486_v24 }
 0x81d   : > { %3399 = vmatpush.msk.msra.mxu1 %vm569_vm6, %v2166_v58  ;;  %v1955_v23 = vpop.permute.xlu0 %1954 }
 0x81f   : > { %3403 = vmatpush.msk.msrb.mxu1 %vm569_vm6, %v2165_v36 }
 0x824   : > { %3400 = vmatmul.msk.f32.vlgmr.msra.gmra.mxu1 %vm5207_vm12, %v3377_v60  ;;  %3402 = vmatmul.msk.f32.vlgmr.msrb.gmra.mxu0 %vm5208_vm5, %v3377_v60 }
 0x82c   : > { %3404 = vmatmul.msk.f32.vlgmr.msrb.gmra.mxu1 %vm5209_vm10, %v3377_v60 }
 0x889   : > { %v2001_v39 = vpop.f32.mrf.mxu0 }
 0x891   : > { %v2041_v40 = vpop.f32.mrf.mxu0 }
 0x893   : > { %v2021_v62 = vpop.f32.mrf.mxu2  ;;  %v2061_v63 = vpop.f32.mrf.mxu3 }
 0x894   : > { %v2022_v24 = vadd.f32 %v2021_v62, %v1955_v23  ;;  %v2062_v2 = vadd.f32 %v2061_v63, %v1955_v23 }
 0x896   : > { %v2042_v1 = vadd.f32 %v2041_v40, %v2022_v24 }
 0x898   : > { %v2085_v13 = vadd.f32 2.0, %v2042_v1  ;;  %v2241_v27 = vrot.slane %v2042_v1, 6 }
 0x899   : > { %v1981_v61 = vpop.f32.mrf.mxu1  ;;  %v2081_v12 = vpop.f32.mrf.mxu0 }
 0x89a   : > { %v1982_v3 = vadd.f32 %v1981_v61, %v1955_v23  ;;  %v2082_v5 = vadd.f32 %v2081_v12, %v2062_v2  ;;  %v3397_v7 = vmul.f32 -1.442695, %v2085_v13 }
 0x89c   : > { %v4749_v8 = vadd.f32 %v2001_v39, %v1982_v3  ;;  %v2086_v17 = vadd.f32 2.0, %v2082_v5  ;;  %3951 = vpow2.f32 %v3397_v7  ;;  %v2242_v59 = vrot.slane %v2082_v5, 6 }
 0x89e   : > { %v2084_v6 = vadd.f32 2.0, %v4749_v8  ;;  %v3398_v9 = vmul.f32 -1.442695, %v2086_v17  ;;  %v2240_v30 = vrot.slane %v4749_v8, 6 }
 0x8a0   : > { %v3396_v52 = vmul.f32 -1.442695, %v2084_v6  ;;  %3953 = vpow2.f32 %v3398_v9 }
 0x8a1   : > { %v4752_v16 = vpop.f32.mrf.mxu1  ;;  %v2214_v26 = vpop.f32.mrf.mxu0 }
 0x8a2   : > { %3955 = vpow2.f32 %v3396_v52  ;;  %v3952_v46 = vpop.eup %3951  ;;  %v2247_v34 = vadd.f32 %v2241_v27, %v2214_v26  ;;  %v2246_v23 = vadd.f32 %v2240_v30, %v4752_v16 }
 0x8a3   : > { %v2097_v53 = vadd.f32 1.0, %v3952_v46 }
 0x8a5   : > { %3957 = vrcp.f32 %v2097_v53  ;;  %v2123_v25 = vand.u32 2147483647, %v2097_v53  ;;  %v2125_v54 = vand.u32 2147483648, %v2097_v53  ;;  %vm2119_vm0 = vweird.f32 %v2097_v53 }
 0x8a6   : > { %v3954_v10 = vpop.eup %3953 }
 0x8a7   : > { %v2098_v47 = vadd.f32 1.0, %v3954_v10  ;;  %vm2124_vm1 = vcmp.eq.f32.partialorder %v2123_v25, 8.507059e+37  ;;  %v2126_v44 = vor.u32 1.1754944e-38, %v2125_v54 }
 0x8a8   : > { %v3956_v14 = vpop.eup %3955 }
 0x8a9   : > { %v2096_v15 = vadd.f32 1.0, %v3956_v14  ;;  %3959 = vrcp.f32 %v2098_v47  ;;  %v2140_v32 = vand.u32 2147483648, %v2098_v47  ;;  %v2138_v48 = vand.u32 2147483647, %v2098_v47  ;;  %v2234_v42 = vpop.f32.mrf.mxu1 }
 0x8aa   : > { %vm2134_vm5 = vweird.f32 %v2098_v47  ;;  %v2248_v58 = vadd.f32 %v2242_v59, %v2234_v42 }
 0x8ab   : > { %3961 = vrcp.f32 %v2096_v15  ;;  %v3958_v18 = vpop.eup %3957  ;;  %v2108_v49 = vand.u32 2147483647, %v2096_v15  ;;  %v2110_v43 = vand.u32 2147483648, %v2096_v15  ;;  %v2141_v57 = vor.u32 1.1754944e-38, %v2140_v32 }
 0x8ac   : > { %v2115_v19 = vmul.f32 %v3958_v18, %v2097_v53  ;;  %vm2120_vm11 = vweird.f32 %v3958_v18  ;;  %vm2104_vm8 = vweird.f32 %v2096_v15 }
 0x8ad   : > { %vm2121_vm14 = vmor %vm2119_vm0, %vm2120_vm11  ;;  %vm2139_vm11 = vcmp.eq.f32.partialorder %v2138_v48, 8.507059e+37  ;;  %v2111_v40 = vor.u32 1.1754944e-38, %v2110_v43 }
 0x8ae   : > { %v2116_v21 = vsub.f32 1.0, %v2115_v19 }
 0x8af   : > { %v3960_v20 = vpop.eup %3959 }
 0x8b0   : > { %v2130_v28 = vmul.f32 %v3960_v20, %v2098_v47  ;;  %v2117_v31 = vmul.f32 %v3958_v18, %v2116_v21  ;;  %vm2135_vm12 = vweird.f32 %v3960_v20 }
 0x8b1   : > { %v3962_v29 = vpop.eup %3961  ;;  %vm2136_vm7 = vmor %vm2134_vm5, %vm2135_vm12  ;;  %vm5213_vm12 = vcmask 744448   ;;  %vm5214_vm5 = vcmask 891904  }
 0x8b2   : > { %v2100_v51 = vmul.f32 %v3962_v29, %v2096_v15  ;;  %v2131_v38 = vsub.f32 1.0, %v2130_v28  ;;  %v2118_v11 = vadd.f32 %v3958_v18, %v2117_v31  ;;  %vm2105_vm10 = vweird.f32 %v3962_v29 }
 0x8b3   : > { %vm2106_vm0 = vmor %vm2104_vm8, %vm2105_vm10  ;;  %vm5211_vm8 = vcmask 736256   ;;  %vm5215_vm10 = vcmask 883712  }
 0x8b4   : > { %v2101_v45 = vsub.f32 1.0, %v2100_v51  ;;  %v2132_v50 = vmul.f32 %v3960_v20, %v2131_v38  ;;  %v2122_v37 = vsel %vm2121_vm14, %v3958_v18, %v2118_v11  ;;  %vm2109_vm14 = vcmp.eq.f32.partialorder %v2108_v49, 8.507059e+37 }
 0x8b5   : > { %v2127_v56 = vsel %vm2124_vm1, %v2126_v44, %v2122_v37  ;;  %vm5212_vm1 = vcmask 293888  }
 0x8b6   : > { %v2102_v36 = vmul.f32 %v3962_v29, %v2101_v45  ;;  %v2133_v0 = vadd.f32 %v3960_v20, %v2132_v50  ;;  %3963 = vlog2.f32 %v2127_v56  ;;  %v2250_v55 = vmul.f32 %v2247_v34, %v2127_v56 }
 0x8b8   : > { %v2103_v60 = vadd.f32 %v3962_v29, %v2102_v36  ;;  %v2137_v39 = vsel %vm2136_vm7, %v3960_v20, %v2133_v0  ;;  %v2253_v62 = vsel %vm1310_vm2, %v2214_v26, %v2250_v55  ;;  %vm5210_vm7 = vcmask 707584  }
 0x8b9   : > { %v2142_v63 = vsel %vm2139_vm11, %v2141_v57, %v2137_v39  ;;  %v2256_v13 = vmul.f32 %v2253_v62, %v4250_v35  ;;  %vm5216_vm11 = vcmask 900096  }
 0x8ba   : > { %v2107_v24 = vsel %vm2106_vm0, %v3962_v29, %v2103_v60  ;;  %3965 = vlog2.f32 %v2142_v63  ;;  %v2251_v1 = vmul.f32 %v2248_v58, %v2142_v63  ;;  %vm5217_vm0 = vcmask 1031168  }
 0x8bb   : > { %v2112_v2 = vsel %vm2109_vm14, %v2111_v40, %v2107_v24  ;;  %v2261_v6 = vrot.slane %v2256_v13, 4  ;;  %vm5218_vm14 = vcmask 1039360  }
 0x8bc   : > { %3967 = vlog2.f32 %v2112_v2  ;;  %v2249_v61 = vmul.f32 %v2246_v23, %v2112_v2  ;;  %v2254_v12 = vsel %vm1310_vm2, %v2234_v42, %v2251_v1  ;;  %v3964_v3 = vpop.eup %3963 }
 0x8bd   : > { %v2257_v5 = vmul.f32 %v2254_v12, %v4248_v33  ;;  %v2147_v17 = vmul.f32 0.6931472, %v3964_v3 }
 0x8be   : > { %v2252_v7 = vsel %vm1310_vm2, %v4752_v16, %v2249_v61  ;;  %v3413_v61 = vld [vmem:[%s5137_s6 + $0x10] sm:$0xff] }
 0x8bf   : > { %v2255_v8 = vmul.f32 %v2252_v7, %v4244_v22  ;;  %2265 = vrot.lane.b32.xlu2 %v2257_v5, %s3996_s19  ;;  %v2275_v47 = vmul.f32 %v2147_v17, %v4250_v35 }
 0x8c0   : > { %v3966_v9 = vpop.eup %3965 }
 0x8c1   : > { %v2149_v52 = vmul.f32 0.6931472, %v3966_v9  ;;  %v2262_v46 = vsel %vm569_vm6, %v2255_v8, %v2261_v6  ;;  %v2278_v18 = vsel %vm1336_vm13, %v2275_v47, 0.0  ;;  %v3412_v6 = vld [vmem:[%s5136_s5 + $0x28] sm:$0xff] }
 0x8c2   : > { %v3968_v53 = vpop.eup %3967  ;;  %2263 = vrot.lane.b32.xlu1 %v2262_v46, %s3996_s19  ;;  %v3408_v9 = vld [vmem:[%s5134_s3 + $0x28] sm:$0xff]  ;;  %v3407_v46 = vld [vmem:[%s5134_s3 + $0x20] sm:$0xff] }
 0x8c3   : > { %v2145_v10 = vmul.f32 0.6931472, %v3968_v53  ;;  %v2276_v15 = vmul.f32 %v2149_v52, %v4248_v33  ;;  %v3411_v52 = vld [vmem:[%s5136_s5 + $0x20] sm:$0xff] }
 0x8c5   : > { %v2274_v14 = vmul.f32 %v2145_v10, %v4244_v22  ;;  %v2280_v20 = vsel %vm1340_vm15, %v2276_v15, 0.0 }
 0x8c7   : > { %v2277_v16 = vsel %vm1336_vm13, %v2274_v14, 0.0 }
 0x8c8   : > { %v2279_v19 = vadd.f32 %v2278_v18, %v2277_v16 }
 0x8ca   : > { %v4772_v21 = vadd.f32 %v2280_v20, %v2279_v19 }
 0x919   : > { %v2266_v26 = vpop.permute.xlu2 %2265 }
 0x934   : > { %v2264_v25 = vpop.permute.xlu1 %2263 }
 0x935   : > { %v2267_v54 = vrot.slane %v2264_v25, 4 }
 0x937   : > { %v2268_v27 = vsel %vm388_vm3, %v2267_v54, %v2264_v25  ;;  %v2269_v28 = vsel %vm388_vm3, %v2267_v54, %v2266_v26 }
 0x938   : > { %2272 = vst.msk [vmem:[#allocation2] sm:$0xff] %vm4083_vm4, %v2268_v27 }
 0x939   : > { %2273 = vst.msk [vmem:[#allocation2 + $0x8] sm:$0xf] %vm5210_vm7, %v2269_v28  ;;  %vm5219_vm7 = vmmov %vm5211_vm8 }
 0x93f   : > { %v4779_v29 = vld [vmem:[#allocation2] sm:$0xff] }
 0x940   : > { %v2314_v59 = vld [vmem:[#allocation2 + $0x8] sm:$0xf]  ;;  %2317 = vst [vmem:[#allocation1] ss:$2 sm:$0xff] %v4779_v29 }
 0x941   : > { %2319 = vst [vmem:[#allocation1 + $0x10] ss:$2 sm:$0xff] %v2314_v59  ;;  %v3090_v12 = vld [vmem:[#allocation2 + $0x8] sm:$0xf] }
 0x947   : > { %v4782_v30 = vld.sshfl [vmem:[#allocation1] sm:$0xff pattern:$0x75316420]  ;;  %v4784_v31 = vld.sshfl [vmem:[#allocation1 + $0x8] sm:$0xff pattern:$0x75316420] }
 0x948   : > { %2327 = vst [vmem:[#allocation1 + $0x1] ss:$2 sm:$0xff] %v4779_v29  ;;  %v4787_v51 = vld.sshfl [vmem:[#allocation1 + $0x10] sm:$0xff pattern:$0x75316420] }
 0x949   : > { %2329 = vst [vmem:[#allocation1 + $0x11] ss:$2 sm:$0xff] %v2314_v59 }
 0x94f   : > { %v2330_v34 = vld.sshfl [vmem:[#allocation1] sm:$0xff pattern:$0x75316420]  ;;  %v2331_v38 = vld.sshfl [vmem:[#allocation1 + $0x8] sm:$0xff pattern:$0x75316420] }
 0x950   : > { %2344 = vst [vmem:[#allocation1] ss:$2 sm:$0xff] %v4779_v29  ;;  %v2332_v11 = vld.sshfl [vmem:[#allocation1 + $0x10] sm:$0xff pattern:$0x75316420] }
 0x951   : > { %v3778_v44 = vpack.i.bf16 %v2331_v38, %v2332_v11  ;;  %2346 = vst [vmem:[#allocation1 + $0x10] ss:$2 sm:$0xff] %v2314_v59 }
 0x953   : > { %3779 = vrot.lane.b32.xlu2 %v3778_v44, %s4004_s29 }
 0x957   : > { %v2347_v32 = vld.sshfl [vmem:[#allocation1] sm:$0xff pattern:$0x75316420]  ;;  %v2348_v45 = vld.sshfl [vmem:[#allocation1 + $0x8] sm:$0xff pattern:$0x75316420] }
 0x958   : > { %2362 = vst [vmem:[#allocation1 + $0x1] ss:$2 sm:$0xff] %v4779_v29  ;;  %v2349_v50 = vld.sshfl [vmem:[#allocation1 + $0x10] sm:$0xff pattern:$0x75316420] }
 0x959   : > { %v3783_v48 = vpack.i.bf16 %v2348_v45, %v2349_v50  ;;  %2364 = vst [vmem:[#allocation1 + $0x11] ss:$2 sm:$0xff] %v2314_v59 }
 0x95b   : > { %3784 = vrot.lane.b32.xlu0 %v3783_v48, %s3997_s20  ;;  %v3405_v48 = vld [vmem:[%s5133_s2 + $0x20] sm:$0xff] }
 0x95f   : > { %v2365_v42 = vld.sshfl [vmem:[#allocation1] sm:$0xff pattern:$0x75316420]  ;;  %v2366_v49 = vld.sshfl [vmem:[#allocation1 + $0x8] sm:$0xff pattern:$0x75316420] }
 0x960   : > { %2379 = vst [vmem:[#allocation1] ss:$2 sm:$0xff] %v4779_v29  ;;  %v2367_v43 = vld.sshfl [vmem:[#allocation1 + $0x10] sm:$0xff pattern:$0x75316420] }
 0x961   : > { %v3788_v37 = vpack.i.bf16 %v2366_v49, %v2367_v43  ;;  %2381 = vst [vmem:[#allocation1 + $0x10] ss:$2 sm:$0xff] %v2314_v59 }
 0x963   : > { %3789 = vrot.lane.b32.xlu1 %v3788_v37, %s3998_s21 }
 0x967   : > { %v2382_v36 = vld.sshfl [vmem:[#allocation1] sm:$0xff pattern:$0x75316420]  ;;  %v2383_v56 = vld.sshfl [vmem:[#allocation1 + $0x8] sm:$0xff pattern:$0x75316420] }
 0x968   : > { %2397 = vst [vmem:[#allocation1 + $0x1] ss:$2 sm:$0xff] %v4779_v29  ;;  %2385 = vrot.lane.b32.xlu0 %v2382_v36, %s3999_s22  ;;  %v2384_v0 = vld.sshfl [vmem:[#allocation1 + $0x10] sm:$0xff pattern:$0x75316420] }
 0x969   : > { %v3793_v55 = vpack.i.bf16 %v2383_v56, %v2384_v0  ;;  %2399 = vst [vmem:[#allocation1 + $0x11] ss:$2 sm:$0xff] %v2314_v59 }
 0x96b   : > { %3794 = vrot.lane.b32.xlu1 %v3793_v55, %s3999_s22 }
 0x96f   : > { %v2400_v57 = vld.sshfl [vmem:[#allocation1] sm:$0xff pattern:$0x75316420]  ;;  %v2401_v58 = vld.sshfl [vmem:[#allocation1 + $0x8] sm:$0xff pattern:$0x75316420] }
 0x970   : > { %2414 = vst [vmem:[#allocation1] ss:$2 sm:$0xff] %v4779_v29  ;;  %v2402_v60 = vld.sshfl [vmem:[#allocation1 + $0x10] sm:$0xff pattern:$0x75316420] }
 0x971   : > { %v3798_v39 = vpack.i.bf16 %v2401_v58, %v2402_v60  ;;  %2416 = vst [vmem:[#allocation1 + $0x10] ss:$2 sm:$0xff] %v2314_v59 }
 0x973   : > { %3799 = vrot.lane.b32.xlu2 %v3798_v39, %s4000_s23  ;;  %2403 = vrot.lane.b32.xlu1 %v2400_v57, %s4000_s23 }
 0x977   : > { %v2417_v40 = vld.sshfl [vmem:[#allocation1] sm:$0xff pattern:$0x75316420]  ;;  %v2418_v23 = vld.sshfl [vmem:[#allocation1 + $0x8] sm:$0xff pattern:$0x75316420] }
 0x978   : > { %2432 = vst [vmem:[#allocation1 + $0x1] ss:$2 sm:$0xff] %v4779_v29  ;;  %v2419_v62 = vld.sshfl [vmem:[#allocation1 + $0x10] sm:$0xff pattern:$0x75316420] }
 0x979   : > { %v3803_v63 = vpack.i.bf16 %v2418_v23, %v2419_v62  ;;  %2434 = vst [vmem:[#allocation1 + $0x11] ss:$2 sm:$0xff] %v2314_v59 }
 0x97b   : > { %3804 = vrot.lane.b32.xlu1 %v3803_v63, %s4001_s24 }
 0x97f   : > { %v2435_v24 = vld.sshfl [vmem:[#allocation1] sm:$0xff pattern:$0x75316420]  ;;  %v2436_v1 = vld.sshfl [vmem:[#allocation1 + $0x8] sm:$0xff pattern:$0x75316420] }
 0x980   : > { %2449 = vst [vmem:[#allocation1] ss:$2 sm:$0xff] %v4779_v29  ;;  %v2437_v2 = vld.sshfl [vmem:[#allocation1 + $0x10] sm:$0xff pattern:$0x75316420] }
 0x981   : > { %v3808_v13 = vpack.i.bf16 %v2436_v1, %v2437_v2  ;;  %2451 = vst [vmem:[#allocation1 + $0x10] ss:$2 sm:$0xff] %v2314_v59 }
 0x983   : > { %2420 = vrot.lane.b32.xlu1 %v2417_v40, %s4001_s24  ;;  %3809 = vrot.lane.b32.xlu2 %v3808_v13, %s4002_s25 }
 0x987   : > { %v2452_v3 = vld.sshfl [vmem:[#allocation1] sm:$0xff pattern:$0x75316420]  ;;  %v2453_v5 = vld.sshfl [vmem:[#allocation1 + $0x8] sm:$0xff pattern:$0x75316420] }
 0x988   : > { %2897 = vst [vmem:[#allocation1] ss:$2 sm:$0xff] %v3413_v61  ;;  %v2454_v7 = vld.sshfl [vmem:[#allocation1 + $0x10] sm:$0xff pattern:$0x75316420]  ;;  %v3406_v61 = vld [vmem:[%s5133_s2 + $0x28] sm:$0xff] }
 0x989   : > { %2459 = vrot.lane.b32.xlu0 %v2454_v7, %s4003_s28  ;;  %3095 = vst [vmem:[#allocation1 + $0x10] ss:$2 sm:$0xff] %v3090_v12 }
 0x98b   : > { %2333 = vrot.lane.b32.xlu1 %v2330_v34, %s4004_s29  ;;  %2438 = vrot.lane.b32.xlu2 %v2435_v24, %s4002_s25 }
 0x98f   : > { %v4812_v8 = vld.sshfl [vmem:[#allocation1] sm:$0xff pattern:$0x75316420]  ;;  %v4814_v17 = vld.sshfl [vmem:[#allocation1 + $0x8] sm:$0xff pattern:$0x75316420] }
 0x990   : > { %3093 = vst [vmem:[#allocation1] ss:$2 sm:$0xff] %v4779_v29 }
 0x991   : > { %2457 = vrot.lane.b32.xlu0 %v2453_v5, %s4003_s28 }
 0x993   : > { %2579 = vperm.xlu1 %3500, %v3412_v6   ;;  %2350 = vrot.lane.b32.xlu2 %v2347_v32, %s3997_s20 }
 0x999   : > { %2455 = vrot.lane.b32.xlu0 %v2452_v3, %s4003_s28 }
 0x99b   : > { %2482 = vperm.xlu2 %3501, %v3408_v9  }
 0x9a1   : > { %2368 = vrot.lane.b32.xlu0 %v2365_v42, %s3998_s21 }
 0x9a3   : > { %2574 = vperm.xlu2 %3501, %v3411_v52  }
 0x9a9   : > { %2477 = vperm.xlu0 %3502, %v3407_v46  }
 0x9ad   : > { %v4837_v47 = vpop.permute.xlu2 %3779 }
 0x9ae   : > { %v3781_v34 = vunpack.i.l.bf16 %v4837_v47  ;;  %v3782_v0 = vunpack.i.h.bf16 %v4837_v47 }
 0x9b0   : > { %v2465_v37 = vsel %vm569_vm6, %v4787_v51, %v3781_v34  ;;  %v2340_v24 = vsel %vm5218_vm14, %v3782_v0, %v3781_v34 }
 0x9b1   : > { %v2464_v3 = vsel %vm569_vm6, %v4784_v31, %v2340_v24 }
 0x9cd   : > { %v4839_v14 = vpop.permute.xlu0 %3784  ;;  %v3800_v16 = vpop.permute.xlu2 %3799 }
 0x9ce   : > { %v3801_v28 = vunpack.i.l.bf16 %v3800_v16  ;;  %v3786_v38 = vunpack.i.l.bf16 %v4839_v14  ;;  %v3802_v42 = vunpack.i.h.bf16 %v3800_v16  ;;  %v3787_v55 = vunpack.i.h.bf16 %v4839_v14 }
 0x9d0   : > { %v2410_v40 = vsel %vm5215_vm10, %v3802_v42, %v3801_v28  ;;  %v2357_v63 = vsel %vm5217_vm0, %v3787_v55, %v3786_v38 }
 0x9d5   : > { %v4833_v53 = vpop.permute.xlu1 %3789 }
 0x9d6   : > { %v3791_v29 = vunpack.i.l.bf16 %v4833_v53  ;;  %v3792_v49 = vunpack.i.h.bf16 %v4833_v53 }
 0x9d8   : > { %v2468_v50 = vsel %vm569_vm6, %v3786_v38, %v3791_v29  ;;  %v2375_v23 = vsel %vm5216_vm11, %v3792_v49, %v3791_v29  ;;  %vm5225_vm11 = vmmov %vm5217_vm0 }
 0x9d9   : > { %v2467_v1 = vsel %vm569_vm6, %v2357_v63, %v2375_v23  ;;  %vm5226_vm0 = vmmov %vm5218_vm14  ;;  %vm5227_vm14 = vcmask 900096  }
 0x9da   : > { %v2386_v18 = vpop.permute.xlu0 %2385 }
 0x9dd   : > { %v4835_v10 = vpop.permute.xlu1 %3794  ;;  %v3810_v20 = vpop.permute.xlu2 %3809 }
 0x9de   : > { %v3796_v54 = vunpack.i.l.bf16 %v4835_v10  ;;  %v3811_v26 = vunpack.i.l.bf16 %v3810_v20  ;;  %v3797_v32 = vunpack.i.h.bf16 %v4835_v10  ;;  %v3812_v45 = vunpack.i.h.bf16 %v3810_v20 }
 0x9e0   : > { %v2471_v44 = vsel %vm569_vm6, %v3796_v54, %v3801_v28  ;;  %v2445_v57 = vsel %vm5213_vm12, %v3812_v45, %v3811_v26  ;;  %v2392_v58 = vsel %vm5214_vm5, %v3797_v32, %v3796_v54 }
 0x9e1   : > { %v2470_v62 = vsel %vm569_vm6, %v2392_v58, %v2410_v40 }
 0x9e5   : > { %v2404_v15 = vpop.permute.xlu1 %2403  ;;  %v2439_v51 = vpop.permute.xlu2 %2438 }
 0x9ed   : > { %v3805_v19 = vpop.permute.xlu1 %3804  ;;  %v2351_v46 = vpop.permute.xlu2 %2350 }
 0x9ee   : > { %v3806_v25 = vunpack.i.l.bf16 %v3805_v19  ;;  %v3807_v11 = vunpack.i.h.bf16 %v3805_v19  ;;  %v2356_v10 = vsel %vm5225_vm11, %v2351_v46, %v3787_v55 }
 0x9f0   : > { %v2474_v59 = vsel %vm569_vm6, %v3806_v25, %v3811_v26  ;;  %v2427_v36 = vsel %vm529_vm9, %v3807_v11, %v3806_v25 }
 0x9f1   : > { %v2473_v60 = vsel %vm569_vm6, %v2427_v36, %v2445_v57 }
 0x9f5   : > { %v2421_v39 = vpop.permute.xlu1 %2420  ;;  %v2483_v19 = vpop.permute.xlu2 %2482 }
 0x9f6   : > { %v2426_v2 = vsel %vm529_vm9, %v2421_v39, %v3807_v11 }
 0x9fb   : > { %v2460_v27 = vpop.permute.xlu0 %2459 }
 0x9fc   : > { %3422 = vmatpush.msk.msra.mxu3 %vm569_vm6, %v2460_v27 }
 0x9fd   : > { %v2334_v31 = vpop.permute.xlu1 %2333 }
 0x9fe   : > { %2555 = vmatpush.msra.mxu3 %v2474_v59  ;;  %v2339_v47 = vsel %vm5226_vm0, %v2334_v31, %v3782_v0 }
 0x9ff   : > { %v2463_v16 = vsel %vm569_vm6, %v4782_v30, %v2339_v47  ;;  %v3409_v30 = vld [vmem:[%s5135_s4 + $0x20] sm:$0xff] }
 0xa00   : > { %2556 = vmatpush.msra.mxu3 %v2471_v44 }
 0xa02   : > { %2557 = vmatpush.msra.mxu3 %v2468_v50  ;;  %v3410_v50 = vld [vmem:[%s5135_s4 + $0x28] sm:$0xff] }
 0xa03   : > { %v2458_v43 = vpop.permute.xlu0 %2457 }
 0xa04   : > { %v2462_v56 = vsel %vm5211_vm8, %v2458_v43, %v2460_v27  ;;  %2558 = vmatpush.msra.mxu3 %v2465_v37  ;;  %vm5220_vm8 = vmmov %vm5215_vm10  ;;  %vm5224_vm10 = vcmask 891904  }
 0xa05   : > { %3419 = vmatpush.msk.msra.mxu2 %vm569_vm6, %v2462_v56  ;;  %3423 = vmatmul.msk.f32.vlgmr.msra.gmra.mxu3 %vm5212_vm1, %v3405_v48  ;;  %v2409_v5 = vsel %vm5220_vm8, %v2404_v15, %v3802_v42  ;;  %vm5221_vm1 = vmmov %vm5213_vm12  ;;  %vm5222_vm12 = vcmask 293888   ;;  %v2391_v9 = vsel %vm5224_vm10, %v2386_v18, %v3797_v32  ;;  %v2575_v56 = vpop.permute.xlu2 %2574  ;;  %v2580_v57 = vpop.permute.xlu1 %2579 }
 0xa06   : > { %v2444_v7 = vsel %vm5221_vm1, %v2439_v51, %v3812_v45  ;;  %vm5223_vm5 = vmmov %vm5222_vm12  ;;  %v2469_v52 = vsel %vm569_vm6, %v2391_v9, %v2409_v5 }
 0xa07   : > { %2532 = vmatpush.msra.mxu2 %v2473_v60  ;;  %v2472_v6 = vsel %vm569_vm6, %v2426_v2, %v2444_v7  ;;  %vm5229_vm8 = vmmov %vm5223_vm5 }
 0xa08   : > { %vm5230_vm1 = vmmov %vm5223_vm5 }
 0xa09   : > { %2533 = vmatpush.msra.mxu2 %v2470_v62 }
 0xa0b   : > { %2534 = vmatpush.msra.mxu2 %v2467_v1  ;;  %v2456_v13 = vpop.permute.xlu0 %2455 }
 0xa0c   : > { %v2461_v12 = vsel %vm5219_vm7, %v2456_v13, %v2458_v43  ;;  %vm5228_vm7 = vmmov %vm5223_vm5 }
 0xa0d   : > { %3416 = vmatpush.msk.msra.mxu0 %vm569_vm6, %v2461_v12  ;;  %2535 = vmatpush.msra.mxu2 %v2464_v3 }
 0xa0e   : > { %3424 = vmatmul.msk.f32.gmra.mxu3 %vm5222_vm12, %v3406_v61  ;;  %3420 = vmatmul.msk.f32.vlgmr.msra.gmra.mxu2 %vm5223_vm5, %v3405_v48  ;;  %vm5231_vm12 = vcmask 130048  }
 0xa0f   : > { %2509 = vmatpush.msra.mxu0 %v2472_v6  ;;  %vm5232_vm5 = vmmov %vm5231_vm12 }
 0xa10   : > { %vm5233_vm10 = vmmov %vm5232_vm5 }
 0xa11   : > { %2510 = vmatpush.msra.mxu0 %v2469_v52  ;;  %vm5234_vm11 = vmmov %vm5232_vm5 }
 0xa12   : > { %vm5235_vm0 = vmmov %vm5232_vm5 }
 0xa13   : > { %v2369_v53 = vpop.permute.xlu0 %2368 }
 0xa14   : > { %v2374_v14 = vsel %vm5227_vm14, %v2369_v53, %v3792_v49  ;;  %vm5236_vm14 = vmmov %vm5235_vm0 }
 0xa15   : > { %v2466_v15 = vsel %vm569_vm6, %v2356_v10, %v2374_v14 }
 0xa16   : > { %2511 = vmatpush.msra.mxu0 %v2466_v15  ;;  %3421 = vmatmul.msk.f32.gmra.mxu2 %vm5228_vm7, %v3406_v61  ;;  %vm5237_vm7 = vcmask 1047704  }
 0xa18   : > { %2512 = vmatpush.msra.mxu0 %v2463_v16 }
 0xa19   : > { %3417 = vmatmul.msk.f32.vlgmr.msra.gmra.mxu0 %vm5229_vm8, %v3405_v48  ;;  %vm5238_vm8 = vmmov %vm5237_vm7 }
 0xa1b   : > { %v2478_v20 = vpop.permute.xlu0 %2477 }
 0xa21   : > { %3418 = vmatmul.msk.f32.gmra.mxu0 %vm5230_vm1, %v3406_v61  ;;  %vm5239_vm1 = vcmask 711680  }
 0xa88   : > { %v2560_v18 = vpop.f32.mrf.mxu3 }
 0xa89   : > { %v2561_v26 = vadd.f32 %v2560_v18, %v2478_v20 }
 0xa8b   : > { %v2568_v29 = vmax.f32 %v2561_v26, 0.0 }
 0xa91   : > { %v2563_v25 = vpop.f32.mrf.mxu3  ;;  %v2537_v54 = vpop.f32.mrf.mxu2 }
 0xa92   : > { %v2564_v27 = vadd.f32 %v2563_v25, %v2483_v19  ;;  %v2538_v38 = vadd.f32 %v2537_v54, %v2478_v20 }
 0xa94   : > { %v2571_v28 = vmax.f32 %v2564_v27, 0.0  ;;  %v2567_v32 = vmax.f32 %v2538_v38, 0.0  ;;  %v3414_v38 = vld [vmem:[%s5138_s7 + $0x8] sm:$0xf] }
 0xa96   : > { %2648 = vmatpush.msrb.mxu2 %v2571_v28  ;;  %v2514_v59 = vpop.f32.mrf.mxu0 }
 0xa97   : > { %v2515_v48 = vadd.f32 %v2514_v59, %v2478_v20  ;;  %v3096_v59 = vld.sshfl [vmem:[#allocation1] sm:$0xff pattern:$0x75316420] }
 0xa98   : > { %2649 = vmatpush.msrb.mxu2 %v2568_v29 }
 0xa99   : > { %3429 = vmatmul.msk.f32.vlgmr.msrb.gmra.mxu2 %vm5231_vm12, %v3409_v30  ;;  %v2540_v34 = vpop.f32.mrf.mxu2  ;;  %v2566_v43 = vmax.f32 %v2515_v48, 0.0  ;;  %vm5240_vm12 = vmmov %vm5239_vm1 }
 0xa9a   : > { %v2541_v11 = vadd.f32 %v2540_v34, %v2483_v19  ;;  %v3097_v34 = vld.sshfl [vmem:[#allocation1 + $0x8] sm:$0xff pattern:$0x75316420] }
 0xa9c   : > { %v2570_v44 = vmax.f32 %v2541_v11, 0.0 }
 0xa9e   : > { %v2517_v45 = vpop.f32.mrf.mxu0  ;;  %2625 = vmatpush.msrb.mxu0 %v2570_v44 }
 0xa9f   : > { %v2518_v42 = vadd.f32 %v2517_v45, %v2483_v19 }
 0xaa0   : > { %2626 = vmatpush.msrb.mxu0 %v2567_v32 }
 0xaa1   : > { %v2569_v49 = vmax.f32 %v2518_v42, 0.0  ;;  %3430 = vmatmul.msk.f32.gmra.mxu2 %vm5232_vm5, %v3410_v50  ;;  %3427 = vmatmul.msk.f32.vlgmr.msrb.gmra.mxu0 %vm5233_vm10, %v3409_v30  ;;  %vm5241_vm5 = vcmask 744448  }
 0xaa2   : > { %vm5242_vm10 = vmmov %vm5241_vm5 }
 0xaa3   : > { %2602 = vmatpush.msra.mxu1 %v2569_v49 }
 0xaa5   : > { %2603 = vmatpush.msra.mxu1 %v2566_v43 }
 0xaa6   : > { %3425 = vmatmul.msk.f32.vlgmr.msra.gmra.mxu1 %vm5234_vm11, %v3409_v30  ;;  %v3098_v30 = vld.sshfl [vmem:[#allocation1 + $0x10] sm:$0xff pattern:$0x75316420]  ;;  %vm5243_vm11 = vcmask 883712  }
 0xaa9   : > { %3428 = vmatmul.msk.f32.gmra.mxu0 %vm5235_vm0, %v3410_v50  ;;  %vm5244_vm0 = vmmov %vm5241_vm5 }
 0xaae   : > { %3426 = vmatmul.msk.f32.gmra.mxu1 %vm5236_vm14, %v3410_v50  ;;  %vm5245_vm14 = vmmov %vm5243_vm11 }
 0xb1c   : > { %v2651_v37 = vpop.f32.mrf.mxu2 }
 0xb1d   : > { %v2652_v39 = vadd.f32 %v2651_v37, %v2575_v56 }
 0xb1e   : > { %v2628_v36 = vpop.f32.mrf.mxu0 }
 0xb1f   : > { %v2659_v2 = vmax.f32 %v2652_v39, 0.0  ;;  %v2629_v5 = vadd.f32 %v2628_v36, %v2575_v56 }
 0xb21   : > { %v2665_v3 = vmul.f32 %v2659_v2, %v4248_v33  ;;  %v2658_v9 = vmax.f32 %v2629_v5, 0.0 }
 0xb23   : > { %v2605_v0 = vpop.f32.mrf.mxu1  ;;  %v2664_v52 = vmul.f32 %v2658_v9, %v4250_v35 }
 0xb24   : > { %v2606_v55 = vadd.f32 %v2605_v0, %v2575_v56  ;;  %v2654_v23 = vpop.f32.mrf.mxu2 }
 0xb25   : > { %v2655_v63 = vadd.f32 %v2654_v23, %v2580_v57 }
 0xb26   : > { %v2657_v58 = vmax.f32 %v2606_v55, 0.0  ;;  %v2631_v60 = vpop.f32.mrf.mxu0 }
 0xb27   : > { %v2632_v51 = vadd.f32 %v2631_v60, %v2580_v57  ;;  %v2662_v12 = vmax.f32 %v2655_v63, 0.0 }
 0xb28   : > { %v2663_v40 = vmul.f32 %v2657_v58, %v4244_v22 }
 0xb29   : > { %v2661_v62 = vmax.f32 %v2632_v51, 0.0  ;;  %v2668_v6 = vmul.f32 %v2662_v12, %v4248_v33 }
 0xb2a   : > { %2675 = vrot.lane.b32.xlu2 %v2663_v40, %s3996_s19 }
 0xb2b   : > { %v2667_v24 = vmul.f32 %v2661_v62, %v4250_v35  ;;  %v2608_v1 = vpop.f32.mrf.mxu1 }
 0xb2c   : > { %v2609_v13 = vadd.f32 %v2608_v1, %v2580_v57 }
 0xb2d   : > { %2683 = vrot.lane.b32.xlu1 %v2667_v24, %s3996_s19 }
 0xb2e   : > { %v2660_v61 = vmax.f32 %v2609_v13, 0.0 }
 0xb30   : > { %v2666_v7 = vmul.f32 %v2660_v61, %v4244_v22 }
 0xb32   : > { %2681 = vrot.lane.b32.xlu0 %v2666_v7, %s3996_s19  ;;  %2679 = vrot.lane.b32.xlu2 %v2665_v3, %s3996_s19 }
 0xb35   : > { %2685 = vrot.lane.b32.xlu1 %v2668_v6, %s3996_s19 }
 0xb3a   : > { %2677 = vrot.lane.b32.xlu0 %v2664_v52, %s3996_s19 }
 0xb84   : > { %v2676_v46 = vpop.permute.xlu2 %2675 }
 0xb85   : > { %2697 = vst.msk [vmem:[#allocation3] sm:$0xff] %vm5237_vm7, %v2676_v46  ;;  %vm5246_vm7 = vmmov %vm5244_vm0 }
 0xb8c   : > { %v2680_v15 = vpop.permute.xlu2 %2679  ;;  %v4934_v54 = vld [vmem:[#allocation3] sm:$0xff] }
 0xb9f   : > { %v2684_v31 = vpop.permute.xlu1 %2683 }
 0xba4   : > { %v2682_v53 = vpop.permute.xlu0 %2681 }
 0xba5   : > { %v4921_v10 = vsel %vm388_vm3, %v2682_v53, %v2684_v31  ;;  %2700 = vst.msk [vmem:[#allocation3 + $0x18] sm:$0xff] %vm5238_vm8, %v2682_v53  ;;  %vm5247_vm8 = vcmask 891904  }
 0xba7   : > { %v2686_v47 = vpop.permute.xlu1 %2685 }
 0xba8   : > { %v2690_v14 = vsel %vm388_vm3, %v2684_v31, %v2686_v47 }
 0xba9   : > { %2702 = vst.msk [vmem:[#allocation3 + $0x28] sm:$0xff] %vm5239_vm1, %v2690_v14  ;;  %vm5248_vm1 = vmmov %vm5247_vm8 }
 0xbac   : > { %v2678_v16 = vpop.permute.xlu0 %2677  ;;  %v4926_v18 = vld [vmem:[#allocation3 + $0x18] sm:$0xff] }
 0xbad   : > { %v4929_v19 = vsel %vm388_vm3, %v2676_v46, %v2678_v16  ;;  %v2688_v20 = vsel %vm388_vm3, %v2678_v16, %v2680_v15  ;;  %v3848_v25 = vpack.i.bf16 %v4921_v10, %v4926_v18 }
 0xbae   : > { %v3843_v26 = vpack.i.bf16 %v4929_v19, %v4934_v54  ;;  %2699 = vst.msk [vmem:[#allocation3 + $0x10] sm:$0xff] %vm5240_vm12, %v2688_v20  ;;  %vm5249_vm12 = vcmask 736256  }
 0xbaf   : > { %3849 = vrot.lane.b32.xlu0 %v3848_v25, %s4002_s25 }
 0xbb0   : > { %3844 = vrot.lane.b32.xlu2 %v3843_v26, %s4003_s28  ;;  %3814 = vrot.lane.b32.xlu1 %v3843_v26, %s4002_s25  ;;  %v4947_v28 = vld [vmem:[#allocation3 + $0x28] sm:$0xff] }
 0xbb5   : > { %v4945_v27 = vld [vmem:[#allocation3 + $0x10] sm:$0xff] }
 0xbb6   : > { %v3888_v29 = vpack.i.bf16 %v4945_v27, %v4947_v28 }
 0xbb7   : > { %3884 = vrot.lane.b32.xlu0 %v3848_v25, %s4004_s29 }
 0xbb8   : > { %3854 = vrot.lane.b32.xlu2 %v3848_v25, %s4001_s24  ;;  %3819 = vrot.lane.b32.xlu1 %v3843_v26, %s4001_s24 }
 0xbbf   : > { %3889 = vrot.lane.b32.xlu0 %v3888_v29, %s4002_s25  ;;  %s368_s25 = scalar_lea.vmem %s5141_s10, %s5278_s14 }
 0xbc0   : > { %3859 = vrot.lane.b32.xlu2 %v3848_v25, %s4000_s23  ;;  %3824 = vrot.lane.b32.xlu1 %v3843_v26, %s4000_s23 }
 0xbc7   : > { %3894 = vrot.lane.b32.xlu0 %v3888_v29, %s4001_s24 }
 0xbc8   : > { %3864 = vrot.lane.b32.xlu2 %v3848_v25, %s3999_s22  ;;  %3829 = vrot.lane.b32.xlu1 %v3843_v26, %s3999_s22 }
 0xbcf   : > { %3899 = vrot.lane.b32.xlu0 %v3888_v29, %s4000_s23 }
 0xbd0   : > { %3869 = vrot.lane.b32.xlu2 %v3848_v25, %s3998_s21  ;;  %3834 = vrot.lane.b32.xlu1 %v3843_v26, %s3998_s21 }
 0xbd7   : > { %3904 = vrot.lane.b32.xlu0 %v3888_v29, %s3999_s22 }
 0xbd8   : > { %3874 = vrot.lane.b32.xlu2 %v3848_v25, %s3997_s20  ;;  %3839 = vrot.lane.b32.xlu1 %v3843_v26, %s3997_s20 }
 0xbdf   : > { %3909 = vrot.lane.b32.xlu0 %v3888_v29, %s3998_s21 }
 0xbe0   : > { %3879 = vrot.lane.b32.xlu2 %v3848_v25, %s4003_s28  ;;  %3919 = vrot.lane.b32.xlu1 %v3888_v29, %s3997_s20 }
 0xbe7   : > { %3914 = vrot.lane.b32.xlu0 %v3843_v26, %s4004_s29 }
 0xbe8   : > { %3929 = vrot.lane.b32.xlu2 %v3888_v29, %s4003_s28  ;;  %3924 = vrot.lane.b32.xlu1 %v3888_v29, %s4004_s29 }
 0xbef   : > { %3099 = vrot.lane.b32.xlu0 %v3096_v59, %s3999_s22 }
 0xbf0   : > { %3103 = vrot.lane.b32.xlu2 %v3098_v30, %s3999_s22  ;;  %3101 = vrot.lane.b32.xlu1 %v3097_v34, %s3999_s22 }
 0xbf7   : > { %2893 = vperm.xlu0 %3502, %v3414_v38  }
 0xc0a   : > { %v4975_v11 = vpop.permute.xlu2 %3844 }
 0xc0b   : > { %v3847_v30 = vunpack.i.h.bf16 %v4975_v11  ;;  %v3846_v34 = vunpack.i.l.bf16 %v4975_v11 }
 0xc12   : > { %v4977_v44 = vpop.permute.xlu2 %3854 }
 0xc13   : > { %v3857_v36 = vunpack.i.h.bf16 %v4977_v44  ;;  %v3856_v56 = vunpack.i.l.bf16 %v4977_v44 }
 0xc15   : > { %v2839_v57 = vsel %vm529_vm9, %v3856_v56, %v3857_v36 }
 0xc1a   : > { %v4979_v32 = vpop.permute.xlu2 %3859 }
 0xc1b   : > { %v3862_v51 = vunpack.i.h.bf16 %v4979_v32  ;;  %v3861_v39 = vunpack.i.l.bf16 %v4979_v32 }
 0xc1d   : > { %v2817_v63 = vsel %vm5243_vm11, %v3861_v39, %v3862_v51  ;;  %vm5252_vm11 = vcmask 130048  }
 0xc21   : > { %v3850_v45 = vpop.permute.xlu0 %3849  ;;  %1343 = vadd.xlane.f32.xlu0 %v4443_v41 }
 0xc22   : > { %v3852_v50 = vunpack.i.h.bf16 %v3850_v45  ;;  %v3851_v48 = vunpack.i.l.bf16 %v3850_v45  ;;  %v3815_v42 = vpop.permute.xlu1 %3814  ;;  %v4982_v49 = vpop.permute.xlu2 %3864 }
 0xc23   : > { %v3817_v43 = vunpack.i.h.bf16 %v3815_v42  ;;  %v3816_v37 = vunpack.i.l.bf16 %v3815_v42  ;;  %v3867_v12 = vunpack.i.h.bf16 %v4982_v49  ;;  %v3866_v3 = vunpack.i.l.bf16 %v4982_v49 }
 0xc24   : > { %v2861_v0 = vsel %vm5241_vm5, %v3851_v48, %v3852_v50  ;;  %vm5250_vm5 = vcmask 900096  }
 0xc25   : > { %2903 = vmatpush.msrb.mxu3 %v2861_v0  ;;  %v2859_v55 = vsel %vm5242_vm10, %v3816_v37, %v3817_v43  ;;  %v2795_v46 = vsel %vm5247_vm8, %v3866_v3, %v3867_v12  ;;  %vm5251_vm10 = vmmov %vm5249_vm12  ;;  %vm5257_vm8 = vcmask 1031168  }
 0xc26   : > { %v2881_v48 = vsel %vm5251_vm10, %v3846_v34, %v3847_v30 }
 0xc27   : > { %2904 = vmatpush.msrb.mxu3 %v2859_v55 }
 0xc29   : > { %v4989_v41 = vpop.permute.xlu0 %3884  ;;  %2905 = vmatpush.msrb.mxu3 %v2839_v57 }
 0xc2a   : > { %v3820_v58 = vpop.permute.xlu1 %3819  ;;  %v4991_v60 = vpop.permute.xlu2 %3869  ;;  %v3887_v3 = vunpack.i.h.bf16 %v4989_v41 }
 0xc2b   : > { %v3822_v40 = vunpack.i.h.bf16 %v3820_v58  ;;  %v3821_v23 = vunpack.i.l.bf16 %v3820_v58  ;;  %v3872_v53 = vunpack.i.h.bf16 %v4991_v60  ;;  %v3871_v47 = vunpack.i.l.bf16 %v4991_v60 }
 0xc2d   : > { %v2837_v62 = vsel %vm529_vm9, %v3821_v23, %v3822_v40  ;;  %v2773_v11 = vsel %vm5250_vm5, %v3871_v47, %v3872_v53 }
 0xc2e   : > { %2906 = vmatpush.msrb.mxu3 %v2837_v62 }
 0xc30   : > { %2907 = vmatpush.msrb.mxu3 %v2817_v63 }
 0xc31   : > { %v3890_v24 = vpop.permute.xlu0 %3889 }
 0xc32   : > { %v3892_v1 = vunpack.i.h.bf16 %v3890_v24  ;;  %v3891_v2 = vunpack.i.l.bf16 %v3890_v24  ;;  %v4999_v13 = vpop.permute.xlu1 %3824  ;;  %v5001_v61 = vpop.permute.xlu2 %3874 }
 0xc33   : > { %v3827_v5 = vunpack.i.h.bf16 %v4999_v13  ;;  %v3826_v7 = vunpack.i.l.bf16 %v4999_v13  ;;  %v3876_v55 = vunpack.i.l.bf16 %v5001_v61 }
 0xc34   : > { %2983 = vmatpush.msra.mxu2 %v3891_v2  ;;  %v2862_v6 = vsel %vm5244_vm0, %v3852_v50, %v3891_v2  ;;  %v2860_v52 = vsel %vm5246_vm7, %v3817_v43, %v3892_v1  ;;  %v3877_v43 = vunpack.i.h.bf16 %v5001_v61  ;;  %vm5254_vm0 = vmmov %vm5250_vm5  ;;  %vm5260_vm5 = vcmask 891904  }
 0xc35   : > { %2943 = vmatpush.msra.mxu0 %v2862_v6  ;;  %v2815_v9 = vsel %vm5245_vm14, %v3826_v7, %v3827_v5 }
 0xc36   : > { %2984 = vmatpush.msra.mxu2 %v3892_v1  ;;  %2908 = vmatpush.msrb.mxu3 %v2815_v9  ;;  %v2751_v1 = vsel %vm5257_vm8, %v3876_v55, %v3877_v43 }
 0xc37   : > { %2944 = vmatpush.msra.mxu0 %v2860_v52 }
 0xc38   : > { %2909 = vmatpush.msrb.mxu3 %v2795_v46 }
 0xc39   : > { %v3895_v31 = vpop.permute.xlu0 %3894 }
 0xc3a   : > { %v3897_v14 = vunpack.i.h.bf16 %v3895_v31  ;;  %v3896_v15 = vunpack.i.l.bf16 %v3895_v31  ;;  %v5015_v16 = vpop.permute.xlu1 %3829  ;;  %v3880_v20 = vpop.permute.xlu2 %3879 }
 0xc3b   : > { %v3832_v25 = vunpack.i.h.bf16 %v5015_v16  ;;  %v3831_v26 = vunpack.i.l.bf16 %v5015_v16  ;;  %v3882_v29 = vunpack.i.h.bf16 %v3880_v20  ;;  %v3881_v59 = vunpack.i.l.bf16 %v3880_v20 }
 0xc3c   : > { %2985 = vmatpush.msra.mxu2 %v3896_v15  ;;  %v2840_v38 = vsel %vm529_vm9, %v3857_v36, %v3896_v15  ;;  %v2838_v50 = vsel %vm529_vm9, %v3822_v40, %v3897_v14  ;;  %vm5253_vm9 = vmmov %vm5245_vm14 }
 0xc3d   : > { %2945 = vmatpush.msra.mxu0 %v2840_v38  ;;  %v2793_v44 = vsel %vm5248_vm1, %v3831_v26, %v3832_v25  ;;  %v2883_v45 = vsel %vm5249_vm12, %v3881_v59, %v3882_v29  ;;  %vm5255_vm14 = vmmov %vm5251_vm10 }
 0xc3e   : > { %2986 = vmatpush.msra.mxu2 %v3897_v14  ;;  %2910 = vmatpush.msrb.mxu3 %v2793_v44  ;;  %vm5256_vm7 = vmmov %vm5253_vm9 }
 0xc3f   : > { %2946 = vmatpush.msra.mxu0 %v2838_v50  ;;  %2937 = vmatpush.msrb.mxu1 %v2883_v45  ;;  %vm5258_vm1 = vmmov %vm5251_vm10 }
 0xc40   : > { %2911 = vmatpush.msrb.mxu3 %v2773_v11  ;;  %vm5259_vm12 = vmmov %vm5252_vm11 }
 0xc41   : > { %v3900_v42 = vpop.permute.xlu0 %3899  ;;  %2938 = vmatpush.msrb.mxu1 %v2881_v48  ;;  %vm5261_vm10 = vmmov %vm5257_vm8 }
 0xc42   : > { %v3902_v37 = vunpack.i.h.bf16 %v3900_v42  ;;  %v3901_v36 = vunpack.i.l.bf16 %v3900_v42  ;;  %3431 = vmatmul.msk.f32.vlgmr.msrb.gmra.mxu1 %vm5252_vm11, %v4814_v17  ;;  %v3835_v56 = vpop.permute.xlu1 %3834  ;;  %v3930_v0 = vpop.permute.xlu2 %3929  ;;  %vm5262_vm11 = vmmov %vm5260_vm5 }
 0xc43   : > { %v3837_v57 = vunpack.i.h.bf16 %v3835_v56  ;;  %v3836_v58 = vunpack.i.l.bf16 %v3835_v56  ;;  %v3931_v39 = vunpack.i.l.bf16 %v3930_v0  ;;  %v3932_v23 = vunpack.i.h.bf16 %v3930_v0 }
 0xc44   : > { %2987 = vmatpush.msra.mxu2 %v3901_v36  ;;  %v2818_v40 = vsel %vm5253_vm9, %v3862_v51, %v3901_v36  ;;  %v2816_v24 = vsel %vm5256_vm7, %v3827_v5, %v3902_v37  ;;  %v3886_v5 = vunpack.i.l.bf16 %v4989_v41  ;;  %vm5263_vm9 = vcmask 1039360  }
 0xc45   : > { %2947 = vmatpush.msra.mxu0 %v2818_v40  ;;  %v2771_v62 = vsel %vm5254_vm0, %v3836_v58, %v3837_v57  ;;  %v2884_v63 = vsel %vm5255_vm14, %v3882_v29, %v3931_v39  ;;  %v2882_v2 = vsel %vm5258_vm1, %v3847_v30, %v3932_v23  ;;  %vm5264_vm0 = vmmov %vm5259_vm12  ;;  %vm5265_vm14 = vcmask 900096  }
 0xc46   : > { %2988 = vmatpush.msra.mxu2 %v3902_v37  ;;  %2912 = vmatpush.msrb.mxu3 %v2771_v62  ;;  %v2729_v41 = vsel %vm5263_vm9, %v3886_v5, %v3887_v3  ;;  %vm5266_vm7 = vmmov %vm5265_vm14 }
 0xc47   : > { %2948 = vmatpush.msra.mxu0 %v2816_v24  ;;  %2977 = vmatpush.msra.mxu1 %v2884_v63  ;;  %vm5267_vm1 = vmmov %vm5257_vm8 }
 0xc48   : > { %2913 = vmatpush.msrb.mxu3 %v2751_v1 }
 0xc49   : > { %v3905_v32 = vpop.permute.xlu0 %3904  ;;  %2978 = vmatpush.msra.mxu1 %v2882_v2 }
 0xc4a   : > { %v3907_v51 = vunpack.i.h.bf16 %v3905_v32  ;;  %v3906_v13 = vunpack.i.l.bf16 %v3905_v32  ;;  %3432 = vmatmul.msk.f32.vlgmr.msra.gmra.mxu1 %vm5259_vm12, %v4814_v17  ;;  %v3840_v61 = vpop.permute.xlu1 %3839  ;;  %vm5268_vm12 = vmmov %vm5263_vm9  ;;  %v3104_v50 = vpop.permute.xlu2 %3103 }
 0xc4b   : > { %3017 = vmatpush.msrb.mxu1 %v3931_v39  ;;  %v3842_v7 = vunpack.i.h.bf16 %v3840_v61  ;;  %v3841_v6 = vunpack.i.l.bf16 %v3840_v61 }
 0xc4c   : > { %2989 = vmatpush.msra.mxu2 %v3906_v13  ;;  %v2796_v9 = vsel %vm5260_vm5, %v3867_v12, %v3906_v13  ;;  %v2794_v46 = vsel %vm5262_vm11, %v3832_v25, %v3907_v51  ;;  %vm5269_vm5 = vmmov %vm5263_vm9 }
 0xc4d   : > { %2949 = vmatpush.msra.mxu0 %v2796_v9  ;;  %3018 = vmatpush.msrb.mxu1 %v3932_v23  ;;  %v2749_v52 = vsel %vm5261_vm10, %v3841_v6, %v3842_v7  ;;  %vm5270_vm10 = vmmov %vm5269_vm5 }
 0xc4e   : > { %2990 = vmatpush.msra.mxu2 %v3907_v51  ;;  %2914 = vmatpush.msrb.mxu3 %v2749_v52  ;;  %vm5271_vm9 = vmmov %vm5262_vm11 }
 0xc4f   : > { %2950 = vmatpush.msra.mxu0 %v2794_v46 }
 0xc50   : > { %2915 = vmatpush.msrb.mxu3 %v2729_v41 }
 0xc51   : > { %v3910_v31 = vpop.permute.xlu0 %3909 }
 0xc52   : > { %v3912_v47 = vunpack.i.h.bf16 %v3910_v31  ;;  %v3911_v14 = vunpack.i.l.bf16 %v3910_v31  ;;  %3433 = vmatmul.msk.f32.vlgmr.msrb.gmra.mxu1 %vm5264_vm0, %v4814_v17  ;;  %v3920_v49 = vpop.permute.xlu1 %3919  ;;  %vm5272_vm0 = vcmask 31744  }
 0xc53   : > { %v3921_v15 = vunpack.i.l.bf16 %v3920_v49  ;;  %v3922_v20 = vunpack.i.h.bf16 %v3920_v49 }
 0xc54   : > { %2991 = vmatpush.msra.mxu2 %v3911_v14  ;;  %v2774_v12 = vsel %vm5265_vm14, %v3872_v53, %v3911_v14  ;;  %v2772_v16 = vsel %vm5266_vm7, %v3837_v57, %v3912_v47  ;;  %vm5273_vm14 = vmmov %vm5272_vm0 }
 0xc55   : > { %2951 = vmatpush.msra.mxu0 %v2774_v12  ;;  %v2752_v25 = vsel %vm5257_vm8, %v3877_v43, %v3921_v15  ;;  %v2750_v59 = vsel %vm5267_vm1, %v3842_v7, %v3922_v20  ;;  %vm5274_vm7 = vmmov %vm5272_vm0 }
 0xc56   : > { %2992 = vmatpush.msra.mxu2 %v3912_v47 }
 0xc57   : > { %2952 = vmatpush.msra.mxu0 %v2772_v16 }
 0xc58   : > { %2993 = vmatpush.msra.mxu2 %v3921_v15 }
 0xc59   : > { %v3915_v26 = vpop.permute.xlu0 %3914  ;;  %2953 = vmatpush.msra.mxu0 %v2752_v25 }
 0xc5a   : > { %v3917_v29 = vunpack.i.h.bf16 %v3915_v26  ;;  %v3916_v17 = vunpack.i.l.bf16 %v3915_v26  ;;  %2994 = vmatpush.msra.mxu2 %v3922_v20  ;;  %v3925_v60 = vpop.permute.xlu1 %3924 }
 0xc5b   : > { %2954 = vmatpush.msra.mxu0 %v2750_v59  ;;  %v3927_v53 = vunpack.i.h.bf16 %v3925_v60  ;;  %v3926_v30 = vunpack.i.l.bf16 %v3925_v60 }
 0xc5c   : > { %v2727_v34 = vsel %vm5268_vm12, %v3916_v17, %v3917_v29 }
 0xc5d   : > { %2916 = vmatpush.msrb.mxu3 %v2727_v34  ;;  %2995 = vmatpush.msra.mxu2 %v3926_v30  ;;  %v2730_v38 = vsel %vm5269_vm5, %v3887_v3, %v3926_v30  ;;  %v2728_v44 = vsel %vm5270_vm10, %v3917_v29, %v3927_v53 }
 0xc5e   : > { %2955 = vmatpush.msra.mxu0 %v2730_v38 }
 0xc5f   : > { %2917 = vmatpush.msrb.mxu3 %v4926_v18  ;;  %2996 = vmatpush.msra.mxu2 %v3927_v53  ;;  %v3415_v18 = vld [vmem:[%s5139_s8 + $0x8] sm:$0xf] }
 0xc60   : > { %2956 = vmatpush.msra.mxu0 %v2728_v44 }
 0xc61   : > { %2918 = vmatpush.msrb.mxu3 %v4934_v54  ;;  %v3100_v45 = vpop.permute.xlu0 %3099  ;;  %2997 = vmatpush.msra.mxu2 %v4947_v28 }
 0xc62   : > { %2919 = vmatmul.f32.vlgmr.msrb.gmra.mxu3 %v4812_v8  ;;  %2957 = vmatpush.msra.mxu0 %v4921_v10  ;;  %v3102_v11 = vpop.permute.xlu1 %3101 }
 0xc63   : > { %v3105_v48 = vsel %vm5262_vm11, %v3100_v45, %v3102_v11  ;;  %v3106_v42 = vsel %vm5271_vm9, %v3102_v11, %v3104_v50  ;;  %2998 = vmatpush.msra.mxu2 %v4945_v27 }
 0xc64   : > { %2958 = vmatpush.msra.mxu0 %v4929_v19  ;;  %2999 = vmatmul.f32.vlgmr.msra.gmra.mxu2 %v4812_v8 }
 0xc65   : > { %3437 = vmatpush.msk.msra.mxu3 %vm569_vm6, %v3105_v48  ;;  %3439 = vmatpush.msk.msra.mxu1 %vm569_vm6, %v3106_v42 }
 0xc66   : > { %2959 = vmatmul.f32.vlgmr.msra.gmra.mxu0 %v4812_v8  ;;  %3440 = vmatmul.msk.f32.vlgmr.msra.gmra.mxu1 %vm5272_vm0, %v3415_v18 }
 0xc67   : > { %3441 = vmatpush.msk.msrb.mxu3 %vm569_vm6, %v3104_v50 }
 0xc69   : > { %v2894_v54 = vpop.permute.xlu0 %2893 }
 0xc6a   : > { %3438 = vmatmul.msk.f32.vlgmr.msra.gmra.mxu3 %vm5273_vm14, %v3415_v18 }
 0xc72   : > { %3442 = vmatmul.msk.f32.vlgmr.msrb.gmra.mxu3 %vm5274_vm7, %v3415_v18 }
 0xcbf   : > { %v2940_v10 = vpop.f32.mrf.mxu1 }
 0xcc7   : > { %v2980_v19 = vpop.f32.mrf.mxu1 }
 0xccf   : > { %v3020_v57 = vpop.f32.mrf.mxu1 }
 0xce3   : > { %v2960_v27 = vpop.f32.mrf.mxu0  ;;  %v3153_v6 = vpop.f32.mrf.mxu1 }
 0xce4   : > { %v2961_v28 = vadd.f32 %v2960_v27, %v2894_v54 }
 0xce5   : > { %v2920_v43 = vpop.f32.mrf.mxu3 }
 0xce6   : > { %v2921_v37 = vadd.f32 %v2920_v43, %v2894_v54  ;;  %v2981_v36 = vadd.f32 %v2980_v19, %v2961_v28 }
 0xce7   : > { %v3000_v56 = vpop.f32.mrf.mxu2 }
 0xce8   : > { %v2941_v0 = vadd.f32 %v2940_v10, %v2921_v37  ;;  %v3024_v55 = vadd.f32 2.0, %v2981_v36  ;;  %v3001_v8 = vadd.f32 %v3000_v56, %v2894_v54  ;;  %v3180_v5 = vrot.slane %v2981_v36, 6 }
 0xcea   : > { %v3023_v58 = vadd.f32 2.0, %v2941_v0  ;;  %v3435_v39 = vmul.f32 -1.442695, %v3024_v55  ;;  %v5086_v40 = vadd.f32 %v3020_v57, %v3001_v8  ;;  %v3179_v46 = vrot.slane %v2941_v0, 6 }
 0xceb   : > { %v3186_v49 = vadd.f32 %v3180_v5, %v3153_v6 }
 0xcec   : > { %v3434_v23 = vmul.f32 -1.442695, %v3023_v58  ;;  %3969 = vpow2.f32 %v3435_v39  ;;  %v3025_v62 = vadd.f32 2.0, %v5086_v40  ;;  %v3181_v12 = vrot.slane %v5086_v40, 6 }
 0xced   : > { %v3133_v61 = vpop.f32.mrf.mxu3 }
 0xcee   : > { %3971 = vpow2.f32 %v3434_v23  ;;  %v3436_v63 = vmul.f32 -1.442695, %v3025_v62  ;;  %v3185_v11 = vadd.f32 %v3179_v46, %v3133_v61 }
 0xcf0   : > { %3973 = vpow2.f32 %v3436_v63 }
 0xcf2   : > { %v3970_v24 = vpop.eup %3969 }
 0xcf3   : > { %v3036_v1 = vadd.f32 1.0, %v3970_v24 }
 0xcf4   : > { %v3972_v2 = vpop.eup %3971 }
 0xcf5   : > { %v3035_v32 = vadd.f32 1.0, %v3972_v2  ;;  %3975 = vrcp.f32 %v3036_v1  ;;  %v3062_v47 = vand.u32 2147483647, %v3036_v1  ;;  %v3064_v14 = vand.u32 2147483648, %v3036_v1  ;;  %v3173_v45 = vpop.f32.mrf.mxu3 }
 0xcf6   : > { %v3974_v51 = vpop.eup %3973  ;;  %vm3058_vm12 = vweird.f32 %v3036_v1  ;;  %v3187_v27 = vadd.f32 %v3181_v12, %v3173_v45 }
 0xcf7   : > { %3977 = vrcp.f32 %v3035_v32  ;;  %v3037_v13 = vadd.f32 1.0, %v3974_v51  ;;  %vm3043_vm1 = vweird.f32 %v3035_v32  ;;  %v3047_v25 = vand.u32 2147483647, %v3035_v32 }
 0xcf8   : > { %v3049_v26 = vand.u32 2147483648, %v3035_v32  ;;  %vm3063_vm11 = vcmp.eq.f32.partialorder %v3062_v47, 8.507059e+37  ;;  %v3065_v60 = vor.u32 1.1754944e-38, %v3064_v14 }
 0xcf9   : > { %3979 = vrcp.f32 %v3037_v13  ;;  %v3077_v53 = vand.u32 2147483647, %v3037_v13  ;;  %v3079_v30 = vand.u32 2147483648, %v3037_v13  ;;  %vm3048_vm14 = vcmp.eq.f32.partialorder %v3047_v25, 8.507059e+37 }
 0xcfa   : > { %v3050_v50 = vor.u32 1.1754944e-38, %v3049_v26  ;;  %vm3073_vm7 = vweird.f32 %v3037_v13 }
 0xcfb   : > { %v3976_v3 = vpop.eup %3975  ;;  %v3080_v54 = vor.u32 1.1754944e-38, %v3079_v30 }
 0xcfc   : > { %v3054_v7 = vmul.f32 %v3976_v3, %v3036_v1  ;;  %vm3059_vm8 = vweird.f32 %v3976_v3 }
 0xcfd   : > { %v3978_v9 = vpop.eup %3977  ;;  %vm3060_vm10 = vmor %vm3058_vm12, %vm3059_vm8  ;;  %vm3078_vm12 = vcmp.eq.f32.partialorder %v3077_v53, 8.507059e+37 }
 0xcfe   : > { %v3039_v52 = vmul.f32 %v3978_v9, %v3035_v32  ;;  %v3055_v41 = vsub.f32 1.0, %v3054_v7  ;;  %vm3044_vm5 = vweird.f32 %v3978_v9 }
 0xcff   : > { %v3980_v31 = vpop.eup %3979  ;;  %vm3045_vm0 = vmor %vm3043_vm1, %vm3044_vm5  ;;  %vm5275_vm1 = vcmask 707584  }
 0xd00   : > { %v3040_v15 = vsub.f32 1.0, %v3039_v52  ;;  %v3056_v16 = vmul.f32 %v3976_v3, %v3055_v41  ;;  %v3069_v20 = vmul.f32 %v3980_v31, %v3037_v13  ;;  %vm3074_vm9 = vweird.f32 %v3980_v31 }
 0xd01   : > { %vm3075_vm8 = vmor %vm3073_vm7, %vm3074_vm9 }
 0xd02   : > { %v3041_v29 = vmul.f32 %v3978_v9, %v3040_v15  ;;  %v3057_v17 = vadd.f32 %v3976_v3, %v3056_v16  ;;  %v3070_v59 = vsub.f32 1.0, %v3069_v20 }
 0xd04   : > { %v3042_v34 = vadd.f32 %v3978_v9, %v3041_v29  ;;  %v3061_v38 = vsel %vm3060_vm10, %v3976_v3, %v3057_v17  ;;  %v3071_v44 = vmul.f32 %v3980_v31, %v3070_v59 }
 0xd05   : > { %v3066_v48 = vsel %vm3063_vm11, %v3065_v60, %v3061_v38 }
 0xd06   : > { %v3046_v42 = vsel %vm3045_vm0, %v3978_v9, %v3042_v34  ;;  %v3189_v18 = vmul.f32 %v3186_v49, %v3066_v48  ;;  %v3072_v10 = vadd.f32 %v3980_v31, %v3071_v44 }
 0xd07   : > { %v3051_v19 = vsel %vm3048_vm14, %v3050_v50, %v3046_v42 }
 0xd08   : > { %v3188_v28 = vmul.f32 %v3185_v11, %v3051_v19  ;;  %v3192_v43 = vsel %vm1310_vm2, %v3153_v6, %v3189_v18  ;;  %v3076_v37 = vsel %vm3075_vm8, %v3980_v31, %v3072_v10  ;;  %3981 = vlog2.f32 %v3051_v19 }
 0xd09   : > { %v3195_v36 = vmul.f32 %v3192_v43, %v4250_v35  ;;  %v3081_v56 = vsel %vm3078_vm12, %v3080_v54, %v3076_v37  ;;  %3983 = vlog2.f32 %v3066_v48 }
 0xd0a   : > { %v3191_v0 = vsel %vm1310_vm2, %v3133_v61, %v3188_v28  ;;  %v3190_v55 = vmul.f32 %v3187_v27, %v3081_v56  ;;  %3985 = vlog2.f32 %v3081_v56 }
 0xd0b   : > { %v3194_v8 = vmul.f32 %v3191_v0, %v4244_v22  ;;  %v3200_v57 = vrot.slane %v3195_v36, 4 }
 0xd0c   : > { %v3193_v58 = vsel %vm1310_vm2, %v3173_v45, %v3190_v55 }
 0xd0d   : > { %v3196_v39 = vmul.f32 %v3193_v58, %v4248_v33  ;;  %v3201_v40 = vsel %vm569_vm6, %v3194_v8, %v3200_v57 }
 0xd0e   : > { %3202 = vrot.lane.b32.xlu1 %v3201_v40, %s3996_s19  ;;  %v3982_v23 = vpop.eup %3981 }
 0xd0f   : > { %3204 = vrot.lane.b32.xlu2 %v3196_v39, %s3996_s19  ;;  %v3984_v62 = vpop.eup %3983  ;;  %v3084_v63 = vmul.f32 0.6931472, %v3982_v23 }
 0xd10   : > { %v3986_v24 = vpop.eup %3985  ;;  %v3086_v1 = vmul.f32 0.6931472, %v3984_v62 }
 0xd11   : > { %v3088_v2 = vmul.f32 0.6931472, %v3986_v24  ;;  %v3213_v32 = vmul.f32 %v3084_v63, %v4244_v22 }
 0xd12   : > { %v3214_v51 = vmul.f32 %v3086_v1, %v4250_v35 }
 0xd13   : > { %v3215_v13 = vmul.f32 %v3088_v2, %v4248_v33  ;;  %v3216_v61 = vsel %vm1336_vm13, %v3213_v32, 0.0 }
 0xd14   : > { %v3217_v3 = vsel %vm1336_vm13, %v3214_v51, 0.0 }
 0xd15   : > { %v3218_v5 = vadd.f32 %v3217_v3, %v3216_v61  ;;  %v3219_v7 = vsel %vm1340_vm15, %v3215_v13, 0.0 }
 0xd17   : > { %v3220_v6 = vadd.f32 %v3219_v7, %v3218_v5 }
 0xd38   : > { %2282 = vadd.xlane.f32.xlu1 %v4772_v21  ;;  %3221 = vadd.xlane.f32.xlu2 %v3220_v6  ;;  %v1344_v21 = vpop.xlane.xlu0 %1343 }
 0xd39   : > { %v1346_v31 = vrot.slane %v1344_v21, 2 }
 0xd3b   : > { %v1348_v47 = vsel %vm1310_vm2, %v1346_v31, 0.0 }
 0xd3c   : > { %v1349_v14 = vrot.slane %v1348_v47, 4 }
 0xd3e   : > { %v1350_v49 = vadd.f32 %v1349_v14, %v1348_v47 }
 0xd40   : > { %v1351_v4 = vrot.slane %v1350_v49, 2 }
 0xd42   : > { %v1352_v59 = vadd.f32 %v1351_v4, %v1350_v49 }
 0xd44   : > { %v1353_v38 = vrot.slane %v1352_v59, 1 }
 0xd46   : > { %v1354_v48 = vadd.f32 %v1353_v38, %v1352_v59 }
 0xd69   : > { %v3205_v46 = vpop.permute.xlu2 %3204 }
 0xd80   : > { %v3203_v9 = vpop.permute.xlu1 %3202 }
 0xd81   : > { %v3206_v52 = vrot.slane %v3203_v9, 4 }
 0xd83   : > { %v3207_v22 = vsel %vm388_vm3, %v3206_v52, %v3203_v9  ;;  %v3208_v35 = vsel %vm388_vm3, %v3206_v52, %v3205_v46  ;;  %vm3251_vm3 = vcmask 0  }
 0xd84   : > { %3211 = vst.msk [vmem:[#allocation2] sm:$0xff] %vm4083_vm4, %v3207_v22  ;;  %vm3249_vm4 = vcmask 551936  }
 0xd85   : > { %3212 = vst.msk [vmem:[#allocation2 + $0x8] sm:$0xf] %vm5275_vm1, %v3208_v35 }
 0xd8b   : > { %v3234_v33 = vld [vmem:[#allocation2] sm:$0xff] }
 0xd8c   : > { %3238 = vrot.lane.b32.xlu2 %v3234_v33, %s3999_s22  ;;  %v3235_v41 = vld [vmem:[#allocation2 + $0x8] sm:$0xf] }
 0xd8d   : > { %3240 = vrot.lane.b32.xlu0 %v3235_v41, %s3999_s22 }
 0xdab   : > { %v2283_v12 = vpop.xlane.xlu1 %2282  ;;  %v3222_v15 = vpop.xlane.xlu2 %3221 }
 0xdac   : > { %v2285_v16 = vrot.slane %v2283_v12, 2  ;;  %v3224_v20 = vrot.slane %v3222_v15, 2 }
 0xdae   : > { %v2287_v25 = vsel %vm1310_vm2, %v2285_v16, 0.0  ;;  %v3226_v26 = vsel %vm1310_vm2, %v3224_v20, 0.0  ;;  %vm5276_vm2 = vcmask 891904  }
 0xdaf   : > { %v2288_v29 = vrot.slane %v2287_v25, 4  ;;  %v3227_v17 = vrot.slane %v3226_v26, 4 }
 0xdb1   : > { %v2289_v60 = vadd.f32 %v2288_v29, %v2287_v25  ;;  %v3228_v53 = vadd.f32 %v3227_v17, %v3226_v26 }
 0xdb3   : > { %v2290_v30 = vrot.slane %v2289_v60, 2  ;;  %v3229_v34 = vrot.slane %v3228_v53, 2 }
 0xdb5   : > { %v2291_v44 = vadd.f32 %v2290_v30, %v2289_v60  ;;  %v3230_v45 = vadd.f32 %v3229_v34, %v3228_v53 }
 0xdb7   : > { %v2292_v50 = vrot.slane %v2291_v44, 1  ;;  %v3231_v11 = vrot.slane %v3230_v45, 1 }
 0xdb9   : > { %v2293_v42 = vadd.f32 %v2292_v50, %v2291_v44  ;;  %v3232_v10 = vadd.f32 %v3231_v11, %v3230_v45 }
 0xdbb   : > { %v2294_v18 = vadd.f32 %v2293_v42, %v1354_v48 }
 0xdbd   : > { %v3233_v19 = vadd.f32 %v3232_v10, %v2294_v18 }
 0xdbf   : > { %3252 = vst.msk [vmem:[%s368_s25] sm:$0x1] %vm3251_vm3, %v3233_v19 }
 0xde6   : > { %v3239_v54 = vpop.permute.xlu2 %3238 }
 0xde7   : > { %v3242_v28 = vrot.slane %v3239_v54, 4 }
 0xdff   : > { %v3241_v27 = vpop.permute.xlu0 %3240 }
 0xe00   : > { %v3243_v43 = vrot.slane %v3241_v27, 4  ;;  %3250 = vst.msk [vmem:[%s365_s26 + $0x8] sm:$0xf] %vm3249_vm4, %v3241_v27 }
 0xe02   : > { %v3244_v37 = vsel %vm569_vm6, %v3242_v28, %v3243_v43 }
 0xe03   : > { %v3245_v36 = vsel %vm5276_vm2, %v3239_v54, %v3244_v37 }
 0xe04   : > { %3248 = vst [vmem:[%s365_s26] sm:$0xff] %v3245_v36 }
 0xe05 PF: > { %s21_s13 = sadd.s32 1, %s3993_s13  }
 0xe06   : > { %p18_p4 = scmp.ge.s32.totalorder %s21_s13, 4  }
 0xe08   :  { %20 = sbr.rel (!%p18_p4) target bundleno = 1 (0x1), region = 154 }

// kernel: flownet_normal_flow.3
= control target key start
LH: loop header
LB: loop body
LE: loop exit
PB: predicated region body
PF: predicated region fallthrough
CT: control target
= control target key end

     0   :  { %s6659_s18 = smov 0   ;;  %s8732_s0 = inlined_call_operand.vmem [shape: f32[2,64,36], index: 0, kind: input, shape index: {}]   ;;  %s8733_s1 = inlined_call_operand.vmem [shape: f32[1,36], index: 1, kind: input, shape index: {}]   ;;  %s8734_s2 = inlined_call_operand.vmem [shape: f32[4,16,576], index: 2, kind: input, shape index: {}]   ;;  %s8735_s3 = inlined_call_operand.vmem [shape: f32[4,16,1], index: 3, kind: input, shape index: {}]   ;;  %s8736_s4 = inlined_call_operand.vmem [shape: f32[4,16,16], index: 4, kind: input, shape index: {}]   ;;  %s8737_s5 = inlined_call_operand.vmem [shape: f32[4,16,1], index: 5, kind: input, shape index: {}]   ;;  %s8738_s6 = inlined_call_operand.vmem [shape: f32[4,64,144], index: 6, kind: input, shape index: {}]   ;;  %s8739_s7 = inlined_call_operand.vmem [shape: f32[4,64,1], index: 7, kind: input, shape index: {}]   ;;  %s8740_s8 = inlined_call_operand.vmem [shape: f32[4,64,64], index: 8, kind: input, shape index: {}]   ;;  %s8741_s9 = inlined_call_operand.vmem [shape: f32[32,288], index: 9, kind: input, shape index: {}]   ;;  %s8742_s10 = inlined_call_operand.vmem [shape: f32[32,1], index: 10, kind: input, shape index: {}]   ;;  %s8743_s11 = inlined_call_operand.vmem [shape: f32[64,288], index: 11, kind: input, shape index: {}]   ;;  %s8744_s12 = inlined_call_operand.vmem [shape: f32[64,1], index: 12, kind: input, shape index: {}]   ;;  %s8745_s13 = inlined_call_operand.vmem [shape: f32[2,32,36], index: 13, kind: output, shape index: {0}]   ;;  %s8746_s14 = inlined_call_operand.vmem [shape: f32[2,32,36], index: 14, kind: output, shape index: {1}]   ;;  %s8747_s15 = inlined_call_operand.vmem [shape: f32[2,1,1], index: 15, kind: output, shape index: {2}]  }
   0x1   :  { %8769 = sst [smem:[#allocation7_spill]] %s8732_s0 }
   0x2   :  { %8770 = sst [smem:[#allocation8_spill]] %s8745_s13 }
   0x3   :  { %8771 = sst [smem:[#allocation9_spill]] %s8746_s14 }
   0x4   :  { %8772 = sst [smem:[#allocation10_spill]] %s8747_s15 }
   0x5 LB: > { %8773 = sst [smem:[#allocation5_spill]] %s6566_s18  ;;  %s5111_s19 = sadd.s32 4294967295, %s6566_s18   ;;  %s6566_s18 = sphi %s6659_s18, %s26_s18  }
   0x6   : > { %p5115_p0 = scmp.ge.s32.totalorder %s6566_s18, 1  ;;  %p442_p1 = scmp.lt.s32.totalorder %s6566_s18, 3 }
   0x8   : > { %p443_p2 = pnand %p5115_p0, %p442_p1 }
   0xa   : > { %446 = sbr.rel (%p443_p2) target bundleno = 5302 (0x14b6), region = 72 }
   0xf   : > { %p498_p3 = scmp.lt.s32.totalorder %s5111_s19, 1  ;;  %vm516_vm0 = vcmask 408576   ;;  %v6568_v0 = vmov 0.0   ;;  %s8775_s0 = sld [smem:[#allocation7_spill]]  ;;  %vm571_vm1 = vcmask 351288   ;;  %vm847_vm2 = vcmask 523264  }
  0x10   : > { %520 = vst.msk [vmem:[#allocation2 + $0x18] sm:$0xff] %vm516_vm0, %v6568_v0  ;;  %s8764_s24 = smov 7   ;;  %s8748_s25 = smov 127   ;;  %vm981_vm3 = vcmask 130048  }
  0x11   : > { %s8795_s19 = smov (!%p498_p3, %s5111_s19), 1  ;;  %517 = vst.msk [vmem:[#allocation2] sm:$0xff] %vm516_vm0, %v6568_v0  ;;  %s8760_s26 = smov 115  }
  0x12   : > { %8774 = sst [smem:[#allocation6_spill]] %s8795_s19  ;;  %518 = vst.msk [vmem:[#allocation2 + $0x8] sm:$0xff] %vm516_vm0, %v6568_v0  ;;  %s5376_s20 = sshll.u32 %s8795_s19, 6 }
  0x13   : > { %519 = vst.msk [vmem:[#allocation2 + $0x10] sm:$0xff] %vm516_vm0, %v6568_v0  ;;  %s8762_s27 = smov 120   ;;  %s8754_s28 = smov 122  }
  0x14   : > { %521 = vst.msk [vmem:[#allocation2 + $0x20] sm:$0xff] %vm516_vm0, %v6568_v0  ;;  %s8756_s29 = smov 116   ;;  %s8752_s30 = smov 121  }
  0x15   : > { %s502_s23 = scalar_lea.vmem %s8775_s0, %s5376_s20  ;;  %522 = vst.msk [vmem:[#allocation2 + $0x28] sm:$0xff] %vm516_vm0, %v6568_v0  ;;  %s8758_s16 = smov 126  }
  0x16   : > { %v538_v1 = vld [vmem:[%s502_s23 + $0x38] sm:$0xff]  ;;  %v536_v2 = vld [vmem:[%s502_s23 + $0x28] sm:$0xff]  ;;  %523 = vst.msk [vmem:[#allocation2 + $0x30] sm:$0xff] %vm516_vm0, %v6568_v0  ;;  %v537_v4 = vld [vmem:[%s502_s23 + $0x30] sm:$0xff]  ;;  %s8750_s17 = smov 114   ;;  %s8778_s20 = smov 114  }
  0x17   : > { %561 = vrot.lane.b32.xlu0 %v538_v1, %s8764_s24  ;;  %557 = vrot.lane.b32.xlu1 %v536_v2, %s8764_s24  ;;  %v534_v3 = vld [vmem:[%s502_s23 + $0x18] sm:$0xff]  ;;  %524 = vst.msk [vmem:[#allocation2 + $0x38] sm:$0xff] %vm516_vm0, %v6568_v0  ;;  %v535_v5 = vld [vmem:[%s502_s23 + $0x20] sm:$0xff]  ;;  %s8779_s21 = smov 127   ;;  %s8782_s0 = smov 115  }
  0x18   : > { %553 = vrot.lane.b32.xlu2 %v534_v3, %s8764_s24  ;;  %525 = vst.msk [vmem:[#allocation3] sm:$0xff] %vm516_vm0, %v6568_v0  ;;  %v533_v6 = vld [vmem:[%s502_s23 + $0x10] sm:$0xff]  ;;  %v532_v7 = vld [vmem:[%s502_s23 + $0x8] sm:$0xff]  ;;  %v531_v8 = vld [vmem:[%s502_s23] sm:$0xff]  ;;  %s8790_s18 = sld [smem:[#allocation8_spill]] }
  0x19   : > { %526 = vst.msk [vmem:[#allocation3 + $0x8] sm:$0xff] %vm516_vm0, %v6568_v0  ;;  %s8791_s23 = sld [smem:[#allocation10_spill]] }
  0x1a   : > { %527 = vst.msk [vmem:[#allocation4] sm:$0xff] %vm516_vm0, %v6568_v0  ;;  %s8792_s19 = sld [smem:[#allocation9_spill]] }
  0x1b   : > { %528 = vst.msk [vmem:[#allocation4 + $0x8] sm:$0xff] %vm516_vm0, %v6568_v0 }
  0x1c   : > { %529 = vst.msk [vmem:[#allocation4 + $0x10] sm:$0xff] %vm516_vm0, %v6568_v0 }
  0x1d   : > { %530 = vst.msk [vmem:[#allocation4 + $0x18] sm:$0xff] %vm516_vm0, %v6568_v0 }
  0x1f   : > { %559 = vrot.lane.b32.xlu0 %v537_v4, %s8764_s24  ;;  %555 = vrot.lane.b32.xlu1 %v535_v5, %s8764_s24 }
  0x20   : > { %551 = vrot.lane.b32.xlu2 %v533_v6, %s8764_s24 }
  0x27   : > { %549 = vrot.lane.b32.xlu0 %v532_v7, %s8764_s24  ;;  %547 = vrot.lane.b32.xlu1 %v531_v8, %s8764_s24  ;;  %v581_v8 = vld [vmem:[%s8734_s2] sm:$0xff] }
  0x72   : > { %v554_v9 = vpop.permute.xlu2 %553 }
  0x73   : > { %575 = vst.msk [vmem:[#allocation2 + $0x18] sm:$0xff] %vm571_vm1, %v554_v9 }
  0x7a   : > { %v552_v10 = vpop.permute.xlu2 %551  ;;  %v6697_v11 = vld [vmem:[#allocation2 + $0x18] sm:$0xff] }
  0x7b   : > { %574 = vst.msk [vmem:[#allocation2 + $0x10] sm:$0xff] %vm571_vm1, %v552_v10 }
  0x82   : > { %v6699_v12 = vld [vmem:[#allocation2 + $0x10] sm:$0xff] }
  0x83   : > { %v6703_v13 = vpack.i.bf16 %v6699_v12, %v6697_v11 }
  0x85   : > { %5411 = vrot.lane.b32.xlu1 %v6703_v13, %s8748_s25 }
  0x89   : > { %v562_v14 = vpop.permute.xlu0 %561  ;;  %v558_v15 = vpop.permute.xlu1 %557 }
  0x8a   : > { %579 = vst.msk [vmem:[#allocation2 + $0x38] sm:$0xff] %vm571_vm1, %v562_v14 }
  0x8b   : > { %577 = vst.msk [vmem:[#allocation2 + $0x28] sm:$0xff] %vm571_vm1, %v558_v15 }
  0x91   : > { %v560_v16 = vpop.permute.xlu0 %559  ;;  %v556_v17 = vpop.permute.xlu1 %555  ;;  %v6711_v18 = vld [vmem:[#allocation2 + $0x38] sm:$0xff] }
  0x92   : > { %578 = vst.msk [vmem:[#allocation2 + $0x30] sm:$0xff] %vm571_vm1, %v560_v16  ;;  %v6722_v24 = vld [vmem:[#allocation2 + $0x28] sm:$0xff] }
  0x93   : > { %576 = vst.msk [vmem:[#allocation2 + $0x20] sm:$0xff] %vm571_vm1, %v556_v17 }
  0x99   : > { %v550_v19 = vpop.permute.xlu0 %549  ;;  %v548_v20 = vpop.permute.xlu1 %547  ;;  %v6713_v21 = vld [vmem:[#allocation2 + $0x30] sm:$0xff] }
  0x9a   : > { %573 = vst.msk [vmem:[#allocation2 + $0x8] sm:$0xff] %vm571_vm1, %v550_v19  ;;  %v6718_v22 = vpack.i.bf16 %v6713_v21, %v6711_v18  ;;  %v6720_v23 = vld [vmem:[#allocation2 + $0x20] sm:$0xff] }
  0x9b   : > { %572 = vst.msk [vmem:[#allocation2] sm:$0xff] %vm571_vm1, %v548_v20  ;;  %v6727_v25 = vpack.i.bf16 %v6720_v23, %v6722_v24 }
  0x9c   : > { %5401 = vrot.lane.b32.xlu2 %v6718_v22, %s8748_s25  ;;  %5426 = vrot.lane.b32.xlu1 %v6718_v22, %s8760_s26 }
  0x9d   : > { %5406 = vrot.lane.b32.xlu0 %v6727_v25, %s8748_s25 }
  0xa1   : > { %v6735_v26 = vld [vmem:[#allocation2 + $0x8] sm:$0xff] }
  0xa2   : > { %v6737_v27 = vld [vmem:[#allocation2] sm:$0xff] }
  0xa3   : > { %v6741_v28 = vpack.i.bf16 %v6737_v27, %v6735_v26 }
  0xa4   : > { %5441 = vrot.lane.b32.xlu1 %v6727_v25, %s8760_s26 }
  0xa5   : > { %5421 = vrot.lane.b32.xlu0 %v6718_v22, %s8762_s27  ;;  %5416 = vrot.lane.b32.xlu2 %v6741_v28, %s8748_s25  ;;  %s8780_s25 = smov 7  }
  0xac   : > { %5456 = vrot.lane.b32.xlu1 %v6703_v13, %s8760_s26 }
  0xad   : > { %5436 = vrot.lane.b32.xlu0 %v6727_v25, %s8762_s27  ;;  %5431 = vrot.lane.b32.xlu2 %v6718_v22, %s8754_s28 }
  0xb4   : > { %5471 = vrot.lane.b32.xlu1 %v6741_v28, %s8760_s26 }
  0xb5   : > { %5451 = vrot.lane.b32.xlu0 %v6703_v13, %s8762_s27  ;;  %5446 = vrot.lane.b32.xlu2 %v6727_v25, %s8754_s28 }
  0xbc   : > { %5486 = vrot.lane.b32.xlu1 %v6718_v22, %s8756_s29 }
  0xbd   : > { %5466 = vrot.lane.b32.xlu0 %v6741_v28, %s8762_s27  ;;  %5461 = vrot.lane.b32.xlu2 %v6703_v13, %s8754_s28 }
  0xc4   : > { %5501 = vrot.lane.b32.xlu1 %v6727_v25, %s8756_s29 }
  0xc5   : > { %5481 = vrot.lane.b32.xlu0 %v6718_v22, %s8752_s30  ;;  %5476 = vrot.lane.b32.xlu2 %v6741_v28, %s8754_s28  ;;  %s8776_s28 = smov 122  }
  0xcc   : > { %5516 = vrot.lane.b32.xlu1 %v6703_v13, %s8756_s29 }
  0xcd   : > { %5496 = vrot.lane.b32.xlu0 %v6727_v25, %s8752_s30  ;;  %5491 = vrot.lane.b32.xlu2 %v6718_v22, %s8758_s16 }
  0xd4   : > { %5531 = vrot.lane.b32.xlu1 %v6741_v28, %s8752_s30 }
  0xd5   : > { %5511 = vrot.lane.b32.xlu0 %v6703_v13, %s8752_s30  ;;  %5506 = vrot.lane.b32.xlu2 %v6727_v25, %s8758_s16  ;;  %s8777_s30 = smov 121  }
  0xdc   : > { %5546 = vrot.lane.b32.xlu1 %v6741_v28, %s8758_s16 }
  0xdd   : > { %5526 = vrot.lane.b32.xlu0 %v6703_v13, %s8758_s16  ;;  %5521 = vrot.lane.b32.xlu2 %v6718_v22, %s8750_s17 }
  0xe5   : > { %5541 = vrot.lane.b32.xlu0 %v6727_v25, %s8750_s17  ;;  %5536 = vrot.lane.b32.xlu2 %v6741_v28, %s8756_s29 }
  0xed   : > { %5556 = vrot.lane.b32.xlu0 %v6741_v28, %s8750_s17  ;;  %5551 = vrot.lane.b32.xlu2 %v6703_v13, %s8750_s17  ;;  %s8781_s17 = smov 120  }
  0xf6   : > { %v5402_v29 = vpop.permute.xlu2 %5401 }
  0xf7   : > { %v5403_v30 = vunpack.i.l.bf16 %v5402_v29  ;;  %v5404_v31 = vunpack.i.h.bf16 %v5402_v29  ;;  %v5412_v33 = vpop.permute.xlu1 %5411 }
  0xf8   : > { %v5413_v46 = vunpack.i.l.bf16 %v5412_v33  ;;  %v5414_v48 = vunpack.i.h.bf16 %v5412_v33 }
  0xf9   : > { %854 = vmatpush.msra.mxu2 %v5403_v30 }
  0xfb   : > { %855 = vmatpush.msra.mxu2 %v5404_v31 }
  0xff   : > { %v5417_v32 = vpop.permute.xlu2 %5416 }
 0x100   : > { %v5418_v52 = vunpack.i.l.bf16 %v5417_v32  ;;  %v5419_v55 = vunpack.i.h.bf16 %v5417_v32 }
 0x107   : > { %v5432_v34 = vpop.permute.xlu2 %5431 }
 0x108   : > { %v5433_v35 = vunpack.i.l.bf16 %v5432_v34  ;;  %v5434_v36 = vunpack.i.h.bf16 %v5432_v34 }
 0x10a   : > { %877 = vmatpush.msra.mxu1 %v5433_v35 }
 0x10c   : > { %878 = vmatpush.msra.mxu1 %v5434_v36 }
 0x10e   : > { %v5427_v37 = vpop.permute.xlu1 %5426 }
 0x10f   : > { %v5407_v38 = vpop.permute.xlu0 %5406  ;;  %v5447_v39 = vpop.permute.xlu2 %5446  ;;  %v5428_v40 = vunpack.i.l.bf16 %v5427_v37  ;;  %v5429_v43 = vunpack.i.h.bf16 %v5427_v37 }
 0x110   : > { %v5408_v41 = vunpack.i.l.bf16 %v5407_v38  ;;  %v5448_v42 = vunpack.i.l.bf16 %v5447_v39  ;;  %v5409_v44 = vunpack.i.h.bf16 %v5407_v38  ;;  %v5449_v45 = vunpack.i.h.bf16 %v5447_v39 }
 0x111   : > { %923 = vmatpush.msra.mxu3 %v5428_v40 }
 0x112   : > { %856 = vmatpush.msra.mxu2 %v5408_v41  ;;  %879 = vmatpush.msra.mxu1 %v5448_v42 }
 0x113   : > { %924 = vmatpush.msra.mxu3 %v5429_v43 }
 0x114   : > { %857 = vmatpush.msra.mxu2 %v5409_v44  ;;  %880 = vmatpush.msra.mxu1 %v5449_v45  ;;  %v592_v44 = vld [vmem:[%s8735_s3 + $0x8] sm:$0xff] }
 0x116   : > { %858 = vmatpush.msra.mxu2 %v5413_v46  ;;  %v5442_v47 = vpop.permute.xlu1 %5441  ;;  %v6578_v46 = vmov 0  }
 0x117   : > { %v5422_v49 = vpop.permute.xlu0 %5421  ;;  %v5462_v50 = vpop.permute.xlu2 %5461  ;;  %v5443_v51 = vunpack.i.l.bf16 %v5442_v47  ;;  %v5444_v54 = vunpack.i.h.bf16 %v5442_v47  ;;  %5560 = vset.pattern.permute.xlu1 %v6578_v46  ;;  %5561 = vset.pattern.permute.xlu2 %v6578_v46 }
 0x118   : > { %859 = vmatpush.msra.mxu2 %v5414_v48  ;;  %v5463_v53 = vunpack.i.l.bf16 %v5462_v50  ;;  %v5464_v56 = vunpack.i.h.bf16 %v5462_v50  ;;  %v5423_v7 = vunpack.i.l.bf16 %v5422_v49  ;;  %v5424_v9 = vunpack.i.h.bf16 %v5422_v49  ;;  %844 = vperm.xlu1 %5560, %v592_v44   ;;  %v584_v48 = vld [vmem:[%s8734_s2 + $0x18] sm:$0xff]  ;;  %v593_v44 = vld [vmem:[%s8736_s4] sm:$0xff] }
 0x119   : > { %925 = vmatpush.msra.mxu3 %v5443_v51  ;;  %5562 = vset.pattern.permute.xlu0 %v6578_v46 }
 0x11a   : > { %860 = vmatpush.msra.mxu2 %v5418_v52  ;;  %881 = vmatpush.msra.mxu1 %v5463_v53 }
 0x11b   : > { %926 = vmatpush.msra.mxu3 %v5444_v54  ;;  %v589_v54 = vld [vmem:[%s8734_s2 + $0x40] sm:$0xff] }
 0x11c   : > { %861 = vmatpush.msra.mxu2 %v5419_v55  ;;  %882 = vmatpush.msra.mxu1 %v5464_v56  ;;  %v595_v55 = vld [vmem:[%s8737_s5] sm:$0xff] }
 0x11d   : > { %v591_v56 = vld [vmem:[%s8735_s3] sm:$0xff] }
 0x11e   : > { %862 = vmatpush.msra.mxu2 %v6711_v18  ;;  %v5457_v57 = vpop.permute.xlu1 %5456  ;;  %839 = vperm.xlu2 %5561, %v591_v56  }
 0x11f   : > { %v5437_v58 = vpop.permute.xlu0 %5436  ;;  %v5477_v59 = vpop.permute.xlu2 %5476  ;;  %v5458_v60 = vunpack.i.l.bf16 %v5457_v57  ;;  %v5459_v62 = vunpack.i.h.bf16 %v5457_v57 }
 0x120   : > { %863 = vmatpush.msra.mxu2 %v6713_v21  ;;  %v5478_v61 = vunpack.i.l.bf16 %v5477_v59  ;;  %v5479_v63 = vunpack.i.h.bf16 %v5477_v59  ;;  %v5438_v14 = vunpack.i.l.bf16 %v5437_v58  ;;  %v5439_v17 = vunpack.i.h.bf16 %v5437_v58  ;;  %v586_v21 = vld [vmem:[%s8734_s2 + $0x28] sm:$0xff]  ;;  %v583_v58 = vld [vmem:[%s8734_s2 + $0x10] sm:$0xff]  ;;  %973 = vperm.xlu1 %5560, %v595_v55  }
 0x121   : > { %927 = vmatpush.msra.mxu3 %v5458_v60 }
 0x122   : > { %864 = vmatpush.msra.mxu2 %v6722_v24  ;;  %883 = vmatpush.msra.mxu1 %v5478_v61 }
 0x123   : > { %928 = vmatpush.msra.mxu3 %v5459_v62 }
 0x124   : > { %865 = vmatpush.msra.mxu2 %v6720_v23  ;;  %884 = vmatpush.msra.mxu1 %v5479_v63 }
 0x126   : > { %866 = vmatpush.msra.mxu2 %v6697_v11  ;;  %v5472_v0 = vpop.permute.xlu1 %5471 }
 0x127   : > { %v5452_v1 = vpop.permute.xlu0 %5451  ;;  %v5492_v2 = vpop.permute.xlu2 %5491  ;;  %v5473_v3 = vunpack.i.l.bf16 %v5472_v0  ;;  %v5474_v4 = vunpack.i.h.bf16 %v5472_v0 }
 0x128   : > { %867 = vmatpush.msra.mxu2 %v6699_v12  ;;  %v5493_v5 = vunpack.i.l.bf16 %v5492_v2  ;;  %v5494_v6 = vunpack.i.h.bf16 %v5492_v2  ;;  %v5453_v20 = vunpack.i.l.bf16 %v5452_v1  ;;  %v5454_v23 = vunpack.i.h.bf16 %v5452_v1  ;;  %v582_v1 = vld [vmem:[%s8734_s2 + $0x8] sm:$0xff]  ;;  %v588_v2 = vld [vmem:[%s8734_s2 + $0x38] sm:$0xff] }
 0x129   : > { %929 = vmatpush.msra.mxu3 %v5473_v3 }
 0x12a   : > { %868 = vmatpush.msra.mxu2 %v6735_v26  ;;  %885 = vmatpush.msra.mxu1 %v5493_v5 }
 0x12b   : > { %930 = vmatpush.msra.mxu3 %v5474_v4 }
 0x12c   : > { %869 = vmatpush.msra.mxu2 %v6737_v27  ;;  %886 = vmatpush.msra.mxu1 %v5494_v6 }
 0x12d   : > { %870 = vmatmul.f32.vlgmr.msra.gmra.mxu2 %v581_v8 }
 0x12e   : > { %900 = vmatpush.msrb.mxu2 %v5423_v7  ;;  %v5487_v10 = vpop.permute.xlu1 %5486 }
 0x12f   : > { %v5467_v11 = vpop.permute.xlu0 %5466  ;;  %v5507_v12 = vpop.permute.xlu2 %5506  ;;  %v5488_v15 = vunpack.i.l.bf16 %v5487_v10  ;;  %v5489_v18 = vunpack.i.h.bf16 %v5487_v10 }
 0x130   : > { %901 = vmatpush.msrb.mxu2 %v5424_v9  ;;  %v5508_v16 = vunpack.i.l.bf16 %v5507_v12  ;;  %v5509_v19 = vunpack.i.h.bf16 %v5507_v12  ;;  %v5468_v29 = vunpack.i.l.bf16 %v5467_v11  ;;  %v5469_v32 = vunpack.i.h.bf16 %v5467_v11  ;;  %v587_v9 = vld [vmem:[%s8734_s2 + $0x30] sm:$0xff] }
 0x131   : > { %931 = vmatpush.msra.mxu3 %v5488_v15  ;;  %v590_v15 = vld [vmem:[%s8734_s2 + $0x48] sm:$0xff] }
 0x132   : > { %902 = vmatpush.msrb.mxu2 %v5438_v14  ;;  %887 = vmatpush.msra.mxu1 %v5508_v16  ;;  %v585_v14 = vld [vmem:[%s8734_s2 + $0x20] sm:$0xff] }
 0x133   : > { %932 = vmatpush.msra.mxu3 %v5489_v18 }
 0x134   : > { %903 = vmatpush.msrb.mxu2 %v5439_v17  ;;  %888 = vmatpush.msra.mxu1 %v5509_v19 }
 0x135   : > { %873 = vmatmul.f32.gmra.mxu2 %v586_v21 }
 0x136   : > { %904 = vmatpush.msrb.mxu2 %v5453_v20  ;;  %v5502_v24 = vpop.permute.xlu1 %5501  ;;  %v596_v20 = vld [vmem:[%s8737_s5 + $0x8] sm:$0xff] }
 0x137   : > { %v5482_v26 = vpop.permute.xlu0 %5481  ;;  %v5522_v27 = vpop.permute.xlu2 %5521  ;;  %v5503_v30 = vunpack.i.l.bf16 %v5502_v24  ;;  %v5504_v33 = vunpack.i.h.bf16 %v5502_v24  ;;  %978 = vperm.xlu0 %5562, %v596_v20  }
 0x138   : > { %905 = vmatpush.msrb.mxu2 %v5454_v23  ;;  %v5523_v31 = vunpack.i.l.bf16 %v5522_v27  ;;  %v5524_v34 = vunpack.i.h.bf16 %v5522_v27  ;;  %v5483_v35 = vunpack.i.l.bf16 %v5482_v26  ;;  %v5484_v36 = vunpack.i.h.bf16 %v5482_v26 }
 0x139   : > { %933 = vmatpush.msra.mxu3 %v5503_v30 }
 0x13a   : > { %906 = vmatpush.msrb.mxu2 %v5468_v29  ;;  %954 = vmatpush.msra.mxu0 %v5523_v31 }
 0x13b   : > { %934 = vmatpush.msra.mxu3 %v5504_v33 }
 0x13c   : > { %907 = vmatpush.msrb.mxu2 %v5469_v32  ;;  %955 = vmatpush.msra.mxu0 %v5524_v34 }
 0x13e   : > { %908 = vmatpush.msrb.mxu2 %v5483_v35  ;;  %v5517_v37 = vpop.permute.xlu1 %5516 }
 0x13f   : > { %v5497_v38 = vpop.permute.xlu0 %5496  ;;  %v5518_v39 = vunpack.i.l.bf16 %v5517_v37  ;;  %v5537_v40 = vpop.permute.xlu2 %5536  ;;  %v5519_v42 = vunpack.i.h.bf16 %v5517_v37 }
 0x140   : > { %909 = vmatpush.msrb.mxu2 %v5484_v36  ;;  %v5498_v41 = vunpack.i.l.bf16 %v5497_v38  ;;  %v5499_v43 = vunpack.i.h.bf16 %v5497_v38  ;;  %v5538_v45 = vunpack.i.l.bf16 %v5537_v40  ;;  %v5539_v47 = vunpack.i.h.bf16 %v5537_v40 }
 0x141   : > { %935 = vmatpush.msra.mxu3 %v5518_v39 }
 0x142   : > { %910 = vmatpush.msrb.mxu2 %v5498_v41 }
 0x143   : > { %936 = vmatpush.msra.mxu3 %v5519_v42 }
 0x144   : > { %911 = vmatpush.msrb.mxu2 %v5499_v43 }
 0x145   : > { %937 = vmatpush.msra.mxu3 %v5538_v45  ;;  %v594_v45 = vld [vmem:[%s8736_s4 + $0x8] sm:$0xff] }
 0x146   : > { %v5532_v50 = vpop.permute.xlu1 %5531 }
 0x147   : > { %v5512_v49 = vpop.permute.xlu0 %5511  ;;  %938 = vmatpush.msra.mxu3 %v5539_v47  ;;  %v5533_v53 = vunpack.i.l.bf16 %v5532_v50  ;;  %v5534_v57 = vunpack.i.h.bf16 %v5532_v50  ;;  %v5552_v5 = vpop.permute.xlu2 %5551 }
 0x148   : > { %v5513_v51 = vunpack.i.l.bf16 %v5512_v49  ;;  %939 = vmatmul.f32.vlgmr.msra.gmra.mxu3 %v584_v48  ;;  %v5514_v52 = vunpack.i.h.bf16 %v5512_v49  ;;  %v5553_v7 = vunpack.i.l.bf16 %v5552_v5  ;;  %v5554_v8 = vunpack.i.h.bf16 %v5552_v5  ;;  %v6862_v49 = vld [vmem:[%s8733_s1] ss:$0 sm:$0xff] }
 0x14a   : > { %912 = vmatpush.msrb.mxu2 %v5513_v51 }
 0x14c   : > { %913 = vmatpush.msrb.mxu2 %v5514_v52 }
 0x14e   : > { %914 = vmatpush.msrb.mxu2 %v5533_v53  ;;  %v5547_v61 = vpop.permute.xlu1 %5546 }
 0x14f   : > { %v5527_v59 = vpop.permute.xlu0 %5526  ;;  %v5548_v63 = vunpack.i.l.bf16 %v5547_v61  ;;  %v5549_v0 = vunpack.i.h.bf16 %v5547_v61 }
 0x150   : > { %915 = vmatpush.msrb.mxu2 %v5534_v57  ;;  %v5528_v60 = vunpack.i.l.bf16 %v5527_v59  ;;  %942 = vmatmul.f32.gmra.mxu3 %v589_v54  ;;  %v5529_v62 = vunpack.i.h.bf16 %v5527_v59 }
 0x151   : > { %916 = vmatmul.f32.vlgmr.msrb.gmra.mxu2 %v583_v58 }
 0x152   : > { %889 = vmatpush.msra.mxu1 %v5528_v60 }
 0x154   : > { %890 = vmatpush.msra.mxu1 %v5529_v62  ;;  %v618_v62 = vld [vmem:[%s8739_s7 + $0x28] sm:$0xff] }
 0x156   : > { %891 = vmatpush.msra.mxu1 %v5548_v63  ;;  %v620_v63 = vld [vmem:[%s8739_s7 + $0x38] sm:$0xff] }
 0x157   : > { %v5542_v3 = vpop.permute.xlu0 %5541 }
 0x158   : > { %892 = vmatpush.msra.mxu1 %v5549_v0  ;;  %v5543_v4 = vunpack.i.l.bf16 %v5542_v3  ;;  %v5544_v6 = vunpack.i.h.bf16 %v5542_v3  ;;  %v613_v0 = vld [vmem:[%s8739_s7] sm:$0xff] }
 0x159   : > { %893 = vmatmul.f32.vlgmr.msra.gmra.mxu1 %v582_v1  ;;  %919 = vmatmul.f32.gmra.mxu2 %v588_v2  ;;  %v614_v1 = vld [vmem:[%s8739_s7 + $0x8] sm:$0xff] }
 0x15a   : > { %956 = vmatpush.msra.mxu0 %v5543_v4 }
 0x15c   : > { %957 = vmatpush.msra.mxu0 %v5544_v6 }
 0x15e   : > { %958 = vmatpush.msra.mxu0 %v5553_v7 }
 0x15f   : > { %v5557_v10 = vpop.permute.xlu0 %5556 }
 0x160   : > { %959 = vmatpush.msra.mxu0 %v5554_v8  ;;  %v5558_v11 = vunpack.i.l.bf16 %v5557_v10  ;;  %v5559_v12 = vunpack.i.h.bf16 %v5557_v10 }
 0x161   : > { %896 = vmatmul.f32.gmra.mxu1 %v587_v9 }
 0x162   : > { %960 = vmatpush.msra.mxu0 %v5558_v11 }
 0x164   : > { %961 = vmatpush.msra.mxu0 %v5559_v12 }
 0x165   : > { %5122 = vmatmul.msk.f32.vlgmr.msra.gmra.mxu0 %vm847_vm2, %v585_v14 }
 0x16d   : > { %5123 = vmatmul.msk.f32.gmra.mxu0 %vm847_vm2, %v590_v15 }
 0x178   : > { %v840_v21 = vpop.permute.xlu2 %839 }
 0x18a   : > { %v845_v23 = vpop.permute.xlu1 %844 }
 0x192   : > { %v974_v46 = vpop.permute.xlu1 %973 }
 0x1a9   : > { %v979_v52 = vpop.permute.xlu0 %978 }
 0x1b0   : > { %v871_v16 = vpop.f32.mrf.mxu2 }
 0x1b1   : > { %v872_v27 = vadd.f32 %v871_v16, %v840_v21 }
 0x1b8   : > { %v874_v17 = vpop.f32.mrf.mxu2 }
 0x1b9   : > { %v875_v29 = vadd.f32 %v874_v17, %v845_v23 }
 0x1cb   : > { %v940_v24 = vpop.f32.mrf.mxu3 }
 0x1d3   : > { %v943_v36 = vpop.f32.mrf.mxu3 }
 0x1d4   : > { %v917_v19 = vpop.f32.mrf.mxu2 }
 0x1d6   : > { %v894_v18 = vpop.f32.mrf.mxu1 }
 0x1d7   : > { %v895_v30 = vadd.f32 %v894_v18, %v872_v27 }
 0x1d9   : > { %v918_v34 = vadd.f32 %v917_v19, %v895_v30 }
 0x1db   : > { %v941_v37 = vadd.f32 %v940_v24, %v918_v34 }
 0x1dc   : > { %v920_v32 = vpop.f32.mrf.mxu2 }
 0x1de   : > { %v897_v26 = vpop.f32.mrf.mxu1 }
 0x1df   : > { %v898_v31 = vadd.f32 %v897_v26, %v875_v29 }
 0x1e1   : > { %v921_v35 = vadd.f32 %v920_v32, %v898_v31  ;;  %v598_v31 = vld [vmem:[%s8738_s6 + $0x8] sm:$0xff] }
 0x1e2   : > { %v963_v33 = vpop.f32.mrf.mxu0 }
 0x1e3   : > { %v944_v38 = vadd.f32 %v943_v36, %v921_v35  ;;  %v964_v40 = vadd.f32 %v963_v33, %v941_v37 }
 0x1e5   : > { %v969_v43 = vmax.f32 %v964_v40, 0.0  ;;  %v597_v40 = vld [vmem:[%s8738_s6] sm:$0xff] }
 0x1ea   : > { %v966_v39 = vpop.f32.mrf.mxu0 }
 0x1eb   : > { %v967_v41 = vadd.f32 %v966_v39, %v944_v38 }
 0x1ed   : > { %v970_v42 = vmax.f32 %v967_v41, 0.0 }
 0x1ef   : > { %1002 = vmatpush.msrb.mxu1 %v970_v42  ;;  %v600_v42 = vld [vmem:[%s8738_s6 + $0x18] sm:$0xff] }
 0x1f1   : > { %1003 = vmatpush.msrb.mxu1 %v969_v43 }
 0x1f2   : > { %5124 = vmatmul.msk.f32.vlgmr.msrb.gmra.mxu1 %vm981_vm3, %v593_v44 }
 0x1fa   : > { %5125 = vmatmul.msk.f32.gmra.mxu1 %vm981_vm3, %v594_v45  ;;  %v621_v45 = vld [vmem:[%s8740_s8] sm:$0xff] }
 0x26f   : > { %v1005_v47 = vpop.f32.mrf.mxu1 }
 0x270   : > { %v1006_v48 = vadd.f32 %v1005_v47, %v974_v46  ;;  %v599_v46 = vld [vmem:[%s8738_s6 + $0x10] sm:$0xff]  ;;  %v602_v47 = vld [vmem:[%s8738_s6 + $0x28] sm:$0xff] }
 0x272   : > { %v1011_v50 = vmax.f32 %v1006_v48, 0.0  ;;  %v622_v48 = vld [vmem:[%s8740_s8 + $0x8] sm:$0xff] }
 0x274   : > { %v1016_v51 = vmul.f32 %v6862_v49, %v1011_v50  ;;  %v601_v50 = vld [vmem:[%s8738_s6 + $0x20] sm:$0xff] }
 0x276   : > { %1020 = vrot.lane.b32.xlu1 %v1016_v51, %s8764_s24  ;;  %v604_v51 = vld [vmem:[%s8738_s6 + $0x38] sm:$0xff] }
 0x277   : > { %v1008_v53 = vpop.f32.mrf.mxu1 }
 0x278   : > { %v1009_v54 = vadd.f32 %v1008_v53, %v979_v52  ;;  %v623_v52 = vld [vmem:[%s8740_s8 + $0x10] sm:$0xff] }
 0x279   : > { %v603_v53 = vld [vmem:[%s8738_s6 + $0x30] sm:$0xff] }
 0x27a   : > { %v1012_v55 = vmax.f32 %v1009_v54, 0.0  ;;  %v606_v54 = vld [vmem:[%s8738_s6 + $0x48] sm:$0xff] }
 0x27c   : > { %v1017_v56 = vmul.f32 %v6862_v49, %v1012_v55  ;;  %v624_v55 = vld [vmem:[%s8740_s8 + $0x18] sm:$0xff] }
 0x27e   : > { %1022 = vrot.lane.b32.xlu2 %v1017_v56, %s8764_s24  ;;  %v605_v56 = vld [vmem:[%s8738_s6 + $0x40] sm:$0xff]  ;;  %s8783_s24 = smov 126  }
 0x2d8   : > { %v1023_v57 = vpop.permute.xlu2 %1022 }
 0x2d9   : > { %1027 = vst.msk [vmem:[#allocation3 + $0x8] sm:$0xff] %vm571_vm1, %v1023_v57  ;;  %v608_v57 = vld [vmem:[%s8738_s6 + $0x58] sm:$0xff] }
 0x2e0   : > { %v6870_v59 = vld [vmem:[#allocation3 + $0x8] sm:$0xff] }
 0x2e8   : > { %v1021_v58 = vpop.permute.xlu1 %1020 }
 0x2e9   : > { %1026 = vst.msk [vmem:[#allocation3] sm:$0xff] %vm571_vm1, %v1021_v58  ;;  %v625_v58 = vld [vmem:[%s8740_s8 + $0x20] sm:$0xff] }
 0x2f0   : > { %v6872_v60 = vld [vmem:[#allocation3] sm:$0xff] }
 0x2f1   : > { %v5573_v61 = vpack.i.bf16 %v6872_v60, %v6870_v59 }
 0x2f3   : > { %5574 = vrot.lane.b32.xlu1 %v5573_v61, %s8762_s27  ;;  %5569 = vrot.lane.b32.xlu0 %v5573_v61, %s8756_s29 }
 0x2f4   : > { %5564 = vrot.lane.b32.xlu2 %v5573_v61, %s8760_s26  ;;  %s8784_s26 = smov 116  }
 0x2fb   : > { %5589 = vrot.lane.b32.xlu1 %v5573_v61, %s8758_s16  ;;  %5584 = vrot.lane.b32.xlu0 %v5573_v61, %s8776_s28 }
 0x2fc   : > { %5579 = vrot.lane.b32.xlu2 %v5573_v61, %s8777_s30 }
 0x303   : > { %5604 = vrot.lane.b32.xlu1 %v6718_v22, %s8777_s30  ;;  %5599 = vrot.lane.b32.xlu0 %v5573_v61, %s8778_s20  ;;  %v619_v22 = vld [vmem:[%s8739_s7 + $0x30] sm:$0xff] }
 0x304   : > { %5594 = vrot.lane.b32.xlu2 %v5573_v61, %s8779_s21  ;;  %v626_v61 = vld [vmem:[%s8740_s8 + $0x28] sm:$0xff] }
 0x30b   : > { %5619 = vrot.lane.b32.xlu1 %v6741_v28, %s8777_s30  ;;  %5614 = vrot.lane.b32.xlu0 %v6703_v13, %s8777_s30  ;;  %v615_v13 = vld [vmem:[%s8739_s7 + $0x10] sm:$0xff]  ;;  %v617_v28 = vld [vmem:[%s8739_s7 + $0x20] sm:$0xff] }
 0x30c   : > { %5609 = vrot.lane.b32.xlu2 %v6727_v25, %s8777_s30  ;;  %v616_v25 = vld [vmem:[%s8739_s7 + $0x18] sm:$0xff] }
 0x313   : > { %1107 = vperm.xlu1 %5560, %v618_v62   ;;  %1112 = vperm.xlu0 %5562, %v619_v22   ;;  %v609_v62 = vld [vmem:[%s8738_s6 + $0x60] sm:$0xff]  ;;  %v612_v22 = vld [vmem:[%s8738_s6 + $0x78] sm:$0xff] }
 0x314   : > { %1117 = vperm.xlu2 %5561, %v620_v63   ;;  %v627_v63 = vld [vmem:[%s8740_s8 + $0x30] sm:$0xff] }
 0x31b   : > { %1092 = vperm.xlu1 %5560, %v615_v13   ;;  %1097 = vperm.xlu0 %5562, %v616_v25   ;;  %v611_v13 = vld [vmem:[%s8738_s6 + $0x70] sm:$0xff]  ;;  %v628_v25 = vld [vmem:[%s8740_s8 + $0x38] sm:$0xff] }
 0x31c   : > { %1102 = vperm.xlu2 %5561, %v617_v28  }
 0x323   : > { %1082 = vperm.xlu0 %5562, %v613_v0  }
 0x324   : > { %1087 = vperm.xlu2 %5561, %v614_v1  }
 0x34e   : > { %v5565_v2 = vpop.permute.xlu2 %5564 }
 0x34f   : > { %v5566_v3 = vunpack.i.l.bf16 %v5565_v2  ;;  %v5567_v4 = vunpack.i.h.bf16 %v5565_v2 }
 0x351   : > { %1144 = vmatpush.msra.mxu2 %v5566_v3 }
 0x353   : > { %1145 = vmatpush.msra.mxu2 %v5567_v4 }
 0x356   : > { %v5580_v5 = vpop.permute.xlu2 %5579 }
 0x357   : > { %v5581_v15 = vunpack.i.l.bf16 %v5580_v5  ;;  %v5582_v17 = vunpack.i.h.bf16 %v5580_v5 }
 0x35e   : > { %v5595_v16 = vpop.permute.xlu2 %5594 }
 0x35f   : > { %v5596_v33 = vunpack.i.l.bf16 %v5595_v16  ;;  %v5597_v35 = vunpack.i.h.bf16 %v5595_v16 }
 0x365   : > { %v5575_v6 = vpop.permute.xlu1 %5574  ;;  %v5570_v7 = vpop.permute.xlu0 %5569 }
 0x366   : > { %v5571_v8 = vunpack.i.l.bf16 %v5570_v7  ;;  %v5572_v9 = vunpack.i.h.bf16 %v5570_v7  ;;  %v5576_v10 = vunpack.i.l.bf16 %v5575_v6  ;;  %v5577_v11 = vunpack.i.h.bf16 %v5575_v6  ;;  %v5610_v27 = vpop.permute.xlu2 %5609 }
 0x367   : > { %v5611_v34 = vunpack.i.l.bf16 %v5610_v27  ;;  %v5612_v37 = vunpack.i.h.bf16 %v5610_v27 }
 0x368   : > { %1146 = vmatpush.msra.mxu2 %v5571_v8 }
 0x36a   : > { %1147 = vmatpush.msra.mxu2 %v5572_v9 }
 0x36c   : > { %1148 = vmatpush.msra.mxu2 %v5576_v10 }
 0x36d   : > { %v5590_v12 = vpop.permute.xlu1 %5589  ;;  %v5585_v14 = vpop.permute.xlu0 %5584 }
 0x36e   : > { %1149 = vmatpush.msra.mxu2 %v5577_v11  ;;  %v5586_v18 = vunpack.i.l.bf16 %v5585_v14  ;;  %v5587_v19 = vunpack.i.h.bf16 %v5585_v14  ;;  %v5591_v23 = vunpack.i.l.bf16 %v5590_v12  ;;  %v5592_v29 = vunpack.i.h.bf16 %v5590_v12  ;;  %v1118_v7 = vpop.permute.xlu2 %1117 }
 0x370   : > { %1150 = vmatpush.msra.mxu2 %v5581_v15 }
 0x372   : > { %1151 = vmatpush.msra.mxu2 %v5582_v17 }
 0x374   : > { %1152 = vmatpush.msra.mxu2 %v5586_v18 }
 0x375   : > { %v5605_v20 = vpop.permute.xlu1 %5604  ;;  %v5600_v21 = vpop.permute.xlu0 %5599 }
 0x376   : > { %1153 = vmatpush.msra.mxu2 %v5587_v19  ;;  %v5601_v24 = vunpack.i.l.bf16 %v5600_v21  ;;  %v5606_v26 = vunpack.i.l.bf16 %v5605_v20  ;;  %v5602_v30 = vunpack.i.h.bf16 %v5600_v21  ;;  %v5607_v32 = vunpack.i.h.bf16 %v5605_v20  ;;  %v1103_v12 = vpop.permute.xlu2 %1102 }
 0x378   : > { %1154 = vmatpush.msra.mxu2 %v5591_v23  ;;  %1199 = vmatpush.msrb.mxu3 %v5601_v24 }
 0x379   : > { %1386 = vmatpush.msrb.mxu0 %v5606_v26 }
 0x37a   : > { %1155 = vmatpush.msra.mxu2 %v5592_v29  ;;  %1200 = vmatpush.msrb.mxu3 %v5602_v30 }
 0x37b   : > { %1387 = vmatpush.msrb.mxu0 %v5607_v32  ;;  %5126 = vmatmul.msk.f32.vlgmr.msrb.gmra.mxu3 %vm981_vm3, %v598_v31 }
 0x37c   : > { %1156 = vmatpush.msra.mxu2 %v5596_v33 }
 0x37d   : > { %1388 = vmatpush.msrb.mxu0 %v5611_v34  ;;  %v5615_v36 = vpop.permute.xlu0 %5614  ;;  %v5620_v39 = vpop.permute.xlu1 %5619 }
 0x37e   : > { %1157 = vmatpush.msra.mxu2 %v5597_v35  ;;  %v5616_v38 = vunpack.i.l.bf16 %v5615_v36  ;;  %v5617_v41 = vunpack.i.h.bf16 %v5615_v36  ;;  %v5621_v43 = vunpack.i.l.bf16 %v5620_v39  ;;  %v5622_v44 = vunpack.i.h.bf16 %v5620_v39 }
 0x37f   : > { %1389 = vmatpush.msrb.mxu0 %v5612_v37 }
 0x380   : > { %1158 = vmatpush.msra.mxu2 %v6870_v59  ;;  %v607_v59 = vld [vmem:[%s8738_s6 + $0x50] sm:$0xff] }
 0x381   : > { %1390 = vmatpush.msrb.mxu0 %v5616_v38 }
 0x382   : > { %1159 = vmatpush.msra.mxu2 %v6872_v60  ;;  %v610_v60 = vld [vmem:[%s8738_s6 + $0x68] sm:$0xff] }
 0x383   : > { %1391 = vmatpush.msrb.mxu0 %v5617_v41  ;;  %1160 = vmatmul.f32.vlgmr.msra.gmra.mxu2 %v597_v40 }
 0x384   : > { %5127 = vmatmul.msk.f32.gmra.mxu3 %vm981_vm3, %v600_v42 }
 0x385   : > { %1392 = vmatpush.msrb.mxu0 %v5621_v43  ;;  %v1108_v18 = vpop.permute.xlu1 %1107  ;;  %v1113_v31 = vpop.permute.xlu0 %1112 }
 0x387   : > { %1393 = vmatpush.msrb.mxu0 %v5622_v44 }
 0x388   : > { %5138 = vmatmul.msk.f32.vlgmr.msrb.gmra.mxu0 %vm847_vm2, %v621_v45 }
 0x38b   : > { %1163 = vmatmul.f32.gmra.mxu2 %v599_v46 }
 0x38c   : > { %5128 = vmatmul.msk.f32.gmra.mxu3 %vm981_vm3, %v602_v47 }
 0x390   : > { %5139 = vmatmul.msk.f32.gmra.mxu0 %vm847_vm2, %v622_v48 }
 0x393   : > { %1166 = vmatmul.f32.gmra.mxu2 %v601_v50 }
 0x394   : > { %5129 = vmatmul.msk.f32.gmra.mxu3 %vm981_vm3, %v604_v51 }
 0x398   : > { %5140 = vmatmul.msk.f32.gmra.mxu0 %vm847_vm2, %v623_v52 }
 0x39b   : > { %1169 = vmatmul.f32.gmra.mxu2 %v603_v53  ;;  %v1088_v53 = vpop.permute.xlu2 %1087 }
 0x39c   : > { %5130 = vmatmul.msk.f32.gmra.mxu3 %vm981_vm3, %v606_v54 }
 0x3a0   : > { %5141 = vmatmul.msk.f32.gmra.mxu0 %vm847_vm2, %v624_v55 }
 0x3a3   : > { %1172 = vmatmul.f32.gmra.mxu2 %v605_v56 }
 0x3a4   : > { %5131 = vmatmul.msk.f32.gmra.mxu3 %vm981_vm3, %v608_v57 }
 0x3a8   : > { %5142 = vmatmul.msk.f32.gmra.mxu0 %vm847_vm2, %v625_v58 }
 0x3ab   : > { %1175 = vmatmul.f32.gmra.mxu2 %v607_v59 }
 0x3ac   : > { %5132 = vmatmul.msk.f32.gmra.mxu3 %vm981_vm3, %v610_v60 }
 0x3b0   : > { %5143 = vmatmul.msk.f32.gmra.mxu0 %vm847_vm2, %v626_v61 }
 0x3b3   : > { %1178 = vmatmul.f32.gmra.mxu2 %v609_v62 }
 0x3b4   : > { %5133 = vmatmul.msk.f32.gmra.mxu3 %vm981_vm3, %v612_v22 }
 0x3b8   : > { %5144 = vmatmul.msk.f32.gmra.mxu0 %vm847_vm2, %v627_v63 }
 0x3bb   : > { %1181 = vmatmul.f32.gmra.mxu2 %v611_v13 }
 0x3c0   : > { %5145 = vmatmul.msk.f32.gmra.mxu0 %vm847_vm2, %v628_v25 }
 0x3fe   : > { %v7006_v28 = vpop.f32.mrf.mxu3 }
 0x405   : > { %v7014_v4 = vpop.f32.mrf.mxu0 }
 0x406   : > { %v7008_v0 = vpop.f32.mrf.mxu2 }
 0x407   : > { %v7010_v1 = vpop.f32.mrf.mxu3 }
 0x40d   : > { %v7022_v9 = vpop.f32.mrf.mxu0 }
 0x40e   : > { %v1164_v2 = vpop.f32.mrf.mxu2 }
 0x40f   : > { %v7012_v3 = vpop.f32.mrf.mxu3  ;;  %v1165_v55 = vadd.f32 %v1164_v2, %v1088_v53  ;;  %v1093_v2 = vpop.permute.xlu1 %1092 }
 0x411   : > { %v1206_v62 = vadd.f32 %v7010_v1, %v1165_v55 }
 0x415   : > { %v7024_v14 = vpop.f32.mrf.mxu0 }
 0x416   : > { %v7016_v5 = vpop.f32.mrf.mxu2 }
 0x417   : > { %v7018_v6 = vpop.f32.mrf.mxu3 }
 0x41d   : > { %v7026_v24 = vpop.f32.mrf.mxu0 }
 0x41e   : > { %v7020_v8 = vpop.f32.mrf.mxu2 }
 0x41f   : > { %v1214_v10 = vpop.f32.mrf.mxu3 }
 0x425   : > { %v7028_v37 = vpop.f32.mrf.mxu0 }
 0x426   : > { %v1173_v11 = vpop.f32.mrf.mxu2 }
 0x427   : > { %v1174_v15 = vadd.f32 %v1173_v11, %v1103_v12  ;;  %v1217_v16 = vpop.f32.mrf.mxu3 }
 0x429   : > { %v1215_v17 = vadd.f32 %v1214_v10, %v1174_v15  ;;  %v1168_v15 = vadd.f32 %v7016_v5, %v1093_v2 }
 0x42b   : > { %v1226_v21 = vadd.f32 2.0, %v1215_v17 }
 0x42d   : > { %v5134_v29 = vmul.f32 -1.442695, %v1226_v21  ;;  %v1410_v54 = vpop.f32.mrf.mxu0 }
 0x42e   : > { %v1176_v19 = vpop.f32.mrf.mxu2 }
 0x42f   : > { %v1177_v20 = vadd.f32 %v1176_v19, %v1108_v18  ;;  %v1220_v27 = vpop.f32.mrf.mxu3 }
 0x431   : > { %v1218_v23 = vadd.f32 %v1217_v16, %v1177_v20  ;;  %v1098_v20 = vpop.permute.xlu0 %1097 }
 0x433   : > { %v1227_v26 = vadd.f32 2.0, %v1218_v23 }
 0x435   : > { %v5135_v30 = vmul.f32 -1.442695, %v1227_v26  ;;  %v1413_v18 = vpop.f32.mrf.mxu0 }
 0x436   : > { %v1179_v32 = vpop.f32.mrf.mxu2 }
 0x437   : > { %6444 = vpow2.f32 %v5135_v30  ;;  %v1180_v33 = vadd.f32 %v1179_v32, %v1113_v31  ;;  %v1223_v41 = vpop.f32.mrf.mxu3 }
 0x438   : > { %6446 = vpow2.f32 %v5134_v29 }
 0x439   : > { %v1221_v34 = vadd.f32 %v1220_v27, %v1180_v33  ;;  %v1209_v27 = vadd.f32 %v7012_v3, %v1168_v15 }
 0x43b   : > { %v1228_v35 = vadd.f32 2.0, %v1221_v34  ;;  %v1421_v32 = vadd.f32 %v1413_v18, %v1209_v27  ;;  %v5160_v27 = vld [vmem:[%s8737_s5 + $0x10] sm:$0xff] }
 0x43d   : > { %v6445_v36 = vpop.eup %6444  ;;  %v5136_v38 = vmul.f32 -1.442695, %v1228_v35  ;;  %v1171_v35 = vadd.f32 %v7020_v8, %v1098_v20  ;;  %v1083_v8 = vpop.permute.xlu0 %1082 }
 0x43e   : > { %v1243_v39 = vadd.f32 1.0, %v6445_v36  ;;  %v1182_v40 = vpop.f32.mrf.mxu2  ;;  %v6447_v42 = vpop.eup %6446 }
 0x43f   : > { %6448 = vpow2.f32 %v5136_v38  ;;  %v1183_v43 = vadd.f32 %v1182_v40, %v1118_v7  ;;  %v7030_v45 = vadd.f32 1.0, %v6447_v42  ;;  %v1420_v7 = vadd.f32 %v1410_v54, %v1206_v62 }
 0x440   : > { %6450 = vrcp.f32 %v1243_v39  ;;  %v1272_v57 = vand.u32 2147483648, %v1243_v39  ;;  %v1270_v59 = vand.u32 2147483647, %v1243_v39  ;;  %vm1266_vm5 = vweird.f32 %v1243_v39 }
 0x441   : > { %v1224_v44 = vadd.f32 %v1223_v41, %v1183_v43  ;;  %6452 = vrcp.f32 %v7030_v45  ;;  %v1429_v40 = vmul.f32 %v6862_v49, %v7024_v14  ;;  %v1162_v14 = vadd.f32 %v7008_v0, %v1083_v8 }
 0x442   : > { %v1273_v25 = vor.u32 1.1754944e-38, %v1272_v57  ;;  %vm1271_vm7 = vcmp.eq.f32.partialorder %v1270_v59, 8.507059e+37  ;;  %vm1251_vm0 = vweird.f32 %v7030_v45  ;;  %v1255_v54 = vand.u32 2147483647, %v7030_v45 }
 0x443   : > { %v1229_v46 = vadd.f32 2.0, %v1224_v44  ;;  %v1203_v0 = vadd.f32 %v7006_v28, %v1162_v14  ;;  %v1430_v59 = vmul.f32 %v6862_v49, %v7026_v24  ;;  %v1428_v24 = vmul.f32 %v6862_v49, %v7022_v9 }
 0x445   : > { %v6449_v47 = vpop.eup %6448  ;;  %v5137_v48 = vmul.f32 -1.442695, %v1229_v46  ;;  %v1212_v46 = vadd.f32 %v7018_v6, %v1171_v35  ;;  %v1257_v6 = vand.u32 2147483648, %v7030_v45 }
 0x446   : > { %v6451_v50 = vpop.eup %6450  ;;  %v1244_v51 = vadd.f32 1.0, %v6449_v47  ;;  %v1416_v47 = vpop.f32.mrf.mxu0 }
 0x447   : > { %v1262_v52 = vmul.f32 %v6451_v50, %v1243_v39  ;;  %6454 = vpow2.f32 %v5137_v48  ;;  %vm1267_vm4 = vweird.f32 %v6451_v50  ;;  %v7033_v60 = vpop.eup %6452 }
 0x448   : > { %6456 = vrcp.f32 %v1244_v51  ;;  %vm1268_vm6 = vmor %vm1266_vm5, %vm1267_vm4  ;;  %v1247_v16 = vmul.f32 %v7033_v60, %v7030_v45  ;;  %v1287_v19 = vand.u32 2147483648, %v1244_v51  ;;  %v1285_v26 = vand.u32 2147483647, %v1244_v51 }
 0x449   : > { %v1263_v56 = vsub.f32 1.0, %v1262_v52  ;;  %vm1281_vm9 = vweird.f32 %v1244_v51  ;;  %vm1252_vm14 = vweird.f32 %v7033_v60  ;;  %v1422_v52 = vadd.f32 %v1416_v47, %v1212_v46 }
 0x44a   : > { %v1248_v5 = vsub.f32 1.0, %v1247_v16  ;;  %v1288_v31 = vor.u32 1.1754944e-38, %v1287_v19  ;;  %vm1286_vm11 = vcmp.eq.f32.partialorder %v1285_v26, 8.507059e+37  ;;  %vm1253_vm5 = vmor %vm1251_vm0, %vm1252_vm14  ;;  %v1419_v45 = vadd.f32 %v7028_v37, %v1203_v0  ;;  %v5157_v26 = vld [vmem:[%s8735_s3 + $0x18] sm:$0xff] }
 0x44b   : > { %v1264_v58 = vmul.f32 %v6451_v50, %v1263_v56 }
 0x44c   : > { %v1249_v3 = vmul.f32 %v7033_v60, %v1248_v5 }
 0x44d   : > { %v6455_v61 = vpop.eup %6454  ;;  %v1265_v22 = vadd.f32 %v6451_v50, %v1264_v58  ;;  %v1258_v58 = vor.u32 1.1754944e-38, %v1257_v6 }
 0x44e   : > { %v6457_v63 = vpop.eup %6456  ;;  %v1245_v13 = vadd.f32 1.0, %v6455_v61 }
 0x44f   : > { %v1277_v10 = vmul.f32 %v6457_v63, %v1244_v51  ;;  %v1269_v11 = vsel %vm1268_vm6, %v6451_v50, %v1265_v22  ;;  %vm1282_vm8 = vweird.f32 %v6457_v63  ;;  %v1250_v50 = vadd.f32 %v7033_v60, %v1249_v3 }
 0x450   : > { %6458 = vrcp.f32 %v1245_v13  ;;  %v7036_v12 = vsel %vm1271_vm7, %v1273_v25, %v1269_v11  ;;  %vm1283_vm10 = vmor %vm1281_vm9, %vm1282_vm8  ;;  %v1302_v41 = vand.u32 2147483648, %v1245_v13  ;;  %v1300_v44 = vand.u32 2147483647, %v1245_v13 }
 0x451   : > { %v1424_v1 = vmul.f32 %v1420_v7, %v7036_v12  ;;  %v1278_v17 = vsub.f32 1.0, %v1277_v10  ;;  %vm1296_vm13 = vweird.f32 %v1245_v13  ;;  %v1254_v57 = vsel %vm1253_vm5, %v7033_v60, %v1250_v50 }
 0x452   : > { %v1303_v51 = vor.u32 1.1754944e-38, %v1302_v41  ;;  %vm1301_vm4 = vcmp.eq.f32.partialorder %v1300_v44, 8.507059e+37  ;;  %vm1256_vm6 = vcmp.eq.f32.partialorder %v1255_v54, 8.507059e+37  ;;  %v1427_v60 = vmul.f32 %v6862_v49, %v7014_v4 }
 0x453   : > { %v1432_v21 = vmul.f32 %v6862_v49, %v1424_v1  ;;  %v1279_v23 = vmul.f32 %v6457_v63, %v1278_v17  ;;  %v7070_v62 = vsel %vm1256_vm6, %v1258_v58, %v1254_v57 }
 0x454   : > { %v1423_v22 = vmul.f32 %v1419_v45, %v7070_v62 }
 0x455   : > { %1453 = vrot.lane.b32.xlu0 %v1432_v21, %s8780_s25  ;;  %v1280_v29 = vadd.f32 %v6457_v63, %v1279_v23 }
 0x456   : > { %v6459_v30 = vpop.eup %6458  ;;  %v1431_v28 = vmul.f32 %v6862_v49, %v1423_v22 }
 0x457   : > { %v1292_v33 = vmul.f32 %v6459_v30, %v1245_v13  ;;  %v1284_v34 = vsel %vm1283_vm10, %v6457_v63, %v1280_v29  ;;  %vm1297_vm12 = vweird.f32 %v6459_v30  ;;  %v5161_v29 = vld [vmem:[%s8737_s5 + $0x18] sm:$0xff] }
 0x458   : > { %v7046_v36 = vsel %vm1286_vm11, %v1288_v31, %v1284_v34  ;;  %vm1298_vm15 = vmor %vm1296_vm13, %vm1297_vm12  ;;  %v5156_v31 = vld [vmem:[%s8735_s3 + $0x10] sm:$0xff] }
 0x459   : > { %v1425_v38 = vmul.f32 %v1421_v32, %v7046_v36  ;;  %v1293_v39 = vsub.f32 1.0, %v1292_v33 }
 0x45b   : > { %v1433_v42 = vmul.f32 %v6862_v49, %v1425_v38  ;;  %v1294_v43 = vmul.f32 %v6459_v30, %v1293_v39 }
 0x45d   : > { %1455 = vrot.lane.b32.xlu2 %v1433_v42, %s8780_s25  ;;  %1447 = vrot.lane.b32.xlu0 %v1429_v40, %s8780_s25  ;;  %v1295_v48 = vadd.f32 %v6459_v30, %v1294_v43 }
 0x45f   : > { %v1299_v53 = vsel %vm1298_vm15, %v6459_v30, %v1295_v48 }
 0x460   : > { %v7062_v55 = vsel %vm1301_vm4, %v1303_v51, %v1299_v53 }
 0x461   : > { %v1426_v56 = vmul.f32 %v1422_v52, %v7062_v55 }
 0x463   : > { %v1434_v61 = vmul.f32 %v6862_v49, %v1426_v56 }
 0x465   : > { %1457 = vrot.lane.b32.xlu1 %v1434_v61, %s8780_s25  ;;  %1449 = vrot.lane.b32.xlu2 %v1430_v59, %s8780_s25 }
 0x46d   : > { %1443 = vrot.lane.b32.xlu2 %v1427_v60, %s8780_s25  ;;  %1451 = vrot.lane.b32.xlu1 %v1431_v28, %s8780_s25 }
 0x475   : > { %1445 = vrot.lane.b32.xlu1 %v1428_v24, %s8780_s25 }
 0x4b7   : > { %v1456_v37 = vpop.permute.xlu2 %1455 }
 0x4b8   : > { %1473 = vst.msk [vmem:[#allocation2 + $0x30] sm:$0xff] %vm571_vm1, %v1456_v37 }
 0x4bf   : > { %v1450_v63 = vpop.permute.xlu2 %1449  ;;  %v7138_v21 = vld [vmem:[#allocation2 + $0x30] sm:$0xff] }
 0x4c0   : > { %1470 = vst.msk [vmem:[#allocation2 + $0x18] sm:$0xff] %vm571_vm1, %v1450_v63 }
 0x4c7   : > { %v1444_v13 = vpop.permute.xlu2 %1443  ;;  %v1454_v25 = vpop.permute.xlu0 %1453  ;;  %v7091_v49 = vld [vmem:[#allocation2 + $0x18] sm:$0xff] }
 0x4c8   : > { %1467 = vst.msk [vmem:[#allocation2] sm:$0xff] %vm571_vm1, %v1444_v13 }
 0x4c9   : > { %1472 = vst.msk [vmem:[#allocation2 + $0x28] sm:$0xff] %vm571_vm1, %v1454_v25 }
 0x4cf   : > { %v1448_v4 = vpop.permute.xlu0 %1447  ;;  %v7116_v17 = vld [vmem:[#allocation2] sm:$0xff] }
 0x4d0   : > { %1469 = vst.msk [vmem:[#allocation2 + $0x10] sm:$0xff] %vm571_vm1, %v1448_v4  ;;  %v7107_v16 = vld [vmem:[#allocation2 + $0x28] sm:$0xff] }
 0x4d7   : > { %v1458_v7 = vpop.permute.xlu1 %1457  ;;  %v7089_v10 = vld [vmem:[#allocation2 + $0x10] sm:$0xff] }
 0x4d8   : > { %1474 = vst.msk [vmem:[#allocation2 + $0x38] sm:$0xff] %vm571_vm1, %v1458_v7  ;;  %v7096_v9 = vpack.i.bf16 %v7089_v10, %v7091_v49 }
 0x4da   : > { %5624 = vrot.lane.b32.xlu2 %v7096_v9, %s8779_s21  ;;  %5634 = vrot.lane.b32.xlu1 %v7096_v9, %s8776_s28 }
 0x4df   : > { %v1452_v11 = vpop.permute.xlu1 %1451  ;;  %v7136_v20 = vld [vmem:[#allocation2 + $0x38] sm:$0xff] }
 0x4e0   : > { %1471 = vst.msk [vmem:[#allocation2 + $0x20] sm:$0xff] %vm571_vm1, %v1452_v11  ;;  %v7142_v23 = vpack.i.bf16 %v7138_v21, %v7136_v20 }
 0x4e2   : > { %5644 = vrot.lane.b32.xlu1 %v7096_v9, %s8781_s17 }
 0x4e7   : > { %v1446_v2 = vpop.permute.xlu1 %1445  ;;  %v7105_v15 = vld [vmem:[#allocation2 + $0x20] sm:$0xff] }
 0x4e8   : > { %1468 = vst.msk [vmem:[#allocation2 + $0x8] sm:$0xff] %vm571_vm1, %v1446_v2  ;;  %v7112_v1 = vpack.i.bf16 %v7105_v15, %v7107_v16 }
 0x4ea   : > { %5659 = vrot.lane.b32.xlu2 %v7112_v1, %s8776_s28 }
 0x4ef   : > { %v7118_v18 = vld [vmem:[#allocation2 + $0x8] sm:$0xff] }
 0x4f0   : > { %v7122_v19 = vpack.i.bf16 %v7116_v17, %v7118_v18 }
 0x4f2   : > { %5664 = vrot.lane.b32.xlu2 %v7112_v1, %s8781_s17  ;;  %5649 = vrot.lane.b32.xlu1 %v7122_v19, %s8781_s17 }
 0x4f3   : > { %5629 = vrot.lane.b32.xlu0 %v7122_v19, %s8779_s21 }
 0x4fa   : > { %5669 = vrot.lane.b32.xlu2 %v7112_v1, %s8782_s0  ;;  %5654 = vrot.lane.b32.xlu1 %v7112_v1, %s8779_s21 }
 0x4fb   : > { %5639 = vrot.lane.b32.xlu0 %v7122_v19, %s8776_s28 }
 0x502   : > { %5684 = vrot.lane.b32.xlu2 %v7096_v9, %s8782_s0  ;;  %5694 = vrot.lane.b32.xlu1 %v7142_v23, %s8776_s28 }
 0x503   : > { %5674 = vrot.lane.b32.xlu0 %v7142_v23, %s8779_s21 }
 0x50a   : > { %5709 = vrot.lane.b32.xlu2 %v7142_v23, %s8782_s0  ;;  %5699 = vrot.lane.b32.xlu1 %v7112_v1, %s8777_s30 }
 0x50b   : > { %5679 = vrot.lane.b32.xlu0 %v7112_v1, %s8783_s24 }
 0x512   : > { %5714 = vrot.lane.b32.xlu2 %v7122_v19, %s8782_s0  ;;  %5729 = vrot.lane.b32.xlu1 %v7096_v9, %s8777_s30 }
 0x513   : > { %5689 = vrot.lane.b32.xlu0 %v7096_v9, %s8783_s24 }
 0x51a   : > { %5744 = vrot.lane.b32.xlu2 %v7142_v23, %s8784_s26  ;;  %5734 = vrot.lane.b32.xlu1 %v7142_v23, %s8777_s30 }
 0x51b   : > { %5704 = vrot.lane.b32.xlu0 %v7142_v23, %s8781_s17 }
 0x522   : > { %5749 = vrot.lane.b32.xlu2 %v7112_v1, %s8784_s26  ;;  %5739 = vrot.lane.b32.xlu1 %v7122_v19, %s8777_s30 }
 0x523   : > { %5719 = vrot.lane.b32.xlu0 %v7142_v23, %s8783_s24 }
 0x52a   : > { %5769 = vrot.lane.b32.xlu2 %v7096_v9, %s8778_s20  ;;  %5764 = vrot.lane.b32.xlu1 %v7096_v9, %s8784_s26 }
 0x52b   : > { %5724 = vrot.lane.b32.xlu0 %v7122_v19, %s8783_s24 }
 0x532   : > { %1772 = vperm.xlu2 %5561, %v5157_v26   ;;  %5779 = vrot.lane.b32.xlu1 %v7122_v19, %s8778_s20 }
 0x533   : > { %5754 = vrot.lane.b32.xlu0 %v7142_v23, %s8778_s20 }
 0x534   : > { %v5625_v5 = vpop.permute.xlu2 %5624 }
 0x535   : > { %v5626_v28 = vunpack.i.l.bf16 %v5625_v5  ;;  %v5627_v37 = vunpack.i.h.bf16 %v5625_v5 }
 0x53a   : > { %1900 = vperm.xlu2 %5561, %v5160_v27   ;;  %1905 = vperm.xlu1 %5560, %v5161_v29  }
 0x53b   : > { %5759 = vrot.lane.b32.xlu0 %v7112_v1, %s8778_s20 }
 0x543   : > { %5774 = vrot.lane.b32.xlu0 %v7122_v19, %s8784_s26 }
 0x544   : > { %v7197_v30 = vpop.permute.xlu2 %5659 }
 0x54b   : > { %1767 = vperm.xlu0 %5562, %v5156_v31  }
 0x54c   : > { %v7202_v32 = vpop.permute.xlu2 %5664  ;;  %v7204_v33 = vpop.permute.xlu1 %5634 }
 0x54d   : > { %v5666_v27 = vunpack.i.l.bf16 %v7202_v32 }
 0x554   : > { %v5670_v34 = vpop.permute.xlu2 %5669  ;;  %v7206_v35 = vpop.permute.xlu1 %5644 }
 0x555   : > { %v5671_v43 = vunpack.i.l.bf16 %v5670_v34  ;;  %v5672_v44 = vunpack.i.h.bf16 %v5670_v34 }
 0x55c   : > { %v5685_v38 = vpop.permute.xlu2 %5684 }
 0x55d   : > { %v5686_v8 = vunpack.i.l.bf16 %v5685_v38  ;;  %v5687_v50 = vunpack.i.h.bf16 %v5685_v38 }
 0x564   : > { %v5710_v39 = vpop.permute.xlu2 %5709  ;;  %v7208_v3 = vpop.permute.xlu1 %5649 }
 0x565   : > { %v5711_v40 = vunpack.i.l.bf16 %v5710_v39  ;;  %v5630_v41 = vpop.permute.xlu0 %5629  ;;  %v5712_v42 = vunpack.i.h.bf16 %v5710_v39  ;;  %v5651_v31 = vunpack.i.l.bf16 %v7208_v3  ;;  %v5652_v34 = vunpack.i.h.bf16 %v7208_v3 }
 0x566   : > { %v5631_v63 = vunpack.i.l.bf16 %v5630_v41  ;;  %v5632_v13 = vunpack.i.h.bf16 %v5630_v41 }
 0x567   : > { %1850 = vmatpush.msra.mxu0 %v5711_v40  ;;  %v5636_v40 = vunpack.i.l.bf16 %v7204_v33 }
 0x569   : > { %1851 = vmatpush.msra.mxu0 %v5712_v42 }
 0x56b   : > { %1852 = vmatpush.msra.mxu0 %v5671_v43 }
 0x56c   : > { %v5715_v46 = vpop.permute.xlu2 %5714  ;;  %v5655_v47 = vpop.permute.xlu1 %5654 }
 0x56d   : > { %v7210_v48 = vpop.permute.xlu0 %5639  ;;  %1853 = vmatpush.msra.mxu0 %v5672_v44  ;;  %v5716_v14 = vunpack.i.l.bf16 %v5715_v46  ;;  %v5717_v51 = vunpack.i.h.bf16 %v5715_v46  ;;  %v5656_v0 = vunpack.i.l.bf16 %v5655_v47  ;;  %v5657_v59 = vunpack.i.h.bf16 %v5655_v47 }
 0x56e   : > { %v5641_v43 = vunpack.i.l.bf16 %v7210_v48  ;;  %v5642_v46 = vunpack.i.h.bf16 %v7210_v48 }
 0x56f   : > { %1854 = vmatpush.msra.mxu0 %v5686_v8 }
 0x571   : > { %1855 = vmatpush.msra.mxu0 %v5687_v50 }
 0x573   : > { %1856 = vmatpush.msra.mxu0 %v5716_v14 }
 0x574   : > { %v5745_v6 = vpop.permute.xlu2 %5744  ;;  %v5695_v52 = vpop.permute.xlu1 %5694 }
 0x575   : > { %v5746_v53 = vunpack.i.l.bf16 %v5745_v6  ;;  %v5675_v54 = vpop.permute.xlu0 %5674  ;;  %1857 = vmatpush.msra.mxu0 %v5717_v51  ;;  %v5747_v57 = vunpack.i.h.bf16 %v5745_v6  ;;  %v5696_v29 = vunpack.i.l.bf16 %v5695_v52  ;;  %v5697_v5 = vunpack.i.h.bf16 %v5695_v52 }
 0x576   : > { %v5676_v56 = vunpack.i.l.bf16 %v5675_v54  ;;  %v5677_v58 = vunpack.i.h.bf16 %v5675_v54  ;;  %v5148_v54 = vld [vmem:[%s8734_s2 + $0x60] sm:$0xff] }
 0x577   : > { %1858 = vmatpush.msra.mxu0 %v5746_v53 }
 0x578   : > { %1781 = vmatpush.msra.mxu1 %v5676_v56 }
 0x579   : > { %1859 = vmatpush.msra.mxu0 %v5747_v57 }
 0x57a   : > { %1782 = vmatpush.msra.mxu1 %v5677_v58 }
 0x57c   : > { %1783 = vmatpush.msra.mxu1 %v5656_v0  ;;  %v5750_v61 = vpop.permute.xlu2 %5749  ;;  %v7212_v45 = vpop.permute.xlu1 %5699 }
 0x57d   : > { %v5751_v22 = vunpack.i.l.bf16 %v5750_v61  ;;  %v7214_v60 = vpop.permute.xlu0 %5679  ;;  %v5752_v24 = vunpack.i.h.bf16 %v5750_v61  ;;  %v5701_v44 = vunpack.i.l.bf16 %v7212_v45  ;;  %v5702_v47 = vunpack.i.h.bf16 %v7212_v45  ;;  %v5147_v61 = vld [vmem:[%s8734_s2 + $0x58] sm:$0xff]  ;;  %v5153_v45 = vld [vmem:[%s8734_s2 + $0x88] sm:$0xff] }
 0x57e   : > { %1784 = vmatpush.msra.mxu1 %v5657_v59  ;;  %v5681_v6 = vunpack.i.l.bf16 %v7214_v60  ;;  %v5682_v48 = vunpack.i.h.bf16 %v7214_v60 }
 0x57f   : > { %1860 = vmatpush.msra.mxu0 %v5751_v22 }
 0x580   : > { %1785 = vmatpush.msra.mxu1 %v5626_v28 }
 0x581   : > { %1861 = vmatpush.msra.mxu0 %v5752_v24 }
 0x582   : > { %1786 = vmatpush.msra.mxu1 %v5627_v37 }
 0x584   : > { %1787 = vmatpush.msra.mxu1 %v5631_v63  ;;  %v7216_v25 = vpop.permute.xlu1 %5729  ;;  %v5149_v63 = vld [vmem:[%s8734_s2 + $0x68] sm:$0xff] }
 0x585   : > { %v7218_v4 = vpop.permute.xlu0 %5689  ;;  %v5731_v50 = vunpack.i.l.bf16 %v7216_v25  ;;  %v5732_v14 = vunpack.i.h.bf16 %v7216_v25  ;;  %v5770_v25 = vpop.permute.xlu2 %5769 }
 0x586   : > { %1788 = vmatpush.msra.mxu1 %v5632_v13  ;;  %v5691_v57 = vunpack.i.l.bf16 %v7218_v4  ;;  %v5692_v58 = vunpack.i.h.bf16 %v7218_v4 }
 0x588   : > { %1789 = vmatpush.msra.mxu1 %v7136_v20  ;;  %v5667_v20 = vunpack.i.h.bf16 %v7202_v32  ;;  %v5662_v32 = vunpack.i.h.bf16 %v7197_v30 }
 0x58a   : > { %1790 = vmatpush.msra.mxu1 %v7138_v21 }
 0x58c   : > { %1791 = vmatpush.msra.mxu1 %v7107_v16  ;;  %v5735_v7 = vpop.permute.xlu1 %5734 }
 0x58d   : > { %v5705_v11 = vpop.permute.xlu0 %5704  ;;  %v5736_v41 = vunpack.i.l.bf16 %v5735_v7  ;;  %v5737_v3 = vunpack.i.h.bf16 %v5735_v7  ;;  %v5152_v7 = vld [vmem:[%s8734_s2 + $0x80] sm:$0xff] }
 0x58e   : > { %v5706_v2 = vunpack.i.l.bf16 %v5705_v11  ;;  %1792 = vmatpush.msra.mxu1 %v7105_v15  ;;  %v5707_v26 = vunpack.i.h.bf16 %v5705_v11  ;;  %v5146_v15 = vld [vmem:[%s8734_s2 + $0x50] sm:$0xff]  ;;  %v5771_v11 = vunpack.i.l.bf16 %v5770_v25 }
 0x590   : > { %1793 = vmatpush.msra.mxu1 %v7091_v49  ;;  %1827 = vmatpush.msra.mxu3 %v5706_v2  ;;  %v5646_v49 = vunpack.i.l.bf16 %v7206_v35 }
 0x592   : > { %1794 = vmatpush.msra.mxu1 %v7089_v10  ;;  %1828 = vmatpush.msra.mxu3 %v5707_v26  ;;  %v5647_v10 = vunpack.i.h.bf16 %v7206_v35  ;;  %v5151_v35 = vld [vmem:[%s8734_s2 + $0x78] sm:$0xff]  ;;  %v5772_v26 = vunpack.i.h.bf16 %v5770_v25  ;;  %v5179_v25 = vld [vmem:[%s8739_s7 + $0x48] sm:$0xff] }
 0x594   : > { %1795 = vmatpush.msra.mxu1 %v7118_v18  ;;  %1829 = vmatpush.msra.mxu3 %v5666_v27  ;;  %v7229_v16 = vpop.permute.xlu1 %5739  ;;  %v5661_v18 = vunpack.i.l.bf16 %v7197_v30  ;;  %v5637_v30 = vunpack.i.h.bf16 %v7204_v33  ;;  %v5154_v27 = vld [vmem:[%s8734_s2 + $0x90] sm:$0xff] }
 0x595   : > { %v5720_v21 = vpop.permute.xlu0 %5719  ;;  %v5741_v52 = vunpack.i.l.bf16 %v7229_v16  ;;  %v5742_v53 = vunpack.i.h.bf16 %v7229_v16 }
 0x596   : > { %1796 = vmatpush.msra.mxu1 %v7116_v17  ;;  %1830 = vmatpush.msra.mxu3 %v5667_v20  ;;  %v5721_v33 = vunpack.i.l.bf16 %v5720_v21  ;;  %v5722_v51 = vunpack.i.h.bf16 %v5720_v21  ;;  %v5155_v21 = vld [vmem:[%s8734_s2 + $0x98] sm:$0xff] }
 0x597   : > { %1797 = vmatmul.f32.vlgmr.msra.gmra.mxu1 %v5146_v15  ;;  %v5150_v15 = vld [vmem:[%s8734_s2 + $0x70] sm:$0xff] }
 0x598   : > { %1804 = vmatpush.msrb.mxu1 %v5696_v29  ;;  %1831 = vmatpush.msra.mxu3 %v5646_v49 }
 0x59a   : > { %1805 = vmatpush.msrb.mxu1 %v5697_v5  ;;  %1832 = vmatpush.msra.mxu3 %v5647_v10 }
 0x59c   : > { %1806 = vmatpush.msrb.mxu1 %v5661_v18  ;;  %1833 = vmatpush.msra.mxu3 %v5651_v31  ;;  %v5765_v17 = vpop.permute.xlu1 %5764 }
 0x59d   : > { %v5725_v38 = vpop.permute.xlu0 %5724  ;;  %v5766_v39 = vunpack.i.l.bf16 %v5765_v17  ;;  %v5767_v42 = vunpack.i.h.bf16 %v5765_v17 }
 0x59e   : > { %1807 = vmatpush.msrb.mxu1 %v5662_v32  ;;  %1834 = vmatpush.msra.mxu3 %v5652_v34  ;;  %v5726_v0 = vunpack.i.l.bf16 %v5725_v38  ;;  %v5727_v59 = vunpack.i.h.bf16 %v5725_v38  ;;  %v1773_v32 = vpop.permute.xlu2 %1772 }
 0x59f   : > { %1800 = vmatmul.f32.gmra.mxu1 %v5151_v35  ;;  %1862 = vmatpush.msra.mxu0 %v5766_v39 }
 0x5a0   : > { %1808 = vmatpush.msrb.mxu1 %v5636_v40  ;;  %1835 = vmatpush.msra.mxu3 %v5736_v41 }
 0x5a1   : > { %1863 = vmatpush.msra.mxu0 %v5767_v42 }
 0x5a2   : > { %1809 = vmatpush.msrb.mxu1 %v5637_v30  ;;  %1836 = vmatpush.msra.mxu3 %v5737_v3 }
 0x5a4   : > { %1810 = vmatpush.msrb.mxu1 %v5641_v43  ;;  %1837 = vmatpush.msra.mxu3 %v5701_v44  ;;  %v5780_v2 = vpop.permute.xlu1 %5779 }
 0x5a5   : > { %v5755_v8 = vpop.permute.xlu0 %5754  ;;  %v5781_v20 = vunpack.i.l.bf16 %v5780_v2  ;;  %v5782_v16 = vunpack.i.h.bf16 %v5780_v2 }
 0x5a6   : > { %1811 = vmatpush.msrb.mxu1 %v5642_v46  ;;  %1838 = vmatpush.msra.mxu3 %v5702_v47  ;;  %v5756_v60 = vunpack.i.l.bf16 %v5755_v8  ;;  %v5757_v24 = vunpack.i.h.bf16 %v5755_v8 }
 0x5a8   : > { %1812 = vmatpush.msrb.mxu1 %v5721_v33  ;;  %1839 = vmatpush.msra.mxu3 %v5731_v50 }
 0x5aa   : > { %1813 = vmatpush.msrb.mxu1 %v5722_v51  ;;  %1840 = vmatpush.msra.mxu3 %v5732_v14  ;;  %v5158_v14 = vld [vmem:[%s8736_s4 + $0x10] sm:$0xff]  ;;  %v5159_v51 = vld [vmem:[%s8736_s4 + $0x18] sm:$0xff] }
 0x5ac   : > { %1814 = vmatpush.msrb.mxu1 %v5681_v6  ;;  %1841 = vmatpush.msra.mxu3 %v5741_v52  ;;  %v1901_v6 = vpop.permute.xlu2 %1900 }
 0x5ad   : > { %v5760_v56 = vpop.permute.xlu0 %5759 }
 0x5ae   : > { %1815 = vmatpush.msrb.mxu1 %v5682_v48  ;;  %1842 = vmatpush.msra.mxu3 %v5742_v53  ;;  %v5761_v13 = vunpack.i.l.bf16 %v5760_v56  ;;  %v5762_v4 = vunpack.i.h.bf16 %v5760_v56 }
 0x5af   : > { %1843 = vmatmul.f32.vlgmr.msra.gmra.mxu3 %v5148_v54  ;;  %v7295_v54 = vld [vmem:[%s8733_s1] ss:$0 sm:$0xff] }
 0x5b0   : > { %1816 = vmatpush.msrb.mxu1 %v5691_v57  ;;  %v1906_v57 = vpop.permute.xlu1 %1905 }
 0x5b2   : > { %1817 = vmatpush.msrb.mxu1 %v5692_v58 }
 0x5b4   : > { %1818 = vmatpush.msrb.mxu1 %v5726_v0 }
 0x5b5   : > { %v5775_v22 = vpop.permute.xlu0 %5774 }
 0x5b6   : > { %v5776_v28 = vunpack.i.l.bf16 %v5775_v22  ;;  %1819 = vmatpush.msrb.mxu1 %v5727_v59  ;;  %v5777_v37 = vunpack.i.h.bf16 %v5775_v22 }
 0x5b7   : > { %1820 = vmatmul.f32.vlgmr.msrb.gmra.mxu1 %v5147_v61  ;;  %1846 = vmatmul.f32.gmra.mxu3 %v5153_v45 }
 0x5b8   : > { %1881 = vmatpush.msra.mxu1 %v5756_v60  ;;  %1864 = vmatpush.msra.mxu0 %v5776_v28 }
 0x5ba   : > { %1882 = vmatpush.msra.mxu1 %v5757_v24  ;;  %1865 = vmatpush.msra.mxu0 %v5777_v37  ;;  %v5183_v37 = vld [vmem:[%s8739_s7 + $0x68] sm:$0xff] }
 0x5bb   : > { %1866 = vmatmul.f32.vlgmr.msra.gmra.mxu0 %v5149_v63  ;;  %v5185_v63 = vld [vmem:[%s8739_s7 + $0x78] sm:$0xff] }
 0x5bc   : > { %1883 = vmatpush.msra.mxu1 %v5761_v13  ;;  %v5178_v13 = vld [vmem:[%s8739_s7 + $0x40] sm:$0xff] }
 0x5bd   : > { %v1768_v34 = vpop.permute.xlu0 %1767 }
 0x5be   : > { %1884 = vmatpush.msra.mxu1 %v5762_v4 }
 0x5bf   : > { %1823 = vmatmul.f32.gmra.mxu1 %v5152_v7 }
 0x5c0   : > { %1885 = vmatpush.msra.mxu1 %v5771_v11 }
 0x5c2   : > { %1886 = vmatpush.msra.mxu1 %v5772_v26 }
 0x5c3   : > { %1869 = vmatmul.f32.gmra.mxu0 %v5154_v27 }
 0x5c4   : > { %1887 = vmatpush.msra.mxu1 %v5781_v20 }
 0x5c6   : > { %1888 = vmatpush.msra.mxu1 %v5782_v16 }
 0x5c7   : > { %5194 = vmatmul.msk.f32.vlgmr.msra.gmra.mxu1 %vm847_vm2, %v5150_v15 }
 0x5cf   : > { %5195 = vmatmul.msk.f32.gmra.mxu1 %vm847_vm2, %v5155_v21 }
 0x614   : > { %v1798_v49 = vpop.f32.mrf.mxu1 }
 0x615   : > { %v1799_v17 = vadd.f32 %v1798_v49, %v1768_v34 }
 0x61c   : > { %v1801_v29 = vpop.f32.mrf.mxu1 }
 0x61d   : > { %v1802_v35 = vadd.f32 %v1801_v29, %v1773_v32 }
 0x632   : > { %v1844_v5 = vpop.f32.mrf.mxu3 }
 0x634   : > { %v1821_v10 = vpop.f32.mrf.mxu1 }
 0x635   : > { %v1822_v38 = vadd.f32 %v1821_v10, %v1799_v17 }
 0x637   : > { %v1845_v42 = vadd.f32 %v1844_v5, %v1822_v38 }
 0x638   : > { %v1867_v31 = vpop.f32.mrf.mxu0 }
 0x639   : > { %v1868_v43 = vadd.f32 %v1867_v31, %v1845_v42 }
 0x63a   : > { %v1847_v40 = vpop.f32.mrf.mxu3 }
 0x63c   : > { %v1824_v18 = vpop.f32.mrf.mxu1 }
 0x63d   : > { %v1825_v39 = vadd.f32 %v1824_v18, %v1802_v35 }
 0x63f   : > { %v1848_v30 = vadd.f32 %v1847_v40, %v1825_v39 }
 0x640   : > { %v1870_v3 = vpop.f32.mrf.mxu0 }
 0x641   : > { %v1871_v44 = vadd.f32 %v1870_v3, %v1848_v30  ;;  %v5163_v30 = vld [vmem:[%s8738_s6 + $0x88] sm:$0xff] }
 0x644   : > { %v1890_v41 = vpop.f32.mrf.mxu1 }
 0x645   : > { %v1891_v47 = vadd.f32 %v1890_v41, %v1868_v43 }
 0x647   : > { %v1896_v33 = vmax.f32 %v1891_v47, 0.0 }
 0x64c   : > { %v1893_v46 = vpop.f32.mrf.mxu1 }
 0x64d   : > { %v1894_v8 = vadd.f32 %v1893_v46, %v1871_v44 }
 0x64f   : > { %v1897_v50 = vmax.f32 %v1894_v8, 0.0 }
 0x651   : > { %1928 = vmatpush.msrb.mxu2 %v1897_v50 }
 0x653   : > { %1929 = vmatpush.msrb.mxu2 %v1896_v33 }
 0x654   : > { %5196 = vmatmul.msk.f32.vlgmr.msrb.gmra.mxu2 %vm981_vm3, %v5158_v14  ;;  %v5162_v14 = vld [vmem:[%s8738_s6 + $0x80] sm:$0xff] }
 0x65c   : > { %5197 = vmatmul.msk.f32.gmra.mxu2 %vm981_vm3, %v5159_v51 }
 0x6d7   : > { %v1931_v52 = vpop.f32.mrf.mxu2 }
 0x6d8   : > { %v1932_v48 = vadd.f32 %v1931_v52, %v1901_v6  ;;  %v5165_v6 = vld [vmem:[%s8738_s6 + $0x98] sm:$0xff] }
 0x6da   : > { %v1937_v53 = vmax.f32 %v1932_v48, 0.0 }
 0x6dc   : > { %v1939_v56 = vmul.f32 %v7295_v54, %v1937_v53  ;;  %v5186_v53 = vld [vmem:[%s8740_s8 + $0x40] sm:$0xff] }
 0x6de   : > { %1943 = vrot.lane.b32.xlu1 %v1939_v56, %s8780_s25  ;;  %v5164_v56 = vld [vmem:[%s8738_s6 + $0x90] sm:$0xff] }
 0x6df   : > { %v1934_v58 = vpop.f32.mrf.mxu2 }
 0x6e0   : > { %v1935_v0 = vadd.f32 %v1934_v58, %v1906_v57  ;;  %v5167_v57 = vld [vmem:[%s8738_s6 + $0xa8] sm:$0xff] }
 0x6e1   : > { %v5187_v58 = vld [vmem:[%s8740_s8 + $0x48] sm:$0xff] }
 0x6e2   : > { %v1938_v59 = vmax.f32 %v1935_v0, 0.0  ;;  %v5166_v0 = vld [vmem:[%s8738_s6 + $0xa0] sm:$0xff] }
 0x6e4   : > { %v1940_v61 = vmul.f32 %v7295_v54, %v1938_v59  ;;  %v5169_v59 = vld [vmem:[%s8738_s6 + $0xb8] sm:$0xff] }
 0x6e6   : > { %1945 = vrot.lane.b32.xlu0 %v1940_v61, %s8780_s25  ;;  %v5188_v61 = vld [vmem:[%s8740_s8 + $0x50] sm:$0xff] }
 0x750   : > { %v1944_v45 = vpop.permute.xlu1 %1943 }
 0x751   : > { %1949 = vst.msk [vmem:[#allocation3] sm:$0xff] %vm571_vm1, %v1944_v45  ;;  %v5168_v45 = vld [vmem:[%s8738_s6 + $0xb0] sm:$0xff] }
 0x758   : > { %v1946_v22 = vpop.permute.xlu0 %1945  ;;  %v7303_v60 = vld [vmem:[#allocation3] sm:$0xff] }
 0x759   : > { %1950 = vst.msk [vmem:[#allocation3 + $0x8] sm:$0xff] %vm571_vm1, %v1946_v22  ;;  %v5171_v22 = vld [vmem:[%s8738_s6 + $0xc8] sm:$0xff] }
 0x760   : > { %v7305_v28 = vld [vmem:[#allocation3 + $0x8] sm:$0xff] }
 0x761   : > { %v5793_v24 = vpack.i.bf16 %v7303_v60, %v7305_v28 }
 0x763   : > { %5794 = vrot.lane.b32.xlu1 %v5793_v24, %s8781_s17  ;;  %5789 = vrot.lane.b32.xlu0 %v5793_v24, %s8784_s26 }
 0x764   : > { %5784 = vrot.lane.b32.xlu2 %v5793_v24, %s8782_s0 }
 0x76b   : > { %5809 = vrot.lane.b32.xlu1 %v5793_v24, %s8783_s24  ;;  %5804 = vrot.lane.b32.xlu0 %v5793_v24, %s8776_s28 }
 0x76c   : > { %5799 = vrot.lane.b32.xlu2 %v5793_v24, %s8777_s30 }
 0x773   : > { %5824 = vrot.lane.b32.xlu1 %v7142_v23, %s8777_s30  ;;  %5819 = vrot.lane.b32.xlu0 %v5793_v24, %s8778_s20  ;;  %v5184_v23 = vld [vmem:[%s8739_s7 + $0x70] sm:$0xff] }
 0x774   : > { %5814 = vrot.lane.b32.xlu2 %v5793_v24, %s8779_s21  ;;  %v5173_v24 = vld [vmem:[%s8738_s6 + $0xd8] sm:$0xff] }
 0x77b   : > { %5839 = vrot.lane.b32.xlu1 %v7122_v19, %s8777_s30  ;;  %5834 = vrot.lane.b32.xlu0 %v7096_v9, %s8777_s30  ;;  %v5180_v9 = vld [vmem:[%s8739_s7 + $0x50] sm:$0xff]  ;;  %v5182_v19 = vld [vmem:[%s8739_s7 + $0x60] sm:$0xff] }
 0x77c   : > { %5829 = vrot.lane.b32.xlu2 %v7112_v1, %s8777_s30  ;;  %v5181_v1 = vld [vmem:[%s8739_s7 + $0x58] sm:$0xff] }
 0x783   : > { %2030 = vperm.xlu1 %5560, %v5183_v37   ;;  %2035 = vperm.xlu0 %5562, %v5184_v23   ;;  %v5190_v37 = vld [vmem:[%s8740_s8 + $0x60] sm:$0xff]  ;;  %v5172_v23 = vld [vmem:[%s8738_s6 + $0xd0] sm:$0xff] }
 0x784   : > { %2040 = vperm.xlu2 %5561, %v5185_v63   ;;  %v5175_v63 = vld [vmem:[%s8738_s6 + $0xe8] sm:$0xff] }
 0x78b   : > { %2015 = vperm.xlu1 %5560, %v5180_v9   ;;  %2020 = vperm.xlu0 %5562, %v5181_v1   ;;  %v5191_v9 = vld [vmem:[%s8740_s8 + $0x68] sm:$0xff]  ;;  %v5174_v1 = vld [vmem:[%s8738_s6 + $0xe0] sm:$0xff] }
 0x78c   : > { %2025 = vperm.xlu2 %5561, %v5182_v19   ;;  %v5177_v19 = vld [vmem:[%s8738_s6 + $0xf8] sm:$0xff] }
 0x793   : > { %2005 = vperm.xlu0 %5562, %v5178_v13   ;;  %v5192_v13 = vld [vmem:[%s8740_s8 + $0x70] sm:$0xff] }
 0x794   : > { %2010 = vperm.xlu2 %5561, %v5179_v25   ;;  %v5176_v25 = vld [vmem:[%s8738_s6 + $0xf0] sm:$0xff] }
 0x7be   : > { %v5785_v4 = vpop.permute.xlu2 %5784 }
 0x7bf   : > { %v5786_v7 = vunpack.i.l.bf16 %v5785_v4  ;;  %v5787_v11 = vunpack.i.h.bf16 %v5785_v4  ;;  %v5193_v4 = vld [vmem:[%s8740_s8 + $0x78] sm:$0xff] }
 0x7c1   : > { %2067 = vmatpush.msrb.mxu3 %v5786_v7 }
 0x7c3   : > { %2068 = vmatpush.msrb.mxu3 %v5787_v11 }
 0x7c6   : > { %v5800_v2 = vpop.permute.xlu2 %5799 }
 0x7c7   : > { %v5801_v10 = vunpack.i.l.bf16 %v5800_v2  ;;  %v5802_v18 = vunpack.i.h.bf16 %v5800_v2 }
 0x7ce   : > { %v5815_v5 = vpop.permute.xlu2 %5814 }
 0x7cf   : > { %v5816_v43 = vunpack.i.l.bf16 %v5815_v5  ;;  %v5817_v46 = vunpack.i.h.bf16 %v5815_v5 }
 0x7d5   : > { %v5795_v26 = vpop.permute.xlu1 %5794  ;;  %v5790_v27 = vpop.permute.xlu0 %5789 }
 0x7d6   : > { %v5791_v20 = vunpack.i.l.bf16 %v5790_v27  ;;  %v5792_v16 = vunpack.i.h.bf16 %v5790_v27  ;;  %v5796_v15 = vunpack.i.l.bf16 %v5795_v26  ;;  %v5797_v21 = vunpack.i.h.bf16 %v5795_v26  ;;  %v5830_v40 = vpop.permute.xlu2 %5829 }
 0x7d7   : > { %v5831_v44 = vunpack.i.l.bf16 %v5830_v40  ;;  %v5832_v47 = vunpack.i.h.bf16 %v5830_v40 }
 0x7d8   : > { %2069 = vmatpush.msrb.mxu3 %v5791_v20 }
 0x7da   : > { %2070 = vmatpush.msrb.mxu3 %v5792_v16 }
 0x7dc   : > { %2071 = vmatpush.msrb.mxu3 %v5796_v15 }
 0x7dd   : > { %v5810_v49 = vpop.permute.xlu1 %5809  ;;  %v5805_v29 = vpop.permute.xlu0 %5804 }
 0x7de   : > { %2072 = vmatpush.msrb.mxu3 %v5797_v21  ;;  %v5806_v31 = vunpack.i.l.bf16 %v5805_v29  ;;  %v5807_v32 = vunpack.i.h.bf16 %v5805_v29  ;;  %v5811_v35 = vunpack.i.l.bf16 %v5810_v49  ;;  %v5812_v41 = vunpack.i.h.bf16 %v5810_v49  ;;  %v2041_v21 = vpop.permute.xlu2 %2040 }
 0x7e0   : > { %2073 = vmatpush.msrb.mxu3 %v5801_v10 }
 0x7e2   : > { %2074 = vmatpush.msrb.mxu3 %v5802_v18 }
 0x7e4   : > { %2075 = vmatpush.msrb.mxu3 %v5806_v31 }
 0x7e5   : > { %v5825_v34 = vpop.permute.xlu1 %5824  ;;  %v5820_v17 = vpop.permute.xlu0 %5819 }
 0x7e6   : > { %v5826_v38 = vunpack.i.l.bf16 %v5825_v34  ;;  %v5821_v39 = vunpack.i.l.bf16 %v5820_v17  ;;  %2076 = vmatpush.msrb.mxu3 %v5807_v32  ;;  %v5822_v42 = vunpack.i.h.bf16 %v5820_v17  ;;  %v5827_v3 = vunpack.i.h.bf16 %v5825_v34  ;;  %v2026_v18 = vpop.permute.xlu2 %2025 }
 0x7e8   : > { %2077 = vmatpush.msrb.mxu3 %v5811_v35  ;;  %2122 = vmatpush.msrb.mxu0 %v5821_v39 }
 0x7e9   : > { %2309 = vmatpush.msrb.mxu1 %v5826_v38 }
 0x7ea   : > { %2078 = vmatpush.msrb.mxu3 %v5812_v41  ;;  %2123 = vmatpush.msrb.mxu0 %v5822_v42 }
 0x7eb   : > { %2310 = vmatpush.msrb.mxu1 %v5827_v3  ;;  %5198 = vmatmul.msk.f32.vlgmr.msrb.gmra.mxu0 %vm981_vm3, %v5163_v30 }
 0x7ec   : > { %2079 = vmatpush.msrb.mxu3 %v5816_v43 }
 0x7ed   : > { %2311 = vmatpush.msrb.mxu1 %v5831_v44  ;;  %v5835_v8 = vpop.permute.xlu0 %5834  ;;  %v5840_v33 = vpop.permute.xlu1 %5839 }
 0x7ee   : > { %v5836_v50 = vunpack.i.l.bf16 %v5835_v8  ;;  %2080 = vmatpush.msrb.mxu3 %v5817_v46  ;;  %v5837_v51 = vunpack.i.h.bf16 %v5835_v8  ;;  %v5841_v52 = vunpack.i.l.bf16 %v5840_v33  ;;  %v5842_v48 = vunpack.i.h.bf16 %v5840_v33 }
 0x7ef   : > { %2312 = vmatpush.msrb.mxu1 %v5832_v47 }
 0x7f0   : > { %2081 = vmatpush.msrb.mxu3 %v7305_v28  ;;  %v5170_v28 = vld [vmem:[%s8738_s6 + $0xc0] sm:$0xff] }
 0x7f1   : > { %2313 = vmatpush.msrb.mxu1 %v5836_v50 }
 0x7f2   : > { %2082 = vmatpush.msrb.mxu3 %v7303_v60  ;;  %v5189_v60 = vld [vmem:[%s8740_s8 + $0x58] sm:$0xff] }
 0x7f3   : > { %2314 = vmatpush.msrb.mxu1 %v5837_v51  ;;  %2083 = vmatmul.f32.vlgmr.msrb.gmra.mxu3 %v5162_v14 }
 0x7f4   : > { %5199 = vmatmul.msk.f32.gmra.mxu0 %vm981_vm3, %v5165_v6 }
 0x7f5   : > { %2315 = vmatpush.msrb.mxu1 %v5841_v52  ;;  %v2031_v35 = vpop.permute.xlu1 %2030  ;;  %v2036_v46 = vpop.permute.xlu0 %2035 }
 0x7f7   : > { %2316 = vmatpush.msrb.mxu1 %v5842_v48 }
 0x7f8   : > { %5210 = vmatmul.msk.f32.vlgmr.msrb.gmra.mxu1 %vm847_vm2, %v5186_v53 }
 0x7fb   : > { %2086 = vmatmul.f32.gmra.mxu3 %v5164_v56 }
 0x7fc   : > { %5200 = vmatmul.msk.f32.gmra.mxu0 %vm981_vm3, %v5167_v57 }
 0x800   : > { %5211 = vmatmul.msk.f32.gmra.mxu1 %vm847_vm2, %v5187_v58 }
 0x803   : > { %2089 = vmatmul.f32.gmra.mxu3 %v5166_v0 }
 0x804   : > { %5201 = vmatmul.msk.f32.gmra.mxu0 %vm981_vm3, %v5169_v59 }
 0x808   : > { %5212 = vmatmul.msk.f32.gmra.mxu1 %vm847_vm2, %v5188_v61 }
 0x80b   : > { %2092 = vmatmul.f32.gmra.mxu3 %v5168_v45 }
 0x80c   : > { %5202 = vmatmul.msk.f32.gmra.mxu0 %vm981_vm3, %v5171_v22 }
 0x810   : > { %5213 = vmatmul.msk.f32.gmra.mxu1 %vm847_vm2, %v5189_v60 }
 0x813   : > { %2095 = vmatmul.f32.gmra.mxu3 %v5170_v28 }
 0x814   : > { %5203 = vmatmul.msk.f32.gmra.mxu0 %vm981_vm3, %v5173_v24  ;;  %v2011_v24 = vpop.permute.xlu2 %2010 }
 0x818   : > { %5214 = vmatmul.msk.f32.gmra.mxu1 %vm847_vm2, %v5190_v37 }
 0x81b   : > { %2098 = vmatmul.f32.gmra.mxu3 %v5172_v23 }
 0x81c   : > { %5204 = vmatmul.msk.f32.gmra.mxu0 %vm981_vm3, %v5175_v63 }
 0x820   : > { %5215 = vmatmul.msk.f32.gmra.mxu1 %vm847_vm2, %v5191_v9 }
 0x823   : > { %2101 = vmatmul.f32.gmra.mxu3 %v5174_v1 }
 0x824   : > { %5205 = vmatmul.msk.f32.gmra.mxu0 %vm981_vm3, %v5177_v19 }
 0x828   : > { %5216 = vmatmul.msk.f32.gmra.mxu1 %vm847_vm2, %v5192_v13 }
 0x82b   : > { %2104 = vmatmul.f32.gmra.mxu3 %v5176_v25 }
 0x830   : > { %5217 = vmatmul.msk.f32.gmra.mxu1 %vm847_vm2, %v5193_v4 }
 0x868   : > { %v7439_v7 = vpop.f32.mrf.mxu0 }
 0x871   : > { %v7441_v11 = vpop.f32.mrf.mxu0 }
 0x875   : > { %v7447_v20 = vpop.f32.mrf.mxu1 }
 0x876   : > { %v7443_v2 = vpop.f32.mrf.mxu3 }
 0x879   : > { %v7445_v26 = vpop.f32.mrf.mxu0 }
 0x87d   : > { %v7455_v29 = vpop.f32.mrf.mxu1 }
 0x87e   : > { %v2087_v27 = vpop.f32.mrf.mxu3 }
 0x87f   : > { %v2088_v23 = vadd.f32 %v2087_v27, %v2011_v24  ;;  %v2016_v27 = vpop.permute.xlu1 %2015 }
 0x881   : > { %v7451_v15 = vpop.f32.mrf.mxu0  ;;  %v2129_v4 = vadd.f32 %v7441_v11, %v2088_v23 }
 0x885   : > { %v7457_v31 = vpop.f32.mrf.mxu1 }
 0x886   : > { %v7449_v16 = vpop.f32.mrf.mxu3 }
 0x889   : > { %v2137_v10 = vpop.f32.mrf.mxu0 }
 0x88d   : > { %v7459_v42 = vpop.f32.mrf.mxu1 }
 0x88e   : > { %v7453_v49 = vpop.f32.mrf.mxu3 }
 0x891   : > { %v2140_v34 = vpop.f32.mrf.mxu0 }
 0x895   : > { %v7461_v51 = vpop.f32.mrf.mxu1 }
 0x896   : > { %v2096_v5 = vpop.f32.mrf.mxu3 }
 0x897   : > { %v2097_v32 = vadd.f32 %v2096_v5, %v2026_v18 }
 0x899   : > { %v2138_v17 = vadd.f32 %v2137_v10, %v2097_v32  ;;  %v2143_v3 = vpop.f32.mrf.mxu0 }
 0x89b   : > { %v2149_v40 = vadd.f32 2.0, %v2138_v17 }
 0x89d   : > { %v5206_v43 = vmul.f32 -1.442695, %v2149_v40  ;;  %v2333_v37 = vpop.f32.mrf.mxu1 }
 0x89e   : > { %v2099_v38 = vpop.f32.mrf.mxu3  ;;  %v2343_v32 = vadd.f32 %v2333_v37, %v2129_v4 }
 0x89f   : > { %v2100_v39 = vadd.f32 %v2099_v38, %v2031_v35  ;;  %v2091_v38 = vadd.f32 %v7449_v16, %v2016_v27 }
 0x8a1   : > { %v2141_v41 = vadd.f32 %v2140_v34, %v2100_v39  ;;  %v2146_v53 = vpop.f32.mrf.mxu0 }
 0x8a3   : > { %v2150_v30 = vadd.f32 2.0, %v2141_v41 }
 0x8a5   : > { %v5207_v44 = vmul.f32 -1.442695, %v2150_v30  ;;  %v2336_v41 = vpop.f32.mrf.mxu1 }
 0x8a6   : > { %v2102_v47 = vpop.f32.mrf.mxu3 }
 0x8a7   : > { %6460 = vpow2.f32 %v5207_v44  ;;  %v2103_v8 = vadd.f32 %v2102_v47, %v2036_v46  ;;  %v2132_v47 = vadd.f32 %v7445_v26, %v2091_v38 }
 0x8a8   : > { %6462 = vpow2.f32 %v5206_v43 }
 0x8a9   : > { %v2144_v50 = vadd.f32 %v2143_v3, %v2103_v8  ;;  %v2021_v3 = vpop.permute.xlu0 %2020 }
 0x8ab   : > { %v2151_v33 = vadd.f32 2.0, %v2144_v50 }
 0x8ad   : > { %v6461_v14 = vpop.eup %6460  ;;  %v5208_v6 = vmul.f32 -1.442695, %v2151_v33 }
 0x8ae   : > { %v2166_v52 = vadd.f32 1.0, %v6461_v14  ;;  %v2105_v48 = vpop.f32.mrf.mxu3  ;;  %v6463_v56 = vpop.eup %6462  ;;  %v2344_v14 = vadd.f32 %v2336_v41, %v2132_v47 }
 0x8af   : > { %6464 = vpow2.f32 %v5208_v6  ;;  %v2106_v57 = vadd.f32 %v2105_v48, %v2041_v21  ;;  %v7463_v0 = vadd.f32 1.0, %v6463_v56  ;;  %v2094_v48 = vadd.f32 %v7453_v49, %v2021_v3 }
 0x8b0   : > { %6466 = vrcp.f32 %v2166_v52  ;;  %v2195_v9 = vand.u32 2147483648, %v2166_v52  ;;  %v2193_v19 = vand.u32 2147483647, %v2166_v52  ;;  %vm2189_vm8 = vweird.f32 %v2166_v52 }
 0x8b1   : > { %v2147_v58 = vadd.f32 %v2146_v53, %v2106_v57  ;;  %6468 = vrcp.f32 %v7463_v0  ;;  %v2006_v49 = vpop.permute.xlu0 %2005  ;;  %vm2174_vm6 = vweird.f32 %v7463_v0 }
 0x8b2   : > { %v2196_v18 = vor.u32 1.1754944e-38, %v2195_v9  ;;  %vm2194_vm10 = vcmp.eq.f32.partialorder %v2193_v19, 8.507059e+37 }
 0x8b3   : > { %v2152_v59 = vadd.f32 2.0, %v2147_v58  ;;  %v2352_v58 = vmul.f32 %v7295_v54, %v7457_v31  ;;  %v2085_v31 = vadd.f32 %v7443_v2, %v2006_v49 }
 0x8b5   : > { %v6465_v61 = vpop.eup %6464  ;;  %v5209_v45 = vmul.f32 -1.442695, %v2152_v59  ;;  %v2126_v2 = vadd.f32 %v7439_v7, %v2085_v31 }
 0x8b6   : > { %v6467_v22 = vpop.eup %6466  ;;  %v2167_v60 = vadd.f32 1.0, %v6465_v61 }
 0x8b7   : > { %v2185_v28 = vmul.f32 %v6467_v22, %v2166_v52  ;;  %6470 = vpow2.f32 %v5209_v45  ;;  %vm2190_vm7 = vweird.f32 %v6467_v22  ;;  %v7466_v13 = vpop.eup %6468 }
 0x8b8   : > { %6472 = vrcp.f32 %v2167_v60  ;;  %vm2191_vm9 = vmor %vm2189_vm8, %vm2190_vm7  ;;  %v2170_v39 = vmul.f32 %v7466_v13, %v7463_v0  ;;  %v2210_v30 = vand.u32 2147483648, %v2167_v60  ;;  %v2208_v46 = vand.u32 2147483647, %v2167_v60 }
 0x8b9   : > { %v2186_v63 = vsub.f32 1.0, %v2185_v28  ;;  %vm2204_vm12 = vweird.f32 %v2167_v60  ;;  %v2339_v28 = vpop.f32.mrf.mxu1  ;;  %vm2175_vm4 = vweird.f32 %v7466_v13 }
 0x8ba   : > { %v2171_v16 = vsub.f32 1.0, %v2170_v39  ;;  %v2211_v33 = vor.u32 1.1754944e-38, %v2210_v30  ;;  %vm2209_vm14 = vcmp.eq.f32.partialorder %v2208_v46, 8.507059e+37  ;;  %vm2176_vm8 = vmor %vm2174_vm6, %vm2175_vm4 }
 0x8bb   : > { %v2187_v1 = vmul.f32 %v6467_v22, %v2186_v63 }
 0x8bc   : > { %v2172_v26 = vmul.f32 %v7466_v13, %v2171_v16 }
 0x8bd   : > { %v6471_v25 = vpop.eup %6470  ;;  %v2188_v21 = vadd.f32 %v6467_v22, %v2187_v1  ;;  %v2178_v1 = vand.u32 2147483647, %v7463_v0 }
 0x8be   : > { %v6473_v10 = vpop.eup %6472  ;;  %v2168_v5 = vadd.f32 1.0, %v6471_v25  ;;  %v2173_v37 = vadd.f32 %v7466_v13, %v2172_v26 }
 0x8bf   : > { %v2200_v34 = vmul.f32 %v6473_v10, %v2167_v60  ;;  %v2192_v17 = vsel %vm2191_vm9, %v6467_v22, %v2188_v21  ;;  %vm2205_vm11 = vweird.f32 %v6473_v10  ;;  %v2135_v60 = vadd.f32 %v7451_v15, %v2094_v48  ;;  %v5228_v48 = vld [vmem:[%s8735_s3 + $0x20] sm:$0xff] }
 0x8c0   : > { %6474 = vrcp.f32 %v2168_v5  ;;  %v7469_v35 = vsel %vm2194_vm10, %v2196_v18, %v2192_v17  ;;  %vm2206_vm13 = vmor %vm2204_vm12, %vm2205_vm11  ;;  %v2225_v59 = vand.u32 2147483648, %v2168_v5  ;;  %v2223_v22 = vand.u32 2147483647, %v2168_v5 }
 0x8c1   : > { %v2347_v11 = vmul.f32 %v2343_v32, %v7469_v35  ;;  %v2201_v40 = vsub.f32 1.0, %v2200_v34  ;;  %vm2219_vm0 = vweird.f32 %v2168_v5  ;;  %v2180_v15 = vand.u32 2147483648, %v7463_v0 }
 0x8c2   : > { %v2226_v23 = vor.u32 1.1754944e-38, %v2225_v59  ;;  %v2345_v63 = vadd.f32 %v2339_v28, %v2135_v60  ;;  %vm2224_vm7 = vcmp.eq.f32.partialorder %v2223_v22, 8.507059e+37  ;;  %v2177_v4 = vsel %vm2176_vm8, %v7466_v13, %v2173_v37 }
 0x8c3   : > { %v2355_v43 = vmul.f32 %v7295_v54, %v2347_v11  ;;  %v2202_v44 = vmul.f32 %v6473_v10, %v2201_v40  ;;  %v2181_v21 = vor.u32 1.1754944e-38, %v2180_v15  ;;  %vm2179_vm9 = vcmp.eq.f32.partialorder %v2178_v1, 8.507059e+37 }
 0x8c4   : > { %v2342_v0 = vadd.f32 %v7461_v51, %v2126_v2  ;;  %v2350_v13 = vmul.f32 %v7295_v54, %v7447_v20 }
 0x8c5   : > { %2376 = vrot.lane.b32.xlu0 %v2355_v43, %s8780_s25  ;;  %v2203_v8 = vadd.f32 %v6473_v10, %v2202_v44  ;;  %v7503_v18 = vsel %vm2179_vm9, %v2181_v21, %v2177_v4 }
 0x8c6   : > { %v6475_v50 = vpop.eup %6474  ;;  %v2346_v32 = vmul.f32 %v2342_v0, %v7503_v18 }
 0x8c7   : > { %v2215_v6 = vmul.f32 %v6475_v50, %v2168_v5  ;;  %v2207_v52 = vsel %vm2206_vm13, %v6473_v10, %v2203_v8  ;;  %vm2220_vm15 = vweird.f32 %v6475_v50  ;;  %v2353_v10 = vmul.f32 %v7295_v54, %v7459_v42 }
 0x8c8   : > { %v7479_v53 = vsel %vm2209_vm14, %v2211_v33, %v2207_v52  ;;  %vm2221_vm5 = vmor %vm2219_vm0, %vm2220_vm15  ;;  %v2354_v7 = vmul.f32 %v7295_v54, %v2346_v32  ;;  %v2351_v42 = vmul.f32 %v7295_v54, %v7455_v29  ;;  %v5232_v33 = vld [vmem:[%s8737_s5 + $0x20] sm:$0xff]  ;;  %v5233_v52 = vld [vmem:[%s8737_s5 + $0x28] sm:$0xff] }
 0x8c9   : > { %v2348_v56 = vmul.f32 %v2344_v14, %v7479_v53  ;;  %v2216_v57 = vsub.f32 1.0, %v2215_v6 }
 0x8cb   : > { %v2356_v61 = vmul.f32 %v7295_v54, %v2348_v56  ;;  %v2217_v45 = vmul.f32 %v6475_v50, %v2216_v57 }
 0x8cd   : > { %2378 = vrot.lane.b32.xlu2 %v2356_v61, %s8780_s25  ;;  %2370 = vrot.lane.b32.xlu0 %v2352_v58, %s8780_s25  ;;  %v2218_v24 = vadd.f32 %v6475_v50, %v2217_v45 }
 0x8cf   : > { %v2222_v9 = vsel %vm2221_vm5, %v6475_v50, %v2218_v24  ;;  %v5229_v50 = vld [vmem:[%s8735_s3 + $0x28] sm:$0xff] }
 0x8d0   : > { %v7495_v19 = vsel %vm2224_vm7, %v2226_v23, %v2222_v9 }
 0x8d1   : > { %v2349_v25 = vmul.f32 %v2345_v63, %v7495_v19 }
 0x8d3   : > { %v2357_v5 = vmul.f32 %v7295_v54, %v2349_v25 }
 0x8d5   : > { %2380 = vrot.lane.b32.xlu1 %v2357_v5, %s8780_s25  ;;  %2372 = vrot.lane.b32.xlu2 %v2353_v10, %s8780_s25 }
 0x8dd   : > { %2366 = vrot.lane.b32.xlu2 %v2350_v13, %s8780_s25  ;;  %2374 = vrot.lane.b32.xlu1 %v2354_v7, %s8780_s25 }
 0x8e5   : > { %2368 = vrot.lane.b32.xlu1 %v2351_v42, %s8780_s25 }
 0x927   : > { %v2379_v51 = vpop.permute.xlu2 %2378 }
 0x928   : > { %2396 = vst.msk [vmem:[#allocation2 + $0x30] sm:$0xff] %vm571_vm1, %v2379_v51 }
 0x92f   : > { %v2373_v34 = vpop.permute.xlu2 %2372  ;;  %v7567_v8 = vld [vmem:[#allocation2 + $0x30] sm:$0xff] }
 0x930   : > { %2393 = vst.msk [vmem:[#allocation2 + $0x18] sm:$0xff] %vm571_vm1, %v2373_v34 }
 0x937   : > { %v2367_v17 = vpop.permute.xlu2 %2366  ;;  %v2377_v27 = vpop.permute.xlu0 %2376  ;;  %v7524_v54 = vld [vmem:[#allocation2 + $0x18] sm:$0xff] }
 0x938   : > { %2390 = vst.msk [vmem:[#allocation2] sm:$0xff] %vm571_vm1, %v2367_v17  ;;  %v5218_v17 = vld [vmem:[%s8734_s2 + $0xa0] sm:$0xff] }
 0x939   : > { %2395 = vst.msk [vmem:[#allocation2 + $0x28] sm:$0xff] %vm571_vm1, %v2377_v27 }
 0x93f   : > { %v2371_v20 = vpop.permute.xlu0 %2370  ;;  %v7545_v43 = vld [vmem:[#allocation2] sm:$0xff] }
 0x940   : > { %2392 = vst.msk [vmem:[#allocation2 + $0x10] sm:$0xff] %vm571_vm1, %v2371_v20  ;;  %v7536_v30 = vld [vmem:[#allocation2 + $0x28] sm:$0xff] }
 0x947   : > { %v2381_v38 = vpop.permute.xlu1 %2380  ;;  %v7522_v39 = vld [vmem:[#allocation2 + $0x10] sm:$0xff] }
 0x948   : > { %2397 = vst.msk [vmem:[#allocation2 + $0x38] sm:$0xff] %vm571_vm1, %v2381_v38  ;;  %v7529_v29 = vpack.i.bf16 %v7522_v39, %v7524_v54 }
 0x94a   : > { %5844 = vrot.lane.b32.xlu2 %v7529_v29, %s8779_s21 }
 0x94f   : > { %v2375_v11 = vpop.permute.xlu1 %2374  ;;  %v7565_v47 = vld [vmem:[#allocation2 + $0x38] sm:$0xff] }
 0x950   : > { %2394 = vst.msk [vmem:[#allocation2 + $0x20] sm:$0xff] %vm571_vm1, %v2375_v11  ;;  %v7571_v16 = vpack.i.bf16 %v7567_v8, %v7565_v47 }
 0x957   : > { %v2369_v40 = vpop.permute.xlu1 %2368  ;;  %v7534_v41 = vld [vmem:[#allocation2 + $0x20] sm:$0xff] }
 0x958   : > { %2391 = vst.msk [vmem:[#allocation2 + $0x8] sm:$0xff] %vm571_vm1, %v2369_v40  ;;  %v7541_v3 = vpack.i.bf16 %v7534_v41, %v7536_v30 }
 0x95a   : > { %5869 = vrot.lane.b32.xlu2 %v7541_v3, %s8776_s28 }
 0x95f   : > { %v7547_v44 = vld [vmem:[#allocation2 + $0x8] sm:$0xff] }
 0x960   : > { %v7551_v46 = vpack.i.bf16 %v7545_v43, %v7547_v44 }
 0x962   : > { %5894 = vrot.lane.b32.xlu2 %v7541_v3, %s8782_s0  ;;  %5859 = vrot.lane.b32.xlu1 %v7551_v46, %s8776_s28 }
 0x963   : > { %5849 = vrot.lane.b32.xlu0 %v7551_v46, %s8779_s21 }
 0x96a   : > { %5914 = vrot.lane.b32.xlu2 %v7529_v29, %s8782_s0  ;;  %5864 = vrot.lane.b32.xlu1 %v7541_v3, %s8779_s21 }
 0x96b   : > { %5854 = vrot.lane.b32.xlu0 %v7529_v29, %s8776_s28 }
 0x972   : > { %5929 = vrot.lane.b32.xlu2 %v7541_v3, %s8778_s20  ;;  %5874 = vrot.lane.b32.xlu1 %v7541_v3, %s8783_s24 }
 0x973   : > { %5879 = vrot.lane.b32.xlu0 %v7571_v16, %s8779_s21 }
 0x97a   : > { %5934 = vrot.lane.b32.xlu2 %v7571_v16, %s8783_s24  ;;  %5889 = vrot.lane.b32.xlu1 %v7529_v29, %s8783_s24 }
 0x97b   : > { %5884 = vrot.lane.b32.xlu0 %v7541_v3, %s8781_s17 }
 0x982   : > { %5954 = vrot.lane.b32.xlu2 %v7571_v16, %s8782_s0  ;;  %5904 = vrot.lane.b32.xlu1 %v7571_v16, %s8776_s28 }
 0x983   : > { %5899 = vrot.lane.b32.xlu0 %v7529_v29, %s8781_s17 }
 0x98a   : > { %5959 = vrot.lane.b32.xlu2 %v7571_v16, %s8778_s20  ;;  %5909 = vrot.lane.b32.xlu1 %v7551_v46, %s8783_s24 }
 0x98b   : > { %5919 = vrot.lane.b32.xlu0 %v7551_v46, %s8781_s17 }
 0x992   : > { %5964 = vrot.lane.b32.xlu2 %v7529_v29, %s8778_s20  ;;  %5924 = vrot.lane.b32.xlu1 %v7551_v46, %s8782_s0 }
 0x993   : > { %5939 = vrot.lane.b32.xlu0 %v7571_v16, %s8781_s17 }
 0x99a   : > { %5989 = vrot.lane.b32.xlu2 %v7551_v46, %s8778_s20  ;;  %5949 = vrot.lane.b32.xlu1 %v7541_v3, %s8784_s26 }
 0x99b   : > { %5944 = vrot.lane.b32.xlu0 %v7541_v3, %s8777_s30 }
 0x9a2   : > { %2694 = vperm.xlu2 %5561, %v5229_v50   ;;  %5979 = vrot.lane.b32.xlu1 %v7571_v16, %s8784_s26 }
 0x9a3   : > { %5969 = vrot.lane.b32.xlu0 %v7571_v16, %s8777_s30 }
 0x9a4   : > { %v5845_v14 = vpop.permute.xlu2 %5844 }
 0x9a5   : > { %v5846_v10 = vunpack.i.l.bf16 %v5845_v14  ;;  %v5847_v5 = vunpack.i.h.bf16 %v5845_v14 }
 0x9aa   : > { %2822 = vperm.xlu2 %5561, %v5232_v33   ;;  %5984 = vrot.lane.b32.xlu1 %v7529_v29, %s8784_s26 }
 0x9ab   : > { %5974 = vrot.lane.b32.xlu0 %v7529_v29, %s8777_s30 }
 0x9b2   : > { %5999 = vrot.lane.b32.xlu1 %v7551_v46, %s8784_s26 }
 0x9b3   : > { %5994 = vrot.lane.b32.xlu0 %v7551_v46, %s8777_s30 }
 0x9b4   : > { %v7627_v6 = vpop.permute.xlu2 %5869 }
 0x9ba   : > { %2827 = vperm.xlu1 %5560, %v5233_v52  }
 0x9bb   : > { %2689 = vperm.xlu0 %5562, %v5228_v48  }
 0x9bc   : > { %v5895_v56 = vpop.permute.xlu2 %5894 }
 0x9bd   : > { %v5896_v24 = vunpack.i.l.bf16 %v5895_v56  ;;  %v5897_v37 = vunpack.i.h.bf16 %v5895_v56 }
 0x9c4   : > { %v5915_v57 = vpop.permute.xlu2 %5914 }
 0x9c5   : > { %v5916_v23 = vunpack.i.l.bf16 %v5915_v57  ;;  %v5917_v9 = vunpack.i.h.bf16 %v5915_v57 }
 0x9cc   : > { %v7635_v26 = vpop.permute.xlu2 %5929 }
 0x9d4   : > { %v7637_v58 = vpop.permute.xlu2 %5934  ;;  %v7639_v59 = vpop.permute.xlu1 %5859 }
 0x9d5   : > { %v5850_v61 = vpop.permute.xlu0 %5849  ;;  %v5862_v57 = vunpack.i.h.bf16 %v7639_v59 }
 0x9d6   : > { %v5851_v0 = vunpack.i.l.bf16 %v5850_v61  ;;  %v5852_v32 = vunpack.i.h.bf16 %v5850_v61 }
 0x9dc   : > { %v5955_v45 = vpop.permute.xlu2 %5954  ;;  %v5865_v22 = vpop.permute.xlu1 %5864 }
 0x9dd   : > { %v5956_v60 = vunpack.i.l.bf16 %v5955_v45  ;;  %v7641_v28 = vpop.permute.xlu0 %5854  ;;  %v5957_v49 = vunpack.i.h.bf16 %v5955_v45  ;;  %v5866_v25 = vunpack.i.l.bf16 %v5865_v22  ;;  %v5867_v4 = vunpack.i.h.bf16 %v5865_v22 }
 0x9de   : > { %v5856_v33 = vunpack.i.l.bf16 %v7641_v28  ;;  %v5857_v52 = vunpack.i.h.bf16 %v7641_v28 }
 0x9df   : > { %2772 = vmatpush.msra.mxu1 %v5956_v60 }
 0x9e1   : > { %2773 = vmatpush.msra.mxu1 %v5957_v49  ;;  %v5936_v49 = vunpack.i.l.bf16 %v7637_v58 }
 0x9e3   : > { %2774 = vmatpush.msra.mxu1 %v5896_v24 }
 0x9e4   : > { %v7643_v31 = vpop.permute.xlu1 %5874 }
 0x9e5   : > { %v5880_v15 = vpop.permute.xlu0 %5879  ;;  %2775 = vmatpush.msra.mxu1 %v5897_v37  ;;  %v5937_v37 = vunpack.i.h.bf16 %v7637_v58 }
 0x9e6   : > { %v5881_v63 = vunpack.i.l.bf16 %v5880_v15  ;;  %v5882_v1 = vunpack.i.h.bf16 %v5880_v15 }
 0x9e7   : > { %2776 = vmatpush.msra.mxu1 %v5916_v23 }
 0x9e8   : > { %2703 = vmatpush.msra.mxu2 %v5881_v63 }
 0x9e9   : > { %2777 = vmatpush.msra.mxu1 %v5917_v9  ;;  %v5960_v9 = vpop.permute.xlu2 %5959 }
 0x9ea   : > { %2704 = vmatpush.msra.mxu2 %v5882_v1 }
 0x9ec   : > { %2705 = vmatpush.msra.mxu2 %v5866_v25  ;;  %v7645_v21 = vpop.permute.xlu1 %5889  ;;  %v5877_v25 = vunpack.i.h.bf16 %v7643_v31 }
 0x9ed   : > { %v5885_v2 = vpop.permute.xlu0 %5884 }
 0x9ee   : > { %2706 = vmatpush.msra.mxu2 %v5867_v4 }
 0x9f0   : > { %2707 = vmatpush.msra.mxu2 %v5846_v10 }
 0x9f2   : > { %2708 = vmatpush.msra.mxu2 %v5847_v5  ;;  %v5891_v5 = vunpack.i.l.bf16 %v7645_v21 }
 0x9f4   : > { %2709 = vmatpush.msra.mxu2 %v5851_v0  ;;  %v5905_v13 = vpop.permute.xlu1 %5904 }
 0x9f5   : > { %v5900_v7 = vpop.permute.xlu0 %5899  ;;  %v5906_v38 = vunpack.i.l.bf16 %v5905_v13 }
 0x9f6   : > { %2710 = vmatpush.msra.mxu2 %v5852_v32  ;;  %v5901_v14 = vunpack.i.l.bf16 %v5900_v7  ;;  %v5902_v48 = vunpack.i.h.bf16 %v5900_v7 }
 0x9f8   : > { %2711 = vmatpush.msra.mxu2 %v7565_v47  ;;  %v5887_v47 = vunpack.i.h.bf16 %v5885_v2 }
 0x9fa   : > { %2712 = vmatpush.msra.mxu2 %v7567_v8 }
 0x9fc   : > { %2713 = vmatpush.msra.mxu2 %v7536_v30  ;;  %v7650_v42 = vpop.permute.xlu1 %5909  ;;  %v5886_v30 = vunpack.i.l.bf16 %v5885_v2 }
 0x9fd   : > { %v5920_v51 = vpop.permute.xlu0 %5919 }
 0x9fe   : > { %2714 = vmatpush.msra.mxu2 %v7534_v41  ;;  %v5907_v41 = vunpack.i.h.bf16 %v5905_v13  ;;  %v5921_v56 = vunpack.i.l.bf16 %v5920_v51  ;;  %v5922_v61 = vunpack.i.h.bf16 %v5920_v51  ;;  %v5892_v13 = vunpack.i.h.bf16 %v7645_v21 }
 0x9ff   : > { %v5912_v51 = vunpack.i.h.bf16 %v7650_v42  ;;  %v5961_v21 = vunpack.i.l.bf16 %v5960_v9 }
 0xa00   : > { %2715 = vmatpush.msra.mxu2 %v7524_v54 }
 0xa02   : > { %2716 = vmatpush.msra.mxu2 %v7522_v39  ;;  %v5871_v39 = vunpack.i.l.bf16 %v7627_v6 }
 0xa04   : > { %2717 = vmatpush.msra.mxu2 %v7547_v44  ;;  %v5925_v34 = vpop.permute.xlu1 %5924  ;;  %v5872_v44 = vunpack.i.h.bf16 %v7627_v6  ;;  %v5861_v6 = vunpack.i.l.bf16 %v7639_v59  ;;  %v5876_v59 = vunpack.i.l.bf16 %v7643_v31  ;;  %v5911_v31 = vunpack.i.l.bf16 %v7650_v42  ;;  %v5220_v42 = vld [vmem:[%s8734_s2 + $0xb0] sm:$0xff] }
 0xa05   : > { %v5926_v27 = vunpack.i.l.bf16 %v5925_v34  ;;  %v5940_v20 = vpop.permute.xlu0 %5939  ;;  %v5927_v40 = vunpack.i.h.bf16 %v5925_v34 }
 0xa06   : > { %v5941_v11 = vunpack.i.l.bf16 %v5940_v20  ;;  %2718 = vmatpush.msra.mxu2 %v7545_v43  ;;  %v5942_v54 = vunpack.i.h.bf16 %v5940_v20  ;;  %v5223_v43 = vld [vmem:[%s8734_s2 + $0xc8] sm:$0xff] }
 0xa07   : > { %2719 = vmatmul.f32.vlgmr.msra.gmra.mxu2 %v5218_v17  ;;  %2778 = vmatpush.msra.mxu1 %v5926_v27  ;;  %v5219_v17 = vld [vmem:[%s8734_s2 + $0xa8] sm:$0xff]  ;;  %v5965_v27 = vpop.permute.xlu2 %5964 }
 0xa08   : > { %2726 = vmatpush.msrb.mxu2 %v5906_v38  ;;  %2749 = vmatpush.msra.mxu0 %v5941_v11 }
 0xa09   : > { %2779 = vmatpush.msra.mxu1 %v5927_v40 }
 0xa0a   : > { %2727 = vmatpush.msrb.mxu2 %v5907_v41  ;;  %2750 = vmatpush.msra.mxu0 %v5942_v54  ;;  %v5962_v41 = vunpack.i.h.bf16 %v5960_v9 }
 0xa0c   : > { %2728 = vmatpush.msrb.mxu2 %v5871_v39  ;;  %2751 = vmatpush.msra.mxu0 %v5886_v30  ;;  %v5950_v8 = vpop.permute.xlu1 %5949  ;;  %v5221_v39 = vld [vmem:[%s8734_s2 + $0xb8] sm:$0xff]  ;;  %v5931_v30 = vunpack.i.l.bf16 %v7635_v26 }
 0xa0d   : > { %v5945_v50 = vpop.permute.xlu0 %5944  ;;  %v5951_v15 = vunpack.i.l.bf16 %v5950_v8  ;;  %v5952_v1 = vunpack.i.h.bf16 %v5950_v8  ;;  %v5966_v8 = vunpack.i.l.bf16 %v5965_v27 }
 0xa0e   : > { %2729 = vmatpush.msrb.mxu2 %v5872_v44  ;;  %2752 = vmatpush.msra.mxu0 %v5887_v47  ;;  %v5946_v63 = vunpack.i.l.bf16 %v5945_v50  ;;  %v5947_v4 = vunpack.i.h.bf16 %v5945_v50  ;;  %v5932_v44 = vunpack.i.h.bf16 %v7635_v26  ;;  %v5224_v47 = vld [vmem:[%s8734_s2 + $0xd0] sm:$0xff]  ;;  %v5967_v50 = vunpack.i.h.bf16 %v5965_v27  ;;  %v7716_v27 = vld [vmem:[%s8733_s1] ss:$0 sm:$0xff] }
 0xa0f   : > { %2722 = vmatmul.f32.gmra.mxu2 %v5223_v43  ;;  %v5990_v43 = vpop.permute.xlu2 %5989 }
 0xa10   : > { %2730 = vmatpush.msrb.mxu2 %v5856_v33  ;;  %2753 = vmatpush.msra.mxu0 %v5901_v14  ;;  %v5225_v33 = vld [vmem:[%s8734_s2 + $0xd8] sm:$0xff]  ;;  %v5226_v14 = vld [vmem:[%s8734_s2 + $0xe0] sm:$0xff]  ;;  %v5991_v26 = vunpack.i.l.bf16 %v5990_v43 }
 0xa12   : > { %2731 = vmatpush.msrb.mxu2 %v5857_v52  ;;  %2754 = vmatpush.msra.mxu0 %v5902_v48  ;;  %v5992_v52 = vunpack.i.h.bf16 %v5990_v43  ;;  %v5222_v48 = vld [vmem:[%s8734_s2 + $0xc0] sm:$0xff] }
 0xa13   : > { %v5250_v43 = vld [vmem:[%s8739_s7 + $0x80] sm:$0xff] }
 0xa14   : > { %2732 = vmatpush.msrb.mxu2 %v5861_v6  ;;  %2755 = vmatpush.msra.mxu0 %v5921_v56  ;;  %v5980_v45 = vpop.permute.xlu1 %5979  ;;  %v5227_v6 = vld [vmem:[%s8734_s2 + $0xe8] sm:$0xff] }
 0xa15   : > { %v5981_v22 = vunpack.i.l.bf16 %v5980_v45  ;;  %v5970_v60 = vpop.permute.xlu0 %5969  ;;  %v5982_v28 = vunpack.i.h.bf16 %v5980_v45 }
 0xa16   : > { %v5971_v24 = vunpack.i.l.bf16 %v5970_v60  ;;  %2733 = vmatpush.msrb.mxu2 %v5862_v57  ;;  %2756 = vmatpush.msra.mxu0 %v5922_v61  ;;  %v5972_v23 = vunpack.i.h.bf16 %v5970_v60 }
 0xa17   : > { %2780 = vmatpush.msra.mxu1 %v5981_v22 }
 0xa18   : > { %2734 = vmatpush.msrb.mxu2 %v5936_v49  ;;  %2757 = vmatpush.msra.mxu0 %v5971_v24  ;;  %v2695_v49 = vpop.permute.xlu2 %2694 }
 0xa19   : > { %2781 = vmatpush.msra.mxu1 %v5982_v28 }
 0xa1a   : > { %2735 = vmatpush.msrb.mxu2 %v5937_v37  ;;  %2758 = vmatpush.msra.mxu0 %v5972_v23 }
 0xa1b   : > { %2782 = vmatpush.msra.mxu1 %v5951_v15 }
 0xa1c   : > { %2736 = vmatpush.msrb.mxu2 %v5876_v59  ;;  %2759 = vmatpush.msra.mxu0 %v5946_v63  ;;  %v5985_v2 = vpop.permute.xlu1 %5984 }
 0xa1d   : > { %v5986_v58 = vunpack.i.l.bf16 %v5985_v2  ;;  %v5975_v10 = vpop.permute.xlu0 %5974  ;;  %2783 = vmatpush.msra.mxu1 %v5952_v1  ;;  %v5987_v32 = vunpack.i.h.bf16 %v5985_v2 }
 0xa1e   : > { %v5976_v0 = vunpack.i.l.bf16 %v5975_v10  ;;  %2737 = vmatpush.msrb.mxu2 %v5877_v25  ;;  %2760 = vmatpush.msra.mxu0 %v5947_v4  ;;  %v5977_v7 = vunpack.i.h.bf16 %v5975_v10 }
 0xa1f   : > { %2784 = vmatpush.msra.mxu1 %v5986_v58 }
 0xa20   : > { %2738 = vmatpush.msrb.mxu2 %v5891_v5  ;;  %2761 = vmatpush.msra.mxu0 %v5976_v0 }
 0xa21   : > { %2785 = vmatpush.msra.mxu1 %v5987_v32 }
 0xa22   : > { %2739 = vmatpush.msrb.mxu2 %v5892_v13  ;;  %2762 = vmatpush.msra.mxu0 %v5977_v7  ;;  %v5230_v13 = vld [vmem:[%s8736_s4 + $0x20] sm:$0xff]  ;;  %v5231_v7 = vld [vmem:[%s8736_s4 + $0x28] sm:$0xff] }
 0xa24   : > { %2740 = vmatpush.msrb.mxu2 %v5911_v31  ;;  %v6000_v34 = vpop.permute.xlu1 %5999  ;;  %v2823_v31 = vpop.permute.xlu2 %2822 }
 0xa25   : > { %v6001_v20 = vunpack.i.l.bf16 %v6000_v34  ;;  %v5995_v38 = vpop.permute.xlu0 %5994  ;;  %v6002_v40 = vunpack.i.h.bf16 %v6000_v34 }
 0xa26   : > { %v5996_v11 = vunpack.i.l.bf16 %v5995_v38  ;;  %2741 = vmatpush.msrb.mxu2 %v5912_v51  ;;  %v5997_v54 = vunpack.i.h.bf16 %v5995_v38 }
 0xa27   : > { %2742 = vmatmul.f32.vlgmr.msrb.gmra.mxu2 %v5219_v17  ;;  %2786 = vmatpush.msra.mxu1 %v6001_v20 }
 0xa28   : > { %2803 = vmatpush.msra.mxu2 %v5961_v21  ;;  %2763 = vmatpush.msra.mxu0 %v5996_v11 }
 0xa29   : > { %2787 = vmatpush.msra.mxu1 %v6002_v40 }
 0xa2a   : > { %2804 = vmatpush.msra.mxu2 %v5962_v41  ;;  %2764 = vmatpush.msra.mxu0 %v5997_v54 }
 0xa2b   : > { %2765 = vmatmul.f32.vlgmr.msra.gmra.mxu0 %v5220_v42  ;;  %2788 = vmatmul.f32.vlgmr.msra.gmra.mxu1 %v5221_v39 }
 0xa2c   : > { %2805 = vmatpush.msra.mxu2 %v5931_v30  ;;  %v2828_v38 = vpop.permute.xlu1 %2827 }
 0xa2d   : > { %v2690_v24 = vpop.permute.xlu0 %2689 }
 0xa2e   : > { %2806 = vmatpush.msra.mxu2 %v5932_v44 }
 0xa2f   : > { %2745 = vmatmul.f32.gmra.mxu2 %v5224_v47  ;;  %v5255_v47 = vld [vmem:[%s8739_s7 + $0xa8] sm:$0xff] }
 0xa30   : > { %2807 = vmatpush.msra.mxu2 %v5966_v8  ;;  %v5257_v8 = vld [vmem:[%s8739_s7 + $0xb8] sm:$0xff] }
 0xa32   : > { %2808 = vmatpush.msra.mxu2 %v5967_v50  ;;  %v5251_v50 = vld [vmem:[%s8739_s7 + $0x88] sm:$0xff] }
 0xa33   : > { %2768 = vmatmul.f32.gmra.mxu0 %v5225_v33  ;;  %2791 = vmatmul.f32.gmra.mxu1 %v5226_v14 }
 0xa34   : > { %2809 = vmatpush.msra.mxu2 %v5991_v26 }
 0xa36   : > { %2810 = vmatpush.msra.mxu2 %v5992_v52 }
 0xa37   : > { %5266 = vmatmul.msk.f32.vlgmr.msra.gmra.mxu2 %vm847_vm2, %v5222_v48 }
 0xa3f   : > { %5267 = vmatmul.msk.f32.gmra.mxu2 %vm847_vm2, %v5227_v6 }
 0xa8a   : > { %v2720_v56 = vpop.f32.mrf.mxu2 }
 0xa8b   : > { %v2721_v28 = vadd.f32 %v2720_v56, %v2690_v24 }
 0xa92   : > { %v2723_v57 = vpop.f32.mrf.mxu2 }
 0xa93   : > { %v2724_v37 = vadd.f32 %v2723_v57, %v2695_v49 }
 0xaa8   : > { %v2766_v45 = vpop.f32.mrf.mxu0  ;;  %v2789_v60 = vpop.f32.mrf.mxu1 }
 0xaaa   : > { %v2743_v61 = vpop.f32.mrf.mxu2 }
 0xaab   : > { %v2744_v23 = vadd.f32 %v2743_v61, %v2721_v28 }
 0xaad   : > { %v2767_v9 = vadd.f32 %v2766_v45, %v2744_v23 }
 0xaaf   : > { %v2790_v4 = vadd.f32 %v2789_v60, %v2767_v9 }
 0xab0   : > { %v2769_v59 = vpop.f32.mrf.mxu0  ;;  %v2792_v25 = vpop.f32.mrf.mxu1 }
 0xab2   : > { %v2746_v22 = vpop.f32.mrf.mxu2 }
 0xab3   : > { %v2747_v15 = vadd.f32 %v2746_v22, %v2724_v37 }
 0xab5   : > { %v2770_v1 = vadd.f32 %v2769_v59, %v2747_v15 }
 0xab7   : > { %v2793_v2 = vadd.f32 %v2792_v25, %v2770_v1 }
 0xaba   : > { %v2812_v63 = vpop.f32.mrf.mxu2 }
 0xabb   : > { %v2813_v10 = vadd.f32 %v2812_v63, %v2790_v4 }
 0xabd   : > { %v2818_v32 = vmax.f32 %v2813_v10, 0.0 }
 0xac2   : > { %v2815_v58 = vpop.f32.mrf.mxu2 }
 0xac3   : > { %v2816_v5 = vadd.f32 %v2815_v58, %v2793_v2  ;;  %v5237_v58 = vld [vmem:[%s8738_s6 + $0x118] sm:$0xff] }
 0xac5   : > { %v2819_v0 = vmax.f32 %v2816_v5, 0.0 }
 0xac7   : > { %2850 = vmatpush.msra.mxu3 %v2819_v0 }
 0xac9   : > { %2851 = vmatpush.msra.mxu3 %v2818_v32 }
 0xaca   : > { %5268 = vmatmul.msk.f32.vlgmr.msra.gmra.mxu3 %vm981_vm3, %v5230_v13 }
 0xad2   : > { %5269 = vmatmul.msk.f32.gmra.mxu3 %vm981_vm3, %v5231_v7 }
 0xb4d   : > { %v2853_v51 = vpop.f32.mrf.mxu3 }
 0xb4e   : > { %v2854_v34 = vadd.f32 %v2853_v51, %v2823_v31 }
 0xb50   : > { %v2859_v17 = vmax.f32 %v2854_v34, 0.0  ;;  %v5234_v34 = vld [vmem:[%s8738_s6 + $0x100] sm:$0xff] }
 0xb52   : > { %v2861_v20 = vmul.f32 %v7716_v27, %v2859_v17 }
 0xb54   : > { %2865 = vrot.lane.b32.xlu1 %v2861_v20, %s8780_s25  ;;  %v5239_v20 = vld [vmem:[%s8738_s6 + $0x128] sm:$0xff] }
 0xb55   : > { %v2856_v21 = vpop.f32.mrf.mxu3 }
 0xb56   : > { %v2857_v11 = vadd.f32 %v2856_v21, %v2828_v38 }
 0xb58   : > { %v2860_v40 = vmax.f32 %v2857_v11, 0.0  ;;  %v5258_v11 = vld [vmem:[%s8740_s8 + $0x80] sm:$0xff] }
 0xb5a   : > { %v2862_v41 = vmul.f32 %v7716_v27, %v2860_v40  ;;  %v5236_v40 = vld [vmem:[%s8738_s6 + $0x110] sm:$0xff] }
 0xb5c   : > { %2867 = vrot.lane.b32.xlu0 %v2862_v41, %s8780_s25  ;;  %v5241_v41 = vld [vmem:[%s8738_s6 + $0x138] sm:$0xff] }
 0xbc6   : > { %v2866_v54 = vpop.permute.xlu1 %2865 }
 0xbc7   : > { %2871 = vst.msk [vmem:[#allocation3] sm:$0xff] %vm571_vm1, %v2866_v54  ;;  %v5259_v54 = vld [vmem:[%s8740_s8 + $0x88] sm:$0xff] }
 0xbce   : > { %v2868_v42 = vpop.permute.xlu0 %2867  ;;  %v7724_v39 = vld [vmem:[#allocation3] sm:$0xff] }
 0xbcf   : > { %2872 = vst.msk [vmem:[#allocation3 + $0x8] sm:$0xff] %vm571_vm1, %v2868_v42  ;;  %v5238_v42 = vld [vmem:[%s8738_s6 + $0x120] sm:$0xff] }
 0xbd6   : > { %v7726_v30 = vld [vmem:[#allocation3 + $0x8] sm:$0xff] }
 0xbd7   : > { %v6013_v44 = vpack.i.bf16 %v7724_v39, %v7726_v30 }
 0xbd9   : > { %6014 = vrot.lane.b32.xlu1 %v6013_v44, %s8781_s17  ;;  %6009 = vrot.lane.b32.xlu0 %v6013_v44, %s8784_s26 }
 0xbda   : > { %6004 = vrot.lane.b32.xlu2 %v6013_v44, %s8782_s0 }
 0xbe1   : > { %6029 = vrot.lane.b32.xlu1 %v6013_v44, %s8783_s24  ;;  %6024 = vrot.lane.b32.xlu0 %v6013_v44, %s8776_s28 }
 0xbe2   : > { %6019 = vrot.lane.b32.xlu2 %v6013_v44, %s8777_s30 }
 0xbe9   : > { %6044 = vrot.lane.b32.xlu1 %v7571_v16, %s8777_s30  ;;  %6039 = vrot.lane.b32.xlu0 %v6013_v44, %s8778_s20  ;;  %v5256_v16 = vld [vmem:[%s8739_s7 + $0xb0] sm:$0xff] }
 0xbea   : > { %6034 = vrot.lane.b32.xlu2 %v6013_v44, %s8779_s21  ;;  %v5240_v44 = vld [vmem:[%s8738_s6 + $0x130] sm:$0xff] }
 0xbf1   : > { %6059 = vrot.lane.b32.xlu1 %v7551_v46, %s8777_s30  ;;  %6054 = vrot.lane.b32.xlu0 %v7529_v29, %s8777_s30  ;;  %v5252_v29 = vld [vmem:[%s8739_s7 + $0x90] sm:$0xff]  ;;  %v5254_v46 = vld [vmem:[%s8739_s7 + $0xa0] sm:$0xff] }
 0xbf2   : > { %6049 = vrot.lane.b32.xlu2 %v7541_v3, %s8777_s30  ;;  %v5253_v3 = vld [vmem:[%s8739_s7 + $0x98] sm:$0xff] }
 0xbf9   : > { %2952 = vperm.xlu1 %5560, %v5255_v47   ;;  %2957 = vperm.xlu0 %5562, %v5256_v16   ;;  %v5245_v47 = vld [vmem:[%s8738_s6 + $0x158] sm:$0xff] }
 0xbfa   : > { %2962 = vperm.xlu2 %5561, %v5257_v8   ;;  %v5261_v16 = vld [vmem:[%s8740_s8 + $0x98] sm:$0xff]  ;;  %v5242_v8 = vld [vmem:[%s8738_s6 + $0x140] sm:$0xff] }
 0xc01   : > { %2937 = vperm.xlu1 %5560, %v5252_v29   ;;  %2942 = vperm.xlu0 %5562, %v5253_v3   ;;  %v5247_v29 = vld [vmem:[%s8738_s6 + $0x168] sm:$0xff]  ;;  %v5262_v3 = vld [vmem:[%s8740_s8 + $0xa0] sm:$0xff] }
 0xc02   : > { %2947 = vperm.xlu2 %5561, %v5254_v46   ;;  %v5244_v46 = vld [vmem:[%s8738_s6 + $0x150] sm:$0xff] }
 0xc09   : > { %2927 = vperm.xlu0 %5562, %v5250_v43   ;;  %v5249_v43 = vld [vmem:[%s8738_s6 + $0x178] sm:$0xff] }
 0xc0a   : > { %2932 = vperm.xlu2 %5561, %v5251_v50   ;;  %v5263_v50 = vld [vmem:[%s8740_s8 + $0xa8] sm:$0xff] }
 0xc34   : > { %v6005_v33 = vpop.permute.xlu2 %6004 }
 0xc35   : > { %v6006_v14 = vunpack.i.l.bf16 %v6005_v33  ;;  %v6007_v26 = vunpack.i.h.bf16 %v6005_v33  ;;  %v5246_v33 = vld [vmem:[%s8738_s6 + $0x160] sm:$0xff] }
 0xc37   : > { %2989 = vmatpush.msrb.mxu0 %v6006_v14  ;;  %v5264_v14 = vld [vmem:[%s8740_s8 + $0xb0] sm:$0xff] }
 0xc39   : > { %2990 = vmatpush.msrb.mxu0 %v6007_v26  ;;  %v5248_v26 = vld [vmem:[%s8738_s6 + $0x170] sm:$0xff] }
 0xc3c   : > { %v6020_v52 = vpop.permute.xlu2 %6019 }
 0xc3d   : > { %v6021_v49 = vunpack.i.l.bf16 %v6020_v52  ;;  %v6022_v28 = vunpack.i.h.bf16 %v6020_v52  ;;  %v5265_v52 = vld [vmem:[%s8740_s8 + $0xb8] sm:$0xff] }
 0xc44   : > { %v6035_v24 = vpop.permute.xlu2 %6034 }
 0xc45   : > { %v6036_v5 = vunpack.i.l.bf16 %v6035_v24  ;;  %v6037_v32 = vunpack.i.h.bf16 %v6035_v24 }
 0xc4b   : > { %v6015_v48 = vpop.permute.xlu1 %6014  ;;  %v6010_v6 = vpop.permute.xlu0 %6009 }
 0xc4c   : > { %v6011_v56 = vunpack.i.l.bf16 %v6010_v6  ;;  %v6012_v57 = vunpack.i.h.bf16 %v6010_v6  ;;  %v6016_v61 = vunpack.i.l.bf16 %v6015_v48  ;;  %v6017_v45 = vunpack.i.h.bf16 %v6015_v48  ;;  %v6050_v25 = vpop.permute.xlu2 %6049  ;;  %v5235_v48 = vld [vmem:[%s8738_s6 + $0x108] sm:$0xff] }
 0xc4d   : > { %v6051_v0 = vunpack.i.l.bf16 %v6050_v25  ;;  %v6052_v13 = vunpack.i.h.bf16 %v6050_v25 }
 0xc4e   : > { %2991 = vmatpush.msrb.mxu0 %v6011_v56 }
 0xc50   : > { %2992 = vmatpush.msrb.mxu0 %v6012_v57 }
 0xc52   : > { %2993 = vmatpush.msrb.mxu0 %v6016_v61 }
 0xc53   : > { %v6030_v22 = vpop.permute.xlu1 %6029  ;;  %v6025_v60 = vpop.permute.xlu0 %6024 }
 0xc54   : > { %2994 = vmatpush.msrb.mxu0 %v6017_v45  ;;  %v6026_v37 = vunpack.i.l.bf16 %v6025_v60  ;;  %v6027_v23 = vunpack.i.h.bf16 %v6025_v60  ;;  %v6031_v63 = vunpack.i.l.bf16 %v6030_v22  ;;  %v6032_v4 = vunpack.i.h.bf16 %v6030_v22 }
 0xc56   : > { %2995 = vmatpush.msrb.mxu0 %v6021_v49 }
 0xc58   : > { %2996 = vmatpush.msrb.mxu0 %v6022_v28 }
 0xc5a   : > { %2997 = vmatpush.msrb.mxu0 %v6026_v37  ;;  %v2963_v37 = vpop.permute.xlu2 %2962 }
 0xc5b   : > { %v6045_v15 = vpop.permute.xlu1 %6044  ;;  %v6040_v59 = vpop.permute.xlu0 %6039 }
 0xc5c   : > { %v6046_v9 = vunpack.i.l.bf16 %v6045_v15  ;;  %v6041_v1 = vunpack.i.l.bf16 %v6040_v59  ;;  %2998 = vmatpush.msrb.mxu0 %v6027_v23  ;;  %v6042_v2 = vunpack.i.h.bf16 %v6040_v59  ;;  %v6047_v10 = vunpack.i.h.bf16 %v6045_v15 }
 0xc5e   : > { %2999 = vmatpush.msrb.mxu0 %v6031_v63  ;;  %5379 = vmatpush.msrb.mxu1 %v6041_v1 }
 0xc5f   : > { %3231 = vmatpush.msrb.mxu2 %v6046_v9 }
 0xc60   : > { %3000 = vmatpush.msrb.mxu0 %v6032_v4  ;;  %5380 = vmatpush.msrb.mxu1 %v6042_v2 }
 0xc61   : > { %3232 = vmatpush.msrb.mxu2 %v6047_v10  ;;  %5271 = vmatmul.msk.f32.vlgmr.msrb.gmra.mxu1 %vm981_vm3, %v5237_v58 }
 0xc62   : > { %3001 = vmatpush.msrb.mxu0 %v6036_v5  ;;  %v2948_v63 = vpop.permute.xlu2 %2947 }
 0xc63   : > { %3233 = vmatpush.msrb.mxu2 %v6051_v0  ;;  %v6055_v7 = vpop.permute.xlu0 %6054  ;;  %v6060_v51 = vpop.permute.xlu1 %6059 }
 0xc64   : > { %v6056_v31 = vunpack.i.l.bf16 %v6055_v7  ;;  %3002 = vmatpush.msrb.mxu0 %v6037_v32  ;;  %v6057_v17 = vunpack.i.h.bf16 %v6055_v7  ;;  %v6061_v38 = vunpack.i.l.bf16 %v6060_v51  ;;  %v6062_v21 = vunpack.i.h.bf16 %v6060_v51 }
 0xc65   : > { %3234 = vmatpush.msrb.mxu2 %v6052_v13 }
 0xc66   : > { %3003 = vmatpush.msrb.mxu0 %v7726_v30  ;;  %v5260_v30 = vld [vmem:[%s8740_s8 + $0x90] sm:$0xff] }
 0xc67   : > { %3235 = vmatpush.msrb.mxu2 %v6056_v31 }
 0xc68   : > { %3004 = vmatpush.msrb.mxu0 %v7724_v39  ;;  %v5243_v39 = vld [vmem:[%s8738_s6 + $0x148] sm:$0xff] }
 0xc69   : > { %3236 = vmatpush.msrb.mxu2 %v6057_v17  ;;  %3005 = vmatmul.f32.vlgmr.msrb.gmra.mxu0 %v5234_v34 }
 0xc6a   : > { %3044 = vmatpush.msra.mxu0 %v6041_v1  ;;  %5272 = vmatmul.msk.f32.gmra.mxu1 %vm981_vm3, %v5239_v20 }
 0xc6b   : > { %3237 = vmatpush.msrb.mxu2 %v6061_v38  ;;  %v2953_v1 = vpop.permute.xlu1 %2952  ;;  %v2958_v7 = vpop.permute.xlu0 %2957 }
 0xc6c   : > { %3045 = vmatpush.msra.mxu0 %v6042_v2 }
 0xc6d   : > { %3238 = vmatpush.msrb.mxu2 %v6062_v21 }
 0xc6e   : > { %5282 = vmatmul.msk.f32.vlgmr.msrb.gmra.mxu2 %vm847_vm2, %v5258_v11 }
 0xc71   : > { %3008 = vmatmul.f32.gmra.mxu0 %v5236_v40 }
 0xc72   : > { %5273 = vmatmul.msk.f32.gmra.mxu1 %vm981_vm3, %v5241_v41 }
 0xc76   : > { %5283 = vmatmul.msk.f32.gmra.mxu2 %vm847_vm2, %v5259_v54 }
 0xc79   : > { %3011 = vmatmul.f32.gmra.mxu0 %v5238_v42 }
 0xc7a   : > { %5274 = vmatmul.msk.f32.gmra.mxu1 %vm981_vm3, %v5243_v39 }
 0xc7e   : > { %5284 = vmatmul.msk.f32.gmra.mxu2 %vm847_vm2, %v5260_v30 }
 0xc81   : > { %3014 = vmatmul.f32.gmra.mxu0 %v5240_v44 }
 0xc82   : > { %5275 = vmatmul.msk.f32.gmra.mxu1 %vm981_vm3, %v5245_v47 }
 0xc86   : > { %5285 = vmatmul.msk.f32.gmra.mxu2 %vm847_vm2, %v5261_v16 }
 0xc89   : > { %3017 = vmatmul.f32.gmra.mxu0 %v5242_v8 }
 0xc8a   : > { %5276 = vmatmul.msk.f32.gmra.mxu1 %vm981_vm3, %v5247_v29 }
 0xc8e   : > { %5286 = vmatmul.msk.f32.gmra.mxu2 %vm847_vm2, %v5262_v3 }
 0xc91   : > { %3020 = vmatmul.f32.gmra.mxu0 %v5244_v46 }
 0xc92   : > { %5277 = vmatmul.msk.f32.gmra.mxu1 %vm981_vm3, %v5249_v43  ;;  %v2933_v43 = vpop.permute.xlu2 %2932 }
 0xc96   : > { %5287 = vmatmul.msk.f32.gmra.mxu2 %vm847_vm2, %v5263_v50 }
 0xc99   : > { %3023 = vmatmul.f32.gmra.mxu0 %v5246_v33 }
 0xc9e   : > { %5288 = vmatmul.msk.f32.gmra.mxu2 %vm847_vm2, %v5264_v14 }
 0xca1   : > { %3026 = vmatmul.f32.gmra.mxu0 %v5248_v26 }
 0xca6   : > { %5289 = vmatmul.msk.f32.gmra.mxu2 %vm847_vm2, %v5265_v52 }
 0xca9   : > { %5270 = vmatmul.msk.f32.vlgmr.msra.gmra.mxu0 %vm981_vm3, %v5235_v48 }
 0xcde   : > { %v7860_v6 = vpop.f32.mrf.mxu1 }
 0xce6   : > { %v7862_v56 = vpop.f32.mrf.mxu0 }
 0xce7   : > { %v7864_v57 = vpop.f32.mrf.mxu1 }
 0xcee   : > { %v3009_v61 = vpop.f32.mrf.mxu0 }
 0xcef   : > { %v7866_v45 = vpop.f32.mrf.mxu1  ;;  %v3010_v33 = vadd.f32 %v3009_v61, %v2933_v43 }
 0xcf1   : > { %v7868_v22 = vpop.f32.mrf.mxu2 }
 0xcf6   : > { %v7870_v60 = vpop.f32.mrf.mxu0 }
 0xcf7   : > { %v3059_v24 = vpop.f32.mrf.mxu1 }
 0xcf9   : > { %v7874_v28 = vpop.f32.mrf.mxu2 }
 0xcfe   : > { %v7872_v49 = vpop.f32.mrf.mxu0 }
 0xcff   : > { %v3062_v15 = vpop.f32.mrf.mxu1 }
 0xd01   : > { %v7876_v59 = vpop.f32.mrf.mxu2 }
 0xd06   : > { %v3018_v23 = vpop.f32.mrf.mxu0 }
 0xd07   : > { %v3019_v9 = vadd.f32 %v3018_v23, %v2948_v63  ;;  %v3065_v5 = vpop.f32.mrf.mxu1 }
 0xd09   : > { %v3060_v2 = vadd.f32 %v3059_v24, %v3019_v9  ;;  %v7878_v32 = vpop.f32.mrf.mxu2 }
 0xd0b   : > { %v3071_v0 = vadd.f32 2.0, %v3060_v2  ;;  %v2938_v2 = vpop.permute.xlu1 %2937 }
 0xd0d   : > { %v5278_v34 = vmul.f32 -1.442695, %v3071_v0 }
 0xd0e   : > { %v3021_v25 = vpop.f32.mrf.mxu0 }
 0xd0f   : > { %v3022_v4 = vadd.f32 %v3021_v25, %v2953_v1  ;;  %v3068_v11 = vpop.f32.mrf.mxu1 }
 0xd11   : > { %v3063_v58 = vadd.f32 %v3062_v15, %v3022_v4  ;;  %v7880_v41 = vpop.f32.mrf.mxu2 }
 0xd13   : > { %v3072_v10 = vadd.f32 2.0, %v3063_v58 }
 0xd15   : > { %v5279_v13 = vmul.f32 -1.442695, %v3072_v10  ;;  %v2943_v10 = vpop.permute.xlu0 %2942 }
 0xd16   : > { %v3024_v31 = vpop.f32.mrf.mxu0 }
 0xd17   : > { %6476 = vpow2.f32 %v5279_v13  ;;  %v3025_v51 = vadd.f32 %v3024_v31, %v2958_v7 }
 0xd18   : > { %6478 = vpow2.f32 %v5278_v34 }
 0xd19   : > { %v3066_v17 = vadd.f32 %v3065_v5, %v3025_v51  ;;  %v3255_v50 = vpop.f32.mrf.mxu2  ;;  %v3013_v5 = vadd.f32 %v7870_v60, %v2938_v2 }
 0xd1b   : > { %v3073_v20 = vadd.f32 2.0, %v3066_v17 }
 0xd1d   : > { %v6477_v38 = vpop.eup %6476  ;;  %v5280_v21 = vmul.f32 -1.442695, %v3073_v20  ;;  %v3054_v20 = vadd.f32 %v7864_v57, %v3013_v5  ;;  %v3274_v57 = vmul.f32 %v7716_v27, %v7876_v59  ;;  %v3272_v5 = vmul.f32 %v7716_v27, %v7868_v22 }
 0xd1e   : > { %v3088_v40 = vadd.f32 1.0, %v6477_v38  ;;  %v3027_v54 = vpop.f32.mrf.mxu0  ;;  %v6479_v30 = vpop.eup %6478 }
 0xd1f   : > { %6480 = vpow2.f32 %v5280_v21  ;;  %v3028_v42 = vadd.f32 %v3027_v54, %v2963_v37  ;;  %v7882_v16 = vadd.f32 1.0, %v6479_v30  ;;  %v3051_v37 = vadd.f32 %v7860_v6, %v3010_v33 }
 0xd20   : > { %6482 = vrcp.f32 %v3088_v40  ;;  %v3117_v26 = vand.u32 2147483648, %v3088_v40  ;;  %v3115_v48 = vand.u32 2147483647, %v3088_v40  ;;  %vm3111_vm11 = vweird.f32 %v3088_v40 }
 0xd21   : > { %v3069_v39 = vadd.f32 %v3068_v11, %v3028_v42  ;;  %v3265_v61 = vadd.f32 %v3255_v50, %v3051_v37  ;;  %v3258_v31 = vpop.f32.mrf.mxu2  ;;  %v3016_v30 = vadd.f32 %v7872_v49, %v2943_v10 }
 0xd22   : > { %v3118_v63 = vor.u32 1.1754944e-38, %v3117_v26  ;;  %vm3116_vm13 = vcmp.eq.f32.partialorder %v3115_v48, 8.507059e+37  ;;  %v3266_v54 = vadd.f32 %v3258_v31, %v3054_v20 }
 0xd23   : > { %v3074_v44 = vadd.f32 2.0, %v3069_v39  ;;  %v3057_v49 = vadd.f32 %v7866_v45, %v3016_v30  ;;  %v3100_v45 = vand.u32 2147483647, %v7882_v16  ;;  %v5301_v30 = vld [vmem:[%s8735_s3 + $0x38] sm:$0xff] }
 0xd25   : > { %v6481_v47 = vpop.eup %6480  ;;  %v5281_v8 = vmul.f32 -1.442695, %v3074_v44 }
 0xd26   : > { %v6483_v29 = vpop.eup %6482  ;;  %v3089_v3 = vadd.f32 1.0, %v6481_v47  ;;  %v3047_v33 = vpop.f32.mrf.mxu0 }
 0xd27   : > { %v3107_v46 = vmul.f32 %v6483_v29, %v3088_v40  ;;  %6484 = vpow2.f32 %v5281_v8  ;;  %vm3112_vm10 = vweird.f32 %v6483_v29 }
 0xd28   : > { %6486 = vrcp.f32 %v3089_v3  ;;  %vm3113_vm12 = vmor %vm3111_vm11, %vm3112_vm10  ;;  %v3132_v7 = vand.u32 2147483648, %v3089_v3  ;;  %v3130_v17 = vand.u32 2147483647, %v3089_v3  ;;  %vm3126_vm15 = vweird.f32 %v3089_v3 }
 0xd29   : > { %6488 = vrcp.f32 %v7882_v16  ;;  %v3108_v14 = vsub.f32 1.0, %v3107_v46  ;;  %vm3096_vm10 = vweird.f32 %v7882_v16 }
 0xd2a   : > { %v3133_v21 = vor.u32 1.1754944e-38, %v3132_v7  ;;  %vm3131_vm4 = vcmp.eq.f32.partialorder %v3130_v17, 8.507059e+37 }
 0xd2b   : > { %v3109_v52 = vmul.f32 %v6483_v29, %v3108_v14  ;;  %v3261_v14 = vpop.f32.mrf.mxu2 }
 0xd2d   : > { %v6485_v24 = vpop.eup %6484  ;;  %v3110_v23 = vadd.f32 %v6483_v29, %v3109_v52 }
 0xd2e   : > { %v6487_v15 = vpop.eup %6486  ;;  %v3090_v9 = vadd.f32 1.0, %v6485_v24 }
 0xd2f   : > { %v7886_v1 = vpop.eup %6488  ;;  %v3114_v25 = vsel %vm3113_vm12, %v6483_v29, %v3110_v23  ;;  %v3122_v4 = vmul.f32 %v6487_v15, %v3089_v3  ;;  %vm3127_vm14 = vweird.f32 %v6487_v15  ;;  %v2928_v3 = vpop.permute.xlu0 %2927  ;;  %v3267_v23 = vadd.f32 %v3261_v14, %v3057_v49 }
 0xd30   : > { %v7888_v58 = vsel %vm3116_vm13, %v3118_v63, %v3114_v25  ;;  %6490 = vrcp.f32 %v3090_v9  ;;  %v3092_v13 = vmul.f32 %v7886_v1, %v7882_v16  ;;  %vm3128_vm0 = vmor %vm3126_vm15, %vm3127_vm14  ;;  %v3147_v29 = vand.u32 2147483648, %v3090_v9 }
 0xd31   : > { %v3269_v6 = vmul.f32 %v3265_v61, %v7888_v58  ;;  %v3123_v0 = vsub.f32 1.0, %v3122_v4  ;;  %v3145_v50 = vand.u32 2147483647, %v3090_v9  ;;  %v3007_v26 = vadd.f32 %v7862_v56, %v2928_v3 }
 0xd32   : > { %v3093_v11 = vsub.f32 1.0, %v3092_v13  ;;  %vm3141_vm6 = vweird.f32 %v3090_v9  ;;  %vm3097_vm7 = vweird.f32 %v7886_v1  ;;  %v3148_v48 = vor.u32 1.1754944e-38, %v3147_v29  ;;  %v5300_v29 = vld [vmem:[%s8735_s3 + $0x30] sm:$0xff] }
 0xd33   : > { %v3277_v51 = vmul.f32 %v7716_v27, %v3269_v6  ;;  %v3124_v34 = vmul.f32 %v6487_v15, %v3123_v0  ;;  %v3048_v24 = vadd.f32 %v3047_v33, %v3007_v26  ;;  %vm3146_vm9 = vcmp.eq.f32.partialorder %v3145_v50, 8.507059e+37  ;;  %vm3098_vm11 = vmor %vm3096_vm10, %vm3097_vm7 }
 0xd34   : > { %v3094_v8 = vmul.f32 %v7886_v1, %v3093_v11  ;;  %v3102_v56 = vand.u32 2147483648, %v7882_v16  ;;  %vm3101_vm12 = vcmp.eq.f32.partialorder %v3100_v45, 8.507059e+37  ;;  %6492 = vlog2.f32 %v7070_v62 }
 0xd35   : > { %v3125_v38 = vadd.f32 %v6487_v15, %v3124_v34  ;;  %3298 = vrot.lane.b32.xlu0 %v3277_v51, %s8780_s25  ;;  %v3264_v61 = vadd.f32 %v7880_v41, %v3048_v24  ;;  %v3273_v41 = vmul.f32 %v7716_v27, %v7874_v28  ;;  %vm1479_vm13 = vcmask 293888  }
 0xd36   : > { %v6491_v60 = vpop.eup %6490  ;;  %v3095_v59 = vadd.f32 %v7886_v1, %v3094_v8  ;;  %v3103_v2 = vor.u32 1.1754944e-38, %v3102_v56  ;;  %6494 = vlog2.f32 %v7036_v12  ;;  %vm4408_vm14 = vcmask 261120  }
 0xd37   : > { %v3129_v40 = vsel %vm3128_vm0, %v6487_v15, %v3125_v38  ;;  %v3137_v42 = vmul.f32 %v6491_v60, %v3090_v9  ;;  %vm3142_vm5 = vweird.f32 %v6491_v60  ;;  %v3275_v9 = vmul.f32 %v7716_v27, %v7878_v32 }
 0xd38   : > { %v7897_v39 = vsel %vm3131_vm4, %v3133_v21, %v3129_v40  ;;  %vm3143_vm8 = vmor %vm3141_vm6, %vm3142_vm5  ;;  %v3099_v25 = vsel %vm3098_vm11, %v7886_v1, %v3095_v59  ;;  %6496 = vlog2.f32 %v7046_v36  ;;  %v5314_v36 = vld [vmem:[%s8738_s6 + $0x1c0] sm:$0xff] }
 0xd39   : > { %v3270_v44 = vmul.f32 %v3266_v54, %v7897_v39  ;;  %v3138_v47 = vsub.f32 1.0, %v3137_v42  ;;  %v7924_v10 = vsel %vm3101_vm12, %v3103_v2, %v3099_v25  ;;  %6498 = vlog2.f32 %v7503_v18 }
 0xd3a   : > { %v3268_v16 = vmul.f32 %v3264_v61, %v7924_v10  ;;  %6500 = vlog2.f32 %v7469_v35 }
 0xd3b   : > { %v3278_v46 = vmul.f32 %v7716_v27, %v3270_v44  ;;  %v3139_v43 = vmul.f32 %v6491_v60, %v3138_v47  ;;  %v5305_v47 = vld [vmem:[%s8737_s5 + $0x38] sm:$0xff]  ;;  %6502 = vlog2.f32 %v7062_v55 }
 0xd3c   : > { %v3276_v32 = vmul.f32 %v7716_v27, %v3268_v16  ;;  %6504 = vlog2.f32 %v7495_v19 }
 0xd3d   : > { %v3140_v52 = vadd.f32 %v6491_v60, %v3139_v43  ;;  %3300 = vrot.lane.b32.xlu2 %v3278_v46, %s8780_s25  ;;  %3292 = vrot.lane.b32.xlu0 %v3274_v57, %s8780_s25  ;;  %v5304_v46 = vld [vmem:[%s8737_s5 + $0x30] sm:$0xff]  ;;  %6506 = vlog2.f32 %v7924_v10 }
 0xd3e   : > { %6508 = vlog2.f32 %v7479_v53 }
 0xd3f   : > { %v3144_v37 = vsel %vm3143_vm8, %v6491_v60, %v3140_v52  ;;  %6510 = vlog2.f32 %v7897_v39 }
 0xd40   : > { %v7912_v15 = vsel %vm3146_vm9, %v3148_v48, %v3144_v37 }
 0xd41   : > { %v3271_v63 = vmul.f32 %v3267_v23, %v7912_v15  ;;  %6512 = vlog2.f32 %v7912_v15 }
 0xd42   : > { %6514 = vlog2.f32 %v7888_v58 }
 0xd43   : > { %v3279_v4 = vmul.f32 %v7716_v27, %v3271_v63 }
 0xd45   : > { %3302 = vrot.lane.b32.xlu1 %v3279_v4, %s8780_s25  ;;  %3294 = vrot.lane.b32.xlu2 %v3275_v9, %s8780_s25 }
 0xd4d   : > { %3288 = vrot.lane.b32.xlu2 %v3272_v5, %s8780_s25  ;;  %3296 = vrot.lane.b32.xlu1 %v3276_v32, %s8780_s25 }
 0xd55   : > { %3290 = vrot.lane.b32.xlu1 %v3273_v41, %s8780_s25 }
 0xd97   : > { %v3301_v1 = vpop.permute.xlu2 %3300 }
 0xd98   : > { %3318 = vst.msk [vmem:[#allocation2 + $0x30] sm:$0xff] %vm571_vm1, %v3301_v1 }
 0xd9f   : > { %v3295_v6 = vpop.permute.xlu2 %3294  ;;  %v7971_v54 = vld [vmem:[#allocation2 + $0x30] sm:$0xff] }
 0xda0   : > { %3315 = vst.msk [vmem:[#allocation2 + $0x18] sm:$0xff] %vm571_vm1, %v3295_v6 }
 0xda7   : > { %v3289_v0 = vpop.permute.xlu2 %3288  ;;  %v3299_v13 = vpop.permute.xlu0 %3298  ;;  %v7942_v27 = vld [vmem:[#allocation2 + $0x18] sm:$0xff] }
 0xda8   : > { %3312 = vst.msk [vmem:[#allocation2] sm:$0xff] %vm571_vm1, %v3289_v0 }
 0xda9   : > { %3317 = vst.msk [vmem:[#allocation2 + $0x28] sm:$0xff] %vm571_vm1, %v3299_v13 }
 0xdaf   : > { %v3293_v22 = vpop.permute.xlu0 %3292  ;;  %v7957_v60 = vld [vmem:[#allocation2] sm:$0xff] }
 0xdb0   : > { %3314 = vst.msk [vmem:[#allocation2 + $0x10] sm:$0xff] %vm571_vm1, %v3293_v22  ;;  %v7951_v20 = vld [vmem:[#allocation2 + $0x28] sm:$0xff] }
 0xdb7   : > { %v3303_v7 = vpop.permute.xlu1 %3302  ;;  %v7940_v31 = vld [vmem:[#allocation2 + $0x10] sm:$0xff] }
 0xdb8   : > { %3319 = vst.msk [vmem:[#allocation2 + $0x38] sm:$0xff] %vm571_vm1, %v3303_v7  ;;  %v6063_v28 = vpack.i.bf16 %v7940_v31, %v7942_v27 }
 0xdba   : > { %6064 = vrot.lane.b32.xlu2 %v6063_v28, %s8779_s21 }
 0xdbf   : > { %v3297_v51 = vpop.permute.xlu1 %3296  ;;  %v7969_v40 = vld [vmem:[#allocation2 + $0x38] sm:$0xff] }
 0xdc0   : > { %3316 = vst.msk [vmem:[#allocation2 + $0x20] sm:$0xff] %vm571_vm1, %v3297_v51  ;;  %v6098_v42 = vpack.i.bf16 %v7971_v54, %v7969_v40 }
 0xdc7   : > { %v3291_v34 = vpop.permute.xlu1 %3290  ;;  %v7949_v17 = vld [vmem:[#allocation2 + $0x20] sm:$0xff] }
 0xdc8   : > { %3313 = vst.msk [vmem:[#allocation2 + $0x8] sm:$0xff] %vm571_vm1, %v3291_v34  ;;  %v6088_v38 = vpack.i.bf16 %v7949_v17, %v7951_v20 }
 0xdca   : > { %6089 = vrot.lane.b32.xlu2 %v6088_v38, %s8776_s28 }
 0xdcf   : > { %v7959_v21 = vld [vmem:[#allocation2 + $0x8] sm:$0xff] }
 0xdd0   : > { %v6078_v11 = vpack.i.bf16 %v7957_v60, %v7959_v21 }
 0xdd2   : > { %6094 = vrot.lane.b32.xlu2 %v6088_v38, %s8782_s0  ;;  %6079 = vrot.lane.b32.xlu1 %v6078_v11, %s8776_s28 }
 0xdd3   : > { %6069 = vrot.lane.b32.xlu0 %v6078_v11, %s8779_s21 }
 0xdda   : > { %6114 = vrot.lane.b32.xlu2 %v6063_v28, %s8782_s0  ;;  %6084 = vrot.lane.b32.xlu1 %v6088_v38, %s8779_s21 }
 0xddb   : > { %6074 = vrot.lane.b32.xlu0 %v6063_v28, %s8776_s28 }
 0xde2   : > { %6129 = vrot.lane.b32.xlu2 %v6078_v11, %s8782_s0  ;;  %6109 = vrot.lane.b32.xlu1 %v6088_v38, %s8781_s17 }
 0xde3   : > { %6099 = vrot.lane.b32.xlu0 %v6098_v42, %s8779_s21 }
 0xdea   : > { %6149 = vrot.lane.b32.xlu2 %v6098_v42, %s8782_s0  ;;  %6124 = vrot.lane.b32.xlu1 %v6063_v28, %s8781_s17 }
 0xdeb   : > { %6104 = vrot.lane.b32.xlu0 %v6088_v38, %s8783_s24 }
 0xdf2   : > { %6154 = vrot.lane.b32.xlu2 %v6088_v38, %s8784_s26  ;;  %6139 = vrot.lane.b32.xlu1 %v6098_v42, %s8776_s28 }
 0xdf3   : > { %6119 = vrot.lane.b32.xlu0 %v6063_v28, %s8783_s24 }
 0xdfa   : > { %6179 = vrot.lane.b32.xlu2 %v6098_v42, %s8784_s26  ;;  %6144 = vrot.lane.b32.xlu1 %v6078_v11, %s8781_s17 }
 0xdfb   : > { %6134 = vrot.lane.b32.xlu0 %v6078_v11, %s8783_s24 }
 0xe02   : > { %6184 = vrot.lane.b32.xlu2 %v6063_v28, %s8784_s26  ;;  %6169 = vrot.lane.b32.xlu1 %v6098_v42, %s8781_s17 }
 0xe03   : > { %6159 = vrot.lane.b32.xlu0 %v6098_v42, %s8783_s24 }
 0xe0a   : > { %6209 = vrot.lane.b32.xlu2 %v6078_v11, %s8784_s26  ;;  %6174 = vrot.lane.b32.xlu1 %v6088_v38, %s8777_s30 }
 0xe0b   : > { %6164 = vrot.lane.b32.xlu0 %v6088_v38, %s8778_s20 }
 0xe12   : > { %6224 = vrot.lane.b32.xlu2 %v6098_v42, %s8777_s30  ;;  %6199 = vrot.lane.b32.xlu1 %v6098_v42, %s8777_s30 }
 0xe13   : > { %6189 = vrot.lane.b32.xlu0 %v6098_v42, %s8778_s20 }
 0xe14   : > { %v8001_v44 = vpop.permute.xlu2 %6064 }
 0xe15   : > { %v6067_v34 = vunpack.i.h.bf16 %v8001_v44 }
 0xe1a   : > { %3616 = vperm.xlu2 %5561, %v5301_v30   ;;  %6204 = vrot.lane.b32.xlu1 %v6063_v28, %s8777_s30 }
 0xe1b   : > { %6194 = vrot.lane.b32.xlu0 %v6063_v28, %s8778_s20 }
 0xe22   : > { %3749 = vperm.xlu2 %5561, %v5305_v47   ;;  %6219 = vrot.lane.b32.xlu1 %v6078_v11, %s8777_s30 }
 0xe23   : > { %6214 = vrot.lane.b32.xlu0 %v6078_v11, %s8778_s20 }
 0xe24   : > { %v8008_v57 = vpop.permute.xlu2 %6089 }
 0xe2a   : > { %6234 = vrot.lane.b32.xlu1 %v6063_v28, %s8777_s30  ;;  %v6066_v28 = vunpack.i.l.bf16 %v8001_v44 }
 0xe2b   : > { %6229 = vrot.lane.b32.xlu0 %v6088_v38, %s8777_s30 }
 0xe2c   : > { %v6095_v8 = vpop.permute.xlu2 %6094 }
 0xe2d   : > { %v6096_v52 = vunpack.i.l.bf16 %v6095_v8  ;;  %v6097_v59 = vunpack.i.h.bf16 %v6095_v8 }
 0xe32   : > { %6239 = vrot.lane.b32.xlu1 %v6078_v11, %s8777_s30 }
 0xe33   : > { %3611 = vperm.xlu0 %5562, %v5300_v29  }
 0xe34   : > { %v6115_v3 = vpop.permute.xlu2 %6114 }
 0xe35   : > { %v6116_v37 = vunpack.i.l.bf16 %v6115_v3  ;;  %v6117_v56 = vunpack.i.h.bf16 %v6115_v3 }
 0xe3b   : > { %3744 = vperm.xlu0 %5562, %v5304_v46  }
 0xe3c   : > { %v6130_v43 = vpop.permute.xlu2 %6129 }
 0xe3d   : > { %v6131_v45 = vunpack.i.l.bf16 %v6130_v43  ;;  %v6132_v63 = vunpack.i.h.bf16 %v6130_v43 }
 0xe44   : > { %v6150_v50 = vpop.permute.xlu2 %6149  ;;  %v8019_v33 = vpop.permute.xlu1 %6079 }
 0xe45   : > { %v6151_v14 = vunpack.i.l.bf16 %v6150_v50  ;;  %v6070_v26 = vpop.permute.xlu0 %6069  ;;  %v6152_v49 = vunpack.i.h.bf16 %v6150_v50 }
 0xe46   : > { %v6071_v38 = vunpack.i.l.bf16 %v6070_v26  ;;  %v6072_v11 = vunpack.i.h.bf16 %v6070_v26 }
 0xe47   : > { %3694 = vmatpush.msra.mxu2 %v6151_v14 }
 0xe49   : > { %3695 = vmatpush.msra.mxu2 %v6152_v49  ;;  %v5295_v49 = vld [vmem:[%s8734_s2 + $0x118] sm:$0xff] }
 0xe4b   : > { %3696 = vmatpush.msra.mxu2 %v6096_v52 }
 0xe4c   : > { %v6155_v48 = vpop.permute.xlu2 %6154  ;;  %v6085_v24 = vpop.permute.xlu1 %6084 }
 0xe4d   : > { %v8021_v23 = vpop.permute.xlu0 %6074  ;;  %3697 = vmatpush.msra.mxu2 %v6097_v59  ;;  %v6156_v32 = vunpack.i.l.bf16 %v6155_v48  ;;  %v6086_v41 = vunpack.i.l.bf16 %v6085_v24  ;;  %v6157_v1 = vunpack.i.h.bf16 %v6155_v48  ;;  %v6087_v6 = vunpack.i.h.bf16 %v6085_v24 }
 0xe4e   : > { %v6076_v59 = vunpack.i.l.bf16 %v8021_v23 }
 0xe4f   : > { %3698 = vmatpush.msra.mxu2 %v6116_v37 }
 0xe51   : > { %3699 = vmatpush.msra.mxu2 %v6117_v56  ;;  %v6081_v56 = vunpack.i.l.bf16 %v8019_v33 }
 0xe53   : > { %3700 = vmatpush.msra.mxu2 %v6131_v45  ;;  %v5298_v45 = vld [vmem:[%s8734_s2 + $0x130] sm:$0xff] }
 0xe54   : > { %v6180_v9 = vpop.permute.xlu2 %6179  ;;  %v8023_v25 = vpop.permute.xlu1 %6109 }
 0xe55   : > { %v6181_v61 = vunpack.i.l.bf16 %v6180_v9  ;;  %v6100_v4 = vpop.permute.xlu0 %6099  ;;  %3701 = vmatpush.msra.mxu2 %v6132_v63  ;;  %v6182_v16 = vunpack.i.h.bf16 %v6180_v9  ;;  %v6112_v14 = vunpack.i.h.bf16 %v8023_v25  ;;  %v6082_v9 = vunpack.i.h.bf16 %v8019_v33 }
 0xe56   : > { %v6101_v2 = vunpack.i.l.bf16 %v6100_v4  ;;  %v6102_v5 = vunpack.i.h.bf16 %v6100_v4 }
 0xe57   : > { %3702 = vmatpush.msra.mxu2 %v6181_v61 }
 0xe58   : > { %3625 = vmatpush.msrb.mxu3 %v6101_v2 }
 0xe59   : > { %3703 = vmatpush.msra.mxu2 %v6182_v16 }
 0xe5a   : > { %3626 = vmatpush.msrb.mxu3 %v6102_v5 }
 0xe5b   : > { %3704 = vmatpush.msra.mxu2 %v6156_v32 }
 0xe5c   : > { %3627 = vmatpush.msrb.mxu3 %v6086_v41  ;;  %v6185_v0 = vpop.permute.xlu2 %6184  ;;  %v8025_v13 = vpop.permute.xlu1 %6124 }
 0xe5d   : > { %v6186_v22 = vunpack.i.l.bf16 %v6185_v0  ;;  %v8027_v7 = vpop.permute.xlu0 %6104  ;;  %3705 = vmatpush.msra.mxu2 %v6157_v1  ;;  %v6187_v51 = vunpack.i.h.bf16 %v6185_v0  ;;  %v6126_v52 = vunpack.i.l.bf16 %v8025_v13  ;;  %v6127_v24 = vunpack.i.h.bf16 %v8025_v13 }
 0xe5e   : > { %3628 = vmatpush.msrb.mxu3 %v6087_v6  ;;  %v6106_v32 = vunpack.i.l.bf16 %v8027_v7  ;;  %v6107_v33 = vunpack.i.h.bf16 %v8027_v7 }
 0xe5f   : > { %3706 = vmatpush.msra.mxu2 %v6186_v22 }
 0xe60   : > { %3629 = vmatpush.msrb.mxu3 %v6066_v28 }
 0xe61   : > { %3707 = vmatpush.msra.mxu2 %v6187_v51 }
 0xe62   : > { %3630 = vmatpush.msrb.mxu3 %v6067_v34 }
 0xe64   : > { %3631 = vmatpush.msrb.mxu3 %v6071_v38  ;;  %v6210_v42 = vpop.permute.xlu2 %6209  ;;  %v6140_v30 = vpop.permute.xlu1 %6139  ;;  %v5291_v38 = vld [vmem:[%s8734_s2 + $0xf8] sm:$0xff] }
 0xe65   : > { %v6211_v47 = vunpack.i.l.bf16 %v6210_v42  ;;  %v8031_v8 = vpop.permute.xlu0 %6119  ;;  %v6212_v29 = vunpack.i.h.bf16 %v6210_v42  ;;  %v6141_v50 = vunpack.i.l.bf16 %v6140_v30 }
 0xe66   : > { %3632 = vmatpush.msrb.mxu3 %v6072_v11  ;;  %v6121_v0 = vunpack.i.l.bf16 %v8031_v8  ;;  %v6122_v22 = vunpack.i.h.bf16 %v8031_v8 }
 0xe67   : > { %3708 = vmatpush.msra.mxu2 %v6211_v47  ;;  %v5292_v47 = vld [vmem:[%s8734_s2 + $0x100] sm:$0xff] }
 0xe68   : > { %3633 = vmatpush.msrb.mxu3 %v7969_v40  ;;  %v5290_v40 = vld [vmem:[%s8734_s2 + $0xf0] sm:$0xff] }
 0xe69   : > { %3709 = vmatpush.msra.mxu2 %v6212_v29 }
 0xe6a   : > { %3634 = vmatpush.msrb.mxu3 %v7971_v54 }
 0xe6c   : > { %3635 = vmatpush.msrb.mxu3 %v7951_v20  ;;  %v6145_v44 = vpop.permute.xlu1 %6144 }
 0xe6d   : > { %v8036_v3 = vpop.permute.xlu0 %6134  ;;  %v6146_v37 = vunpack.i.l.bf16 %v6145_v44  ;;  %v6147_v63 = vunpack.i.h.bf16 %v6145_v44 }
 0xe6e   : > { %3636 = vmatpush.msrb.mxu3 %v7949_v17  ;;  %v6142_v17 = vunpack.i.h.bf16 %v6140_v30  ;;  %v6136_v28 = vunpack.i.l.bf16 %v8036_v3  ;;  %v6137_v34 = vunpack.i.h.bf16 %v8036_v3 }
 0xe70   : > { %3637 = vmatpush.msrb.mxu3 %v7942_v27  ;;  %v6111_v27 = vunpack.i.l.bf16 %v8023_v25 }
 0xe72   : > { %3638 = vmatpush.msrb.mxu3 %v7940_v31  ;;  %v6091_v31 = vunpack.i.l.bf16 %v8008_v57 }
 0xe74   : > { %3639 = vmatpush.msrb.mxu3 %v7959_v21  ;;  %v6170_v46 = vpop.permute.xlu1 %6169  ;;  %v5293_v21 = vld [vmem:[%s8734_s2 + $0x108] sm:$0xff] }
 0xe75   : > { %v6171_v43 = vunpack.i.l.bf16 %v6170_v46  ;;  %v6160_v54 = vpop.permute.xlu0 %6159  ;;  %v6172_v20 = vunpack.i.h.bf16 %v6170_v46  ;;  %3710 = vmatmul.f32.vlgmr.msra.gmra.mxu2 %v5293_v21  ;;  %v5296_v46 = vld [vmem:[%s8734_s2 + $0x120] sm:$0xff]  ;;  %v5294_v21 = vld [vmem:[%s8734_s2 + $0x110] sm:$0xff] }
 0xe76   : > { %3640 = vmatpush.msrb.mxu3 %v7957_v60  ;;  %v6092_v60 = vunpack.i.h.bf16 %v8008_v57  ;;  %v6077_v57 = vunpack.i.h.bf16 %v8021_v23  ;;  %v6161_v23 = vunpack.i.l.bf16 %v6160_v54  ;;  %v6162_v2 = vunpack.i.h.bf16 %v6160_v54 }
 0xe77   : > { %3641 = vmatmul.f32.vlgmr.msrb.gmra.mxu3 %v5290_v40  ;;  %3671 = vmatpush.msra.mxu1 %v6171_v43  ;;  %v5297_v43 = vld [vmem:[%s8734_s2 + $0x128] sm:$0xff] }
 0xe78   : > { %3648 = vmatpush.msra.mxu3 %v6141_v50  ;;  %v6225_v50 = vpop.permute.xlu2 %6224 }
 0xe79   : > { %3672 = vmatpush.msra.mxu1 %v6172_v20 }
 0xe7a   : > { %3649 = vmatpush.msra.mxu3 %v6142_v17 }
 0xe7b   : > { %3673 = vmatpush.msra.mxu1 %v6111_v27 }
 0xe7c   : > { %3650 = vmatpush.msra.mxu3 %v6091_v31  ;;  %v6175_v26 = vpop.permute.xlu1 %6174  ;;  %v6226_v31 = vunpack.i.l.bf16 %v6225_v50 }
 0xe7d   : > { %3674 = vmatpush.msra.mxu1 %v6112_v14  ;;  %v8058_v48 = vpop.permute.xlu0 %6164  ;;  %3713 = vmatmul.f32.gmra.mxu2 %v5298_v45  ;;  %v6176_v5 = vunpack.i.l.bf16 %v6175_v26  ;;  %v6177_v41 = vunpack.i.h.bf16 %v6175_v26  ;;  %v5331_v45 = vld [vmem:[%s8740_s8 + $0xc8] sm:$0xff] }
 0xe7e   : > { %3651 = vmatpush.msra.mxu3 %v6092_v60  ;;  %v6166_v29 = vunpack.i.l.bf16 %v8058_v48  ;;  %v6167_v44 = vunpack.i.h.bf16 %v8058_v48  ;;  %v6227_v60 = vunpack.i.h.bf16 %v6225_v50 }
 0xe7f   : > { %3644 = vmatmul.f32.gmra.mxu3 %v5295_v49  ;;  %3675 = vmatpush.msra.mxu1 %v6126_v52 }
 0xe80   : > { %3652 = vmatpush.msra.mxu3 %v6076_v59  ;;  %v5299_v59 = vld [vmem:[%s8734_s2 + $0x138] sm:$0xff] }
 0xe81   : > { %3676 = vmatpush.msra.mxu1 %v6127_v24 }
 0xe82   : > { %3653 = vmatpush.msra.mxu3 %v6077_v57 }
 0xe83   : > { %3677 = vmatpush.msra.mxu1 %v6146_v37 }
 0xe84   : > { %3654 = vmatpush.msra.mxu3 %v6081_v56  ;;  %v6200_v25 = vpop.permute.xlu1 %6199  ;;  %v5330_v56 = vld [vmem:[%s8740_s8 + $0xc0] sm:$0xff] }
 0xe85   : > { %v6201_v61 = vunpack.i.l.bf16 %v6200_v25  ;;  %3678 = vmatpush.msra.mxu1 %v6147_v63  ;;  %v6202_v4 = vunpack.i.h.bf16 %v6200_v25  ;;  %v6190_v16 = vpop.permute.xlu0 %6189  ;;  %v5332_v63 = vld [vmem:[%s8740_s8 + $0xd0] sm:$0xff] }
 0xe86   : > { %3655 = vmatpush.msra.mxu3 %v6082_v9  ;;  %v6191_v42 = vunpack.i.l.bf16 %v6190_v16  ;;  %v6192_v8 = vunpack.i.h.bf16 %v6190_v16  ;;  %v5333_v9 = vld [vmem:[%s8740_s8 + $0xd8] sm:$0xff] }
 0xe87   : > { %3679 = vmatpush.msra.mxu1 %v6201_v61 }
 0xe88   : > { %3656 = vmatpush.msra.mxu3 %v6161_v23 }
 0xe89   : > { %3680 = vmatpush.msra.mxu1 %v6202_v4 }
 0xe8a   : > { %3657 = vmatpush.msra.mxu3 %v6162_v2 }
 0xe8b   : > { %3681 = vmatpush.msra.mxu1 %v6176_v5  ;;  %v3617_v5 = vpop.permute.xlu2 %3616 }
 0xe8c   : > { %3658 = vmatpush.msra.mxu3 %v6106_v32  ;;  %v6205_v1 = vpop.permute.xlu1 %6204 }
 0xe8d   : > { %v6206_v6 = vunpack.i.l.bf16 %v6205_v1  ;;  %3682 = vmatpush.msra.mxu1 %v6177_v41  ;;  %v6207_v13 = vunpack.i.h.bf16 %v6205_v1  ;;  %v6195_v51 = vpop.permute.xlu0 %6194 }
 0xe8e   : > { %3659 = vmatpush.msra.mxu3 %v6107_v33  ;;  %v6196_v40 = vunpack.i.l.bf16 %v6195_v51  ;;  %v6197_v54 = vunpack.i.h.bf16 %v6195_v51 }
 0xe8f   : > { %3683 = vmatpush.msra.mxu1 %v6206_v6 }
 0xe90   : > { %3660 = vmatpush.msra.mxu3 %v6121_v0 }
 0xe91   : > { %3684 = vmatpush.msra.mxu1 %v6207_v13 }
 0xe92   : > { %3661 = vmatpush.msra.mxu3 %v6122_v22 }
 0xe94   : > { %3662 = vmatpush.msra.mxu3 %v6136_v28  ;;  %v6220_v7 = vpop.permute.xlu1 %6219 }
 0xe95   : > { %v6221_v11 = vunpack.i.l.bf16 %v6220_v7  ;;  %v6222_v30 = vunpack.i.h.bf16 %v6220_v7  ;;  %v6215_v3 = vpop.permute.xlu0 %6214 }
 0xe96   : > { %3663 = vmatpush.msra.mxu3 %v6137_v34  ;;  %v6216_v20 = vunpack.i.l.bf16 %v6215_v3  ;;  %v6217_v17 = vunpack.i.h.bf16 %v6215_v3 }
 0xe97   : > { %3664 = vmatmul.f32.vlgmr.msra.gmra.mxu3 %v5291_v38  ;;  %3685 = vmatpush.msra.mxu1 %v6221_v11 }
 0xe98   : > { %3725 = vmatpush.msrb.mxu3 %v6191_v42 }
 0xe99   : > { %3686 = vmatpush.msra.mxu1 %v6222_v30 }
 0xe9a   : > { %3726 = vmatpush.msrb.mxu3 %v6192_v8  ;;  %3687 = vmatmul.f32.vlgmr.msra.gmra.mxu1 %v5292_v47  ;;  %v5302_v8 = vld [vmem:[%s8736_s4 + $0x30] sm:$0xff] }
 0xe9c   : > { %3727 = vmatpush.msrb.mxu3 %v6166_v29  ;;  %v6235_v27 = vpop.permute.xlu1 %6234  ;;  %v5303_v29 = vld [vmem:[%s8736_s4 + $0x38] sm:$0xff] }
 0xe9d   : > { %v6230_v14 = vpop.permute.xlu0 %6229  ;;  %v6236_v52 = vunpack.i.l.bf16 %v6235_v27  ;;  %v6237_v24 = vunpack.i.h.bf16 %v6235_v27 }
 0xe9e   : > { %3728 = vmatpush.msrb.mxu3 %v6167_v44  ;;  %v6231_v26 = vunpack.i.l.bf16 %v6230_v14  ;;  %v6232_v49 = vunpack.i.h.bf16 %v6230_v14  ;;  %v3750_v14 = vpop.permute.xlu2 %3749 }
 0xe9f   : > { %3667 = vmatmul.f32.gmra.mxu3 %v5296_v46 }
 0xea0   : > { %3729 = vmatpush.msrb.mxu3 %v6196_v40 }
 0xea2   : > { %3730 = vmatpush.msrb.mxu3 %v6197_v54  ;;  %3690 = vmatmul.f32.gmra.mxu1 %v5297_v43  ;;  %v8122_v43 = vld [vmem:[%s8733_s1] ss:$0 sm:$0xff] }
 0xea4   : > { %3731 = vmatpush.msrb.mxu3 %v6216_v20  ;;  %v6240_v48 = vpop.permute.xlu1 %6239 }
 0xea5   : > { %v6241_v57 = vunpack.i.l.bf16 %v6240_v48  ;;  %v6242_v37 = vunpack.i.h.bf16 %v6240_v48  ;;  %v3612_v32 = vpop.permute.xlu0 %3611 }
 0xea6   : > { %3732 = vmatpush.msrb.mxu3 %v6217_v17 }
 0xea7   : > { %5338 = vmatmul.msk.f32.vlgmr.msrb.gmra.mxu3 %vm847_vm2, %v5294_v21 }
 0xea8   : > { %4153 = vmatpush.msra.mxu3 %v6226_v31 }
 0xeaa   : > { %4154 = vmatpush.msra.mxu3 %v6227_v60 }
 0xeac   : > { %4155 = vmatpush.msra.mxu3 %v6231_v26 }
 0xead   : > { %v3745_v20 = vpop.permute.xlu0 %3744 }
 0xeae   : > { %4156 = vmatpush.msra.mxu3 %v6232_v49 }
 0xeaf   : > { %5339 = vmatmul.msk.f32.gmra.mxu3 %vm847_vm2, %v5299_v59 }
 0xeb0   : > { %4157 = vmatpush.msra.mxu3 %v6236_v52 }
 0xeb2   : > { %4158 = vmatpush.msra.mxu3 %v6237_v24 }
 0xeb4   : > { %4159 = vmatpush.msra.mxu3 %v6241_v57 }
 0xeb6   : > { %4160 = vmatpush.msra.mxu3 %v6242_v37 }
 0xeb7   : > { %5354 = vmatmul.msk.f32.vlgmr.msra.gmra.mxu3 %vm847_vm2, %v5330_v56 }
 0xebf   : > { %5355 = vmatmul.msk.f32.gmra.mxu3 %vm847_vm2, %v5331_v45 }
 0xec7   : > { %5356 = vmatmul.msk.f32.gmra.mxu3 %vm847_vm2, %v5332_v63 }
 0xecf   : > { %5357 = vmatmul.msk.f32.gmra.mxu3 %vm847_vm2, %v5333_v9 }
 0xef8   : > { %v3711_v16 = vpop.f32.mrf.mxu2 }
 0xefa   : > { %v3642_v25 = vpop.f32.mrf.mxu3 }
 0xefb   : > { %v3643_v41 = vadd.f32 %v3642_v25, %v3612_v32 }
 0xf00   : > { %v3714_v51 = vpop.f32.mrf.mxu2 }
 0xf02   : > { %v3645_v61 = vpop.f32.mrf.mxu3 }
 0xf03   : > { %v3646_v33 = vadd.f32 %v3645_v61, %v3617_v5 }
 0xf17   : > { %v3688_v4 = vpop.f32.mrf.mxu1 }
 0xf1a   : > { %v3665_v23 = vpop.f32.mrf.mxu3 }
 0xf1b   : > { %v3666_v1 = vadd.f32 %v3665_v23, %v3643_v41  ;;  %v4387_v41 = vld [vmem:[%s8742_s10 + $0x18] sm:$0xff] }
 0xf1d   : > { %v3689_v22 = vadd.f32 %v3688_v4, %v3666_v1  ;;  %v4386_v1 = vld [vmem:[%s8742_s10 + $0x10] sm:$0xff] }
 0xf1f   : > { %v3691_v0 = vpop.f32.mrf.mxu1  ;;  %v3712_v34 = vadd.f32 %v3711_v16, %v3689_v22 }
 0xf22   : > { %v3668_v2 = vpop.f32.mrf.mxu3 }
 0xf23   : > { %v3669_v6 = vadd.f32 %v3668_v2, %v3646_v33  ;;  %v4385_v33 = vld [vmem:[%s8742_s10 + $0x8] sm:$0xff] }
 0xf25   : > { %v3692_v28 = vadd.f32 %v3691_v0, %v3669_v6  ;;  %v4384_v6 = vld [vmem:[%s8742_s10] sm:$0xff]  ;;  %v6493_v0 = vpop.eup %6492 }
 0xf26   : > { %v6495_v62 = vpop.eup %6494 }
 0xf27   : > { %v3715_v7 = vadd.f32 %v3714_v51, %v3692_v28  ;;  %v1309_v51 = vmul.f32 0.6931472, %v6495_v62 }
 0xf2a   : > { %v3734_v13 = vpop.f32.mrf.mxu3 }
 0xf2b   : > { %v3735_v11 = vadd.f32 %v3734_v13, %v3712_v34  ;;  %v1307_v13 = vmul.f32 0.6931472, %v6493_v0  ;;  %v1476_v34 = vmul.f32 %v8122_v43, %v1309_v51  ;;  %v4375_v0 = vld [vmem:[%s8741_s9 + $0x18] sm:$0xff] }
 0xf2d   : > { %v3740_v47 = vmax.f32 %v3735_v11, 0.0  ;;  %v1475_v22 = vmul.f32 %v8122_v43, %v1307_v13 }
 0xf2f   : > { %v1480_v28 = vsel %vm1479_vm13, %v1475_v22, 0.0 }
 0xf32   : > { %v3737_v38 = vpop.f32.mrf.mxu3 }
 0xf33   : > { %v3738_v42 = vadd.f32 %v3737_v38, %v3715_v7  ;;  %v1483_v7 = vsel %vm1479_vm13, %v1476_v34, 0.0  ;;  %v5317_v34 = vld [vmem:[%s8738_s6 + $0x1d8] sm:$0xff] }
 0xf35   : > { %v3741_v30 = vmax.f32 %v3738_v42, 0.0 }
 0xf37   : > { %3772 = vmatpush.msrb.mxu0 %v3741_v30 }
 0xf39   : > { %3773 = vmatpush.msrb.mxu0 %v3740_v47 }
 0xf3a   : > { %5340 = vmatmul.msk.f32.vlgmr.msrb.gmra.mxu0 %vm981_vm3, %v5302_v8  ;;  %v4162_v44 = vpop.f32.mrf.mxu3 }
 0xf3b   : > { %v4194_v50 = vmul.f32 %v8122_v43, %v4162_v44 }
 0xf42   : > { %5341 = vmatmul.msk.f32.gmra.mxu0 %vm981_vm3, %v5303_v29  ;;  %v4165_v3 = vpop.f32.mrf.mxu3 }
 0xf43   : > { %v4195_v52 = vmul.f32 %v8122_v43, %v4165_v3 }
 0xf4a   : > { %v4168_v46 = vpop.f32.mrf.mxu3 }
 0xf4b   : > { %v4196_v48 = vmul.f32 %v8122_v43, %v4168_v46 }
 0xf52   : > { %v4171_v40 = vpop.f32.mrf.mxu3 }
 0xf53   : > { %v4197_v54 = vmul.f32 %v8122_v43, %v4171_v40  ;;  %v5307_v40 = vld [vmem:[%s8738_s6 + $0x188] sm:$0xff] }
 0xf55   : > { %4216 = vrot.lane.b32.xlu0 %v4197_v54, %s8780_s25 }
 0xf5d   : > { %4210 = vrot.lane.b32.xlu0 %v4194_v50, %s8780_s25 }
 0xfb7   : > { %v3775_v17 = vpop.f32.mrf.mxu0 }
 0xfb8   : > { %v3776_v27 = vadd.f32 %v3775_v17, %v3745_v20 }
 0xfba   : > { %v3781_v31 = vmax.f32 %v3776_v27, 0.0  ;;  %v5309_v27 = vld [vmem:[%s8738_s6 + $0x198] sm:$0xff] }
 0xfbc   : > { %v3783_v21 = vmul.f32 %v8122_v43, %v3781_v31 }
 0xfbe   : > { %3787 = vrot.lane.b32.xlu2 %v3783_v21, %s8780_s25 }
 0xfbf   : > { %v3778_v60 = vpop.f32.mrf.mxu0 }
 0xfc0   : > { %v3779_v26 = vadd.f32 %v3778_v60, %v3750_v14 }
 0xfc2   : > { %v3782_v49 = vmax.f32 %v3779_v26, 0.0 }
 0xfc4   : > { %v3784_v59 = vmul.f32 %v8122_v43, %v3782_v49 }
 0xfc6   : > { %3789 = vrot.lane.b32.xlu1 %v3784_v59, %s8780_s25  ;;  %4212 = vrot.lane.b32.xlu2 %v4195_v52, %s8780_s25 }
 0xfc7   : > { %v4217_v24 = vpop.permute.xlu0 %4216 }
 0xfc8   : > { %4237 = vst.msk [vmem:[#allocation2 + $0x18] sm:$0xff] %vm571_vm1, %v4217_v24  ;;  %v5311_v24 = vld [vmem:[%s8738_s6 + $0x1a8] sm:$0xff] }
 0xfce   : > { %4214 = vrot.lane.b32.xlu1 %v4196_v48, %s8780_s25 }
 0xfcf   : > { %v4211_v57 = vpop.permute.xlu0 %4210  ;;  %v8161_v5 = vld [vmem:[#allocation2 + $0x18] sm:$0xff] }
 0xfd0   : > { %4234 = vst.msk [vmem:[#allocation2] sm:$0xff] %vm571_vm1, %v4211_v57 }
 0xfd7   : > { %v8140_v45 = vld [vmem:[#allocation2] sm:$0xff] }
0x1018   : > { %v3788_v37 = vpop.permute.xlu2 %3787 }
0x1019   : > { %3793 = vst.msk [vmem:[#allocation3] sm:$0xff] %vm571_vm1, %v3788_v37 }
0x1020   : > { %v4213_v56 = vpop.permute.xlu2 %4212  ;;  %v8148_v23 = vld [vmem:[#allocation3] sm:$0xff] }
0x1021   : > { %4235 = vst.msk [vmem:[#allocation2 + $0x8] sm:$0xff] %vm571_vm1, %v4213_v56 }
0x1028   : > { %v8142_v63 = vld [vmem:[#allocation2 + $0x8] sm:$0xff] }
0x1029   : > { %v6253_v9 = vpack.i.bf16 %v8140_v45, %v8142_v63 }
0x102b   : > { %6254 = vrot.lane.b32.xlu0 %v6253_v9, %s8776_s28 }
0x1038   : > { %v3790_v25 = vpop.permute.xlu1 %3789 }
0x1039   : > { %3794 = vst.msk [vmem:[#allocation3 + $0x8] sm:$0xff] %vm571_vm1, %v3790_v25  ;;  %v5313_v25 = vld [vmem:[%s8738_s6 + $0x1b8] sm:$0xff] }
0x1040   : > { %v4215_v61 = vpop.permute.xlu1 %4214  ;;  %v8150_v4 = vld [vmem:[#allocation3 + $0x8] sm:$0xff] }
0x1041   : > { %4236 = vst.msk [vmem:[#allocation2 + $0x10] sm:$0xff] %vm571_vm1, %v4215_v61  ;;  %v8155_v2 = vpack.i.bf16 %v8148_v23, %v8150_v4  ;;  %v4372_v61 = vld [vmem:[%s8741_s9] sm:$0xff] }
0x1043   : > { %6244 = vrot.lane.b32.xlu1 %v8155_v2, %s8778_s20 }
0x1048   : > { %v8159_v16 = vld [vmem:[#allocation2 + $0x10] sm:$0xff] }
0x1049   : > { %v6248_v32 = vpack.i.bf16 %v8159_v16, %v8161_v5 }
0x104b   : > { %6249 = vrot.lane.b32.xlu2 %v6248_v32, %s8776_s28  ;;  %6259 = vrot.lane.b32.xlu1 %v6248_v32, %s8783_s24 }
0x104c   : > { %6269 = vrot.lane.b32.xlu0 %v6248_v32, %s8779_s21 }
0x1053   : > { %6274 = vrot.lane.b32.xlu1 %v6253_v9, %s8779_s21  ;;  %6264 = vrot.lane.b32.xlu2 %v6253_v9, %s8783_s24 }
0x1054   : > { %6284 = vrot.lane.b32.xlu0 %v6253_v9, %s8782_s0 }
0x105b   : > { %6289 = vrot.lane.b32.xlu1 %v6248_v32, %s8784_s26  ;;  %6279 = vrot.lane.b32.xlu2 %v6248_v32, %s8782_s0 }
0x105c   : > { %6299 = vrot.lane.b32.xlu0 %v6248_v32, %s8781_s17 }
0x1063   : > { %6304 = vrot.lane.b32.xlu1 %v6253_v9, %s8781_s17  ;;  %6294 = vrot.lane.b32.xlu2 %v6253_v9, %s8784_s26 }
0x1064   : > { %6314 = vrot.lane.b32.xlu0 %v6248_v32, %s8777_s30 }
0x106b   : > { %6319 = vrot.lane.b32.xlu1 %v6253_v9, %s8778_s20  ;;  %6309 = vrot.lane.b32.xlu2 %v6248_v32, %s8778_s20 }
0x1073   : > { %4405 = vperm.xlu1 %5560, %v4387_v41   ;;  %6324 = vrot.lane.b32.xlu2 %v6253_v9, %s8777_s30 }
0x107b   : > { %4395 = vperm.xlu1 %5560, %v4385_v33   ;;  %4400 = vperm.xlu2 %5561, %v4386_v1  }
0x1083   : > { %4390 = vperm.xlu2 %5561, %v4384_v6  }
0x108b   : > { %6329 = vrot.lane.b32.xlu2 %v8155_v2, %s8782_s0 }
0x108e   : > { %1481 = vadd.xlane.f32.xlu0 %v1480_v28 }
0x1093   : > { %6334 = vrot.lane.b32.xlu2 %v8155_v2, %s8784_s26 }
0x109b   : > { %6339 = vrot.lane.b32.xlu2 %v8155_v2, %s8781_s17 }
0x109d   : > { %v6255_v42 = vpop.permute.xlu0 %6254 }
0x109e   : > { %v6256_v47 = vunpack.i.l.bf16 %v6255_v42  ;;  %v6257_v12 = vunpack.i.h.bf16 %v6255_v42  ;;  %v4378_v42 = vld [vmem:[%s8741_s9 + $0x30] sm:$0xff] }
0x10a3   : > { %6344 = vrot.lane.b32.xlu2 %v8155_v2, %s8777_s30 }
0x10a5   : > { %1484 = vadd.xlane.f32.xlu1 %v1483_v7  ;;  %v6250_v38 = vpop.permute.xlu2 %6249 }
0x10a6   : > { %v6251_v11 = vunpack.i.l.bf16 %v6250_v38  ;;  %v6252_v30 = vunpack.i.h.bf16 %v6250_v38 }
0x10a8   : > { %4421 = vmatpush.msra.mxu0 %v6251_v11 }
0x10aa   : > { %4422 = vmatpush.msra.mxu0 %v6252_v30 }
0x10ac   : > { %4423 = vmatpush.msra.mxu0 %v6256_v47 }
0x10ad   : > { %v6265_v8 = vpop.permute.xlu2 %6264 }
0x10ae   : > { %4424 = vmatpush.msra.mxu0 %v6257_v12  ;;  %v6266_v31 = vunpack.i.l.bf16 %v6265_v8  ;;  %v6267_v14 = vunpack.i.h.bf16 %v6265_v8 }
0x10b5   : > { %v6245_v29 = vpop.permute.xlu1 %6244  ;;  %v6280_v44 = vpop.permute.xlu2 %6279 }
0x10b6   : > { %v6246_v3 = vunpack.i.l.bf16 %v6245_v29  ;;  %v6247_v46 = vunpack.i.h.bf16 %v6245_v29  ;;  %v6281_v33 = vunpack.i.l.bf16 %v6280_v44  ;;  %v6282_v1 = vunpack.i.h.bf16 %v6280_v44  ;;  %v5319_v44 = vld [vmem:[%s8738_s6 + $0x1e8] sm:$0xff] }
0x10b8   : > { %3966 = vmatpush.msrb.mxu2 %v6246_v3 }
0x10ba   : > { %3967 = vmatpush.msrb.mxu2 %v6247_v46 }
0x10bb   : > { %5342 = vmatmul.msk.f32.vlgmr.msrb.gmra.mxu2 %vm981_vm3, %v5307_v40 }
0x10bd   : > { %v6260_v54 = vpop.permute.xlu1 %6259  ;;  %v8210_v50 = vpop.permute.xlu2 %6294 }
0x10be   : > { %v6261_v20 = vunpack.i.l.bf16 %v6260_v54  ;;  %v6262_v17 = vunpack.i.h.bf16 %v6260_v54  ;;  %v6270_v21 = vpop.permute.xlu0 %6269  ;;  %v6296_v38 = vunpack.i.l.bf16 %v8210_v50  ;;  %v6297_v11 = vunpack.i.h.bf16 %v8210_v50  ;;  %v4381_v54 = vld [vmem:[%s8741_s9 + $0x48] sm:$0xff] }
0x10bf   : > { %v6271_v49 = vunpack.i.l.bf16 %v6270_v21  ;;  %v6272_v59 = vunpack.i.h.bf16 %v6270_v21  ;;  %v5321_v21 = vld [vmem:[%s8738_s6 + $0x1f8] sm:$0xff] }
0x10c0   : > { %4425 = vmatpush.msra.mxu0 %v6261_v20 }
0x10c2   : > { %4426 = vmatpush.msra.mxu0 %v6262_v17 }
0x10c3   : > { %5343 = vmatmul.msk.f32.gmra.mxu2 %vm981_vm3, %v5309_v27 }
0x10c4   : > { %4427 = vmatpush.msra.mxu0 %v6266_v31 }
0x10c5   : > { %v6275_v60 = vpop.permute.xlu1 %6274  ;;  %v6310_v26 = vpop.permute.xlu2 %6309 }
0x10c6   : > { %v6311_v52 = vunpack.i.l.bf16 %v6310_v26  ;;  %4428 = vmatpush.msra.mxu0 %v6267_v14  ;;  %v6312_v48 = vunpack.i.h.bf16 %v6310_v26  ;;  %v6276_v57 = vunpack.i.l.bf16 %v6275_v60  ;;  %v6277_v37 = vunpack.i.h.bf16 %v6275_v60  ;;  %v4373_v26 = vld [vmem:[%s8741_s9 + $0x8] sm:$0xff] }
0x10c8   : > { %4429 = vmatpush.msra.mxu0 %v6271_v49  ;;  %4491 = vmatpush.msra.mxu2 %v6311_v52 }
0x10ca   : > { %4430 = vmatpush.msra.mxu0 %v6272_v59  ;;  %4492 = vmatpush.msra.mxu2 %v6312_v48  ;;  %v4374_v48 = vld [vmem:[%s8741_s9 + $0x10] sm:$0xff] }
0x10cb   : > { %5344 = vmatmul.msk.f32.gmra.mxu2 %vm981_vm3, %v5311_v24  ;;  %v4376_v24 = vld [vmem:[%s8741_s9 + $0x20] sm:$0xff] }
0x10cc   : > { %4431 = vmatpush.msra.mxu0 %v6276_v57 }
0x10cd   : > { %v6290_v56 = vpop.permute.xlu1 %6289  ;;  %v8220_v9 = vpop.permute.xlu2 %6324 }
0x10ce   : > { %4432 = vmatpush.msra.mxu0 %v6277_v37  ;;  %v6291_v22 = vunpack.i.l.bf16 %v6290_v56  ;;  %v6292_v62 = vunpack.i.h.bf16 %v6290_v56  ;;  %v6326_v14 = vunpack.i.l.bf16 %v8220_v9  ;;  %v6327_v60 = vunpack.i.h.bf16 %v8220_v9  ;;  %v4377_v9 = vld [vmem:[%s8741_s9 + $0x28] sm:$0xff] }
0x10d0   : > { %4433 = vmatpush.msra.mxu0 %v8161_v5  ;;  %v6285_v5 = vpop.permute.xlu0 %6284 }
0x10d1   : > { %v6286_v6 = vunpack.i.l.bf16 %v6285_v5 }
0x10d2   : > { %4434 = vmatpush.msra.mxu0 %v8159_v16  ;;  %v5315_v16 = vld [vmem:[%s8738_s6 + $0x1c8] sm:$0xff] }
0x10d3   : > { %5345 = vmatmul.msk.f32.gmra.mxu2 %vm981_vm3, %v5313_v25  ;;  %v4379_v25 = vld [vmem:[%s8741_s9 + $0x38] sm:$0xff] }
0x10d4   : > { %4435 = vmatpush.msra.mxu0 %v8142_v63  ;;  %v6287_v63 = vunpack.i.h.bf16 %v6285_v5 }
0x10d5   : > { %v6305_v32 = vpop.permute.xlu1 %6304  ;;  %v8232_v41 = vpop.permute.xlu2 %4400 }
0x10d6   : > { %4436 = vmatpush.msra.mxu0 %v8140_v45  ;;  %v6306_v3 = vunpack.i.l.bf16 %v6305_v32  ;;  %v6307_v40 = vunpack.i.h.bf16 %v6305_v32  ;;  %v4382_v32 = vld [vmem:[%s8741_s9 + $0x50] sm:$0xff] }
0x10d7   : > { %4437 = vmatmul.f32.vlgmr.msra.gmra.mxu0 %v4372_v61  ;;  %v4380_v61 = vld [vmem:[%s8741_s9 + $0x40] sm:$0xff] }
0x10d8   : > { %4450 = vmatpush.msrb.mxu0 %v6281_v33  ;;  %v6300_v7 = vpop.permute.xlu0 %6299  ;;  %v4383_v33 = vld [vmem:[%s8741_s9 + $0x58] sm:$0xff] }
0x10d9   : > { %v6301_v47 = vunpack.i.l.bf16 %v6300_v7  ;;  %v6302_v8 = vunpack.i.h.bf16 %v6300_v7 }
0x10da   : > { %4451 = vmatpush.msrb.mxu0 %v6282_v1 }
0x10db   : > { %5346 = vmatmul.msk.f32.gmra.mxu2 %vm981_vm3, %v5315_v16 }
0x10dc   : > { %4452 = vmatpush.msrb.mxu0 %v6286_v6 }
0x10dd   : > { %v6320_v13 = vpop.permute.xlu1 %6319  ;;  %v8242_v45 = vpop.permute.xlu2 %4390 }
0x10de   : > { %v6321_v28 = vunpack.i.l.bf16 %v6320_v13  ;;  %4453 = vmatpush.msrb.mxu0 %v6287_v63  ;;  %v6322_v51 = vunpack.i.h.bf16 %v6320_v13 }
0x10df   : > { %4440 = vmatmul.f32.gmra.mxu0 %v4375_v0 }
0x10e0   : > { %4454 = vmatpush.msrb.mxu0 %v6291_v22  ;;  %4493 = vmatpush.msra.mxu2 %v6321_v28  ;;  %v6315_v46 = vpop.permute.xlu0 %6314 }
0x10e1   : > { %v6316_v20 = vunpack.i.l.bf16 %v6315_v46  ;;  %v6317_v27 = vunpack.i.h.bf16 %v6315_v46 }
0x10e2   : > { %4455 = vmatpush.msrb.mxu0 %v6292_v62  ;;  %4494 = vmatpush.msra.mxu2 %v6322_v51 }
0x10e3   : > { %5347 = vmatmul.msk.f32.gmra.mxu2 %vm981_vm3, %v5317_v34 }
0x10e4   : > { %4456 = vmatpush.msrb.mxu0 %v6296_v38 }
0x10e5   : > { %v6330_v30 = vpop.permute.xlu2 %6329  ;;  %v4406_v46 = vpop.permute.xlu1 %4405 }
0x10e6   : > { %v6331_v12 = vunpack.i.l.bf16 %v6330_v30  ;;  %4457 = vmatpush.msrb.mxu0 %v6297_v11  ;;  %v6332_v29 = vunpack.i.h.bf16 %v6330_v30 }
0x10e7   : > { %4443 = vmatmul.f32.gmra.mxu0 %v4378_v42 }
0x10e8   : > { %4458 = vmatpush.msrb.mxu0 %v6301_v47  ;;  %3911 = vmatpush.msrb.mxu1 %v6331_v12 }
0x10ea   : > { %4459 = vmatpush.msrb.mxu0 %v6302_v8  ;;  %3912 = vmatpush.msrb.mxu1 %v6332_v29 }
0x10eb   : > { %5348 = vmatmul.msk.f32.gmra.mxu2 %vm981_vm3, %v5319_v44 }
0x10ec   : > { %4460 = vmatpush.msrb.mxu0 %v6306_v3 }
0x10ed   : > { %v6335_v50 = vpop.permute.xlu2 %6334 }
0x10ee   : > { %v6336_v17 = vunpack.i.l.bf16 %v6335_v50  ;;  %4461 = vmatpush.msrb.mxu0 %v6307_v40  ;;  %v6337_v31 = vunpack.i.h.bf16 %v6335_v50 }
0x10ef   : > { %4446 = vmatmul.f32.gmra.mxu0 %v4381_v54 }
0x10f0   : > { %4462 = vmatpush.msrb.mxu0 %v6316_v20  ;;  %3913 = vmatpush.msrb.mxu1 %v6336_v17 }
0x10f2   : > { %4463 = vmatpush.msrb.mxu0 %v6317_v27  ;;  %3914 = vmatpush.msrb.mxu1 %v6337_v31 }
0x10f3   : > { %5349 = vmatmul.msk.f32.gmra.mxu2 %vm981_vm3, %v5321_v21  ;;  %v4396_v21 = vpop.permute.xlu1 %4395 }
0x10f4   : > { %4464 = vmatpush.msrb.mxu0 %v6326_v14 }
0x10f5   : > { %v6340_v49 = vpop.permute.xlu2 %6339 }
0x10f6   : > { %v6341_v52 = vunpack.i.l.bf16 %v6340_v49  ;;  %4465 = vmatpush.msrb.mxu0 %v6327_v60  ;;  %v6342_v59 = vunpack.i.h.bf16 %v6340_v49 }
0x10f7   : > { %4466 = vmatmul.f32.vlgmr.msrb.gmra.mxu0 %v4373_v26 }
0x10f8   : > { %3915 = vmatpush.msrb.mxu1 %v6341_v52 }
0x10fa   : > { %3916 = vmatpush.msrb.mxu1 %v6342_v59 }
0x10fb   : > { %5362 = vmatmul.msk.f32.vlgmr.msra.gmra.mxu2 %vm4408_vm14, %v4374_v48 }
0x10fd   : > { %v6345_v57 = vpop.permute.xlu2 %6344 }
0x10fe   : > { %v6346_v37 = vunpack.i.l.bf16 %v6345_v57  ;;  %v6347_v56 = vunpack.i.h.bf16 %v6345_v57 }
0x10ff   : > { %4469 = vmatmul.f32.gmra.mxu0 %v4376_v24 }
0x1100   : > { %3917 = vmatpush.msrb.mxu1 %v6346_v37 }
0x1102   : > { %3918 = vmatpush.msrb.mxu1 %v6347_v56 }
0x1103   : > { %5363 = vmatmul.msk.f32.gmra.mxu2 %vm4408_vm14, %v4377_v9  ;;  %v8330_v9 = vpop.xlane.xlu0 %1481 }
0x1107   : > { %4472 = vmatmul.f32.gmra.mxu0 %v4379_v25 }
0x110b   : > { %5364 = vmatmul.msk.f32.gmra.mxu2 %vm4408_vm14, %v4380_v61 }
0x110f   : > { %4475 = vmatmul.f32.gmra.mxu0 %v4382_v32 }
0x1113   : > { %5365 = vmatmul.msk.f32.gmra.mxu2 %vm4408_vm14, %v4383_v33 }
0x1118   : > { %v8326_v57 = vpop.xlane.xlu1 %1484 }
0x113e   : > { %v8294_v5 = vpop.f32.mrf.mxu2 }
0x1146   : > { %v8296_v1 = vpop.f32.mrf.mxu2 }
0x114e   : > { %v8298_v16 = vpop.f32.mrf.mxu2 }
0x1154   : > { %v4438_v6 = vpop.f32.mrf.mxu0 }
0x1155   : > { %v4439_v38 = vadd.f32 %v4438_v6, %v8242_v45 }
0x1156   : > { %v8300_v63 = vpop.f32.mrf.mxu2 }
0x115c   : > { %v4441_v0 = vpop.f32.mrf.mxu0 }
0x115d   : > { %v4442_v60 = vadd.f32 %v4441_v0, %v4396_v21  ;;  %v5337_v21 = vld [vmem:[%s8740_s8 + $0xf8] sm:$0xff] }
0x115e   : > { %v8302_v13 = vpop.f32.mrf.mxu2 }
0x1164   : > { %v4444_v22 = vpop.f32.mrf.mxu0 }
0x1165   : > { %v4445_v3 = vadd.f32 %v4444_v22, %v8232_v41 }
0x1166   : > { %v8304_v28 = vpop.f32.mrf.mxu2 }
0x116c   : > { %v4447_v62 = vpop.f32.mrf.mxu0 }
0x116d   : > { %v4448_v45 = vadd.f32 %v4447_v62, %v4406_v46  ;;  %v5335_v46 = vld [vmem:[%s8740_s8 + $0xe8] sm:$0xff] }
0x116e   : > { %v8306_v51 = vpop.f32.mrf.mxu2 }
0x1174   : > { %v4467_v34 = vpop.f32.mrf.mxu0 }
0x1175   : > { %v4468_v11 = vadd.f32 %v4467_v34, %v4439_v38 }
0x1176   : > { %v8308_v7 = vpop.f32.mrf.mxu2 }
0x117c   : > { %v4470_v42 = vpop.f32.mrf.mxu0 }
0x117d   : > { %v4471_v49 = vadd.f32 %v4470_v42, %v4442_v60 }
0x117e   : > { %v4496_v30 = vpop.f32.mrf.mxu2 }
0x117f   : > { %v4497_v47 = vadd.f32 %v4496_v30, %v4468_v11 }
0x1181   : > { %v4508_v12 = vmax.f32 %v4497_v47, 0.0 }
0x1183   : > { %v4512_v8 = vmul.f32 %v8122_v43, %v4508_v12 }
0x1184   : > { %v4473_v44 = vpop.f32.mrf.mxu0 }
0x1185   : > { %4520 = vrot.lane.b32.xlu1 %v4512_v8, %s8780_s25  ;;  %v4474_v40 = vadd.f32 %v4473_v44, %v4445_v3  ;;  %v5334_v44 = vld [vmem:[%s8740_s8 + $0xe0] sm:$0xff]  ;;  %v5312_v3 = vld [vmem:[%s8738_s6 + $0x1b0] sm:$0xff] }
0x1186   : > { %v4499_v29 = vpop.f32.mrf.mxu2  ;;  %5358 = vmatmul.msk.f32.gmra.mxu3 %vm847_vm2, %v5334_v44 }
0x1187   : > { %v4500_v59 = vadd.f32 %v4499_v29, %v4471_v49  ;;  %v5306_v29 = vld [vmem:[%s8738_s6 + $0x180] sm:$0xff] }
0x1189   : > { %v4509_v48 = vmax.f32 %v4500_v59, 0.0 }
0x118b   : > { %v4513_v24 = vmul.f32 %v8122_v43, %v4509_v48  ;;  %v5318_v48 = vld [vmem:[%s8738_s6 + $0x1e0] sm:$0xff] }
0x118c   : > { %v4476_v17 = vpop.f32.mrf.mxu0 }
0x118d   : > { %v4477_v31 = vadd.f32 %v4476_v17, %v4448_v45 }
0x118e   : > { %v4502_v54 = vpop.f32.mrf.mxu2  ;;  %5359 = vmatmul.msk.f32.gmra.mxu3 %vm847_vm2, %v5335_v46 }
0x118f   : > { %v4503_v50 = vadd.f32 %v4502_v54, %v4474_v40  ;;  %v6497_v40 = vpop.eup %6496 }
0x1190   : > { %v1311_v54 = vmul.f32 0.6931472, %v6497_v40 }
0x1191   : > { %v4510_v20 = vmax.f32 %v4503_v50, 0.0  ;;  %v5336_v50 = vld [vmem:[%s8740_s8 + $0xf0] sm:$0xff] }
0x1192   : > { %v1477_v17 = vmul.f32 %v8122_v43, %v1311_v54 }
0x1193   : > { %v4514_v27 = vmul.f32 %v8122_v43, %v4510_v20  ;;  %v6499_v20 = vpop.eup %6498 }
0x1194   : > { %v6501_v45 = vpop.eup %6500  ;;  %v1486_v35 = vsel %vm1479_vm13, %v1477_v17, 0.0  ;;  %v2230_v18 = vmul.f32 0.6931472, %v6499_v20 }
0x1195   : > { %4524 = vrot.lane.b32.xlu0 %v4514_v27, %s8780_s25  ;;  %v2232_v27 = vmul.f32 0.6931472, %v6501_v45  ;;  %v6503_v55 = vpop.eup %6502 }
0x1196   : > { %v4505_v14 = vpop.f32.mrf.mxu2  ;;  %5360 = vmatmul.msk.f32.gmra.mxu3 %vm847_vm2, %v5336_v50  ;;  %v6505_v19 = vpop.eup %6504  ;;  %v2398_v10 = vmul.f32 %v8122_v43, %v2230_v18  ;;  %v5324_v50 = vld [vmem:[%s8739_s7 + $0xd0] sm:$0xff] }
0x1197   : > { %v4506_v26 = vadd.f32 %v4505_v14, %v4477_v31  ;;  %v5316_v31 = vld [vmem:[%s8738_s6 + $0x1d0] sm:$0xff]  ;;  %v2399_v14 = vmul.f32 %v8122_v43, %v2232_v27  ;;  %v6507_v60 = vpop.eup %6506  ;;  %v2236_v59 = vmul.f32 0.6931472, %v6505_v19 }
0x1198   : > { %v2402_v49 = vsel %vm1479_vm13, %v2398_v10, 0.0  ;;  %v6509_v53 = vpop.eup %6508 }
0x1199   : > { %v4511_v52 = vmax.f32 %v4506_v26, 0.0  ;;  %v1313_v26 = vmul.f32 0.6931472, %v6503_v55  ;;  %v6511_v39 = vpop.eup %6510  ;;  %v5326_v55 = vld [vmem:[%s8739_s7 + $0xe0] sm:$0xff] }
0x119b   : > { %v4515_v41 = vmul.f32 %v8122_v43, %v4511_v52  ;;  %v2405_v52 = vsel %vm1479_vm13, %v2399_v14, 0.0  ;;  %v5322_v14 = vld [vmem:[%s8739_s7 + $0xc0] sm:$0xff] }
0x119d   : > { %4526 = vrot.lane.b32.xlu2 %v4515_v41, %s8780_s25  ;;  %6349 = vrot.lane.b32.xlu0 %v8155_v2, %s8776_s28  ;;  %v3152_v41 = vmul.f32 0.6931472, %v6507_v60 }
0x119e   : > { %5361 = vmatmul.msk.f32.gmra.mxu3 %vm847_vm2, %v5337_v21 }
0x119f   : > { %v3320_v15 = vmul.f32 %v8122_v43, %v3152_v41 }
0x11a5   : > { %6359 = vrot.lane.b32.xlu0 %v8155_v2, %s8779_s21  ;;  %4522 = vrot.lane.b32.xlu2 %v4513_v24, %s8780_s25  ;;  %v1478_v24 = vmul.f32 %v8122_v43, %v1313_v26  ;;  %v5327_v26 = vld [vmem:[%s8739_s7 + $0xe8] sm:$0xff] }
0x11ad   : > { %6354 = vrot.lane.b32.xlu2 %v8155_v2, %s8783_s24 }
0x11f7   : > { %v4527_v37 = vpop.permute.xlu2 %4526  ;;  %v4521_v56 = vpop.permute.xlu1 %4520 }
0x11f8   : > { %4535 = vst.msk [vmem:[#allocation4 + $0x18] sm:$0xff] %vm571_vm1, %v4527_v37  ;;  %v2401_v37 = vmul.f32 %v8122_v43, %v2236_v59 }
0x11f9   : > { %4532 = vst.msk [vmem:[#allocation4] sm:$0xff] %vm571_vm1, %v4521_v56  ;;  %v6513_v56 = vpop.eup %6512 }
0x11ff   : > { %v4523_v25 = vpop.permute.xlu2 %4522  ;;  %v8343_v22 = vld [vmem:[#allocation4 + $0x18] sm:$0xff] }
0x1200   : > { %4533 = vst.msk [vmem:[#allocation4 + $0x8] sm:$0xff] %vm571_vm1, %v4523_v25  ;;  %v8333_v32 = vld [vmem:[#allocation4] sm:$0xff]  ;;  %v1489_v25 = vsel %vm1479_vm13, %v1478_v24, 0.0  ;;  %v5329_v24 = vld [vmem:[%s8739_s7 + $0xf8] sm:$0xff] }
0x1207   : > { %v4525_v61 = vpop.permute.xlu0 %4524  ;;  %v8335_v33 = vld [vmem:[#allocation4 + $0x8] sm:$0xff]  ;;  %v6355_v38 = vpop.permute.xlu2 %6354 }
0x1208   : > { %4534 = vst.msk [vmem:[#allocation4 + $0x10] sm:$0xff] %vm571_vm1, %v4525_v61  ;;  %v6363_v2 = vpack.i.bf16 %v8333_v32, %v8335_v33  ;;  %v6356_v42 = vunpack.i.l.bf16 %v6355_v38  ;;  %v6357_v30 = vunpack.i.h.bf16 %v6355_v38  ;;  %v2234_v61 = vmul.f32 0.6931472, %v6509_v53 }
0x120a   : > { %6364 = vrot.lane.b32.xlu0 %v6363_v2, %s8776_s28  ;;  %v2400_v38 = vmul.f32 %v8122_v43, %v2234_v61 }
0x120f   : > { %v6350_v6 = vpop.permute.xlu0 %6349  ;;  %v8341_v0 = vld [vmem:[#allocation4 + $0x10] sm:$0xff] }
0x1210   : > { %v6351_v62 = vunpack.i.l.bf16 %v6350_v6  ;;  %v6373_v34 = vpack.i.bf16 %v8341_v0, %v8343_v22  ;;  %v6352_v11 = vunpack.i.h.bf16 %v6350_v6  ;;  %v3324_v6 = vsel %vm1479_vm13, %v3320_v15, 0.0  ;;  %v5325_v15 = vld [vmem:[%s8739_s7 + $0xd8] sm:$0xff] }
0x1212   : > { %3919 = vmatpush.msrb.mxu1 %v6351_v62  ;;  %6374 = vrot.lane.b32.xlu2 %v6373_v34, %s8776_s28  ;;  %v3156_v62 = vmul.f32 0.6931472, %v6511_v39 }
0x1213   : > { %6394 = vrot.lane.b32.xlu1 %v6373_v34, %s8782_s0  ;;  %6369 = vrot.lane.b32.xlu0 %v6363_v2, %s8783_s24 }
0x1214   : > { %3920 = vmatpush.msrb.mxu1 %v6352_v11  ;;  %v5320_v11 = vld [vmem:[%s8738_s6 + $0x1f0] sm:$0xff]  ;;  %v3322_v58 = vmul.f32 %v8122_v43, %v3156_v62 }
0x1216   : > { %3921 = vmatpush.msrb.mxu1 %v6356_v42  ;;  %v6515_v42 = vpop.eup %6514 }
0x1217   : > { %v6360_v47 = vpop.permute.xlu0 %6359 }
0x1218   : > { %v6361_v12 = vunpack.i.l.bf16 %v6360_v47  ;;  %3922 = vmatpush.msrb.mxu1 %v6357_v30  ;;  %v6362_v8 = vunpack.i.h.bf16 %v6360_v47  ;;  %v2408_v47 = vsel %vm1479_vm13, %v2400_v38, 0.0 }
0x121a   : > { %6379 = vrot.lane.b32.xlu2 %v6373_v34, %s8783_s24  ;;  %3923 = vmatpush.msrb.mxu1 %v6361_v12  ;;  %v3154_v12 = vmul.f32 0.6931472, %v6515_v42 }
0x121b   : > { %6399 = vrot.lane.b32.xlu1 %v6373_v34, %s8779_s21  ;;  %6409 = vrot.lane.b32.xlu0 %v6373_v34, %s8784_s26 }
0x121c   : > { %3924 = vmatpush.msrb.mxu1 %v6362_v8  ;;  %v3321_v44 = vmul.f32 %v8122_v43, %v3154_v12 }
0x121e   : > { %3925 = vmatpush.msrb.mxu1 %v8150_v4  ;;  %v5310_v4 = vld [vmem:[%s8738_s6 + $0x1a0] sm:$0xff]  ;;  %v3327_v46 = vsel %vm1479_vm13, %v3321_v44, 0.0 }
0x1220   : > { %3926 = vmatpush.msrb.mxu1 %v8148_v23  ;;  %v5308_v23 = vld [vmem:[%s8738_s6 + $0x190] sm:$0xff] }
0x1221   : > { %3927 = vmatmul.f32.vlgmr.msrb.gmra.mxu1 %v5306_v29  ;;  %v3330_v29 = vsel %vm1479_vm13, %v3322_v58, 0.0 }
0x1222   : > { %6384 = vrot.lane.b32.xlu2 %v6363_v2, %s8782_s0 }
0x1223   : > { %6404 = vrot.lane.b32.xlu1 %v6363_v2, %s8784_s26  ;;  %6414 = vrot.lane.b32.xlu0 %v6373_v34, %s8781_s17 }
0x1229   : > { %3930 = vmatmul.f32.gmra.mxu1 %v5308_v23 }
0x122a   : > { %6389 = vrot.lane.b32.xlu2 %v6363_v2, %s8779_s21 }
0x122b   : > { %6424 = vrot.lane.b32.xlu1 %v6373_v34, %s8777_s30  ;;  %6429 = vrot.lane.b32.xlu0 %v6373_v34, %s8778_s20  ;;  %v3158_v34 = vmul.f32 0.6931472, %v6513_v56 }
0x122d   : > { %v3323_v30 = vmul.f32 %v8122_v43, %v3158_v34  ;;  %v5323_v43 = vld [vmem:[%s8739_s7 + $0xc8] sm:$0xff]  ;;  %v5328_v34 = vld [vmem:[%s8739_s7 + $0xf0] sm:$0xff] }
0x122f   : > { %v3333_v23 = vsel %vm1479_vm13, %v3323_v30, 0.0 }
0x1231   : > { %3933 = vmatmul.f32.gmra.mxu1 %v5310_v4 }
0x1232   : > { %6419 = vrot.lane.b32.xlu2 %v6363_v2, %s8781_s17 }
0x1233   : > { %6439 = vrot.lane.b32.xlu1 %v6363_v2, %s8778_s20 }
0x1239   : > { %3936 = vmatmul.f32.gmra.mxu1 %v5312_v3 }
0x123a   : > { %6434 = vrot.lane.b32.xlu2 %v6363_v2, %s8777_s30  ;;  %v2411_v2 = vsel %vm1479_vm13, %v2401_v37, 0.0 }
0x1241   : > { %3939 = vmatmul.f32.gmra.mxu1 %v5314_v36 }
0x1249   : > { %3942 = vmatmul.f32.gmra.mxu1 %v5316_v31 }
0x1251   : > { %3945 = vmatmul.f32.gmra.mxu1 %v5318_v48 }
0x1255   : > { %1487 = vadd.xlane.f32.xlu0 %v1486_v35 }
0x1259   : > { %3948 = vmatmul.f32.gmra.mxu1 %v5320_v11 }
0x125d   : > { %2403 = vadd.xlane.f32.xlu1 %v2402_v49  ;;  %2406 = vadd.xlane.f32.xlu0 %v2405_v52 }
0x1263   : > { %1490 = vadd.xlane.f32.xlu2 %v1489_v25 }
0x1265   : > { %2412 = vadd.xlane.f32.xlu1 %v2411_v2  ;;  %3325 = vadd.xlane.f32.xlu0 %v3324_v6 }
0x126b   : > { %2409 = vadd.xlane.f32.xlu2 %v2408_v47 }
0x126c   : > { %v6375_v8 = vpop.permute.xlu2 %6374 }
0x126d   : > { %v6376_v4 = vunpack.i.l.bf16 %v6375_v8  ;;  %3331 = vadd.xlane.f32.xlu1 %v3330_v29  ;;  %3334 = vadd.xlane.f32.xlu0 %v3333_v23  ;;  %v6377_v3 = vunpack.i.h.bf16 %v6375_v8 }
0x126f   : > { %4736 = vmatpush.msrb.mxu3 %v6376_v4 }
0x1271   : > { %4737 = vmatpush.msrb.mxu3 %v6377_v3 }
0x1273   : > { %3328 = vadd.xlane.f32.xlu2 %v3327_v46 }
0x1274   : > { %v6380_v40 = vpop.permute.xlu2 %6379 }
0x1275   : > { %v6381_v17 = vunpack.i.l.bf16 %v6380_v40  ;;  %v6382_v45 = vunpack.i.h.bf16 %v6380_v40 }
0x127c   : > { %v6365_v54 = vpop.permute.xlu0 %6364  ;;  %v6385_v35 = vpop.permute.xlu2 %6384 }
0x127d   : > { %v6366_v36 = vunpack.i.l.bf16 %v6365_v54  ;;  %v6367_v20 = vunpack.i.h.bf16 %v6365_v54  ;;  %v6386_v60 = vunpack.i.l.bf16 %v6385_v35  ;;  %v6387_v49 = vunpack.i.h.bf16 %v6385_v35  ;;  %v4643_v54 = vld [vmem:[%s8743_s11 + $0x18] sm:$0xff]  ;;  %v4645_v35 = vld [vmem:[%s8743_s11 + $0x28] sm:$0xff] }
0x127f   : > { %4738 = vmatpush.msrb.mxu3 %v6366_v36  ;;  %v4641_v36 = vld [vmem:[%s8743_s11 + $0x8] sm:$0xff] }
0x1281   : > { %3859 = vperm.xlu0 %5562, %v5324_v50   ;;  %4739 = vmatpush.msrb.mxu3 %v6367_v20  ;;  %v4642_v50 = vld [vmem:[%s8743_s11 + $0x10] sm:$0xff] }
0x1283   : > { %4740 = vmatpush.msrb.mxu3 %v6381_v17  ;;  %v4646_v17 = vld [vmem:[%s8743_s11 + $0x30] sm:$0xff] }
0x1284   : > { %v6390_v53 = vpop.permute.xlu2 %6389 }
0x1285   : > { %v6370_v18 = vpop.permute.xlu0 %6369  ;;  %v6395_v27 = vpop.permute.xlu1 %6394  ;;  %4741 = vmatpush.msrb.mxu3 %v6382_v45  ;;  %v6391_v56 = vunpack.i.l.bf16 %v6390_v53  ;;  %v6392_v25 = vunpack.i.h.bf16 %v6390_v53  ;;  %v4644_v45 = vld [vmem:[%s8743_s11 + $0x20] sm:$0xff] }
0x1286   : > { %v6371_v31 = vunpack.i.l.bf16 %v6370_v18  ;;  %v6396_v21 = vunpack.i.l.bf16 %v6395_v27  ;;  %3854 = vperm.xlu1 %5560, %v5323_v43   ;;  %v6372_v19 = vunpack.i.h.bf16 %v6370_v18  ;;  %v6397_v10 = vunpack.i.h.bf16 %v6395_v27  ;;  %v4649_v18 = vld [vmem:[%s8743_s11 + $0x48] sm:$0xff]  ;;  %v4647_v27 = vld [vmem:[%s8743_s11 + $0x38] sm:$0xff] }
0x1288   : > { %4742 = vmatpush.msrb.mxu3 %v6371_v31  ;;  %4777 = vmatpush.msra.mxu1 %v6396_v21 }
0x1289   : > { %3869 = vperm.xlu0 %5562, %v5326_v55  }
0x128a   : > { %4743 = vmatpush.msrb.mxu3 %v6372_v19  ;;  %4778 = vmatpush.msra.mxu1 %v6397_v10  ;;  %v4648_v19 = vld [vmem:[%s8743_s11 + $0x40] sm:$0xff] }
0x128b   : > { %3849 = vperm.xlu2 %5561, %v5322_v14   ;;  %v1492_v14 = vadd.f32 %v8326_v57, %v8330_v9 }
0x128c   : > { %4779 = vmatpush.msra.mxu1 %v6386_v60  ;;  %v6420_v38 = vpop.permute.xlu2 %6419 }
0x128d   : > { %v6410_v52 = vpop.permute.xlu0 %6409  ;;  %v6400_v59 = vpop.permute.xlu1 %6399  ;;  %v6421_v47 = vunpack.i.l.bf16 %v6420_v38 }
0x128e   : > { %v6411_v41 = vunpack.i.l.bf16 %v6410_v52  ;;  %v6401_v48 = vunpack.i.l.bf16 %v6400_v59  ;;  %3874 = vperm.xlu1 %5560, %v5327_v26   ;;  %4780 = vmatpush.msra.mxu1 %v6387_v49  ;;  %v6412_v39 = vunpack.i.h.bf16 %v6410_v52  ;;  %v6402_v37 = vunpack.i.h.bf16 %v6400_v59  ;;  %v4652_v49 = vld [vmem:[%s8743_s11 + $0x60] sm:$0xff]  ;;  %v4650_v52 = vld [vmem:[%s8743_s11 + $0x50] sm:$0xff] }
0x1290   : > { %4744 = vmatpush.msrb.mxu3 %v6401_v48  ;;  %4781 = vmatpush.msra.mxu1 %v6411_v41  ;;  %v4651_v41 = vld [vmem:[%s8743_s11 + $0x58] sm:$0xff] }
0x1291   : > { %3884 = vperm.xlu0 %5562, %v5329_v24  }
0x1292   : > { %4745 = vmatpush.msrb.mxu3 %v6402_v37  ;;  %4782 = vmatpush.msra.mxu1 %v6412_v39  ;;  %v4655_v39 = vld [vmem:[%s8743_s11 + $0x78] sm:$0xff]  ;;  %v4653_v37 = vld [vmem:[%s8743_s11 + $0x68] sm:$0xff] }
0x1293   : > { %3864 = vperm.xlu2 %5561, %v5325_v15  }
0x1294   : > { %4746 = vmatpush.msrb.mxu3 %v6391_v56 }
0x1295   : > { %v6415_v61 = vpop.permute.xlu0 %6414  ;;  %v6405_v2 = vpop.permute.xlu1 %6404 }
0x1296   : > { %v6406_v6 = vunpack.i.l.bf16 %v6405_v2  ;;  %4747 = vmatpush.msrb.mxu3 %v6392_v25  ;;  %v6407_v62 = vunpack.i.h.bf16 %v6405_v2  ;;  %v6416_v11 = vunpack.i.l.bf16 %v6415_v61  ;;  %v6417_v42 = vunpack.i.h.bf16 %v6415_v61  ;;  %v4654_v25 = vld [vmem:[%s8743_s11 + $0x70] sm:$0xff] }
0x1298   : > { %4748 = vmatpush.msrb.mxu3 %v8343_v22  ;;  %4783 = vmatpush.msra.mxu1 %v6406_v6  ;;  %v6422_v22 = vunpack.i.h.bf16 %v6420_v38 }
0x129a   : > { %4749 = vmatpush.msrb.mxu3 %v8341_v0  ;;  %4784 = vmatpush.msra.mxu1 %v6407_v62  ;;  %v6435_v0 = vpop.permute.xlu2 %6434 }
0x129b   : > { %3879 = vperm.xlu2 %5561, %v5328_v34   ;;  %v6437_v3 = vunpack.i.h.bf16 %v6435_v0 }
0x129c   : > { %4750 = vmatpush.msrb.mxu3 %v8335_v33  ;;  %4785 = vmatpush.msra.mxu1 %v6416_v11  ;;  %v6436_v33 = vunpack.i.l.bf16 %v6435_v0 }
0x129d   : > { %v6430_v58 = vpop.permute.xlu0 %6429  ;;  %v6425_v30 = vpop.permute.xlu1 %6424 }
0x129e   : > { %v6431_v12 = vunpack.i.l.bf16 %v6430_v58  ;;  %4751 = vmatpush.msrb.mxu3 %v8333_v32  ;;  %4786 = vmatpush.msra.mxu1 %v6417_v42  ;;  %v6432_v8 = vunpack.i.h.bf16 %v6430_v58  ;;  %v6426_v29 = vunpack.i.l.bf16 %v6425_v30  ;;  %v6427_v23 = vunpack.i.h.bf16 %v6425_v30  ;;  %v4640_v32 = vld [vmem:[%s8743_s11] sm:$0xff]  ;;  %v8465_v40 = vpop.f32.mrf.mxu1  ;;  %v4658_v42 = vld [vmem:[%s8743_s11 + $0x90] sm:$0xff] }
0x129f   : > { %4752 = vmatmul.f32.vlgmr.msrb.gmra.mxu3 %v4640_v32  ;;  %v4656_v58 = vld [vmem:[%s8743_s11 + $0x80] sm:$0xff] }
0x12a0   : > { %4787 = vmatpush.msra.mxu1 %v6421_v47  ;;  %4830 = vmatpush.msra.mxu0 %v6431_v12 }
0x12a2   : > { %4788 = vmatpush.msra.mxu1 %v6422_v22  ;;  %4831 = vmatpush.msra.mxu0 %v6432_v8  ;;  %v4657_v22 = vld [vmem:[%s8743_s11 + $0x88] sm:$0xff] }
0x12a4   : > { %4789 = vmatpush.msra.mxu1 %v6426_v29 }
0x12a5   : > { %v6440_v4 = vpop.permute.xlu1 %6439 }
0x12a6   : > { %v6441_v44 = vunpack.i.l.bf16 %v6440_v4  ;;  %4790 = vmatpush.msra.mxu1 %v6427_v23  ;;  %v6442_v46 = vunpack.i.h.bf16 %v6440_v4  ;;  %v8477_v20 = vpop.f32.mrf.mxu1 }
0x12a7   : > { %4755 = vmatmul.f32.gmra.mxu3 %v4643_v54 }
0x12a8   : > { %4791 = vmatpush.msra.mxu1 %v6436_v33  ;;  %4832 = vmatpush.msra.mxu0 %v6441_v44 }
0x12aa   : > { %4792 = vmatpush.msra.mxu1 %v6437_v3  ;;  %4833 = vmatpush.msra.mxu0 %v6442_v46 }
0x12ab   : > { %4793 = vmatmul.f32.vlgmr.msra.gmra.mxu1 %v4641_v36  ;;  %5366 = vmatmul.msk.f32.vlgmr.msra.gmra.mxu0 %vm4408_vm14, %v4642_v50  ;;  %v4661_v36 = vld [vmem:[%s8743_s11 + $0xa8] sm:$0xff]  ;;  %v4659_v50 = vld [vmem:[%s8743_s11 + $0x98] sm:$0xff] }
0x12ae   : > { %v8495_v31 = vpop.f32.mrf.mxu1 }
0x12af   : > { %4758 = vmatmul.f32.gmra.mxu3 %v4646_v17 }
0x12b3   : > { %4796 = vmatmul.f32.gmra.mxu1 %v4644_v45  ;;  %5367 = vmatmul.msk.f32.gmra.mxu0 %vm4408_vm14, %v4645_v35 }
0x12b6   : > { %v8512_v24 = vpop.f32.mrf.mxu1 }
0x12b7   : > { %4761 = vmatmul.f32.gmra.mxu3 %v4649_v18 }
0x12bb   : > { %4799 = vmatmul.f32.gmra.mxu1 %v4647_v27  ;;  %5368 = vmatmul.msk.f32.gmra.mxu0 %vm4408_vm14, %v4648_v19  ;;  %v4662_v19 = vld [vmem:[%s8743_s11 + $0xb0] sm:$0xff] }
0x12be   : > { %v3940_v62 = vpop.f32.mrf.mxu1 }
0x12bf   : > { %4764 = vmatmul.f32.gmra.mxu3 %v4652_v49 }
0x12c3   : > { %4802 = vmatmul.f32.gmra.mxu1 %v4650_v52  ;;  %5369 = vmatmul.msk.f32.gmra.mxu0 %vm4408_vm14, %v4651_v41 }
0x12c6   : > { %v3943_v32 = vpop.f32.mrf.mxu1 }
0x12c7   : > { %4767 = vmatmul.f32.gmra.mxu3 %v4655_v39 }
0x12c8   : > { %v1488_v43 = vpop.xlane.xlu0 %1487 }
0x12c9   : > { %v1493_v60 = vadd.f32 %v1492_v14, %v1488_v43  ;;  %v4660_v43 = vld [vmem:[%s8743_s11 + $0xa0] sm:$0xff] }
0x12cb   : > { %4805 = vmatmul.f32.gmra.mxu1 %v4653_v37  ;;  %5370 = vmatmul.msk.f32.gmra.mxu0 %vm4408_vm14, %v4654_v25 }
0x12ce   : > { %v3946_v14 = vpop.f32.mrf.mxu1 }
0x12cf   : > { %4770 = vmatmul.f32.gmra.mxu3 %v4658_v42 }
0x12d0   : > { %v2407_v21 = vpop.xlane.xlu0 %2406  ;;  %v2404_v55 = vpop.xlane.xlu1 %2403 }
0x12d1   : > { %v2414_v10 = vadd.f32 %v2407_v21, %v2404_v55 }
0x12d3   : > { %4808 = vmatmul.f32.gmra.mxu1 %v4656_v58  ;;  %5371 = vmatmul.msk.f32.gmra.mxu0 %vm4408_vm14, %v4657_v22 }
0x12d6   : > { %v1491_v26 = vpop.xlane.xlu2 %1490 }
0x12d7   : > { %v1494_v59 = vadd.f32 %v1493_v60, %v1491_v26  ;;  %4773 = vmatmul.f32.gmra.mxu3 %v4661_v36  ;;  %v4663_v26 = vld [vmem:[%s8743_s11 + $0xb8] sm:$0xff] }
0x12d8   : > { %v2413_v9 = vpop.xlane.xlu1 %2412  ;;  %v3326_v56 = vpop.xlane.xlu0 %3325 }
0x12d9   : > { %v1495_v48 = vrot.slane %v1494_v59, 4 }
0x12db   : > { %v1496_v57 = vadd.f32 %v1495_v48, %v1494_v59  ;;  %4811 = vmatmul.f32.gmra.mxu1 %v4659_v50  ;;  %5372 = vmatmul.msk.f32.gmra.mxu0 %vm4408_vm14, %v4660_v43 }
0x12dd   : > { %v1497_v61 = vrot.slane %v1496_v57, 2 }
0x12de   : > { %v2410_v53 = vpop.xlane.xlu2 %2409 }
0x12df   : > { %v2415_v15 = vadd.f32 %v2414_v10, %v2410_v53  ;;  %v1498_v34 = vadd.f32 %v1497_v61, %v1496_v57 }
0x12e0   : > { %v3332_v12 = vpop.xlane.xlu1 %3331  ;;  %v3335_v23 = vpop.xlane.xlu0 %3334 }
0x12e1   : > { %v2416_v2 = vadd.f32 %v2415_v15, %v2413_v9  ;;  %v1499_v8 = vrot.slane %v1498_v34, 1  ;;  %v3949_v15 = vpop.f32.mrf.mxu1 }
0x12e3   : > { %v2417_v6 = vrot.slane %v2416_v2, 4  ;;  %v1500_v44 = vadd.f32 %v1499_v8, %v1498_v34  ;;  %4814 = vmatmul.f32.gmra.mxu1 %v4662_v19  ;;  %5373 = vmatmul.msk.f32.gmra.mxu0 %vm4408_vm14, %v4663_v26 }
0x12e5   : > { %v2418_v38 = vadd.f32 %v2417_v6, %v2416_v2 }
0x12e6   : > { %v3329_v11 = vpop.xlane.xlu2 %3328 }
0x12e7   : > { %v2419_v30 = vrot.slane %v2418_v38, 2  ;;  %v3336_v47 = vadd.f32 %v3329_v11, %v3326_v56  ;;  %v4174_v56 = vpop.f32.mrf.mxu3 }
0x12e9   : > { %v2420_v29 = vadd.f32 %v2419_v30, %v2418_v38  ;;  %v3337_v0 = vadd.f32 %v3336_v47, %v3332_v12 }
0x12eb   : > { %v2421_v4 = vrot.slane %v2420_v29, 1  ;;  %v3338_v33 = vadd.f32 %v3337_v0, %v3335_v23 }
0x12ed   : > { %v2422_v3 = vadd.f32 %v2421_v4, %v2420_v29  ;;  %v3339_v46 = vrot.slane %v3338_v33, 4 }
0x12ee   : > { %v3850_v54 = vpop.permute.xlu2 %3849 }
0x12ef   : > { %v2423_v17 = vadd.f32 %v2422_v3, %v1500_v44  ;;  %v3340_v45 = vadd.f32 %v3339_v46, %v3338_v33  ;;  %v8558_v47 = vpop.f32.mrf.mxu3 }
0x12f1   : > { %v3341_v35 = vrot.slane %v3340_v45, 2 }
0x12f3   : > { %v3342_v18 = vadd.f32 %v3341_v35, %v3340_v45  ;;  %v3860_v27 = vpop.permute.xlu0 %3859 }
0x12f4   : > { %v3935_v29 = vadd.f32 %v8495_v31, %v3860_v27 }
0x12f5   : > { %v3343_v21 = vrot.slane %v3342_v18, 1 }
0x12f6   : > { %v3865_v55 = vpop.permute.xlu2 %3864  ;;  %v3976_v33 = vadd.f32 %v8298_v16, %v3935_v29 }
0x12f7   : > { %v3344_v10 = vadd.f32 %v3343_v21, %v3342_v18  ;;  %v3938_v44 = vadd.f32 %v8512_v24, %v3865_v55  ;;  %v4180_v50 = vpop.f32.mrf.mxu3 }
0x12f8   : > { %v3855_v60 = vpop.permute.xlu1 %3854 }
0x12f9   : > { %v8551_v49 = vadd.f32 %v3344_v10, %v2423_v17  ;;  %v4188_v17 = vadd.f32 %v4180_v50, %v3976_v33  ;;  %v3979_v45 = vadd.f32 %v8300_v63, %v3938_v44  ;;  %v4668_v33 = vld [vmem:[%s8744_s12 + $0x20] sm:$0xff]  ;;  %v4670_v44 = vld [vmem:[%s8744_s12 + $0x30] sm:$0xff] }
0x12fb   : > { %v3870_v52 = vpop.permute.xlu0 %3869 }
0x12fc   : > { %v3941_v59 = vadd.f32 %v3940_v62, %v3870_v52 }
0x12fe   : > { %v3982_v41 = vadd.f32 %v8302_v13, %v3941_v59  ;;  %v3880_v48 = vpop.permute.xlu2 %3879 }
0x12ff   : > { %v3947_v57 = vadd.f32 %v3946_v14, %v3880_v48 }
0x1300   : > { %v3993_v9 = vadd.f32 2.0, %v3982_v41  ;;  %v3875_v53 = vpop.permute.xlu1 %3874 }
0x1301   : > { %v3988_v39 = vadd.f32 %v8306_v51, %v3947_v57  ;;  %v3944_v37 = vadd.f32 %v3943_v32, %v3875_v53 }
0x1302   : > { %v5350_v25 = vmul.f32 -1.442695, %v3993_v9 }
0x1303   : > { %v3995_v61 = vadd.f32 2.0, %v3988_v39  ;;  %v3985_v2 = vadd.f32 %v8304_v28, %v3944_v37  ;;  %v3885_v6 = vpop.permute.xlu0 %3884  ;;  %v3929_v28 = vadd.f32 %v8465_v40, %v3850_v54  ;;  %v3932_v40 = vadd.f32 %v8477_v20, %v3855_v60 }
0x1304   : > { %6516 = vpow2.f32 %v5350_v25  ;;  %v3950_v34 = vadd.f32 %v3949_v15, %v3885_v6  ;;  %v8595_v6 = vld [vmem:[%s8733_s1] ss:$0 sm:$0xff] }
0x1305   : > { %v5352_v38 = vmul.f32 -1.442695, %v3995_v61  ;;  %v3994_v62 = vadd.f32 2.0, %v3985_v2  ;;  %v3970_v23 = vadd.f32 %v8294_v5, %v3929_v28  ;;  %v3973_v24 = vadd.f32 %v8296_v1, %v3932_v40  ;;  %v4671_v40 = vld [vmem:[%s8744_s12 + $0x38] sm:$0xff] }
0x1306   : > { %v3991_v13 = vadd.f32 %v8308_v7, %v3950_v34 }
0x1307   : > { %6518 = vpow2.f32 %v5352_v38  ;;  %v5351_v11 = vmul.f32 -1.442695, %v3994_v62  ;;  %v4186_v36 = vadd.f32 %v4174_v56, %v3970_v23 }
0x1308   : > { %v3996_v42 = vadd.f32 2.0, %v3991_v13  ;;  %v4187_v13 = vadd.f32 %v8558_v47, %v3973_v24 }
0x1309   : > { %6520 = vpow2.f32 %v5351_v11  ;;  %v4183_v11 = vpop.f32.mrf.mxu3 }
0x130a   : > { %v6517_v58 = vpop.eup %6516  ;;  %v5353_v51 = vmul.f32 -1.442695, %v3996_v42 }
0x130b   : > { %v4009_v30 = vadd.f32 1.0, %v6517_v58 }
0x130c   : > { %6522 = vpow2.f32 %v5353_v51 }
0x130d   : > { %v6519_v12 = vpop.eup %6518  ;;  %6524 = vrcp.f32 %v4009_v30  ;;  %v4022_v31 = vand.u32 2147483647, %v4009_v30  ;;  %v4024_v32 = vand.u32 2147483648, %v4009_v30  ;;  %vm4018_vm2 = vweird.f32 %v4009_v30 }
0x130e   : > { %v4011_v22 = vadd.f32 1.0, %v6519_v12 }
0x130f   : > { %v6521_v8 = vpop.eup %6520  ;;  %vm8575_vm15 = vcmp.eq.f32.partialorder %v4022_v31, 8.507059e+37  ;;  %v4025_v55 = vor.u32 1.1754944e-38, %v4024_v32  ;;  %v4667_v31 = vld [vmem:[%s8744_s12 + $0x18] sm:$0xff]  ;;  %v4666_v32 = vld [vmem:[%s8744_s12 + $0x10] sm:$0xff] }
0x1310   : > { %6526 = vrcp.f32 %v4011_v22  ;;  %v8562_v7 = vadd.f32 1.0, %v6521_v8  ;;  %v4052_v16 = vand.u32 2147483647, %v4011_v22  ;;  %vm4048_vm0 = vweird.f32 %v4011_v22 }
0x1311   : > { %v4054_v10 = vand.u32 2147483648, %v4011_v22  ;;  %v4189_v8 = vadd.f32 %v4183_v11, %v3979_v45 }
0x1312   : > { %v6523_v0 = vpop.eup %6522  ;;  %6528 = vrcp.f32 %v8562_v7  ;;  %v4039_v63 = vand.u32 2147483648, %v8562_v7  ;;  %vm8580_vm6 = vcmp.eq.f32.partialorder %v4052_v16, 8.507059e+37  ;;  %vm4033_vm7 = vweird.f32 %v8562_v7 }
0x1313   : > { %v6525_v4 = vpop.eup %6524  ;;  %v8568_v3 = vadd.f32 1.0, %v6523_v0  ;;  %v4037_v41 = vand.u32 2147483647, %v8562_v7  ;;  %v4055_v37 = vor.u32 1.1754944e-38, %v4054_v10 }
0x1314   : > { %v4014_v46 = vmul.f32 %v6525_v4, %v4009_v30  ;;  %vm4019_vm3 = vweird.f32 %v6525_v4  ;;  %v4040_v15 = vor.u32 1.1754944e-38, %v4039_v63 }
0x1315   : > { %6530 = vrcp.f32 %v8568_v3  ;;  %vm4020_vm4 = vmor %vm4018_vm2, %vm4019_vm3  ;;  %v4067_v61 = vand.u32 2147483647, %v8568_v3  ;;  %v4069_v2 = vand.u32 2147483648, %v8568_v3  ;;  %vm4038_vm12 = vcmp.eq.f32.partialorder %v4037_v41, 8.507059e+37 }
0x1316   : > { %v6527_v54 = vpop.eup %6526  ;;  %v4015_v5 = vsub.f32 1.0, %v4014_v46  ;;  %vm4063_vm14 = vweird.f32 %v8568_v3  ;;  %v4665_v46 = vld [vmem:[%s8744_s12 + $0x8] sm:$0xff] }
0x1317   : > { %v4044_v43 = vmul.f32 %v6527_v54, %v4011_v22  ;;  %vm4049_vm5 = vweird.f32 %v6527_v54  ;;  %v4070_v22 = vor.u32 1.1754944e-38, %v4069_v2  ;;  %vm4068_vm3 = vcmp.eq.f32.partialorder %v4067_v61, 8.507059e+37 }
0x1318   : > { %v6529_v35 = vpop.eup %6528  ;;  %v4016_v18 = vmul.f32 %v6525_v4, %v4015_v5  ;;  %vm4050_vm9 = vmor %vm4048_vm0, %vm4049_vm5 }
0x1319   : > { %v4045_v20 = vsub.f32 1.0, %v4044_v43  ;;  %v4029_v27 = vmul.f32 %v6529_v35, %v8562_v7  ;;  %vm4034_vm8 = vweird.f32 %v6529_v35 }
0x131a   : > { %v4017_v19 = vadd.f32 %v6525_v4, %v4016_v18  ;;  %vm4035_vm10 = vmor %vm4033_vm7, %vm4034_vm8 }
0x131b   : > { %v6531_v14 = vpop.eup %6530  ;;  %v4030_v60 = vsub.f32 1.0, %v4029_v27  ;;  %v4046_v1 = vmul.f32 %v6527_v54, %v4045_v20 }
0x131c   : > { %v4059_v52 = vmul.f32 %v6531_v14, %v8568_v3  ;;  %v4021_v59 = vsel %vm4020_vm4, %v6525_v4, %v4017_v19  ;;  %vm4064_vm11 = vweird.f32 %v6531_v14  ;;  %v4669_v4 = vld [vmem:[%s8744_s12 + $0x28] sm:$0xff]  ;;  %v4664_v3 = vld [vmem:[%s8744_s12] sm:$0xff] }
0x131d   : > { %v4026_v48 = vsel %vm8575_vm15, %v4025_v55, %v4021_v59  ;;  %v4047_v57 = vadd.f32 %v6527_v54, %v4046_v1  ;;  %v4031_v9 = vmul.f32 %v6529_v35, %v4030_v60  ;;  %vm4065_vm2 = vmor %vm4063_vm14, %vm4064_vm11 }
0x131e   : > { %v4060_v53 = vsub.f32 1.0, %v4059_v52  ;;  %v4190_v39 = vmul.f32 %v4186_v36, %v4026_v48  ;;  %6532 = vlog2.f32 %v4026_v48 }
0x131f   : > { %v4051_v56 = vsel %vm4050_vm9, %v6527_v54, %v4047_v57  ;;  %v4032_v25 = vadd.f32 %v6529_v35, %v4031_v9 }
0x1320   : > { %v4198_v34 = vmul.f32 %v8595_v6, %v4190_v39  ;;  %v4056_v38 = vsel %vm8580_vm6, %v4055_v37, %v4051_v56  ;;  %v4061_v62 = vmul.f32 %v6531_v14, %v4060_v53 }
0x1321   : > { %v4192_v42 = vmul.f32 %v4188_v17, %v4056_v38  ;;  %v4036_v58 = vsel %vm4035_vm10, %v6529_v35, %v4032_v25  ;;  %6534 = vlog2.f32 %v4056_v38 }
0x1322   : > { %4218 = vrot.lane.b32.xlu1 %v4198_v34, %s8780_s25  ;;  %v8604_v51 = vsel %vm4038_vm12, %v4040_v15, %v4036_v58  ;;  %v4062_v30 = vadd.f32 %v6531_v14, %v4061_v62  ;;  %v4753_v50 = vpop.f32.mrf.mxu3 }
0x1323   : > { %v4200_v12 = vmul.f32 %v8595_v6, %v4192_v42  ;;  %v4191_v28 = vmul.f32 %v4187_v13, %v8604_v51 }
0x1324   : > { %v4066_v29 = vsel %vm4065_vm2, %v6531_v14, %v4062_v30  ;;  %v6533_v54 = vpop.eup %6532 }
0x1325   : > { %4222 = vrot.lane.b32.xlu0 %v4200_v12, %s8780_s25  ;;  %v4199_v47 = vmul.f32 %v8595_v6, %v4191_v28  ;;  %v8611_v7 = vsel %vm4068_vm3, %v4070_v22, %v4066_v29  ;;  %v4074_v36 = vmul.f32 0.6931472, %v6533_v54 }
0x1326   : > { %v4193_v0 = vmul.f32 %v4189_v8, %v8611_v7 }
0x1327   : > { %4220 = vrot.lane.b32.xlu2 %v4199_v47, %s8780_s25  ;;  %v4242_v5 = vmul.f32 %v8595_v6, %v4074_v36  ;;  %v6535_v17 = vpop.eup %6534 }
0x1328   : > { %v4201_v23 = vmul.f32 %v8595_v6, %v4193_v0  ;;  %v4794_v45 = vpop.f32.mrf.mxu1  ;;  %v4078_v16 = vmul.f32 0.6931472, %v6535_v17  ;;  %v4835_v35 = vpop.f32.mrf.mxu0 }
0x1329   : > { %v4246_v43 = vsel %vm1479_vm13, %v4242_v5, 0.0 }
0x132a   : > { %4224 = vrot.lane.b32.xlu1 %v4201_v23, %s8780_s25  ;;  %v4244_v24 = vmul.f32 %v8595_v6, %v4078_v16  ;;  %v4756_v18 = vpop.f32.mrf.mxu3 }
0x132c   : > { %v4252_v20 = vsel %vm1479_vm13, %v4244_v24, 0.0 }
0x132d   : > { %4699 = vperm.xlu0 %5562, %v4669_v4  }
0x132f   : > { %4694 = vperm.xlu2 %5561, %v4668_v33  }
0x1330   : > { %v8647_v27 = vpop.f32.mrf.mxu1  ;;  %v8649_v21 = vpop.f32.mrf.mxu0 }
0x1332   : > { %4704 = vperm.xlu1 %5560, %v4670_v44   ;;  %v4759_v55 = vpop.f32.mrf.mxu3 }
0x1335   : > { %4674 = vperm.xlu0 %5562, %v4664_v3  }
0x1337   : > { %4709 = vperm.xlu2 %5561, %v4671_v40  }
0x1338   : > { %v4800_v19 = vpop.f32.mrf.mxu1  ;;  %v8651_v10 = vpop.f32.mrf.mxu0 }
0x133a   : > { %4679 = vperm.xlu1 %5560, %v4665_v46   ;;  %v4762_v63 = vpop.f32.mrf.mxu3 }
0x133d   : > { %4689 = vperm.xlu0 %5562, %v4667_v31  }
0x133f   : > { %4684 = vperm.xlu2 %5561, %v4666_v32  }
0x1340   : > { %v8653_v14 = vpop.f32.mrf.mxu1  ;;  %v8656_v1 = vpop.f32.mrf.mxu0 }
0x1342   : > { %v4765_v26 = vpop.f32.mrf.mxu3 }
0x1347   : > { %4919 = vrot.lane.b32.xlu2 %v8595_v6, %s8780_s25 }
0x1348   : > { %v4806_v52 = vpop.f32.mrf.mxu1  ;;  %v4847_v59 = vpop.f32.mrf.mxu0 }
0x134a   : > { %v4768_v41 = vpop.f32.mrf.mxu3 }
0x1350   : > { %v4809_v48 = vpop.f32.mrf.mxu1  ;;  %v4850_v39 = vpop.f32.mrf.mxu0 }
0x1352   : > { %v4771_v15 = vpop.f32.mrf.mxu3 }
0x1358   : > { %v4812_v61 = vpop.f32.mrf.mxu1  ;;  %v4853_v13 = vpop.f32.mrf.mxu0 }
0x135a   : > { %v4774_v42 = vpop.f32.mrf.mxu3 }
0x1360   : > { %v4815_v29 = vpop.f32.mrf.mxu1  ;;  %v4856_v40 = vpop.f32.mrf.mxu0 }
0x1364   : > { %4247 = vadd.xlane.f32.xlu1 %v4246_v43 }
0x136c   : > { %4253 = vadd.xlane.f32.xlu1 %v4252_v20 }
0x1381   : > { %v4221_v60 = vpop.permute.xlu2 %4220 }
0x1382   : > { %4239 = vst.msk [vmem:[#allocation2 + $0x28] sm:$0xff] %vm571_vm1, %v4221_v60 }
0x1389   : > { %v4695_v9 = vpop.permute.xlu2 %4694 }
0x138a   : > { %v4766_v37 = vadd.f32 %v4765_v26, %v4695_v9 }
0x138c   : > { %v4807_v25 = vadd.f32 %v4806_v52, %v4766_v37 }
0x138e   : > { %v4848_v62 = vadd.f32 %v4847_v59, %v4807_v25  ;;  %v4953_v25 = vld [vmem:[#allocation2 + $0x8] sm:$0xff] }
0x1390   : > { %6536 = vtanh.f32 %v4848_v62 }
0x1391   : > { %v4710_v2 = vpop.permute.xlu2 %4709 }
0x1392   : > { %v4775_v28 = vadd.f32 %v4774_v42, %v4710_v2  ;;  %v4954_v42 = vld [vmem:[#allocation2 + $0x10] sm:$0xff] }
0x1394   : > { %v4219_v57 = vpop.permute.xlu1 %4218  ;;  %v4816_v44 = vadd.f32 %v4815_v29, %v4775_v28 }
0x1395   : > { %4238 = vst.msk [vmem:[#allocation2 + $0x20] sm:$0xff] %vm571_vm1, %v4219_v57 }
0x1396   : > { %v8662_v33 = vpop.eup %6536 }
0x1397   : > { %v4223_v53 = vpop.permute.xlu0 %4222 }
0x1398   : > { %4240 = vst.msk [vmem:[#allocation2 + $0x30] sm:$0xff] %vm571_vm1, %v4223_v53 }
0x1399   : > { %v4685_v0 = vpop.permute.xlu2 %4684 }
0x139a   : > { %v4760_v46 = vadd.f32 %v4759_v55, %v4685_v0 }
0x139c   : > { %v4225_v56 = vpop.permute.xlu1 %4224  ;;  %v4801_v16 = vadd.f32 %v4800_v19, %v4760_v46  ;;  %v4863_v28 = vld [vmem:[#allocation2 + $0x20] sm:$0xff] }
0x139d   : > { %4241 = vst.msk [vmem:[#allocation2 + $0x38] sm:$0xff] %vm571_vm1, %v4225_v56  ;;  %vm4996_vm1 = vcmask 0  }
0x139e   : > { %v4842_v26 = vadd.f32 %v8651_v10, %v4801_v16 }
0x139f   : > { %v4700_v34 = vpop.permute.xlu0 %4699  ;;  %v4865_v0 = vld [vmem:[#allocation2 + $0x30] sm:$0xff] }
0x13a0   : > { %v4769_v38 = vadd.f32 %v4768_v41, %v4700_v34 }
0x13a2   : > { %v4810_v11 = vadd.f32 %v4809_v48, %v4769_v38 }
0x13a4   : > { %v4851_v58 = vadd.f32 %v4850_v39, %v4810_v11  ;;  %v4705_v30 = vpop.permute.xlu1 %4704  ;;  %v4920_v11 = vpop.permute.xlu2 %4919 }
0x13a5   : > { %v4772_v12 = vadd.f32 %v4771_v15, %v4705_v30 }
0x13a6   : > { %6538 = vtanh.f32 %v4851_v58  ;;  %v4952_v58 = vld [vmem:[#allocation2] sm:$0xff] }
0x13a7   : > { %v4813_v22 = vadd.f32 %v4812_v61, %v4772_v12  ;;  %v4675_v8 = vpop.permute.xlu0 %4674  ;;  %6540 = vlog2.f32 %v8611_v7  ;;  %v4857_v7 = vadd.f32 %v4856_v40, %v4816_v44 }
0x13a8   : > { %v4754_v47 = vadd.f32 %v4753_v50, %v4675_v8  ;;  %v4887_v50 = vsub.f32 0.0, %v8662_v33 }
0x13a9   : > { %v4854_v23 = vadd.f32 %v4853_v13, %v4813_v22 }
0x13aa   : > { %v4795_v4 = vadd.f32 %v4794_v45, %v4754_v47  ;;  %v4891_v55 = vmul.f32 1.442695, %v4887_v50  ;;  %v4926_v2 = vmul.f32 %v8595_v6, %v4887_v50 }
0x13ab   : > { %6542 = vtanh.f32 %v4854_v23 }
0x13ac   : > { %v6539_v3 = vpop.eup %6538  ;;  %v4836_v31 = vadd.f32 %v4835_v35, %v4795_v4  ;;  %v4680_v32 = vpop.permute.xlu1 %4679  ;;  %6544 = vtanh.f32 %v4857_v7  ;;  %v4930_v38 = vsel %vm1479_vm13, %v4926_v2, 0.0 }
0x13ad   : > { %v4757_v54 = vadd.f32 %v4756_v18, %v4680_v32  ;;  %v4888_v36 = vsub.f32 0.0, %v6539_v3  ;;  %v6541_v5 = vpop.eup %6540  ;;  %6546 = vpow2.f32 %v4891_v55  ;;  %v4864_v32 = vld [vmem:[#allocation2 + $0x28] sm:$0xff] }
0x13ae   : > { %4871 = vrot.lane.b32.xlu2 %v4836_v31, %s8780_s25  ;;  %v4080_v18 = vmul.f32 0.6931472, %v6541_v5 }
0x13af   : > { %v4798_v17 = vadd.f32 %v8647_v27, %v4757_v54  ;;  %v4690_v45 = vpop.permute.xlu0 %4689  ;;  %v4927_v43 = vmul.f32 %v8595_v6, %v4888_v36  ;;  %v4893_v19 = vmul.f32 1.442695, %v4888_v36 }
0x13b0   : > { %v4763_v20 = vadd.f32 %v4762_v63, %v4690_v45  ;;  %v4245_v52 = vmul.f32 %v8595_v6, %v4080_v18 }
0x13b1   : > { %v4839_v24 = vadd.f32 %v8649_v21, %v4798_v17  ;;  %v4933_v35 = vsel %vm1479_vm13, %v4927_v43, 0.0  ;;  %v6543_v60 = vpop.eup %6542  ;;  %6548 = vpow2.f32 %v4893_v19  ;;  %v4866_v17 = vld [vmem:[#allocation2 + $0x38] sm:$0xff] }
0x13b2   : > { %4934 = vadd.xlane.f32.xlu1 %v4933_v35  ;;  %v4804_v27 = vadd.f32 %v8653_v14, %v4763_v20  ;;  %v4889_v21 = vsub.f32 0.0, %v6543_v60  ;;  %v6545_v63 = vpop.eup %6544  ;;  %v4255_v41 = vsel %vm1479_vm13, %v4245_v52, 0.0 }
0x13b3   : > { %4873 = vrot.lane.b32.xlu0 %v4839_v24, %s8780_s25  ;;  %v4890_v57 = vsub.f32 0.0, %v6545_v63  ;;  %v6547_v10 = vpop.eup %6546 }
0x13b4   : > { %v4845_v59 = vadd.f32 %v8656_v1, %v4804_v27  ;;  %v4895_v48 = vmul.f32 1.442695, %v4889_v21  ;;  %v4928_v14 = vmul.f32 %v8595_v6, %v4889_v21 }
0x13b5   : > { %v4897_v9 = vmul.f32 1.442695, %v4890_v57  ;;  %v4929_v37 = vmul.f32 %v8595_v6, %v4890_v57 }
0x13b6   : > { %4875 = vrot.lane.b32.xlu2 %v4842_v26, %s8780_s25  ;;  %6550 = vpow2.f32 %v4895_v48  ;;  %v4936_v53 = vsel %vm1479_vm13, %v4928_v14, 0.0 }
0x13b7   : > { %v6549_v39 = vpop.eup %6548  ;;  %6552 = vpow2.f32 %v4897_v9  ;;  %v4939_v15 = vsel %vm1479_vm13, %v4929_v37, 0.0 }
0x13b8   : > { %6554 = vlog2.f32 %v8604_v51  ;;  %v4955_v51 = vld [vmem:[#allocation2 + $0x18] sm:$0xff] }
0x13ba   : > { %4256 = vadd.xlane.f32.xlu1 %v4255_v41 }
0x13bb   : > { %4877 = vrot.lane.b32.xlu0 %v4845_v59, %s8780_s25 }
0x13bc   : > { %v6551_v1 = vpop.eup %6550 }
0x13bd   : > { %v6553_v56 = vpop.eup %6552 }
0x13be   : > { %4903 = vrot.lane.b32.xlu2 %v6547_v10, %s8780_s25  ;;  %v6555_v61 = vpop.eup %6554 }
0x13bf   : > { %v4076_v34 = vmul.f32 0.6931472, %v6555_v61 }
0x13c1   : > { %v4243_v62 = vmul.f32 %v8595_v6, %v4076_v34 }
0x13c2   : > { %4937 = vadd.xlane.f32.xlu1 %v4936_v53 }
0x13c3   : > { %4905 = vrot.lane.b32.xlu0 %v6549_v39, %s8780_s25  ;;  %v4249_v13 = vsel %vm1479_vm13, %v4243_v62, 0.0 }
0x13c6   : > { %4907 = vrot.lane.b32.xlu2 %v6551_v1, %s8780_s25 }
0x13ca   : > { %4940 = vadd.xlane.f32.xlu1 %v4939_v15 }
0x13cb   : > { %4909 = vrot.lane.b32.xlu0 %v6553_v56, %s8780_s25  ;;  %s8789_s25 = sld [smem:[#allocation6_spill]] }
0x13d1   : > { %s5377_s0 = sshll.u32 %s8789_s25, 5  ;;  %s515_s13 = scalar_lea.vmem %s8791_s23, %s8789_s25 }
0x13d2   : > { %s8705_s20 = scalar_lea.vmem %s8790_s18, %s5377_s0  ;;  %s512_s29 = scalar_lea.vmem %s8792_s19, %s5377_s0 }
0x13d7   : > { %v4248_v47 = vpop.xlane.xlu1 %4247 }
0x13df   : > { %v4254_v40 = vpop.xlane.xlu1 %4253 }
0x13e3   : > { %4962 = vrot.lane.b32.xlu1 %v4953_v25, %s8777_s30 }
0x13ef   : > { %4931 = vadd.xlane.f32.xlu2 %v4930_v38 }
0x13f5   : > { %4250 = vadd.xlane.f32.xlu0 %v4249_v13 }
0x1407   : > { %4964 = vrot.lane.b32.xlu2 %v4954_v42, %s8777_s30 }
0x1408   : > { %v4872_v30 = vpop.permute.xlu2 %4871 }
0x1409   : > { %4960 = vrot.lane.b32.xlu0 %v4952_v58, %s8777_s30  ;;  %v4883_v22 = vsub.f32 %v4863_v28, %v4872_v30 }
0x1410   : > { %v4876_v12 = vpop.permute.xlu2 %4875 }
0x1411   : > { %4966 = vrot.lane.b32.xlu0 %v4955_v51, %s8777_s30  ;;  %v4885_v23 = vsub.f32 %v4865_v0, %v4876_v12 }
0x1418   : > { %v4904_v8 = vpop.permute.xlu2 %4903 }
0x1419   : > { %v4915_v29 = vmul.f32 %v4904_v8, %v4883_v22 }
0x141b   : > { %v4922_v6 = vmul.f32 %v4920_v11, %v4915_v29 }
0x141d   : > { %4980 = vrot.lane.b32.xlu1 %v4922_v6, %s8777_s30 }
0x1420   : > { %v4908_v4 = vpop.permute.xlu2 %4907 }
0x1421   : > { %v4917_v33 = vmul.f32 %v4908_v4, %v4885_v23 }
0x1423   : > { %v4924_v44 = vmul.f32 %v4920_v11, %v4917_v33 }
0x1425   : > { %v4874_v3 = vpop.permute.xlu0 %4873  ;;  %4984 = vrot.lane.b32.xlu2 %v4924_v44, %s8777_s30  ;;  %v4935_v31 = vpop.xlane.xlu1 %4934 }
0x1426   : > { %v4884_v54 = vsub.f32 %v4864_v32, %v4874_v3 }
0x142d   : > { %v4878_v46 = vpop.permute.xlu0 %4877  ;;  %v4257_v7 = vpop.xlane.xlu1 %4256 }
0x142e   : > { %v4886_v45 = vsub.f32 %v4866_v17, %v4878_v46 }
0x1435   : > { %v4906_v36 = vpop.permute.xlu0 %4905  ;;  %v4938_v20 = vpop.xlane.xlu1 %4937 }
0x1436   : > { %v4916_v5 = vmul.f32 %v4906_v36, %v4884_v54 }
0x1438   : > { %v4923_v50 = vmul.f32 %v4920_v11, %v4916_v5 }
0x143a   : > { %4982 = vrot.lane.b32.xlu0 %v4923_v50, %s8777_s30 }
0x143d   : > { %v4910_v43 = vpop.permute.xlu0 %4909  ;;  %v4941_v35 = vpop.xlane.xlu1 %4940 }
0x143e   : > { %v4918_v16 = vmul.f32 %v4910_v43, %v4886_v45 }
0x1440   : > { %v4925_v24 = vmul.f32 %v4920_v11, %v4918_v16 }
0x1442   : > { %4986 = vrot.lane.b32.xlu1 %v4925_v24, %s8777_s30 }
0x1455   : > { %v4963_v18 = vpop.permute.xlu1 %4962 }
0x1456   : > { %4973 = vst.msk [vmem:[%s8705_s20 + $0x8] sm:$0xff] %vm1479_vm13, %v4963_v18 }
0x1462   : > { %v4932_v55 = vpop.xlane.xlu2 %4931 }
0x1463   : > { %v4942_v60 = vadd.f32 %v4935_v31, %v4932_v55 }
0x1465   : > { %v4943_v26 = vadd.f32 %v4942_v60, %v4938_v20 }
0x1467   : > { %v4944_v27 = vadd.f32 %v4943_v26, %v4941_v35 }
0x1468   : > { %v4251_v52 = vpop.xlane.xlu0 %4250 }
0x1469   : > { %v4945_v21 = vrot.slane %v4944_v27, 4  ;;  %v4258_v19 = vadd.f32 %v4251_v52, %v4248_v47 }
0x146a   : > { %v4965_v63 = vpop.permute.xlu2 %4964 }
0x146b   : > { %v4946_v59 = vadd.f32 %v4945_v21, %v4944_v27  ;;  %v4259_v41 = vadd.f32 %v4258_v19, %v4254_v40  ;;  %4974 = vst.msk [vmem:[%s8705_s20 + $0x10] sm:$0xff] %vm1479_vm13, %v4965_v63 }
0x146d   : > { %v4260_v48 = vadd.f32 %v4259_v41, %v4257_v7  ;;  %v4947_v57 = vrot.slane %v4946_v59, 2 }
0x146f   : > { %v4261_v10 = vrot.slane %v4260_v48, 4  ;;  %v4948_v9 = vadd.f32 %v4947_v57, %v4946_v59 }
0x1471   : > { %v4262_v14 = vadd.f32 %v4261_v10, %v4260_v48  ;;  %v4949_v1 = vrot.slane %v4948_v9, 1 }
0x1473   : > { %v4263_v53 = vrot.slane %v4262_v14, 2  ;;  %v4950_v56 = vadd.f32 %v4949_v1, %v4948_v9 }
0x1475   : > { %v4264_v39 = vadd.f32 %v4263_v53, %v4262_v14 }
0x1477   : > { %v4265_v37 = vrot.slane %v4264_v39, 1 }
0x1479   : > { %v4266_v15 = vadd.f32 %v4265_v37, %v4264_v39 }
0x147b   : > { %v4267_v25 = vadd.f32 %v4266_v15, %v8551_v49  ;;  %v4961_v61 = vpop.permute.xlu0 %4960 }
0x147c   : > { %4972 = vst.msk [vmem:[%s8705_s20] sm:$0xff] %vm1479_vm13, %v4961_v61 }
0x147d   : > { %v4951_v2 = vadd.f32 %v4950_v56, %v4267_v25 }
0x147f   : > { %4997 = vst.msk [vmem:[%s515_s13] sm:$0x1] %vm4996_vm1, %v4951_v2  ;;  %v4985_v34 = vpop.permute.xlu2 %4984 }
0x1480   : > { %4994 = vst.msk [vmem:[%s512_s29 + $0x10] sm:$0xff] %vm1479_vm13, %v4985_v34 }
0x1483   : > { %v4967_v38 = vpop.permute.xlu0 %4966 }
0x1484   : > { %4975 = vst.msk [vmem:[%s8705_s20 + $0x18] sm:$0xff] %vm1479_vm13, %v4967_v38 }
0x148f   : > { %v4981_v49 = vpop.permute.xlu1 %4980 }
0x1490   : > { %4992 = vst.msk [vmem:[%s512_s29] sm:$0xff] %vm1479_vm13, %v4981_v49 }
0x14ac   : > { %v4983_v62 = vpop.permute.xlu0 %4982 }
0x14ad   : > { %4993 = vst.msk [vmem:[%s512_s29 + $0x8] sm:$0xff] %vm1479_vm13, %v4983_v62 }
0x14b4   : > { %v4987_v13 = vpop.permute.xlu1 %4986 }
0x14b5   : > { %4995 = vst.msk [vmem:[%s512_s29 + $0x18] sm:$0xff] %vm1479_vm13, %v4987_v13 }
0x14b6 PF: > { %s8793_s16 = sld [smem:[#allocation5_spill]] }
0x14bc   : > { %s26_s18 = sadd.s32 1, %s8793_s16  }
0x14bd   : > { %p23_p4 = scmp.ge.s32.totalorder %s26_s18, 4  }
0x14bf   :  { %25 = sbr.rel (!%p23_p4) target bundleno = 5 (0x5), region = 147 }

</bundles_post_ra>
